<compile_context>
chip_gen: v7x
topology: tpu7x:2x2x1
jax: 0.10.0
libtpu: 0.0.40
codegen_flags: <defaults>
</compile_context>

<pallas_src>
import functools

import jax
import jax.numpy as jnp
from jax.experimental import pallas as pl
from jax.experimental.pallas import tpu as pltpu


def _softmax_attention(q, k, v, inv_temperature, mask=None):
    # q, k, v: (GB, T, D) f32 ; mask: (GB or 1, T, T) f32, or None.
    s = jnp.einsum(
        "gqd,gkd->gqk", q * inv_temperature, k,
        preferred_element_type=jnp.float32,
    )
    if mask is not None:
        s = jnp.where(mask == 0, jnp.float32(-1e9), s)
    s_max = jnp.max(s, axis=-1, keepdims=True)
    p = jnp.exp(s - s_max)
    attn = p / jnp.sum(p, axis=-1, keepdims=True)
    x = jnp.einsum(
        "gqk,gkd->gqd", attn, v, preferred_element_type=jnp.float32,
    )
    return x, attn


def _sdpa_kernel(q_ref, k_ref, v_ref, x_ref, attn_ref, *, inv_temperature):
    x, attn = _softmax_attention(
        q_ref[...].astype(jnp.float32),
        k_ref[...].astype(jnp.float32),
        v_ref[...].astype(jnp.float32),
        inv_temperature,
    )
    x_ref[...] = x.astype(x_ref.dtype)
    attn_ref[...] = attn.astype(attn_ref.dtype)


def _sdpa_masked_kernel(q_ref, k_ref, v_ref, mask_ref, x_ref, attn_ref, *,
                        inv_temperature):
    # mask block is either (GB, T, T) (per-group) or (1, T, T) (shared);
    # jnp.where broadcasts over the leading axis either way.
    x, attn = _softmax_attention(
        q_ref[...].astype(jnp.float32),
        k_ref[...].astype(jnp.float32),
        v_ref[...].astype(jnp.float32),
        inv_temperature,
        mask=mask_ref[...],
    )
    x_ref[...] = x.astype(x_ref.dtype)
    attn_ref[...] = attn.astype(attn_ref.dtype)


def scaled_dot_product_attention_temporal(q, k, v, mask=None, *, temperature,
                                          vmem_block_bytes=4 << 20):
    """q, k, v: [B, H, N, T, D] float32.  Returns (x, attn) like the module."""
    B, H, N, T, D = q.shape
    G = B * H * N
    q3 = q.reshape(G, T, D)
    k3 = k.reshape(G, T, D)
    v3 = v.reshape(G, T, D)

    has_mask = mask is not None
    shared_mask = False
    mask_arr = None
    if has_mask:
        mask_arr = jnp.asarray(mask, jnp.float32)
        # Left-pad to 5-D so broadcasting rules match torch.
        if mask_arr.ndim < 5:
            mask_arr = mask_arr.reshape(
                (1,) * (5 - mask_arr.ndim) + mask_arr.shape)
        shared_mask = all(int(d) == 1 for d in mask_arr.shape[:-2])
        if shared_mask:
            mask3 = mask_arr.reshape(1, T, T)
        else:
            mask3 = jnp.broadcast_to(
                mask_arr, (B, H, N, T, T)).reshape(G, T, T)

    # Bytes of live f32 data per group inside one grid step:
    #   q + k + v + x  -> 4*T*D floats;  attn (+ per-group mask) -> T*T floats.
    n_tt = 2 if (has_mask and not shared_mask) else 1
    per_group_bytes = 4 * (4 * T * D + n_tt * T * T)
    GB = min(G, max(8, vmem_block_bytes // per_group_bytes))
    if GB < G:
        GB = max(8, (GB // 8) * 8)   # tidy leading-dim block size when tiling
    grid = (pl.cdiv(G, GB),)

    qkv_spec = pl.BlockSpec((GB, T, D), lambda i: (i, 0, 0))
    att_spec = pl.BlockSpec((GB, T, T), lambda i: (i, 0, 0))

    in_specs = [qkv_spec, qkv_spec, qkv_spec]
    args = [q3, k3, v3]
    inv_t = 1.0 / float(temperature)
    if has_mask:
        if shared_mask:
            # One (T, T) mask, fetched once per step regardless of group count.
            in_specs.append(pl.BlockSpec((1, T, T), lambda i: (0, 0, 0)))
        else:
            in_specs.append(att_spec)
        args.append(mask3)
        kernel = functools.partial(_sdpa_masked_kernel, inv_temperature=inv_t)
    else:
        kernel = functools.partial(_sdpa_kernel, inv_temperature=inv_t)

    x3, attn3 = pl.pallas_call(
        kernel,
        out_shape=(
            jax.ShapeDtypeStruct((G, T, D), q.dtype),
            jax.ShapeDtypeStruct((G, T, T), q.dtype),
        ),
        grid_spec=pltpu.PrefetchScalarGridSpec(
            num_scalar_prefetch=0,
            grid=grid,
            in_specs=in_specs,
            out_specs=[qkv_spec, att_spec],
        ),
        compiler_params=pltpu.CompilerParams(
            dimension_semantics=("parallel",),
        ),
    )(*args)

    return x3.reshape(B, H, N, T, D), attn3.reshape(B, H, N, T, T)


if __name__ == "__main__":
    key = jax.random.PRNGKey(0)
    kq, kk, kv, km = jax.random.split(key, 4)

    # Small shapes consistent with SAGCN temporal attention:
    # batch=2, heads=4, nodes(spatial)=16, seq(T)=8, hidden(d_k)=32
    B, H, N, T, D = 2, 4, 16, 8, 32
    temperature = float(D) ** 0.5

    q = jax.random.normal(kq, (B, H, N, T, D), dtype=jnp.float32)
    k = jax.random.normal(kk, (B, H, N, T, D), dtype=jnp.float32)
    v = jax.random.normal(kv, (B, H, N, T, D), dtype=jnp.float32)

    s_ref = jnp.einsum("bhntd,bhnsd->bhnts", q / temperature, k)

    # ---- mask=None path (module default) ----
    x, attn = scaled_dot_product_attention_temporal(q, k, v,
                                                    temperature=temperature)
    x = jax.block_until_ready(x)

    a_ref = jax.nn.softmax(s_ref, axis=-1)
    x_ref = jnp.einsum("bhnts,bhnsd->bhntd", a_ref, v)
    assert x.shape == (B, H, N, T, D) and attn.shape == (B, H, N, T, T)
    assert jnp.allclose(attn, a_ref, rtol=1e-5, atol=1e-5)
    assert jnp.allclose(x, x_ref, rtol=1e-5, atol=1e-5)

    # ---- shared (broadcast) mask path: temporal causal mask ----
    mask = jnp.tril(jnp.ones((T, T), jnp.float32))[None, None, None]
    xm, am = scaled_dot_product_attention_temporal(q, k, v, mask=mask,
                                                   temperature=temperature)
    xm = jax.block_until_ready(xm)

    sm_ref = jnp.where(mask == 0, -1e9, s_ref)
    am_ref = jax.nn.softmax(sm_ref, axis=-1)
    xm_ref = jnp.einsum("bhnts,bhnsd->bhntd", am_ref, v)
    assert jnp.allclose(am, am_ref, rtol=1e-5, atol=1e-5)
    assert jnp.allclose(xm, xm_ref, rtol=1e-5, atol=1e-5)

    # ---- per-group mask path (mask varies over batch/head/node) ----
    mask2 = (jax.random.uniform(km, (B, H, N, T, T)) > 0.3).astype(jnp.float32)
    xg, ag = scaled_dot_product_attention_temporal(q, k, v, mask=mask2,
                                                   temperature=temperature)
    xg = jax.block_until_ready(xg)

    sg_ref = jnp.where(mask2 == 0, -1e9, s_ref)
    ag_ref = jax.nn.softmax(sg_ref, axis=-1)
    xg_ref = jnp.einsum("bhnts,bhnsd->bhntd", ag_ref, v)
    assert jnp.allclose(ag, ag_ref, rtol=1e-5, atol=1e-5)
    assert jnp.allclose(xg, xg_ref, rtol=1e-5, atol=1e-5)

    print("KERNEL_OK")
</pallas_src>

<mosaic_0001>
module attributes {stable_mosaic.version = 11 : i64} {
  func.func @_sdpa_kernel(%arg0: i32, %arg1: memref<128x8x32xf32, #tpu.memory_space<vmem>>, %arg2: memref<128x8x32xf32, #tpu.memory_space<vmem>>, %arg3: memref<128x8x32xf32, #tpu.memory_space<vmem>>, %arg4: memref<128x8x32xf32, #tpu.memory_space<vmem>>, %arg5: memref<128x8x8xf32, #tpu.memory_space<vmem>>) attributes {dimension_semantics = [#tpu.dimension_semantics<parallel>], iteration_bounds = array<i64: 1>, scalar_prefetch = 0 : i64, scratch_operands = 0 : i64, tpu.core_type = #tpu.core_type<tc>, window_params = [{transform_indices = @transform_0, window_bounds = array<i64: 128, 8, 32>}, {transform_indices = @transform_1, window_bounds = array<i64: 128, 8, 32>}, {transform_indices = @transform_2, window_bounds = array<i64: 128, 8, 32>}, {transform_indices = @transform_3, window_bounds = array<i64: 128, 8, 32>}, {transform_indices = @transform_4, window_bounds = array<i64: 128, 8, 8>}]} {
    %c0 = arith.constant 0 : index
    %c0_0 = arith.constant 0 : index
    %c0_1 = arith.constant 0 : index
    %0 = vector.load %arg1[%c0, %c0_0, %c0_1] : memref<128x8x32xf32, #tpu.memory_space<vmem>>, vector<128x8x32xf32>
    %c0_2 = arith.constant 0 : index
    %c0_3 = arith.constant 0 : index
    %c0_4 = arith.constant 0 : index
    %1 = vector.load %arg2[%c0_2, %c0_3, %c0_4] : memref<128x8x32xf32, #tpu.memory_space<vmem>>, vector<128x8x32xf32>
    %c0_5 = arith.constant 0 : index
    %c0_6 = arith.constant 0 : index
    %c0_7 = arith.constant 0 : index
    %2 = vector.load %arg3[%c0_5, %c0_6, %c0_7] : memref<128x8x32xf32, #tpu.memory_space<vmem>>, vector<128x8x32xf32>
    %cst = arith.constant 0.176776692 : f32
    %3 = vector.broadcast %cst : f32 to vector<128x8x32xf32>
    %4 = arith.mulf %0, %3 : vector<128x8x32xf32>
    "tpu.trace_start"() <{level = 10 : i32, message = "gqd,gkd->gqk"}> : () -> ()
    %cst_8 = arith.constant dense<0.000000e+00> : vector<128x8x8xf32>
    %5 = tpu.matmul %4, %1, %cst_8 {dimension_numbers = #tpu.dot_dimension_numbers<[2], [2], [1], [1], [0, 0, 0, 1, 1, 1], [0], [0]>} : vector<128x8x32xf32>, vector<128x8x32xf32>, vector<128x8x8xf32> -> vector<128x8x8xf32>
    "tpu.trace_stop"() : () -> ()
    %cst_9 = arith.constant dense<0xFF800000> : vector<128x8xf32>
    %6 = vector.multi_reduction <maximumf>, %5, %cst_9 [2] : vector<128x8x8xf32> to vector<128x8xf32>
    %7 = vector.shape_cast %6 : vector<128x8xf32> to vector<128x8x1xf32>
    %8 = vector.broadcast %7 : vector<128x8x1xf32> to vector<128x8x8xf32>
    %9 = arith.subf %5, %8 : vector<128x8x8xf32>
    %10 = math.exp %9 : vector<128x8x8xf32>
    %cst_10 = arith.constant dense<0.000000e+00> : vector<128x8xf32>
    %11 = vector.multi_reduction <add>, %10, %cst_10 [2] : vector<128x8x8xf32> to vector<128x8xf32>
    %12 = vector.shape_cast %11 : vector<128x8xf32> to vector<128x8x1xf32>
    %13 = vector.broadcast %12 : vector<128x8x1xf32> to vector<128x8x8xf32>
    %14 = arith.divf %10, %13 : vector<128x8x8xf32>
    "tpu.trace_start"() <{level = 10 : i32, message = "gqk,gkd->gqd"}> : () -> ()
    %cst_11 = arith.constant dense<0.000000e+00> : vector<128x8x32xf32>
    %15 = tpu.matmul %14, %2, %cst_11 {dimension_numbers = #tpu.dot_dimension_numbers<[2], [1], [1], [2], [0, 0, 0, 1, 1, 2], [0], [0]>} : vector<128x8x8xf32>, vector<128x8x32xf32>, vector<128x8x32xf32> -> vector<128x8x32xf32>
    "tpu.trace_stop"() : () -> ()
    %c0_12 = arith.constant 0 : index
    %c0_13 = arith.constant 0 : index
    %c0_14 = arith.constant 0 : index
    %16 = vector.load %arg4[%c0_12, %c0_13, %c0_14] : memref<128x8x32xf32, #tpu.memory_space<vmem>>, vector<128x8x32xf32>
    tpu.vector_store %arg4[%c0_12, %c0_13, %c0_14], %15 {strides = array<i32>} : memref<128x8x32xf32, #tpu.memory_space<vmem>>, vector<128x8x32xf32>,
    %c0_15 = arith.constant 0 : index
    %c0_16 = arith.constant 0 : index
    %c0_17 = arith.constant 0 : index
    %17 = vector.load %arg5[%c0_15, %c0_16, %c0_17] : memref<128x8x8xf32, #tpu.memory_space<vmem>>, vector<128x8x8xf32>
    tpu.vector_store %arg5[%c0_15, %c0_16, %c0_17], %14 {strides = array<i32>} : memref<128x8x8xf32, #tpu.memory_space<vmem>>, vector<128x8x8xf32>,
    return
  }
  func.func @transform_0(%arg0: i32) -> (i32, i32, i32) {
    %c0_i32 = arith.constant 0 : i32
    %c0_i32_0 = arith.constant 0 : i32
    %c0_i32_1 = arith.constant 0 : i32
    return %arg0, %c0_i32, %c0_i32_0 : i32, i32, i32
  }
  func.func @transform_1(%arg0: i32) -> (i32, i32, i32) {
    %c0_i32 = arith.constant 0 : i32
    %c0_i32_0 = arith.constant 0 : i32
    %c0_i32_1 = arith.constant 0 : i32
    return %arg0, %c0_i32, %c0_i32_0 : i32, i32, i32
  }
  func.func @transform_2(%arg0: i32) -> (i32, i32, i32) {
    %c0_i32 = arith.constant 0 : i32
    %c0_i32_0 = arith.constant 0 : i32
    %c0_i32_1 = arith.constant 0 : i32
    return %arg0, %c0_i32, %c0_i32_0 : i32, i32, i32
  }
  func.func @transform_3(%arg0: i32) -> (i32, i32, i32) {
    %c0_i32 = arith.constant 0 : i32
    %c0_i32_0 = arith.constant 0 : i32
    %c0_i32_1 = arith.constant 0 : i32
    return %arg0, %c0_i32, %c0_i32_0 : i32, i32, i32
  }
  func.func @transform_4(%arg0: i32) -> (i32, i32, i32) {
    %c0_i32 = arith.constant 0 : i32
    %c0_i32_0 = arith.constant 0 : i32
    %c0_i32_1 = arith.constant 0 : i32
    return %arg0, %c0_i32, %c0_i32_0 : i32, i32, i32
  }
}

</mosaic_0001>

<bundles_post_ra>
// kernel: tpu_custom_call.1
= control target key start
LH: loop header
LB: loop body
LE: loop exit
PB: predicated region body
PF: predicated region fallthrough
CT: control target
= control target key end

     0   :  { %vm528_vm0 = vcmask 261120   ;;  %v29132_v0 = vmov 0.0   ;;  %vm23965_vm1 = vmmov 0   ;;  %vm10257_vm2 = vcmask 64512   ;;  %s29127_s1 = inlined_call_operand.vmem [shape: f32[128,8,32], index: 1, kind: input, shape index: {}]   ;;  %s29128_s0 = inlined_call_operand.vmem [shape: f32[128,8,32], index: 0, kind: input, shape index: {}]   ;;  %s29129_s2 = inlined_call_operand.vmem [shape: f32[128,8,32], index: 2, kind: input, shape index: {}]   ;;  %s29130_s4 = inlined_call_operand.vmem [shape: f32[128,8,8], index: 4, kind: output, shape index: {1}]   ;;  %s29131_s3 = inlined_call_operand.vmem [shape: f32[128,8,32], index: 3, kind: output, shape index: {0}]  }
   0x1   :  { %22170 = vmatprep.subr.mxu0 %v29132_v0  ;;  %v144_v1 = vld [vmem:[%s29127_s1] sm:$0xff]  ;;  %22172 = vmatprep.mubr.msk.f32.mxu0 %vm23965_vm1, %v29132_v0  ;;  %v145_v3 = vld [vmem:[%s29127_s1 + $0x8] sm:$0xff]  ;;  %v18_v6 = vld [vmem:[%s29128_s0 + $0x10] sm:$0xff] }
   0x2   :  { %v16_v2 = vld [vmem:[%s29128_s0] sm:$0xff]  ;;  %22171 = vmatpush3.xpose.msk.msra.mxu0 %vm528_vm0, %v144_v1  ;;  %22175 = vmatprep.subr.mxu1 %v29132_v0  ;;  %v17_v5 = vld [vmem:[%s29128_s0 + $0x8] sm:$0xff]  ;;  %v146_v7 = vld [vmem:[%s29127_s1 + $0x10] sm:$0xff]  ;;  %v402_v10 = vmul.f32 0.17677669, %v18_v6 }
   0x3   :  { %v400_v4 = vmul.f32 0.17677669, %v16_v2  ;;  %22180 = vmatprep.subr.mxu0 %v29132_v0  ;;  %22176 = vmatpush3.xpose.msk.msra.mxu1 %vm528_vm0, %v145_v3  ;;  %v401_v8 = vmul.f32 0.17677669, %v17_v5  ;;  %v19_v9 = vld [vmem:[%s29128_s0 + $0x18] sm:$0xff]  ;;  %v20_v12 = vld [vmem:[%s29128_s0 + $0x20] sm:$0xff] }
   0x4   :  { %22177 = vmatprep.mubr.msk.f32.mxu1 %vm23965_vm1, %v29132_v0  ;;  %22185 = vmatprep.subr.mxu1 %v29132_v0  ;;  %v147_v11 = vld [vmem:[%s29127_s1 + $0x18] sm:$0xff]  ;;  %v148_v13 = vld [vmem:[%s29127_s1 + $0x20] sm:$0xff]  ;;  %v403_v14 = vmul.f32 0.17677669, %v19_v9  ;;  %v21_v15 = vld [vmem:[%s29128_s0 + $0x28] sm:$0xff] }
   0x5   :  { %22173 = vmatmul.mubr.msk.f32.vlgmr.msra.gmra.mrb[0].mxu0 %vm528_vm0, %v400_v4  ;;  %v404_v16 = vmul.f32 0.17677669, %v20_v12  ;;  %v149_v17 = vld [vmem:[%s29127_s1 + $0x28] sm:$0xff]  ;;  %v22_v18 = vld [vmem:[%s29128_s0 + $0x30] sm:$0xff]  ;;  %v405_v20 = vmul.f32 0.17677669, %v21_v15 }
   0x6   :  { %22181 = vmatpush3.xpose.msk.msra.mxu0 %vm528_vm0, %v146_v7  ;;  %22182 = vmatprep.mubr.msk.f32.mxu0 %vm23965_vm1, %v29132_v0  ;;  %v150_v19 = vld [vmem:[%s29127_s1 + $0x30] sm:$0xff]  ;;  %v23_v21 = vld [vmem:[%s29128_s0 + $0x38] sm:$0xff]  ;;  %v406_v22 = vmul.f32 0.17677669, %v22_v18  ;;  %v24_v24 = vld [vmem:[%s29128_s0 + $0x40] sm:$0xff] }
   0x7   :  { %22178 = vmatmul.mubr.msk.f32.vlgmr.msra.gmra.mrb[0].mxu1 %vm528_vm0, %v401_v8  ;;  %22190 = vmatprep.subr.mxu0 %v29132_v0  ;;  %v151_v23 = vld [vmem:[%s29127_s1 + $0x38] sm:$0xff]  ;;  %v152_v25 = vld [vmem:[%s29127_s1 + $0x40] sm:$0xff]  ;;  %v407_v26 = vmul.f32 0.17677669, %v23_v21  ;;  %v25_v27 = vld [vmem:[%s29128_s0 + $0x48] sm:$0xff] }
   0x8   :  { %22186 = vmatpush3.xpose.msk.msra.mxu1 %vm528_vm0, %v147_v11  ;;  %22187 = vmatprep.mubr.msk.f32.mxu1 %vm23965_vm1, %v29132_v0  ;;  %v408_v28 = vmul.f32 0.17677669, %v24_v24  ;;  %v153_v29 = vld [vmem:[%s29127_s1 + $0x48] sm:$0xff]  ;;  %v26_v30 = vld [vmem:[%s29128_s0 + $0x50] sm:$0xff]  ;;  %v409_v32 = vmul.f32 0.17677669, %v25_v27 }
   0x9   :  { %22183 = vmatmul.mubr.msk.f32.vlgmr.msra.gmra.mrb[2].mxu0 %vm528_vm0, %v402_v10  ;;  %22195 = vmatprep.subr.mxu1 %v29132_v0  ;;  %v154_v31 = vld [vmem:[%s29127_s1 + $0x50] sm:$0xff]  ;;  %v27_v33 = vld [vmem:[%s29128_s0 + $0x58] sm:$0xff]  ;;  %v410_v34 = vmul.f32 0.17677669, %v26_v30  ;;  %v28_v36 = vld [vmem:[%s29128_s0 + $0x60] sm:$0xff] }
   0xa   :  { %22191 = vmatpush3.xpose.msk.msra.mxu0 %vm528_vm0, %v148_v13  ;;  %22192 = vmatprep.mubr.msk.f32.mxu0 %vm23965_vm1, %v29132_v0  ;;  %v155_v35 = vld [vmem:[%s29127_s1 + $0x58] sm:$0xff]  ;;  %v156_v37 = vld [vmem:[%s29127_s1 + $0x60] sm:$0xff]  ;;  %v411_v38 = vmul.f32 0.17677669, %v27_v33  ;;  %v29_v39 = vld [vmem:[%s29128_s0 + $0x68] sm:$0xff] }
   0xb   :  { %22188 = vmatmul.mubr.msk.f32.vlgmr.msra.gmra.mrb[2].mxu1 %vm528_vm0, %v403_v14  ;;  %22200 = vmatprep.subr.mxu0 %v29132_v0  ;;  %v412_v40 = vmul.f32 0.17677669, %v28_v36  ;;  %v157_v41 = vld [vmem:[%s29127_s1 + $0x68] sm:$0xff]  ;;  %v30_v42 = vld [vmem:[%s29128_s0 + $0x70] sm:$0xff]  ;;  %v413_v44 = vmul.f32 0.17677669, %v29_v39 }
   0xc   :  { %22196 = vmatpush3.xpose.msk.msra.mxu1 %vm528_vm0, %v149_v17  ;;  %22197 = vmatprep.mubr.msk.f32.mxu1 %vm23965_vm1, %v29132_v0  ;;  %v158_v43 = vld [vmem:[%s29127_s1 + $0x70] sm:$0xff]  ;;  %v31_v45 = vld [vmem:[%s29128_s0 + $0x78] sm:$0xff]  ;;  %v414_v46 = vmul.f32 0.17677669, %v30_v42  ;;  %v32_v48 = vld [vmem:[%s29128_s0 + $0x80] sm:$0xff] }
   0xd   :  { %22193 = vmatmul.mubr.msk.f32.vlgmr.msra.gmra.mrb[4].mxu0 %vm528_vm0, %v404_v16  ;;  %22205 = vmatprep.subr.mxu1 %v29132_v0  ;;  %v159_v47 = vld [vmem:[%s29127_s1 + $0x78] sm:$0xff]  ;;  %v160_v49 = vld [vmem:[%s29127_s1 + $0x80] sm:$0xff]  ;;  %v415_v50 = vmul.f32 0.17677669, %v31_v45  ;;  %v33_v51 = vld [vmem:[%s29128_s0 + $0x88] sm:$0xff] }
   0xe   :  { %22201 = vmatpush3.xpose.msk.msra.mxu0 %vm528_vm0, %v150_v19  ;;  %22202 = vmatprep.mubr.msk.f32.mxu0 %vm23965_vm1, %v29132_v0  ;;  %v416_v52 = vmul.f32 0.17677669, %v32_v48  ;;  %v161_v53 = vld [vmem:[%s29127_s1 + $0x88] sm:$0xff]  ;;  %v34_v54 = vld [vmem:[%s29128_s0 + $0x90] sm:$0xff]  ;;  %v417_v56 = vmul.f32 0.17677669, %v33_v51 }
   0xf   :  { %22198 = vmatmul.mubr.msk.f32.vlgmr.msra.gmra.mrb[4].mxu1 %vm528_vm0, %v405_v20  ;;  %22210 = vmatprep.subr.mxu0 %v29132_v0  ;;  %v162_v55 = vld [vmem:[%s29127_s1 + $0x90] sm:$0xff]  ;;  %v35_v57 = vld [vmem:[%s29128_s0 + $0x98] sm:$0xff]  ;;  %v418_v58 = vmul.f32 0.17677669, %v34_v54  ;;  %v36_v60 = vld [vmem:[%s29128_s0 + $0xa0] sm:$0xff] }
  0x10   :  { %22206 = vmatpush3.xpose.msk.msra.mxu1 %vm528_vm0, %v151_v23  ;;  %22207 = vmatprep.mubr.msk.f32.mxu1 %vm23965_vm1, %v29132_v0  ;;  %v163_v59 = vld [vmem:[%s29127_s1 + $0x98] sm:$0xff]  ;;  %v164_v61 = vld [vmem:[%s29127_s1 + $0xa0] sm:$0xff]  ;;  %v419_v62 = vmul.f32 0.17677669, %v35_v57  ;;  %v37_v63 = vld [vmem:[%s29128_s0 + $0xa8] sm:$0xff] }
  0x11   :  { %22203 = vmatmul.mubr.msk.f32.vlgmr.msra.gmra.mrb[6].mxu0 %vm528_vm0, %v406_v22  ;;  %22215 = vmatprep.subr.mxu1 %v29132_v0  ;;  %v420_v1 = vmul.f32 0.17677669, %v36_v60  ;;  %v165_v2 = vld [vmem:[%s29127_s1 + $0xa8] sm:$0xff]  ;;  %v38_v3 = vld [vmem:[%s29128_s0 + $0xb0] sm:$0xff]  ;;  %v421_v5 = vmul.f32 0.17677669, %v37_v63 }
  0x12   :  { %22211 = vmatpush3.xpose.msk.msra.mxu0 %vm528_vm0, %v152_v25  ;;  %22212 = vmatprep.mubr.msk.f32.mxu0 %vm23965_vm1, %v29132_v0  ;;  %v166_v4 = vld [vmem:[%s29127_s1 + $0xb0] sm:$0xff]  ;;  %v39_v6 = vld [vmem:[%s29128_s0 + $0xb8] sm:$0xff]  ;;  %v422_v7 = vmul.f32 0.17677669, %v38_v3  ;;  %v40_v9 = vld [vmem:[%s29128_s0 + $0xc0] sm:$0xff] }
  0x13   :  { %22208 = vmatmul.mubr.msk.f32.vlgmr.msra.gmra.mrb[6].mxu1 %vm528_vm0, %v407_v26  ;;  %22220 = vmatprep.subr.mxu0 %v29132_v0  ;;  %v167_v8 = vld [vmem:[%s29127_s1 + $0xb8] sm:$0xff]  ;;  %v168_v10 = vld [vmem:[%s29127_s1 + $0xc0] sm:$0xff]  ;;  %v423_v11 = vmul.f32 0.17677669, %v39_v6  ;;  %v41_v12 = vld [vmem:[%s29128_s0 + $0xc8] sm:$0xff] }
  0x14   :  { %22216 = vmatpush3.xpose.msk.msra.mxu1 %vm528_vm0, %v153_v29  ;;  %22217 = vmatprep.mubr.msk.f32.mxu1 %vm23965_vm1, %v29132_v0  ;;  %v424_v13 = vmul.f32 0.17677669, %v40_v9  ;;  %v169_v14 = vld [vmem:[%s29127_s1 + $0xc8] sm:$0xff]  ;;  %v42_v15 = vld [vmem:[%s29128_s0 + $0xd0] sm:$0xff]  ;;  %v425_v17 = vmul.f32 0.17677669, %v41_v12 }
  0x15   :  { %22213 = vmatmul.mubr.msk.f32.vlgmr.msra.gmra.mrb[8].mxu0 %vm528_vm0, %v408_v28  ;;  %22225 = vmatprep.subr.mxu1 %v29132_v0  ;;  %v170_v16 = vld [vmem:[%s29127_s1 + $0xd0] sm:$0xff]  ;;  %v43_v18 = vld [vmem:[%s29128_s0 + $0xd8] sm:$0xff]  ;;  %v426_v19 = vmul.f32 0.17677669, %v42_v15  ;;  %v44_v21 = vld [vmem:[%s29128_s0 + $0xe0] sm:$0xff] }
  0x16   :  { %22221 = vmatpush3.xpose.msk.msra.mxu0 %vm528_vm0, %v154_v31  ;;  %22222 = vmatprep.mubr.msk.f32.mxu0 %vm23965_vm1, %v29132_v0  ;;  %v171_v20 = vld [vmem:[%s29127_s1 + $0xd8] sm:$0xff]  ;;  %v172_v22 = vld [vmem:[%s29127_s1 + $0xe0] sm:$0xff]  ;;  %v427_v23 = vmul.f32 0.17677669, %v43_v18  ;;  %v45_v24 = vld [vmem:[%s29128_s0 + $0xe8] sm:$0xff] }
  0x17   :  { %22218 = vmatmul.mubr.msk.f32.vlgmr.msra.gmra.mrb[8].mxu1 %vm528_vm0, %v409_v32  ;;  %22230 = vmatprep.subr.mxu0 %v29132_v0  ;;  %v428_v25 = vmul.f32 0.17677669, %v44_v21  ;;  %v173_v26 = vld [vmem:[%s29127_s1 + $0xe8] sm:$0xff]  ;;  %v46_v27 = vld [vmem:[%s29128_s0 + $0xf0] sm:$0xff]  ;;  %v429_v29 = vmul.f32 0.17677669, %v45_v24 }
  0x18   :  { %22226 = vmatpush3.xpose.msk.msra.mxu1 %vm528_vm0, %v155_v35  ;;  %22227 = vmatprep.mubr.msk.f32.mxu1 %vm23965_vm1, %v29132_v0  ;;  %v174_v28 = vld [vmem:[%s29127_s1 + $0xf0] sm:$0xff]  ;;  %v47_v30 = vld [vmem:[%s29128_s0 + $0xf8] sm:$0xff]  ;;  %v430_v31 = vmul.f32 0.17677669, %v46_v27  ;;  %v48_v33 = vld [vmem:[%s29128_s0 + $0x100] sm:$0xff] }
  0x19   :  { %22223 = vmatmul.mubr.msk.f32.vlgmr.msra.gmra.mrb[10].mxu0 %vm528_vm0, %v410_v34  ;;  %22235 = vmatprep.subr.mxu1 %v29132_v0  ;;  %v175_v32 = vld [vmem:[%s29127_s1 + $0xf8] sm:$0xff]  ;;  %v176_v34 = vld [vmem:[%s29127_s1 + $0x100] sm:$0xff]  ;;  %v431_v35 = vmul.f32 0.17677669, %v47_v30  ;;  %v49_v36 = vld [vmem:[%s29128_s0 + $0x108] sm:$0xff] }
  0x1a   :  { %22231 = vmatpush3.xpose.msk.msra.mxu0 %vm528_vm0, %v156_v37  ;;  %22232 = vmatprep.mubr.msk.f32.mxu0 %vm23965_vm1, %v29132_v0  ;;  %v432_v37 = vmul.f32 0.17677669, %v48_v33  ;;  %v50_v39 = vld [vmem:[%s29128_s0 + $0x110] sm:$0xff]  ;;  %v51_v42 = vld [vmem:[%s29128_s0 + $0x118] sm:$0xff]  ;;  %v52_v45 = vld [vmem:[%s29128_s0 + $0x120] sm:$0xff] }
  0x1b   :  { %22228 = vmatmul.mubr.msk.f32.vlgmr.msra.gmra.mrb[10].mxu1 %vm528_vm0, %v411_v38  ;;  %22240 = vmatprep.subr.mxu0 %v29132_v0  ;;  %v177_v38 = vld [vmem:[%s29127_s1 + $0x108] sm:$0xff]  ;;  %v54_v51 = vld [vmem:[%s29128_s0 + $0x130] sm:$0xff]  ;;  %v55_v54 = vld [vmem:[%s29128_s0 + $0x138] sm:$0xff] }
  0x1c   :  { %22236 = vmatpush3.xpose.msk.msra.mxu1 %vm528_vm0, %v157_v41  ;;  %22237 = vmatprep.mubr.msk.f32.mxu1 %vm23965_vm1, %v29132_v0  ;;  %v433_v41 = vmul.f32 0.17677669, %v49_v36  ;;  %v53_v48 = vld [vmem:[%s29128_s0 + $0x128] sm:$0xff]  ;;  %v56_v57 = vld [vmem:[%s29128_s0 + $0x140] sm:$0xff]  ;;  %v58_v63 = vld [vmem:[%s29128_s0 + $0x150] sm:$0xff] }
  0x1d   :  { %22233 = vmatmul.mubr.msk.f32.vlgmr.msra.gmra.mrb[12].mxu0 %vm528_vm0, %v412_v40  ;;  %22245 = vmatprep.subr.mxu1 %v29132_v0  ;;  %v178_v40 = vld [vmem:[%s29127_s1 + $0x110] sm:$0xff]  ;;  %v57_v60 = vld [vmem:[%s29128_s0 + $0x148] sm:$0xff]  ;;  %v59_v3 = vld [vmem:[%s29128_s0 + $0x158] sm:$0xff] }
  0x1e   :  { %22241 = vmatpush3.xpose.msk.msra.mxu0 %vm528_vm0, %v158_v43  ;;  %22242 = vmatprep.mubr.msk.f32.mxu0 %vm23965_vm1, %v29132_v0  ;;  %v434_v43 = vmul.f32 0.17677669, %v50_v39  ;;  %v60_v6 = vld [vmem:[%s29128_s0 + $0x160] sm:$0xff]  ;;  %v61_v9 = vld [vmem:[%s29128_s0 + $0x168] sm:$0xff]  ;;  %v62_v12 = vld [vmem:[%s29128_s0 + $0x170] sm:$0xff] }
  0x1f   :  { %22238 = vmatmul.mubr.msk.f32.vlgmr.msra.gmra.mrb[12].mxu1 %vm528_vm0, %v413_v44  ;;  %22250 = vmatprep.subr.mxu0 %v29132_v0  ;;  %v179_v44 = vld [vmem:[%s29127_s1 + $0x118] sm:$0xff]  ;;  %v64_v18 = vld [vmem:[%s29128_s0 + $0x180] sm:$0xff]  ;;  %v65_v21 = vld [vmem:[%s29128_s0 + $0x188] sm:$0xff] }
  0x20   :  { %22246 = vmatpush3.xpose.msk.msra.mxu1 %vm528_vm0, %v159_v47  ;;  %22247 = vmatprep.mubr.msk.f32.mxu1 %vm23965_vm1, %v29132_v0  ;;  %v435_v47 = vmul.f32 0.17677669, %v51_v42  ;;  %v63_v15 = vld [vmem:[%s29128_s0 + $0x178] sm:$0xff]  ;;  %v66_v24 = vld [vmem:[%s29128_s0 + $0x190] sm:$0xff]  ;;  %v68_v30 = vld [vmem:[%s29128_s0 + $0x1a0] sm:$0xff] }
  0x21   :  { %22243 = vmatmul.mubr.msk.f32.vlgmr.msra.gmra.mrb[14].mxu0 %vm528_vm0, %v414_v46  ;;  %22255 = vmatprep.subr.mxu1 %v29132_v0  ;;  %v180_v46 = vld [vmem:[%s29127_s1 + $0x120] sm:$0xff]  ;;  %v67_v27 = vld [vmem:[%s29128_s0 + $0x198] sm:$0xff]  ;;  %v69_v33 = vld [vmem:[%s29128_s0 + $0x1a8] sm:$0xff] }
  0x22   :  { %22251 = vmatpush3.xpose.msk.msra.mxu0 %vm528_vm0, %v160_v49  ;;  %22252 = vmatprep.mubr.msk.f32.mxu0 %vm23965_vm1, %v29132_v0  ;;  %v436_v49 = vmul.f32 0.17677669, %v52_v45  ;;  %v70_v36 = vld [vmem:[%s29128_s0 + $0x1b0] sm:$0xff]  ;;  %v71_v39 = vld [vmem:[%s29128_s0 + $0x1b8] sm:$0xff]  ;;  %v72_v42 = vld [vmem:[%s29128_s0 + $0x1c0] sm:$0xff] }
  0x23   :  { %22248 = vmatmul.mubr.msk.f32.vlgmr.msra.gmra.mrb[14].mxu1 %vm528_vm0, %v415_v50  ;;  %22260 = vmatprep.subr.mxu0 %v29132_v0  ;;  %v181_v50 = vld [vmem:[%s29127_s1 + $0x128] sm:$0xff] }
  0x24   :  { %22256 = vmatpush3.xpose.msk.msra.mxu1 %vm528_vm0, %v161_v53  ;;  %22257 = vmatprep.mubr.msk.f32.mxu1 %vm23965_vm1, %v29132_v0  ;;  %v437_v53 = vmul.f32 0.17677669, %v53_v48  ;;  %v73_v45 = vld [vmem:[%s29128_s0 + $0x1c8] sm:$0xff]  ;;  %v74_v48 = vld [vmem:[%s29128_s0 + $0x1d0] sm:$0xff] }
  0x25   :  { %22253 = vmatmul.mubr.msk.f32.vlgmr.msra.gmra.mrb[16].mxu0 %vm528_vm0, %v416_v52  ;;  %22265 = vmatprep.subr.mxu1 %v29132_v0  ;;  %v182_v52 = vld [vmem:[%s29127_s1 + $0x130] sm:$0xff] }
  0x26   :  { %22261 = vmatpush3.xpose.msk.msra.mxu0 %vm528_vm0, %v162_v55  ;;  %22262 = vmatprep.mubr.msk.f32.mxu0 %vm23965_vm1, %v29132_v0  ;;  %v438_v55 = vmul.f32 0.17677669, %v54_v51  ;;  %v75_v51 = vld [vmem:[%s29128_s0 + $0x1d8] sm:$0xff] }
  0x27   :  { %22258 = vmatmul.mubr.msk.f32.vlgmr.msra.gmra.mrb[16].mxu1 %vm528_vm0, %v417_v56  ;;  %22270 = vmatprep.subr.mxu0 %v29132_v0  ;;  %v183_v56 = vld [vmem:[%s29127_s1 + $0x138] sm:$0xff] }
  0x28   :  { %22266 = vmatpush3.xpose.msk.msra.mxu1 %vm528_vm0, %v163_v59  ;;  %22267 = vmatprep.mubr.msk.f32.mxu1 %vm23965_vm1, %v29132_v0  ;;  %v439_v59 = vmul.f32 0.17677669, %v55_v54  ;;  %v76_v54 = vld [vmem:[%s29128_s0 + $0x1e0] sm:$0xff] }
  0x29   :  { %22263 = vmatmul.mubr.msk.f32.vlgmr.msra.gmra.mrb[18].mxu0 %vm528_vm0, %v418_v58  ;;  %22275 = vmatprep.subr.mxu1 %v29132_v0  ;;  %v184_v58 = vld [vmem:[%s29127_s1 + $0x140] sm:$0xff] }
  0x2a   :  { %22271 = vmatpush3.xpose.msk.msra.mxu0 %vm528_vm0, %v164_v61  ;;  %22272 = vmatprep.mubr.msk.f32.mxu0 %vm23965_vm1, %v29132_v0  ;;  %v440_v61 = vmul.f32 0.17677669, %v56_v57  ;;  %v77_v57 = vld [vmem:[%s29128_s0 + $0x1e8] sm:$0xff] }
  0x2b   :  { %22268 = vmatmul.mubr.msk.f32.vlgmr.msra.gmra.mrb[18].mxu1 %vm528_vm0, %v419_v62  ;;  %22280 = vmatprep.subr.mxu0 %v29132_v0  ;;  %v185_v62 = vld [vmem:[%s29127_s1 + $0x148] sm:$0xff] }
  0x2c   :  { %22276 = vmatpush3.xpose.msk.msra.mxu1 %vm528_vm0, %v165_v2  ;;  %22277 = vmatprep.mubr.msk.f32.mxu1 %vm23965_vm1, %v29132_v0  ;;  %v441_v2 = vmul.f32 0.17677669, %v57_v60  ;;  %v78_v60 = vld [vmem:[%s29128_s0 + $0x1f0] sm:$0xff] }
  0x2d   :  { %22273 = vmatmul.mubr.msk.f32.vlgmr.msra.gmra.mrb[20].mxu0 %vm528_vm0, %v420_v1  ;;  %22285 = vmatprep.subr.mxu1 %v29132_v0  ;;  %v186_v1 = vld [vmem:[%s29127_s1 + $0x150] sm:$0xff] }
  0x2e   :  { %22281 = vmatpush3.xpose.msk.msra.mxu0 %vm528_vm0, %v166_v4  ;;  %22282 = vmatprep.mubr.msk.f32.mxu0 %vm23965_vm1, %v29132_v0  ;;  %v442_v4 = vmul.f32 0.17677669, %v58_v63  ;;  %v79_v63 = vld [vmem:[%s29128_s0 + $0x1f8] sm:$0xff] }
  0x2f   :  { %22278 = vmatmul.mubr.msk.f32.vlgmr.msra.gmra.mrb[20].mxu1 %vm528_vm0, %v421_v5  ;;  %22290 = vmatprep.subr.mxu0 %v29132_v0  ;;  %v187_v5 = vld [vmem:[%s29127_s1 + $0x158] sm:$0xff] }
  0x30   :  { %22286 = vmatpush3.xpose.msk.msra.mxu1 %vm528_vm0, %v167_v8  ;;  %22287 = vmatprep.mubr.msk.f32.mxu1 %vm23965_vm1, %v29132_v0  ;;  %v443_v8 = vmul.f32 0.17677669, %v59_v3  ;;  %v80_v3 = vld [vmem:[%s29128_s0 + $0x200] sm:$0xff] }
  0x31   :  { %22283 = vmatmul.mubr.msk.f32.vlgmr.msra.gmra.mrb[22].mxu0 %vm528_vm0, %v422_v7  ;;  %22295 = vmatprep.subr.mxu1 %v29132_v0  ;;  %v188_v7 = vld [vmem:[%s29127_s1 + $0x160] sm:$0xff] }
  0x32   :  { %22291 = vmatpush3.xpose.msk.msra.mxu0 %vm528_vm0, %v168_v10  ;;  %22292 = vmatprep.mubr.msk.f32.mxu0 %vm23965_vm1, %v29132_v0  ;;  %v444_v10 = vmul.f32 0.17677669, %v60_v6  ;;  %v81_v6 = vld [vmem:[%s29128_s0 + $0x208] sm:$0xff] }
  0x33   :  { %22288 = vmatmul.mubr.msk.f32.vlgmr.msra.gmra.mrb[22].mxu1 %vm528_vm0, %v423_v11  ;;  %22300 = vmatprep.subr.mxu0 %v29132_v0  ;;  %v189_v11 = vld [vmem:[%s29127_s1 + $0x168] sm:$0xff] }
  0x34   :  { %22296 = vmatpush3.xpose.msk.msra.mxu1 %vm528_vm0, %v169_v14  ;;  %22297 = vmatprep.mubr.msk.f32.mxu1 %vm23965_vm1, %v29132_v0  ;;  %v445_v14 = vmul.f32 0.17677669, %v61_v9  ;;  %v82_v9 = vld [vmem:[%s29128_s0 + $0x210] sm:$0xff] }
  0x35   :  { %22293 = vmatmul.mubr.msk.f32.vlgmr.msra.gmra.mrb[24].mxu0 %vm528_vm0, %v424_v13  ;;  %22305 = vmatprep.subr.mxu1 %v29132_v0  ;;  %v190_v13 = vld [vmem:[%s29127_s1 + $0x170] sm:$0xff] }
  0x36   :  { %22301 = vmatpush3.xpose.msk.msra.mxu0 %vm528_vm0, %v170_v16  ;;  %22302 = vmatprep.mubr.msk.f32.mxu0 %vm23965_vm1, %v29132_v0  ;;  %v446_v16 = vmul.f32 0.17677669, %v62_v12  ;;  %v83_v12 = vld [vmem:[%s29128_s0 + $0x218] sm:$0xff] }
  0x37   :  { %22298 = vmatmul.mubr.msk.f32.vlgmr.msra.gmra.mrb[24].mxu1 %vm528_vm0, %v425_v17  ;;  %22310 = vmatprep.subr.mxu0 %v29132_v0  ;;  %v191_v17 = vld [vmem:[%s29127_s1 + $0x178] sm:$0xff] }
  0x38   :  { %22306 = vmatpush3.xpose.msk.msra.mxu1 %vm528_vm0, %v171_v20  ;;  %22307 = vmatprep.mubr.msk.f32.mxu1 %vm23965_vm1, %v29132_v0  ;;  %v447_v20 = vmul.f32 0.17677669, %v63_v15  ;;  %v84_v15 = vld [vmem:[%s29128_s0 + $0x220] sm:$0xff] }
  0x39   :  { %22303 = vmatmul.mubr.msk.f32.vlgmr.msra.gmra.mrb[26].mxu0 %vm528_vm0, %v426_v19  ;;  %22315 = vmatprep.subr.mxu1 %v29132_v0  ;;  %v192_v19 = vld [vmem:[%s29127_s1 + $0x180] sm:$0xff] }
  0x3a   :  { %22311 = vmatpush3.xpose.msk.msra.mxu0 %vm528_vm0, %v172_v22  ;;  %22312 = vmatprep.mubr.msk.f32.mxu0 %vm23965_vm1, %v29132_v0  ;;  %v448_v22 = vmul.f32 0.17677669, %v64_v18  ;;  %v85_v18 = vld [vmem:[%s29128_s0 + $0x228] sm:$0xff] }
  0x3b   :  { %22308 = vmatmul.mubr.msk.f32.vlgmr.msra.gmra.mrb[26].mxu1 %vm528_vm0, %v427_v23  ;;  %22320 = vmatprep.subr.mxu0 %v29132_v0  ;;  %v193_v23 = vld [vmem:[%s29127_s1 + $0x188] sm:$0xff] }
  0x3c   :  { %22316 = vmatpush3.xpose.msk.msra.mxu1 %vm528_vm0, %v173_v26  ;;  %22317 = vmatprep.mubr.msk.f32.mxu1 %vm23965_vm1, %v29132_v0  ;;  %v449_v26 = vmul.f32 0.17677669, %v65_v21  ;;  %v86_v21 = vld [vmem:[%s29128_s0 + $0x230] sm:$0xff] }
  0x3d   :  { %22313 = vmatmul.mubr.msk.f32.vlgmr.msra.gmra.mrb[28].mxu0 %vm528_vm0, %v428_v25  ;;  %22325 = vmatprep.subr.mxu1 %v29132_v0  ;;  %v194_v25 = vld [vmem:[%s29127_s1 + $0x190] sm:$0xff] }
  0x3e   :  { %22321 = vmatpush3.xpose.msk.msra.mxu0 %vm528_vm0, %v174_v28  ;;  %22322 = vmatprep.mubr.msk.f32.mxu0 %vm23965_vm1, %v29132_v0  ;;  %v450_v28 = vmul.f32 0.17677669, %v66_v24  ;;  %v87_v24 = vld [vmem:[%s29128_s0 + $0x238] sm:$0xff] }
  0x3f   :  { %22318 = vmatmul.mubr.msk.f32.vlgmr.msra.gmra.mrb[28].mxu1 %vm528_vm0, %v429_v29  ;;  %22330 = vmatprep.subr.mxu0 %v29132_v0  ;;  %v195_v29 = vld [vmem:[%s29127_s1 + $0x198] sm:$0xff] }
  0x40   :  { %22326 = vmatpush3.xpose.msk.msra.mxu1 %vm528_vm0, %v175_v32  ;;  %22327 = vmatprep.mubr.msk.f32.mxu1 %vm23965_vm1, %v29132_v0  ;;  %v451_v32 = vmul.f32 0.17677669, %v67_v27  ;;  %v88_v27 = vld [vmem:[%s29128_s0 + $0x240] sm:$0xff] }
  0x41   :  { %22323 = vmatmul.mubr.msk.f32.vlgmr.msra.gmra.mrb[30].mxu0 %vm528_vm0, %v430_v31  ;;  %22335 = vmatprep.subr.mxu1 %v29132_v0  ;;  %v196_v31 = vld [vmem:[%s29127_s1 + $0x1a0] sm:$0xff] }
  0x42   :  { %22331 = vmatpush3.xpose.msk.msra.mxu0 %vm528_vm0, %v176_v34  ;;  %22332 = vmatprep.mubr.msk.f32.mxu0 %vm23965_vm1, %v29132_v0  ;;  %v452_v34 = vmul.f32 0.17677669, %v68_v30  ;;  %v89_v30 = vld [vmem:[%s29128_s0 + $0x248] sm:$0xff] }
  0x43   :  { %22328 = vmatmul.mubr.msk.f32.vlgmr.msra.gmra.mrb[30].mxu1 %vm528_vm0, %v431_v35  ;;  %22340 = vmatprep.subr.mxu0 %v29132_v0  ;;  %v197_v35 = vld [vmem:[%s29127_s1 + $0x1a8] sm:$0xff] }
  0x44   :  { %22336 = vmatpush3.xpose.msk.msra.mxu1 %vm528_vm0, %v177_v38  ;;  %22337 = vmatprep.mubr.msk.f32.mxu1 %vm23965_vm1, %v29132_v0  ;;  %v453_v38 = vmul.f32 0.17677669, %v69_v33  ;;  %v90_v33 = vld [vmem:[%s29128_s0 + $0x250] sm:$0xff] }
  0x45   :  { %22333 = vmatmul.mubr.msk.f32.vlgmr.msra.gmra.mrb[32].mxu0 %vm528_vm0, %v432_v37  ;;  %22345 = vmatprep.subr.mxu1 %v29132_v0  ;;  %v198_v37 = vld [vmem:[%s29127_s1 + $0x1b0] sm:$0xff] }
  0x46   :  { %22341 = vmatpush3.xpose.msk.msra.mxu0 %vm528_vm0, %v178_v40  ;;  %22342 = vmatprep.mubr.msk.f32.mxu0 %vm23965_vm1, %v29132_v0  ;;  %v454_v40 = vmul.f32 0.17677669, %v70_v36  ;;  %v91_v36 = vld [vmem:[%s29128_s0 + $0x258] sm:$0xff] }
  0x47   :  { %22338 = vmatmul.mubr.msk.f32.vlgmr.msra.gmra.mrb[32].mxu1 %vm528_vm0, %v433_v41  ;;  %22350 = vmatprep.subr.mxu0 %v29132_v0  ;;  %v199_v41 = vld [vmem:[%s29127_s1 + $0x1b8] sm:$0xff] }
  0x48   :  { %22346 = vmatpush3.xpose.msk.msra.mxu1 %vm528_vm0, %v179_v44  ;;  %22347 = vmatprep.mubr.msk.f32.mxu1 %vm23965_vm1, %v29132_v0  ;;  %v455_v44 = vmul.f32 0.17677669, %v71_v39  ;;  %v92_v39 = vld [vmem:[%s29128_s0 + $0x260] sm:$0xff] }
  0x49   :  { %22343 = vmatmul.mubr.msk.f32.vlgmr.msra.gmra.mrb[34].mxu0 %vm528_vm0, %v434_v43  ;;  %22355 = vmatprep.subr.mxu1 %v29132_v0  ;;  %v200_v43 = vld [vmem:[%s29127_s1 + $0x1c0] sm:$0xff] }
  0x4a   :  { %22351 = vmatpush3.xpose.msk.msra.mxu0 %vm528_vm0, %v180_v46  ;;  %22352 = vmatprep.mubr.msk.f32.mxu0 %vm23965_vm1, %v29132_v0  ;;  %v456_v46 = vmul.f32 0.17677669, %v72_v42  ;;  %v93_v42 = vld [vmem:[%s29128_s0 + $0x268] sm:$0xff] }
  0x4b   :  { %22348 = vmatmul.mubr.msk.f32.vlgmr.msra.gmra.mrb[34].mxu1 %vm528_vm0, %v435_v47  ;;  %22360 = vmatprep.subr.mxu0 %v29132_v0  ;;  %v201_v47 = vld [vmem:[%s29127_s1 + $0x1c8] sm:$0xff] }
  0x4c   :  { %22356 = vmatpush3.xpose.msk.msra.mxu1 %vm528_vm0, %v181_v50  ;;  %22357 = vmatprep.mubr.msk.f32.mxu1 %vm23965_vm1, %v29132_v0  ;;  %v457_v50 = vmul.f32 0.17677669, %v73_v45  ;;  %v94_v45 = vld [vmem:[%s29128_s0 + $0x270] sm:$0xff] }
  0x4d   :  { %22353 = vmatmul.mubr.msk.f32.vlgmr.msra.gmra.mrb[36].mxu0 %vm528_vm0, %v436_v49  ;;  %22365 = vmatprep.subr.mxu1 %v29132_v0  ;;  %v202_v49 = vld [vmem:[%s29127_s1 + $0x1d0] sm:$0xff] }
  0x4e   :  { %22361 = vmatpush3.xpose.msk.msra.mxu0 %vm528_vm0, %v182_v52  ;;  %22362 = vmatprep.mubr.msk.f32.mxu0 %vm23965_vm1, %v29132_v0  ;;  %v458_v52 = vmul.f32 0.17677669, %v74_v48  ;;  %v95_v48 = vld [vmem:[%s29128_s0 + $0x278] sm:$0xff] }
  0x4f   :  { %22358 = vmatmul.mubr.msk.f32.vlgmr.msra.gmra.mrb[36].mxu1 %vm528_vm0, %v437_v53  ;;  %22370 = vmatprep.subr.mxu0 %v29132_v0  ;;  %v203_v53 = vld [vmem:[%s29127_s1 + $0x1d8] sm:$0xff] }
  0x50   :  { %22366 = vmatpush3.xpose.msk.msra.mxu1 %vm528_vm0, %v183_v56  ;;  %22367 = vmatprep.mubr.msk.f32.mxu1 %vm23965_vm1, %v29132_v0  ;;  %v459_v56 = vmul.f32 0.17677669, %v75_v51  ;;  %v96_v51 = vld [vmem:[%s29128_s0 + $0x280] sm:$0xff] }
  0x51   :  { %22363 = vmatmul.mubr.msk.f32.vlgmr.msra.gmra.mrb[38].mxu0 %vm528_vm0, %v438_v55  ;;  %22375 = vmatprep.subr.mxu1 %v29132_v0  ;;  %v204_v55 = vld [vmem:[%s29127_s1 + $0x1e0] sm:$0xff] }
  0x52   :  { %22371 = vmatpush3.xpose.msk.msra.mxu0 %vm528_vm0, %v184_v58  ;;  %22372 = vmatprep.mubr.msk.f32.mxu0 %vm23965_vm1, %v29132_v0  ;;  %v460_v58 = vmul.f32 0.17677669, %v76_v54  ;;  %v97_v54 = vld [vmem:[%s29128_s0 + $0x288] sm:$0xff] }
  0x53   :  { %22368 = vmatmul.mubr.msk.f32.vlgmr.msra.gmra.mrb[38].mxu1 %vm528_vm0, %v439_v59  ;;  %22380 = vmatprep.subr.mxu0 %v29132_v0  ;;  %v205_v59 = vld [vmem:[%s29127_s1 + $0x1e8] sm:$0xff] }
  0x54   :  { %22376 = vmatpush3.xpose.msk.msra.mxu1 %vm528_vm0, %v185_v62  ;;  %22377 = vmatprep.mubr.msk.f32.mxu1 %vm23965_vm1, %v29132_v0  ;;  %v461_v62 = vmul.f32 0.17677669, %v77_v57  ;;  %v98_v57 = vld [vmem:[%s29128_s0 + $0x290] sm:$0xff] }
  0x55   :  { %22373 = vmatmul.mubr.msk.f32.vlgmr.msra.gmra.mrb[40].mxu0 %vm528_vm0, %v440_v61  ;;  %22385 = vmatprep.subr.mxu1 %v29132_v0  ;;  %v206_v61 = vld [vmem:[%s29127_s1 + $0x1f0] sm:$0xff] }
  0x56   :  { %22381 = vmatpush3.xpose.msk.msra.mxu0 %vm528_vm0, %v186_v1  ;;  %22382 = vmatprep.mubr.msk.f32.mxu0 %vm23965_vm1, %v29132_v0  ;;  %v462_v1 = vmul.f32 0.17677669, %v78_v60  ;;  %v99_v60 = vld [vmem:[%s29128_s0 + $0x298] sm:$0xff] }
  0x57   :  { %22378 = vmatmul.mubr.msk.f32.vlgmr.msra.gmra.mrb[40].mxu1 %vm528_vm0, %v441_v2  ;;  %22390 = vmatprep.subr.mxu0 %v29132_v0  ;;  %v207_v2 = vld [vmem:[%s29127_s1 + $0x1f8] sm:$0xff] }
  0x58   :  { %22386 = vmatpush3.xpose.msk.msra.mxu1 %vm528_vm0, %v187_v5  ;;  %22387 = vmatprep.mubr.msk.f32.mxu1 %vm23965_vm1, %v29132_v0  ;;  %v463_v5 = vmul.f32 0.17677669, %v79_v63  ;;  %v100_v63 = vld [vmem:[%s29128_s0 + $0x2a0] sm:$0xff] }
  0x59   :  { %22383 = vmatmul.mubr.msk.f32.vlgmr.msra.gmra.mrb[42].mxu0 %vm528_vm0, %v442_v4  ;;  %22395 = vmatprep.subr.mxu1 %v29132_v0  ;;  %v208_v4 = vld [vmem:[%s29127_s1 + $0x200] sm:$0xff] }
  0x5a   :  { %22391 = vmatpush3.xpose.msk.msra.mxu0 %vm528_vm0, %v188_v7  ;;  %22392 = vmatprep.mubr.msk.f32.mxu0 %vm23965_vm1, %v29132_v0  ;;  %v464_v7 = vmul.f32 0.17677669, %v80_v3  ;;  %v101_v3 = vld [vmem:[%s29128_s0 + $0x2a8] sm:$0xff] }
  0x5b   :  { %22388 = vmatmul.mubr.msk.f32.vlgmr.msra.gmra.mrb[42].mxu1 %vm528_vm0, %v443_v8  ;;  %22400 = vmatprep.subr.mxu0 %v29132_v0  ;;  %v209_v8 = vld [vmem:[%s29127_s1 + $0x208] sm:$0xff] }
  0x5c   :  { %22396 = vmatpush3.xpose.msk.msra.mxu1 %vm528_vm0, %v189_v11  ;;  %22397 = vmatprep.mubr.msk.f32.mxu1 %vm23965_vm1, %v29132_v0  ;;  %v465_v11 = vmul.f32 0.17677669, %v81_v6  ;;  %v102_v6 = vld [vmem:[%s29128_s0 + $0x2b0] sm:$0xff] }
  0x5d   :  { %22393 = vmatmul.mubr.msk.f32.vlgmr.msra.gmra.mrb[44].mxu0 %vm528_vm0, %v444_v10  ;;  %22405 = vmatprep.subr.mxu1 %v29132_v0  ;;  %v210_v10 = vld [vmem:[%s29127_s1 + $0x210] sm:$0xff] }
  0x5e   :  { %22401 = vmatpush3.xpose.msk.msra.mxu0 %vm528_vm0, %v190_v13  ;;  %22402 = vmatprep.mubr.msk.f32.mxu0 %vm23965_vm1, %v29132_v0  ;;  %v466_v13 = vmul.f32 0.17677669, %v82_v9  ;;  %v103_v9 = vld [vmem:[%s29128_s0 + $0x2b8] sm:$0xff] }
  0x5f   :  { %22398 = vmatmul.mubr.msk.f32.vlgmr.msra.gmra.mrb[44].mxu1 %vm528_vm0, %v445_v14  ;;  %22410 = vmatprep.subr.mxu0 %v29132_v0  ;;  %v211_v14 = vld [vmem:[%s29127_s1 + $0x218] sm:$0xff] }
  0x60   :  { %22406 = vmatpush3.xpose.msk.msra.mxu1 %vm528_vm0, %v191_v17  ;;  %22407 = vmatprep.mubr.msk.f32.mxu1 %vm23965_vm1, %v29132_v0  ;;  %v467_v17 = vmul.f32 0.17677669, %v83_v12  ;;  %v104_v12 = vld [vmem:[%s29128_s0 + $0x2c0] sm:$0xff] }
  0x61   :  { %22403 = vmatmul.mubr.msk.f32.vlgmr.msra.gmra.mrb[46].mxu0 %vm528_vm0, %v446_v16  ;;  %22415 = vmatprep.subr.mxu1 %v29132_v0  ;;  %v212_v16 = vld [vmem:[%s29127_s1 + $0x220] sm:$0xff] }
  0x62   :  { %22411 = vmatpush3.xpose.msk.msra.mxu0 %vm528_vm0, %v192_v19  ;;  %22412 = vmatprep.mubr.msk.f32.mxu0 %vm23965_vm1, %v29132_v0  ;;  %v468_v19 = vmul.f32 0.17677669, %v84_v15  ;;  %v105_v15 = vld [vmem:[%s29128_s0 + $0x2c8] sm:$0xff] }
  0x63   :  { %22408 = vmatmul.mubr.msk.f32.vlgmr.msra.gmra.mrb[46].mxu1 %vm528_vm0, %v447_v20  ;;  %22420 = vmatprep.subr.mxu0 %v29132_v0  ;;  %v213_v20 = vld [vmem:[%s29127_s1 + $0x228] sm:$0xff] }
  0x64   :  { %22416 = vmatpush3.xpose.msk.msra.mxu1 %vm528_vm0, %v193_v23  ;;  %22417 = vmatprep.mubr.msk.f32.mxu1 %vm23965_vm1, %v29132_v0  ;;  %v469_v23 = vmul.f32 0.17677669, %v85_v18  ;;  %v106_v18 = vld [vmem:[%s29128_s0 + $0x2d0] sm:$0xff] }
  0x65   :  { %22413 = vmatmul.mubr.msk.f32.vlgmr.msra.gmra.mrb[48].mxu0 %vm528_vm0, %v448_v22  ;;  %22425 = vmatprep.subr.mxu1 %v29132_v0  ;;  %v214_v22 = vld [vmem:[%s29127_s1 + $0x230] sm:$0xff] }
  0x66   :  { %22421 = vmatpush3.xpose.msk.msra.mxu0 %vm528_vm0, %v194_v25  ;;  %22422 = vmatprep.mubr.msk.f32.mxu0 %vm23965_vm1, %v29132_v0  ;;  %v470_v25 = vmul.f32 0.17677669, %v86_v21  ;;  %v107_v21 = vld [vmem:[%s29128_s0 + $0x2d8] sm:$0xff] }
  0x67   :  { %22418 = vmatmul.mubr.msk.f32.vlgmr.msra.gmra.mrb[48].mxu1 %vm528_vm0, %v449_v26  ;;  %22430 = vmatprep.subr.mxu0 %v29132_v0  ;;  %v215_v26 = vld [vmem:[%s29127_s1 + $0x238] sm:$0xff] }
  0x68   :  { %22426 = vmatpush3.xpose.msk.msra.mxu1 %vm528_vm0, %v195_v29  ;;  %22427 = vmatprep.mubr.msk.f32.mxu1 %vm23965_vm1, %v29132_v0  ;;  %v471_v29 = vmul.f32 0.17677669, %v87_v24  ;;  %v108_v24 = vld [vmem:[%s29128_s0 + $0x2e0] sm:$0xff] }
  0x69   :  { %22423 = vmatmul.mubr.msk.f32.vlgmr.msra.gmra.mrb[50].mxu0 %vm528_vm0, %v450_v28  ;;  %22435 = vmatprep.subr.mxu1 %v29132_v0  ;;  %v216_v28 = vld [vmem:[%s29127_s1 + $0x240] sm:$0xff] }
  0x6a   :  { %22431 = vmatpush3.xpose.msk.msra.mxu0 %vm528_vm0, %v196_v31  ;;  %22432 = vmatprep.mubr.msk.f32.mxu0 %vm23965_vm1, %v29132_v0  ;;  %v472_v31 = vmul.f32 0.17677669, %v88_v27  ;;  %v109_v27 = vld [vmem:[%s29128_s0 + $0x2e8] sm:$0xff] }
  0x6b   :  { %22428 = vmatmul.mubr.msk.f32.vlgmr.msra.gmra.mrb[50].mxu1 %vm528_vm0, %v451_v32  ;;  %22440 = vmatprep.subr.mxu0 %v29132_v0  ;;  %v217_v32 = vld [vmem:[%s29127_s1 + $0x248] sm:$0xff] }
  0x6c   :  { %22436 = vmatpush3.xpose.msk.msra.mxu1 %vm528_vm0, %v197_v35  ;;  %22437 = vmatprep.mubr.msk.f32.mxu1 %vm23965_vm1, %v29132_v0  ;;  %v473_v35 = vmul.f32 0.17677669, %v89_v30  ;;  %v110_v30 = vld [vmem:[%s29128_s0 + $0x2f0] sm:$0xff] }
  0x6d   :  { %22433 = vmatmul.mubr.msk.f32.vlgmr.msra.gmra.mrb[52].mxu0 %vm528_vm0, %v452_v34  ;;  %22445 = vmatprep.subr.mxu1 %v29132_v0  ;;  %v218_v34 = vld [vmem:[%s29127_s1 + $0x250] sm:$0xff] }
  0x6e   :  { %22441 = vmatpush3.xpose.msk.msra.mxu0 %vm528_vm0, %v198_v37  ;;  %22442 = vmatprep.mubr.msk.f32.mxu0 %vm23965_vm1, %v29132_v0  ;;  %v474_v37 = vmul.f32 0.17677669, %v90_v33  ;;  %v111_v33 = vld [vmem:[%s29128_s0 + $0x2f8] sm:$0xff] }
  0x6f   :  { %22438 = vmatmul.mubr.msk.f32.vlgmr.msra.gmra.mrb[52].mxu1 %vm528_vm0, %v453_v38  ;;  %22450 = vmatprep.subr.mxu0 %v29132_v0  ;;  %v219_v38 = vld [vmem:[%s29127_s1 + $0x258] sm:$0xff] }
  0x70   :  { %22446 = vmatpush3.xpose.msk.msra.mxu1 %vm528_vm0, %v199_v41  ;;  %22447 = vmatprep.mubr.msk.f32.mxu1 %vm23965_vm1, %v29132_v0  ;;  %v475_v41 = vmul.f32 0.17677669, %v91_v36  ;;  %v112_v36 = vld [vmem:[%s29128_s0 + $0x300] sm:$0xff] }
  0x71   :  { %22443 = vmatmul.mubr.msk.f32.vlgmr.msra.gmra.mrb[54].mxu0 %vm528_vm0, %v454_v40  ;;  %22455 = vmatprep.subr.mxu1 %v29132_v0  ;;  %v220_v40 = vld [vmem:[%s29127_s1 + $0x260] sm:$0xff] }
  0x72   :  { %22451 = vmatpush3.xpose.msk.msra.mxu0 %vm528_vm0, %v200_v43  ;;  %22452 = vmatprep.mubr.msk.f32.mxu0 %vm23965_vm1, %v29132_v0  ;;  %v476_v43 = vmul.f32 0.17677669, %v92_v39  ;;  %v113_v39 = vld [vmem:[%s29128_s0 + $0x308] sm:$0xff] }
  0x73   :  { %22448 = vmatmul.mubr.msk.f32.vlgmr.msra.gmra.mrb[54].mxu1 %vm528_vm0, %v455_v44  ;;  %22460 = vmatprep.subr.mxu0 %v29132_v0  ;;  %v221_v44 = vld [vmem:[%s29127_s1 + $0x268] sm:$0xff] }
  0x74   :  { %22456 = vmatpush3.xpose.msk.msra.mxu1 %vm528_vm0, %v201_v47  ;;  %22457 = vmatprep.mubr.msk.f32.mxu1 %vm23965_vm1, %v29132_v0  ;;  %v477_v47 = vmul.f32 0.17677669, %v93_v42  ;;  %v114_v42 = vld [vmem:[%s29128_s0 + $0x310] sm:$0xff] }
  0x75   :  { %22453 = vmatmul.mubr.msk.f32.vlgmr.msra.gmra.mrb[56].mxu0 %vm528_vm0, %v456_v46  ;;  %22465 = vmatprep.subr.mxu1 %v29132_v0  ;;  %v222_v46 = vld [vmem:[%s29127_s1 + $0x270] sm:$0xff] }
  0x76   :  { %22461 = vmatpush3.xpose.msk.msra.mxu0 %vm528_vm0, %v202_v49  ;;  %22462 = vmatprep.mubr.msk.f32.mxu0 %vm23965_vm1, %v29132_v0  ;;  %v478_v49 = vmul.f32 0.17677669, %v94_v45  ;;  %v115_v45 = vld [vmem:[%s29128_s0 + $0x318] sm:$0xff] }
  0x77   :  { %22458 = vmatmul.mubr.msk.f32.vlgmr.msra.gmra.mrb[56].mxu1 %vm528_vm0, %v457_v50  ;;  %22470 = vmatprep.subr.mxu0 %v29132_v0  ;;  %v223_v50 = vld [vmem:[%s29127_s1 + $0x278] sm:$0xff] }
  0x78   :  { %22466 = vmatpush3.xpose.msk.msra.mxu1 %vm528_vm0, %v203_v53  ;;  %22467 = vmatprep.mubr.msk.f32.mxu1 %vm23965_vm1, %v29132_v0  ;;  %v224_v53 = vld [vmem:[%s29127_s1 + $0x280] sm:$0xff] }
  0x79   :  { %22463 = vmatmul.mubr.msk.f32.vlgmr.msra.gmra.mrb[58].mxu0 %vm528_vm0, %v458_v52  ;;  %22475 = vmatprep.subr.mxu1 %v29132_v0  ;;  %v479_v52 = vmul.f32 0.17677669, %v95_v48  ;;  %v116_v48 = vld [vmem:[%s29128_s0 + $0x320] sm:$0xff] }
  0x7a   :  { %22471 = vmatpush3.xpose.msk.msra.mxu0 %vm528_vm0, %v204_v55  ;;  %22472 = vmatprep.mubr.msk.f32.mxu0 %vm23965_vm1, %v29132_v0  ;;  %v480_v55 = vmul.f32 0.17677669, %v96_v51  ;;  %v117_v51 = vld [vmem:[%s29128_s0 + $0x328] sm:$0xff] }
  0x7b   :  { %22468 = vmatmul.mubr.msk.f32.vlgmr.msra.gmra.mrb[58].mxu1 %vm528_vm0, %v459_v56  ;;  %22480 = vmatprep.subr.mxu0 %v29132_v0  ;;  %v225_v56 = vld [vmem:[%s29127_s1 + $0x288] sm:$0xff] }
  0x7c   :  { %22476 = vmatpush3.xpose.msk.msra.mxu1 %vm528_vm0, %v205_v59  ;;  %22477 = vmatprep.mubr.msk.f32.mxu1 %vm23965_vm1, %v29132_v0  ;;  %v226_v59 = vld [vmem:[%s29127_s1 + $0x290] sm:$0xff] }
  0x7d   :  { %22473 = vmatmul.mubr.msk.f32.vlgmr.msra.gmra.mrb[60].mxu0 %vm528_vm0, %v460_v58  ;;  %22485 = vmatprep.subr.mxu1 %v29132_v0  ;;  %v481_v58 = vmul.f32 0.17677669, %v97_v54  ;;  %v118_v54 = vld [vmem:[%s29128_s0 + $0x330] sm:$0xff] }
  0x7e   :  { %22481 = vmatpush3.xpose.msk.msra.mxu0 %vm528_vm0, %v206_v61  ;;  %22482 = vmatprep.mubr.msk.f32.mxu0 %vm23965_vm1, %v29132_v0  ;;  %v482_v61 = vmul.f32 0.17677669, %v98_v57  ;;  %v119_v57 = vld [vmem:[%s29128_s0 + $0x338] sm:$0xff] }
  0x7f   :  { %22478 = vmatmul.mubr.msk.f32.vlgmr.msra.gmra.mrb[60].mxu1 %vm528_vm0, %v461_v62  ;;  %22490 = vmatprep.subr.mxu0 %v29132_v0  ;;  %v227_v62 = vld [vmem:[%s29127_s1 + $0x298] sm:$0xff] }
  0x80   :  { %22486 = vmatpush3.xpose.msk.msra.mxu1 %vm528_vm0, %v207_v2  ;;  %22487 = vmatprep.mubr.msk.f32.mxu1 %vm23965_vm1, %v29132_v0  ;;  %v228_v2 = vld [vmem:[%s29127_s1 + $0x2a0] sm:$0xff] }
  0x81   :  { %22483 = vmatmul.mubr.msk.f32.vlgmr.msra.gmra.mrb[62].mxu0 %vm528_vm0, %v462_v1  ;;  %22495 = vmatprep.subr.mxu1 %v29132_v0  ;;  %v483_v1 = vmul.f32 0.17677669, %v99_v60  ;;  %v120_v60 = vld [vmem:[%s29128_s0 + $0x340] sm:$0xff] }
  0x82   :  { %22491 = vmatpush3.xpose.msk.msra.mxu0 %vm528_vm0, %v208_v4  ;;  %22492 = vmatprep.mubr.msk.f32.mxu0 %vm23965_vm1, %v29132_v0  ;;  %v484_v4 = vmul.f32 0.17677669, %v100_v63  ;;  %v121_v63 = vld [vmem:[%s29128_s0 + $0x348] sm:$0xff] }
  0x83   :  { %22488 = vmatmul.mubr.msk.f32.vlgmr.msra.gmra.mrb[62].mxu1 %vm528_vm0, %v463_v5  ;;  %22500 = vmatprep.subr.mxu0 %v29132_v0  ;;  %v229_v5 = vld [vmem:[%s29127_s1 + $0x2a8] sm:$0xff] }
  0x84   :  { %22496 = vmatpush3.xpose.msk.msra.mxu1 %vm528_vm0, %v209_v8  ;;  %22497 = vmatprep.mubr.msk.f32.mxu1 %vm23965_vm1, %v29132_v0  ;;  %v230_v8 = vld [vmem:[%s29127_s1 + $0x2b0] sm:$0xff] }
  0x85   :  { %22493 = vmatmul.mubr.msk.f32.vlgmr.msra.gmra.mrb[64].mxu0 %vm528_vm0, %v464_v7  ;;  %22505 = vmatprep.subr.mxu1 %v29132_v0  ;;  %v485_v7 = vmul.f32 0.17677669, %v101_v3  ;;  %v122_v3 = vld [vmem:[%s29128_s0 + $0x350] sm:$0xff] }
  0x86   :  { %22501 = vmatpush3.xpose.msk.msra.mxu0 %vm528_vm0, %v210_v10  ;;  %22502 = vmatprep.mubr.msk.f32.mxu0 %vm23965_vm1, %v29132_v0  ;;  %v486_v10 = vmul.f32 0.17677669, %v102_v6  ;;  %v123_v6 = vld [vmem:[%s29128_s0 + $0x358] sm:$0xff] }
  0x87   :  { %22498 = vmatmul.mubr.msk.f32.vlgmr.msra.gmra.mrb[64].mxu1 %vm528_vm0, %v465_v11  ;;  %22510 = vmatprep.subr.mxu0 %v29132_v0  ;;  %v231_v11 = vld [vmem:[%s29127_s1 + $0x2b8] sm:$0xff] }
  0x88   :  { %22506 = vmatpush3.xpose.msk.msra.mxu1 %vm528_vm0, %v211_v14  ;;  %22507 = vmatprep.mubr.msk.f32.mxu1 %vm23965_vm1, %v29132_v0  ;;  %v232_v14 = vld [vmem:[%s29127_s1 + $0x2c0] sm:$0xff] }
  0x89   :  { %22503 = vmatmul.mubr.msk.f32.vlgmr.msra.gmra.mrb[66].mxu0 %vm528_vm0, %v466_v13  ;;  %22515 = vmatprep.subr.mxu1 %v29132_v0  ;;  %v487_v13 = vmul.f32 0.17677669, %v103_v9  ;;  %v124_v9 = vld [vmem:[%s29128_s0 + $0x360] sm:$0xff] }
  0x8a   :  { %22511 = vmatpush3.xpose.msk.msra.mxu0 %vm528_vm0, %v212_v16  ;;  %22512 = vmatprep.mubr.msk.f32.mxu0 %vm23965_vm1, %v29132_v0  ;;  %v488_v16 = vmul.f32 0.17677669, %v104_v12 }
  0x8b   :  { %22508 = vmatmul.mubr.msk.f32.vlgmr.msra.gmra.mrb[66].mxu1 %vm528_vm0, %v467_v17  ;;  %22520 = vmatprep.subr.mxu0 %v29132_v0  ;;  %v233_v17 = vld [vmem:[%s29127_s1 + $0x2c8] sm:$0xff] }
  0x8c   :  { %22516 = vmatpush3.xpose.msk.msra.mxu1 %vm528_vm0, %v213_v20  ;;  %22517 = vmatprep.mubr.msk.f32.mxu1 %vm23965_vm1, %v29132_v0  ;;  %v234_v20 = vld [vmem:[%s29127_s1 + $0x2d0] sm:$0xff] }
  0x8d   :  { %22513 = vmatmul.mubr.msk.f32.vlgmr.msra.gmra.mrb[68].mxu0 %vm528_vm0, %v468_v19  ;;  %22525 = vmatprep.subr.mxu1 %v29132_v0  ;;  %v489_v19 = vmul.f32 0.17677669, %v105_v15 }
  0x8e   :  { %22521 = vmatpush3.xpose.msk.msra.mxu0 %vm528_vm0, %v214_v22  ;;  %22522 = vmatprep.mubr.msk.f32.mxu0 %vm23965_vm1, %v29132_v0  ;;  %v490_v22 = vmul.f32 0.17677669, %v106_v18 }
  0x8f   :  { %22518 = vmatmul.mubr.msk.f32.vlgmr.msra.gmra.mrb[68].mxu1 %vm528_vm0, %v469_v23  ;;  %22530 = vmatprep.subr.mxu0 %v29132_v0  ;;  %v235_v23 = vld [vmem:[%s29127_s1 + $0x2d8] sm:$0xff] }
  0x90   :  { %22526 = vmatpush3.xpose.msk.msra.mxu1 %vm528_vm0, %v215_v26  ;;  %22527 = vmatprep.mubr.msk.f32.mxu1 %vm23965_vm1, %v29132_v0  ;;  %v236_v26 = vld [vmem:[%s29127_s1 + $0x2e0] sm:$0xff] }
  0x91   :  { %22523 = vmatmul.mubr.msk.f32.vlgmr.msra.gmra.mrb[70].mxu0 %vm528_vm0, %v470_v25  ;;  %22535 = vmatprep.subr.mxu1 %v29132_v0  ;;  %v491_v25 = vmul.f32 0.17677669, %v107_v21 }
  0x92   :  { %22531 = vmatpush3.xpose.msk.msra.mxu0 %vm528_vm0, %v216_v28  ;;  %22532 = vmatprep.mubr.msk.f32.mxu0 %vm23965_vm1, %v29132_v0  ;;  %v492_v28 = vmul.f32 0.17677669, %v108_v24  ;;  %v126_v24 = vld [vmem:[%s29128_s0 + $0x370] sm:$0xff] }
  0x93   :  { %22528 = vmatmul.mubr.msk.f32.vlgmr.msra.gmra.mrb[70].mxu1 %vm528_vm0, %v471_v29  ;;  %22540 = vmatprep.subr.mxu0 %v29132_v0  ;;  %v237_v29 = vld [vmem:[%s29127_s1 + $0x2e8] sm:$0xff] }
  0x94   :  { %22536 = vmatpush3.xpose.msk.msra.mxu1 %vm528_vm0, %v217_v32  ;;  %22537 = vmatprep.mubr.msk.f32.mxu1 %vm23965_vm1, %v29132_v0  ;;  %v238_v32 = vld [vmem:[%s29127_s1 + $0x2f0] sm:$0xff] }
  0x95   :  { %22533 = vmatmul.mubr.msk.f32.vlgmr.msra.gmra.mrb[72].mxu0 %vm528_vm0, %v472_v31  ;;  %22545 = vmatprep.subr.mxu1 %v29132_v0  ;;  %v493_v31 = vmul.f32 0.17677669, %v109_v27  ;;  %v127_v27 = vld [vmem:[%s29128_s0 + $0x378] sm:$0xff] }
  0x96   :  { %22541 = vmatpush3.xpose.msk.msra.mxu0 %vm528_vm0, %v218_v34  ;;  %22542 = vmatprep.mubr.msk.f32.mxu0 %vm23965_vm1, %v29132_v0  ;;  %v494_v34 = vmul.f32 0.17677669, %v110_v30 }
  0x97   :  { %22538 = vmatmul.mubr.msk.f32.vlgmr.msra.gmra.mrb[72].mxu1 %vm528_vm0, %v473_v35  ;;  %22550 = vmatprep.subr.mxu0 %v29132_v0  ;;  %v239_v35 = vld [vmem:[%s29127_s1 + $0x2f8] sm:$0xff] }
  0x98   :  { %22546 = vmatpush3.xpose.msk.msra.mxu1 %vm528_vm0, %v219_v38  ;;  %22547 = vmatprep.mubr.msk.f32.mxu1 %vm23965_vm1, %v29132_v0  ;;  %v240_v38 = vld [vmem:[%s29127_s1 + $0x300] sm:$0xff] }
  0x99   :  { %22543 = vmatmul.mubr.msk.f32.vlgmr.msra.gmra.mrb[74].mxu0 %vm528_vm0, %v474_v37  ;;  %22555 = vmatprep.subr.mxu1 %v29132_v0  ;;  %v495_v37 = vmul.f32 0.17677669, %v111_v33 }
  0x9a   :  { %22551 = vmatpush3.xpose.msk.msra.mxu0 %vm528_vm0, %v220_v40  ;;  %22552 = vmatprep.mubr.msk.f32.mxu0 %vm23965_vm1, %v29132_v0  ;;  %v496_v40 = vmul.f32 0.17677669, %v112_v36 }
  0x9b   :  { %22548 = vmatmul.mubr.msk.f32.vlgmr.msra.gmra.mrb[74].mxu1 %vm528_vm0, %v475_v41  ;;  %22560 = vmatprep.subr.mxu0 %v29132_v0  ;;  %v241_v41 = vld [vmem:[%s29127_s1 + $0x308] sm:$0xff] }
  0x9c   :  { %22556 = vmatpush3.xpose.msk.msra.mxu1 %vm528_vm0, %v221_v44  ;;  %22557 = vmatprep.mubr.msk.f32.mxu1 %vm23965_vm1, %v29132_v0  ;;  %v242_v44 = vld [vmem:[%s29127_s1 + $0x310] sm:$0xff] }
  0x9d   :  { %22553 = vmatmul.mubr.msk.f32.vlgmr.msra.gmra.mrb[76].mxu0 %vm528_vm0, %v476_v43  ;;  %22565 = vmatprep.subr.mxu1 %v29132_v0  ;;  %v497_v43 = vmul.f32 0.17677669, %v113_v39 }
  0x9e   :  { %22561 = vmatpush3.xpose.msk.msra.mxu0 %vm528_vm0, %v222_v46  ;;  %22562 = vmatprep.mubr.msk.f32.mxu0 %vm23965_vm1, %v29132_v0  ;;  %v498_v46 = vmul.f32 0.17677669, %v114_v42 }
  0x9f   :  { %22558 = vmatmul.mubr.msk.f32.vlgmr.msra.gmra.mrb[76].mxu1 %vm528_vm0, %v477_v47  ;;  %22570 = vmatprep.subr.mxu0 %v29132_v0  ;;  %v243_v47 = vld [vmem:[%s29127_s1 + $0x318] sm:$0xff] }
  0xa0   :  { %22566 = vmatpush3.xpose.msk.msra.mxu1 %vm528_vm0, %v223_v50  ;;  %22567 = vmatprep.mubr.msk.f32.mxu1 %vm23965_vm1, %v29132_v0  ;;  %v244_v50 = vld [vmem:[%s29127_s1 + $0x320] sm:$0xff] }
  0xa1   :  { %22563 = vmatmul.mubr.msk.f32.vlgmr.msra.gmra.mrb[78].mxu0 %vm528_vm0, %v478_v49  ;;  %22575 = vmatprep.subr.mxu1 %v29132_v0  ;;  %v499_v49 = vmul.f32 0.17677669, %v115_v45  ;;  %v129_v45 = vld [vmem:[%s29128_s0 + $0x388] sm:$0xff] }
  0xa2   :  { %22571 = vmatpush3.xpose.msk.msra.mxu0 %vm528_vm0, %v224_v53  ;;  %22572 = vmatprep.mubr.msk.f32.mxu0 %vm23965_vm1, %v29132_v0  ;;  %v245_v53 = vld [vmem:[%s29127_s1 + $0x328] sm:$0xff] }
  0xa3   :  { %22568 = vmatmul.mubr.msk.f32.vlgmr.msra.gmra.mrb[78].mxu1 %vm528_vm0, %v479_v52  ;;  %22580 = vmatprep.subr.mxu0 %v29132_v0  ;;  %v500_v52 = vmul.f32 0.17677669, %v116_v48  ;;  %v130_v48 = vld [vmem:[%s29128_s0 + $0x390] sm:$0xff] }
  0xa4   :  { %22576 = vmatpush3.xpose.msk.msra.mxu1 %vm528_vm0, %v225_v56  ;;  %22577 = vmatprep.mubr.msk.f32.mxu1 %vm23965_vm1, %v29132_v0  ;;  %v246_v56 = vld [vmem:[%s29127_s1 + $0x330] sm:$0xff] }
  0xa5   :  { %22573 = vmatmul.mubr.msk.f32.vlgmr.msra.gmra.mrb[80].mxu0 %vm528_vm0, %v480_v55  ;;  %22585 = vmatprep.subr.mxu1 %v29132_v0  ;;  %v501_v55 = vmul.f32 0.17677669, %v117_v51 }
  0xa6   :  { %22581 = vmatpush3.xpose.msk.msra.mxu0 %vm528_vm0, %v226_v59  ;;  %22582 = vmatprep.mubr.msk.f32.mxu0 %vm23965_vm1, %v29132_v0  ;;  %v247_v59 = vld [vmem:[%s29127_s1 + $0x338] sm:$0xff] }
  0xa7   :  { %22578 = vmatmul.mubr.msk.f32.vlgmr.msra.gmra.mrb[80].mxu1 %vm528_vm0, %v481_v58  ;;  %22590 = vmatprep.subr.mxu0 %v29132_v0  ;;  %v502_v58 = vmul.f32 0.17677669, %v118_v54 }
  0xa8   :  { %22586 = vmatpush3.xpose.msk.msra.mxu1 %vm528_vm0, %v227_v62  ;;  %22587 = vmatprep.mubr.msk.f32.mxu1 %vm23965_vm1, %v29132_v0  ;;  %v248_v62 = vld [vmem:[%s29127_s1 + $0x340] sm:$0xff] }
  0xa9   :  { %22583 = vmatmul.mubr.msk.f32.vlgmr.msra.gmra.mrb[82].mxu0 %vm528_vm0, %v482_v61  ;;  %22595 = vmatprep.subr.mxu1 %v29132_v0  ;;  %v503_v61 = vmul.f32 0.17677669, %v119_v57 }
  0xaa   :  { %22591 = vmatpush3.xpose.msk.msra.mxu0 %vm528_vm0, %v228_v2  ;;  %22592 = vmatprep.mubr.msk.f32.mxu0 %vm23965_vm1, %v29132_v0  ;;  %v249_v2 = vld [vmem:[%s29127_s1 + $0x348] sm:$0xff] }
  0xab   :  { %22588 = vmatmul.mubr.msk.f32.vlgmr.msra.gmra.mrb[82].mxu1 %vm528_vm0, %v483_v1  ;;  %22600 = vmatprep.subr.mxu0 %v29132_v0  ;;  %v504_v1 = vmul.f32 0.17677669, %v120_v60 }
  0xac   :  { %22596 = vmatpush3.xpose.msk.msra.mxu1 %vm528_vm0, %v229_v5  ;;  %22597 = vmatprep.mubr.msk.f32.mxu1 %vm23965_vm1, %v29132_v0  ;;  %v250_v5 = vld [vmem:[%s29127_s1 + $0x350] sm:$0xff] }
  0xad   :  { %22593 = vmatmul.mubr.msk.f32.vlgmr.msra.gmra.mrb[84].mxu0 %vm528_vm0, %v484_v4  ;;  %22605 = vmatprep.subr.mxu1 %v29132_v0  ;;  %v505_v4 = vmul.f32 0.17677669, %v121_v63 }
  0xae   :  { %22601 = vmatpush3.xpose.msk.msra.mxu0 %vm528_vm0, %v230_v8  ;;  %22602 = vmatprep.mubr.msk.f32.mxu0 %vm23965_vm1, %v29132_v0  ;;  %v251_v8 = vld [vmem:[%s29127_s1 + $0x358] sm:$0xff] }
  0xaf   :  { %22598 = vmatmul.mubr.msk.f32.vlgmr.msra.gmra.mrb[84].mxu1 %vm528_vm0, %v485_v7  ;;  %22610 = vmatprep.subr.mxu0 %v29132_v0  ;;  %v506_v7 = vmul.f32 0.17677669, %v122_v3  ;;  %v132_v3 = vld [vmem:[%s29128_s0 + $0x3a0] sm:$0xff] }
  0xb0   :  { %22606 = vmatpush3.xpose.msk.msra.mxu1 %vm528_vm0, %v231_v11  ;;  %22607 = vmatprep.mubr.msk.f32.mxu1 %vm23965_vm1, %v29132_v0  ;;  %v252_v11 = vld [vmem:[%s29127_s1 + $0x360] sm:$0xff] }
  0xb1   :  { %22603 = vmatmul.mubr.msk.f32.vlgmr.msra.gmra.mrb[86].mxu0 %vm528_vm0, %v486_v10  ;;  %22615 = vmatprep.subr.mxu1 %v29132_v0  ;;  %v507_v10 = vmul.f32 0.17677669, %v123_v6  ;;  %v133_v6 = vld [vmem:[%s29128_s0 + $0x3a8] sm:$0xff] }
  0xb2   :  { %22611 = vmatpush3.xpose.msk.msra.mxu0 %vm528_vm0, %v232_v14  ;;  %22612 = vmatprep.mubr.msk.f32.mxu0 %vm23965_vm1, %v29132_v0 }
  0xb3   :  { %22608 = vmatmul.mubr.msk.f32.vlgmr.msra.gmra.mrb[86].mxu1 %vm528_vm0, %v487_v13  ;;  %22620 = vmatprep.subr.mxu0 %v29132_v0  ;;  %v125_v13 = vld [vmem:[%s29128_s0 + $0x368] sm:$0xff] }
  0xb4   :  { %22616 = vmatpush3.xpose.msk.msra.mxu1 %vm528_vm0, %v233_v17  ;;  %22617 = vmatprep.mubr.msk.f32.mxu1 %vm23965_vm1, %v29132_v0  ;;  %v253_v17 = vld [vmem:[%s29127_s1 + $0x368] sm:$0xff]  ;;  %v509_v21 = vmul.f32 0.17677669, %v125_v13 }
  0xb5   :  { %22613 = vmatmul.mubr.msk.f32.vlgmr.msra.gmra.mrb[88].mxu0 %vm528_vm0, %v488_v16  ;;  %22625 = vmatprep.subr.mxu1 %v29132_v0  ;;  %v508_v16 = vmul.f32 0.17677669, %v124_v9 }
  0xb6   :  { %22621 = vmatpush3.xpose.msk.msra.mxu0 %vm528_vm0, %v234_v20  ;;  %22622 = vmatprep.mubr.msk.f32.mxu0 %vm23965_vm1, %v29132_v0 }
  0xb7   :  { %22618 = vmatmul.mubr.msk.f32.vlgmr.msra.gmra.mrb[88].mxu1 %vm528_vm0, %v489_v19  ;;  %22630 = vmatprep.subr.mxu0 %v29132_v0 }
  0xb8   :  { %22626 = vmatpush3.xpose.msk.msra.mxu1 %vm528_vm0, %v235_v23  ;;  %22627 = vmatprep.mubr.msk.f32.mxu1 %vm23965_vm1, %v29132_v0  ;;  %v254_v23 = vld [vmem:[%s29127_s1 + $0x370] sm:$0xff] }
  0xb9   :  { %22623 = vmatmul.mubr.msk.f32.vlgmr.msra.gmra.mrb[90].mxu0 %vm528_vm0, %v490_v22  ;;  %22635 = vmatprep.subr.mxu1 %v29132_v0 }
  0xba   :  { %22631 = vmatpush3.xpose.msk.msra.mxu0 %vm528_vm0, %v236_v26  ;;  %22632 = vmatprep.mubr.msk.f32.mxu0 %vm23965_vm1, %v29132_v0 }
  0xbb   :  { %22628 = vmatmul.mubr.msk.f32.vlgmr.msra.gmra.mrb[90].mxu1 %vm528_vm0, %v491_v25  ;;  %22640 = vmatprep.subr.mxu0 %v29132_v0 }
  0xbc   :  { %22636 = vmatpush3.xpose.msk.msra.mxu1 %vm528_vm0, %v237_v29  ;;  %22637 = vmatprep.mubr.msk.f32.mxu1 %vm23965_vm1, %v29132_v0  ;;  %v255_v29 = vld [vmem:[%s29127_s1 + $0x378] sm:$0xff] }
  0xbd   :  { %22633 = vmatmul.mubr.msk.f32.vlgmr.msra.gmra.mrb[92].mxu0 %vm528_vm0, %v492_v28  ;;  %22645 = vmatprep.subr.mxu1 %v29132_v0 }
  0xbe   :  { %22641 = vmatpush3.xpose.msk.msra.mxu0 %vm528_vm0, %v238_v32  ;;  %22642 = vmatprep.mubr.msk.f32.mxu0 %vm23965_vm1, %v29132_v0  ;;  %v510_v32 = vmul.f32 0.17677669, %v126_v24 }
  0xbf   :  { %22638 = vmatmul.mubr.msk.f32.vlgmr.msra.gmra.mrb[92].mxu1 %vm528_vm0, %v493_v31  ;;  %22650 = vmatprep.subr.mxu0 %v29132_v0 }
  0xc0   :  { %22646 = vmatpush3.xpose.msk.msra.mxu1 %vm528_vm0, %v239_v35  ;;  %22647 = vmatprep.mubr.msk.f32.mxu1 %vm23965_vm1, %v29132_v0  ;;  %v128_v35 = vld [vmem:[%s29128_s0 + $0x380] sm:$0xff] }
  0xc1   :  { %22643 = vmatmul.mubr.msk.f32.vlgmr.msra.gmra.mrb[94].mxu0 %vm528_vm0, %v494_v34  ;;  %22655 = vmatprep.subr.mxu1 %v29132_v0  ;;  %v511_v34 = vmul.f32 0.17677669, %v127_v27  ;;  %v512_v42 = vmul.f32 0.17677669, %v128_v35  ;;  %v135_v27 = vld [vmem:[%s29128_s0 + $0x3b8] sm:$0xff] }
  0xc2   :  { %22651 = vmatpush3.xpose.msk.msra.mxu0 %vm528_vm0, %v240_v38  ;;  %22652 = vmatprep.mubr.msk.f32.mxu0 %vm23965_vm1, %v29132_v0  ;;  %v256_v38 = vld [vmem:[%s29127_s1 + $0x380] sm:$0xff] }
  0xc3   :  { %22648 = vmatmul.mubr.msk.f32.vlgmr.msra.gmra.mrb[94].mxu1 %vm528_vm0, %v495_v37  ;;  %22660 = vmatprep.subr.mxu0 %v29132_v0 }
  0xc4   :  { %22656 = vmatpush3.xpose.msk.msra.mxu1 %vm528_vm0, %v241_v41  ;;  %22657 = vmatprep.mubr.msk.f32.mxu1 %vm23965_vm1, %v29132_v0 }
  0xc5   :  { %22653 = vmatmul.mubr.msk.f32.vlgmr.msra.gmra.mrb[96].mxu0 %vm528_vm0, %v496_v40  ;;  %22665 = vmatprep.subr.mxu1 %v29132_v0 }
  0xc6   :  { %22661 = vmatpush3.xpose.msk.msra.mxu0 %vm528_vm0, %v242_v44  ;;  %22662 = vmatprep.mubr.msk.f32.mxu0 %vm23965_vm1, %v29132_v0  ;;  %v257_v44 = vld [vmem:[%s29127_s1 + $0x388] sm:$0xff] }
  0xc7   :  { %22658 = vmatmul.mubr.msk.f32.vlgmr.msra.gmra.mrb[96].mxu1 %vm528_vm0, %v497_v43  ;;  %22670 = vmatprep.subr.mxu0 %v29132_v0 }
  0xc8   :  { %22666 = vmatpush3.xpose.msk.msra.mxu1 %vm528_vm0, %v243_v47  ;;  %22667 = vmatprep.mubr.msk.f32.mxu1 %vm23965_vm1, %v29132_v0 }
  0xc9   :  { %22663 = vmatmul.mubr.msk.f32.vlgmr.msra.gmra.mrb[98].mxu0 %vm528_vm0, %v498_v46  ;;  %22675 = vmatprep.subr.mxu1 %v29132_v0 }
  0xca   :  { %22671 = vmatpush3.xpose.msk.msra.mxu0 %vm528_vm0, %v244_v50  ;;  %22672 = vmatprep.mubr.msk.f32.mxu0 %vm23965_vm1, %v29132_v0  ;;  %v258_v50 = vld [vmem:[%s29127_s1 + $0x390] sm:$0xff] }
  0xcb   :  { %22668 = vmatmul.mubr.msk.f32.vlgmr.msra.gmra.mrb[98].mxu1 %vm528_vm0, %v499_v49  ;;  %22680 = vmatprep.subr.mxu0 %v29132_v0 }
  0xcc   :  { %22676 = vmatpush3.xpose.msk.msra.mxu1 %vm528_vm0, %v245_v53  ;;  %22677 = vmatprep.mubr.msk.f32.mxu1 %vm23965_vm1, %v29132_v0  ;;  %v513_v53 = vmul.f32 0.17677669, %v129_v45  ;;  %v265_v45 = vld [vmem:[%s29127_s1 + $0x3c8] sm:$0xff] }
  0xcd   :  { %22673 = vmatmul.mubr.msk.f32.vlgmr.msra.gmra.mrb[100].mxu0 %vm528_vm0, %v500_v52  ;;  %22685 = vmatprep.subr.mxu1 %v29132_v0 }
  0xce   :  { %22681 = vmatpush3.xpose.msk.msra.mxu0 %vm528_vm0, %v246_v56  ;;  %22682 = vmatprep.mubr.msk.f32.mxu0 %vm23965_vm1, %v29132_v0  ;;  %v131_v56 = vld [vmem:[%s29128_s0 + $0x398] sm:$0xff] }
  0xcf   :  { %22678 = vmatmul.mubr.msk.f32.vlgmr.msra.gmra.mrb[100].mxu1 %vm528_vm0, %v501_v55  ;;  %22690 = vmatprep.subr.mxu0 %v29132_v0  ;;  %v514_v55 = vmul.f32 0.17677669, %v130_v48  ;;  %v515_v63 = vmul.f32 0.17677669, %v131_v56 }
  0xd0   :  { %22686 = vmatpush3.xpose.msk.msra.mxu1 %vm528_vm0, %v247_v59  ;;  %22687 = vmatprep.mubr.msk.f32.mxu1 %vm23965_vm1, %v29132_v0  ;;  %v259_v59 = vld [vmem:[%s29127_s1 + $0x398] sm:$0xff] }
  0xd1   :  { %22683 = vmatmul.mubr.msk.f32.vlgmr.msra.gmra.mrb[102].mxu0 %vm528_vm0, %v502_v58  ;;  %22695 = vmatprep.subr.mxu1 %v29132_v0 }
  0xd2   :  { %22691 = vmatpush3.xpose.msk.msra.mxu0 %vm528_vm0, %v248_v62  ;;  %22692 = vmatprep.mubr.msk.f32.mxu0 %vm23965_vm1, %v29132_v0 }
  0xd3   :  { %22688 = vmatmul.mubr.msk.f32.vlgmr.msra.gmra.mrb[102].mxu1 %vm528_vm0, %v503_v61  ;;  %22700 = vmatprep.subr.mxu0 %v29132_v0 }
  0xd4   :  { %22696 = vmatpush3.xpose.msk.msra.mxu1 %vm528_vm0, %v249_v2  ;;  %22697 = vmatprep.mubr.msk.f32.mxu1 %vm23965_vm1, %v29132_v0  ;;  %v260_v2 = vld [vmem:[%s29127_s1 + $0x3a0] sm:$0xff] }
  0xd5   :  { %22693 = vmatmul.mubr.msk.f32.vlgmr.msra.gmra.mrb[104].mxu0 %vm528_vm0, %v504_v1  ;;  %22705 = vmatprep.subr.mxu1 %v29132_v0 }
  0xd6   :  { %22701 = vmatpush3.xpose.msk.msra.mxu0 %vm528_vm0, %v250_v5  ;;  %22702 = vmatprep.mubr.msk.f32.mxu0 %vm23965_vm1, %v29132_v0 }
  0xd7   :  { %22698 = vmatmul.mubr.msk.f32.vlgmr.msra.gmra.mrb[104].mxu1 %vm528_vm0, %v505_v4  ;;  %22710 = vmatprep.subr.mxu0 %v29132_v0 }
  0xd8   :  { %v25181_v12 = vpop.f32.mrb[0].mxu0  ;;  %22706 = vmatpush3.xpose.msk.msra.mxu1 %vm528_vm0, %v251_v8  ;;  %22707 = vmatprep.mubr.msk.f32.mxu1 %vm23965_vm1, %v29132_v0  ;;  %v261_v8 = vld [vmem:[%s29127_s1 + $0x3a8] sm:$0xff] }
  0xd9   :  { %v22174_v14 = vpop.f32.mrb[1].mxu0  ;;  %v10258_v15 = vsel %vm10257_vm2, %v25181_v12, -inf  ;;  %22703 = vmatmul.mubr.msk.f32.vlgmr.msra.gmra.mrb[106].mxu0 %vm528_vm0, %v506_v7  ;;  %22715 = vmatprep.subr.mxu1 %v29132_v0 }
  0xda   :  { %10259 = vmax.xlane.f32.xlu0 %v10258_v15  ;;  %v25196_v18 = vpop.f32.mrb[0].mxu1  ;;  %22711 = vmatpush3.xpose.msk.msra.mxu0 %vm528_vm0, %v252_v11  ;;  %v516_v11 = vmul.f32 0.17677669, %v132_v3  ;;  %v517_v14 = vmul.f32 0.17677669, %v133_v6  ;;  %v134_v15 = vld [vmem:[%s29128_s0 + $0x3b0] sm:$0xff] }
  0xdb   :  { %v22179_v19 = vpop.f32.mrb[1].mxu1  ;;  %v10261_v20 = vsel %vm10257_vm2, %v25196_v18, -inf  ;;  %22708 = vmatmul.mubr.msk.f32.vlgmr.msra.gmra.mrb[106].mxu1 %vm528_vm0, %v507_v10  ;;  %22712 = vmatprep.mubr.msk.f32.mxu0 %vm23965_vm1, %v29132_v0  ;;  %v518_v24 = vmul.f32 0.17677669, %v134_v15 }
  0xdc   :  { %v25204_v22 = vpop.f32.mrb[2].mxu0  ;;  %22716 = vmatpush3.xpose.msk.msra.mxu1 %vm528_vm0, %v253_v17  ;;  %22717 = vmatprep.mubr.msk.f32.mxu1 %vm23965_vm1, %v29132_v0  ;;  %v262_v19 = vld [vmem:[%s29127_s1 + $0x3b0] sm:$0xff] }
  0xdd   :  { %v22184_v25 = vpop.f32.mrb[3].mxu0  ;;  %v10264_v26 = vsel %vm10257_vm2, %v25204_v22, -inf  ;;  %22713 = vmatmul.mubr.msk.f32.vlgmr.msra.gmra.mrb[108].mxu0 %vm528_vm0, %v508_v16  ;;  %22720 = vmatprep.subr.mxu0 %v29132_v0 }
  0xde   :  { %10262 = vmax.xlane.f32.xlu0 %v10261_v20  ;;  %10265 = vmax.xlane.f32.xlu1 %v10264_v26  ;;  %v25222_v28 = vpop.f32.mrb[2].mxu1  ;;  %v263_v26 = vld [vmem:[%s29127_s1 + $0x3b8] sm:$0xff] }
  0xdf   :  { %v22189_v30 = vpop.f32.mrb[3].mxu1  ;;  %v10267_v31 = vsel %vm10257_vm2, %v25222_v28, -inf  ;;  %22718 = vmatmul.mubr.msk.f32.vlgmr.msra.gmra.mrb[108].mxu1 %vm528_vm0, %v509_v21  ;;  %22721 = vmatpush3.xpose.msk.msra.mxu0 %vm528_vm0, %v254_v23 }
  0xe0   :  { %v25231_v33 = vpop.f32.mrb[4].mxu0  ;;  %22722 = vmatprep.mubr.msk.f32.mxu0 %vm23965_vm1, %v29132_v0  ;;  %22725 = vmatprep.subr.mxu1 %v29132_v0 }
  0xe1   :  { %v10270_v36 = vsel %vm10257_vm2, %v25231_v33, -inf  ;;  %v22194_v37 = vpop.f32.mrb[5].mxu0  ;;  %22726 = vmatpush3.xpose.msk.msra.mxu1 %vm528_vm0, %v255_v29  ;;  %22727 = vmatprep.mubr.msk.f32.mxu1 %vm23965_vm1, %v29132_v0 }
  0xe2   :  { %10268 = vmax.xlane.f32.xlu1 %v10267_v31  ;;  %10271 = vmax.xlane.f32.xlu0 %v10270_v36  ;;  %v25247_v39 = vpop.f32.mrb[4].mxu1  ;;  %v136_v31 = vld [vmem:[%s29128_s0 + $0x3c0] sm:$0xff]  ;;  %v519_v37 = vmul.f32 0.17677669, %v135_v27 }
  0xe3   :  { %v22199_v40 = vpop.f32.mrb[5].mxu1  ;;  %v10273_v41 = vsel %vm10257_vm2, %v25247_v39, -inf  ;;  %22723 = vmatmul.mubr.msk.f32.vlgmr.msra.gmra.mrb[110].mxu0 %vm528_vm0, %v510_v32  ;;  %22730 = vmatprep.subr.mxu0 %v29132_v0 }
  0xe4   :  { %v25253_v43 = vpop.f32.mrb[6].mxu0  ;;  %22728 = vmatmul.mubr.msk.f32.vlgmr.msra.gmra.mrb[110].mxu1 %vm528_vm0, %v511_v34  ;;  %22731 = vmatpush3.xpose.msk.msra.mxu0 %vm528_vm0, %v256_v38  ;;  %v264_v34 = vld [vmem:[%s29127_s1 + $0x3c0] sm:$0xff]  ;;  %v520_v40 = vmul.f32 0.17677669, %v136_v31 }
  0xe5   :  { %v10276_v46 = vsel %vm10257_vm2, %v25253_v43, -inf  ;;  %v22204_v47 = vpop.f32.mrb[7].mxu0  ;;  %22732 = vmatprep.mubr.msk.f32.mxu0 %vm23965_vm1, %v29132_v0  ;;  %22735 = vmatprep.subr.mxu1 %v29132_v0 }
  0xe6   :  { %10274 = vmax.xlane.f32.xlu1 %v10273_v41  ;;  %10277 = vmax.xlane.f32.xlu0 %v10276_v46  ;;  %v25271_v49 = vpop.f32.mrb[6].mxu1  ;;  %v137_v41 = vld [vmem:[%s29128_s0 + $0x3c8] sm:$0xff] }
  0xe7   :  { %v22209_v51 = vpop.f32.mrb[7].mxu1  ;;  %v10279_v52 = vsel %vm10257_vm2, %v25271_v49, -inf  ;;  %22733 = vmatmul.mubr.msk.f32.vlgmr.msra.gmra.mrb[112].mxu0 %vm528_vm0, %v512_v42  ;;  %22736 = vmatpush3.xpose.msk.msra.mxu1 %vm528_vm0, %v257_v44 }
  0xe8   :  { %v25280_v54 = vpop.f32.mrb[8].mxu0  ;;  %22737 = vmatprep.mubr.msk.f32.mxu1 %vm23965_vm1, %v29132_v0  ;;  %22740 = vmatprep.subr.mxu0 %v29132_v0 }
  0xe9   :  { %v10282_v57 = vsel %vm10257_vm2, %v25280_v54, -inf  ;;  %v22214_v58 = vpop.f32.mrb[9].mxu0  ;;  %22741 = vmatpush3.xpose.msk.msra.mxu0 %vm528_vm0, %v258_v50  ;;  %22742 = vmatprep.mubr.msk.f32.mxu0 %vm23965_vm1, %v29132_v0  ;;  %v521_v50 = vmul.f32 0.17677669, %v137_v41 }
  0xea   :  { %10280 = vmax.xlane.f32.xlu1 %v10279_v52  ;;  %10283 = vmax.xlane.f32.xlu0 %v10282_v57  ;;  %v25296_v60 = vpop.f32.mrb[8].mxu1  ;;  %v266_v52 = vld [vmem:[%s29127_s1 + $0x3d0] sm:$0xff]  ;;  %v139_v57 = vld [vmem:[%s29128_s0 + $0x3d8] sm:$0xff] }
  0xeb   :  { %v22219_v61 = vpop.f32.mrb[9].mxu1  ;;  %v10285_v62 = vsel %vm10257_vm2, %v25296_v60, -inf  ;;  %22738 = vmatmul.mubr.msk.f32.vlgmr.msra.gmra.mrb[112].mxu1 %vm528_vm0, %v513_v53  ;;  %22745 = vmatprep.subr.mxu1 %v29132_v0  ;;  %v138_v53 = vld [vmem:[%s29128_s0 + $0x3d0] sm:$0xff]  ;;  %v523_v3 = vmul.f32 0.17677669, %v139_v57 }
  0xec   :  { %v25302_v1 = vpop.f32.mrb[10].mxu0  ;;  %22743 = vmatmul.mubr.msk.f32.vlgmr.msra.gmra.mrb[114].mxu0 %vm528_vm0, %v514_v55  ;;  %22746 = vmatpush3.xpose.msk.msra.mxu1 %vm528_vm0, %v259_v59  ;;  %v267_v59 = vld [vmem:[%s29127_s1 + $0x3d8] sm:$0xff] }
  0xed   :  { %v10288_v4 = vsel %vm10257_vm2, %v25302_v1, -inf  ;;  %v22224_v5 = vpop.f32.mrb[11].mxu0  ;;  %22747 = vmatprep.mubr.msk.f32.mxu1 %vm23965_vm1, %v29132_v0  ;;  %22750 = vmatprep.subr.mxu0 %v29132_v0 }
  0xee   :  { %10286 = vmax.xlane.f32.xlu1 %v10285_v62  ;;  %10289 = vmax.xlane.f32.xlu0 %v10288_v4  ;;  %v25320_v7 = vpop.f32.mrb[10].mxu1  ;;  %v140_v4 = vld [vmem:[%s29128_s0 + $0x3e0] sm:$0xff] }
  0xef   :  { %v22229_v9 = vpop.f32.mrb[11].mxu1  ;;  %v10291_v10 = vsel %vm10257_vm2, %v25320_v7, -inf  ;;  %22748 = vmatmul.mubr.msk.f32.vlgmr.msra.gmra.mrb[114].mxu1 %vm528_vm0, %v515_v63  ;;  %22751 = vmatpush3.xpose.msk.msra.mxu0 %vm528_vm0, %v260_v2  ;;  %v522_v63 = vmul.f32 0.17677669, %v138_v53 }
  0xf0   :  { %v25329_v13 = vpop.f32.mrb[12].mxu0  ;;  %22752 = vmatprep.mubr.msk.f32.mxu0 %vm23965_vm1, %v29132_v0  ;;  %22755 = vmatprep.subr.mxu1 %v29132_v0 }
  0xf1   :  { %v10294_v16 = vsel %vm10257_vm2, %v25329_v13, -inf  ;;  %v22234_v17 = vpop.f32.mrb[13].mxu0  ;;  %22756 = vmatpush3.xpose.msk.msra.mxu1 %vm528_vm0, %v261_v8  ;;  %22757 = vmatprep.mubr.msk.f32.mxu1 %vm23965_vm1, %v29132_v0  ;;  %v268_v8 = vld [vmem:[%s29127_s1 + $0x3e0] sm:$0xff] }
  0xf2   :  { %10292 = vmax.xlane.f32.xlu1 %v10291_v10  ;;  %10295 = vmax.xlane.f32.xlu0 %v10294_v16  ;;  %v25345_v20 = vpop.f32.mrb[12].mxu1  ;;  %v269_v16 = vld [vmem:[%s29127_s1 + $0x3e8] sm:$0xff] }
  0xf3   :  { %v22239_v21 = vpop.f32.mrb[13].mxu1  ;;  %v10297_v23 = vsel %vm10257_vm2, %v25345_v20, -inf  ;;  %22753 = vmatmul.mubr.msk.f32.vlgmr.msra.gmra.mrb[116].mxu0 %vm528_vm0, %v516_v11  ;;  %22760 = vmatprep.subr.mxu0 %v29132_v0  ;;  %v141_v17 = vld [vmem:[%s29128_s0 + $0x3e8] sm:$0xff] }
  0xf4   :  { %v25351_v25 = vpop.f32.mrb[14].mxu0  ;;  %22758 = vmatmul.mubr.msk.f32.vlgmr.msra.gmra.mrb[116].mxu1 %vm528_vm0, %v517_v14  ;;  %22761 = vmatpush3.xpose.msk.msra.mxu0 %vm528_vm0, %v262_v19  ;;  %v524_v14 = vmul.f32 0.17677669, %v140_v4 }
  0xf5   :  { %v10300_v29 = vsel %vm10257_vm2, %v25351_v25, -inf  ;;  %v22244_v30 = vpop.f32.mrb[15].mxu0  ;;  %22762 = vmatprep.mubr.msk.f32.mxu0 %vm23965_vm1, %v29132_v0  ;;  %22765 = vmatprep.subr.mxu1 %v29132_v0 }
  0xf6   :  { %10298 = vmax.xlane.f32.xlu1 %v10297_v23  ;;  %10301 = vmax.xlane.f32.xlu0 %v10300_v29  ;;  %v25369_v32 = vpop.f32.mrb[14].mxu1  ;;  %v142_v23 = vld [vmem:[%s29128_s0 + $0x3f0] sm:$0xff]  ;;  %v525_v30 = vmul.f32 0.17677669, %v141_v17 }
  0xf7   :  { %v22249_v35 = vpop.f32.mrb[15].mxu1  ;;  %v10303_v36 = vsel %vm10257_vm2, %v25369_v32, -inf  ;;  %22763 = vmatmul.mubr.msk.f32.vlgmr.msra.gmra.mrb[118].mxu0 %vm528_vm0, %v518_v24  ;;  %22766 = vmatpush3.xpose.msk.msra.mxu1 %vm528_vm0, %v263_v26  ;;  %v270_v26 = vld [vmem:[%s29127_s1 + $0x3f0] sm:$0xff] }
  0xf8   :  { %v25378_v38 = vpop.f32.mrb[16].mxu0  ;;  %22767 = vmatprep.mubr.msk.f32.mxu1 %vm23965_vm1, %v29132_v0  ;;  %22770 = vmatprep.subr.mxu0 %v29132_v0  ;;  %v143_v35 = vld [vmem:[%s29128_s0 + $0x3f8] sm:$0xff] }
  0xf9   :  { %v10306_v42 = vsel %vm10257_vm2, %v25378_v38, -inf  ;;  %v22254_v44 = vpop.f32.mrb[17].mxu0  ;;  %22771 = vmatpush3.xpose.msk.msra.mxu0 %vm528_vm0, %v264_v34  ;;  %22772 = vmatprep.mubr.msk.f32.mxu0 %vm23965_vm1, %v29132_v0  ;;  %v526_v34 = vmul.f32 0.17677669, %v142_v23 }
  0xfa   :  { %10304 = vmax.xlane.f32.xlu1 %v10303_v36  ;;  %10307 = vmax.xlane.f32.xlu0 %v10306_v42  ;;  %v25394_v46 = vpop.f32.mrb[16].mxu1 }
  0xfb   :  { %v22259_v47 = vpop.f32.mrb[17].mxu1  ;;  %v10309_v48 = vsel %vm10257_vm2, %v25394_v46, -inf  ;;  %22768 = vmatmul.mubr.msk.f32.vlgmr.msra.gmra.mrb[118].mxu1 %vm528_vm0, %v519_v37  ;;  %22775 = vmatprep.subr.mxu1 %v29132_v0 }
  0xfc   :  { %v25400_v51 = vpop.f32.mrb[18].mxu0  ;;  %22773 = vmatmul.mubr.msk.f32.vlgmr.msra.gmra.mrb[120].mxu0 %vm528_vm0, %v520_v40  ;;  %22776 = vmatpush3.xpose.msk.msra.mxu1 %vm528_vm0, %v265_v45  ;;  %v271_v40 = vld [vmem:[%s29127_s1 + $0x3f8] sm:$0xff]  ;;  %v527_v45 = vmul.f32 0.17677669, %v143_v35 }
  0xfd   :  { %v10312_v55 = vsel %vm10257_vm2, %v25400_v51, -inf  ;;  %v22264_v56 = vpop.f32.mrb[19].mxu0  ;;  %22777 = vmatprep.mubr.msk.f32.mxu1 %vm23965_vm1, %v29132_v0  ;;  %22780 = vmatprep.subr.mxu0 %v29132_v0 }
  0xfe   :  { %10310 = vmax.xlane.f32.xlu1 %v10309_v48  ;;  %10313 = vmax.xlane.f32.xlu0 %v10312_v55  ;;  %v25418_v58 = vpop.f32.mrb[18].mxu1 }
  0xff   :  { %v22269_v61 = vpop.f32.mrb[19].mxu1  ;;  %v10315_v62 = vsel %vm10257_vm2, %v25418_v58, -inf  ;;  %22778 = vmatmul.mubr.msk.f32.vlgmr.msra.gmra.mrb[120].mxu1 %vm528_vm0, %v521_v50  ;;  %22781 = vmatpush3.xpose.msk.msra.mxu0 %vm528_vm0, %v266_v52 }
 0x100   :  { %v25427_v2 = vpop.f32.mrb[20].mxu0  ;;  %22782 = vmatprep.mubr.msk.f32.mxu0 %vm23965_vm1, %v29132_v0  ;;  %22785 = vmatprep.subr.mxu1 %v29132_v0 }
 0x101   :  { %v10318_v5 = vsel %vm10257_vm2, %v25427_v2, -inf  ;;  %v22274_v6 = vpop.f32.mrb[21].mxu0  ;;  %22786 = vmatpush3.xpose.msk.msra.mxu1 %vm528_vm0, %v267_v59  ;;  %22787 = vmatprep.mubr.msk.f32.mxu1 %vm23965_vm1, %v29132_v0 }
 0x102   :  { %10316 = vmax.xlane.f32.xlu1 %v10315_v62  ;;  %10319 = vmax.xlane.f32.xlu0 %v10318_v5  ;;  %v25443_v9 = vpop.f32.mrb[20].mxu1 }
 0x103   :  { %v22279_v10 = vpop.f32.mrb[21].mxu1  ;;  %v10321_v11 = vsel %vm10257_vm2, %v25443_v9, -inf  ;;  %22783 = vmatmul.mubr.msk.f32.vlgmr.msra.gmra.mrb[122].mxu0 %vm528_vm0, %v522_v63  ;;  %22790 = vmatprep.subr.mxu0 %v29132_v0 }
 0x104   :  { %v25449_v15 = vpop.f32.mrb[22].mxu0  ;;  %22788 = vmatmul.mubr.msk.f32.vlgmr.msra.gmra.mrb[122].mxu1 %vm528_vm0, %v523_v3  ;;  %22791 = vmatpush3.xpose.msk.msra.mxu0 %vm528_vm0, %v268_v8 }
 0x105   :  { %v10324_v19 = vsel %vm10257_vm2, %v25449_v15, -inf  ;;  %v22284_v21 = vpop.f32.mrb[23].mxu0  ;;  %22792 = vmatprep.mubr.msk.f32.mxu0 %vm23965_vm1, %v29132_v0  ;;  %22795 = vmatprep.subr.mxu1 %v29132_v0 }
 0x106   :  { %10322 = vmax.xlane.f32.xlu1 %v10321_v11  ;;  %10325 = vmax.xlane.f32.xlu0 %v10324_v19  ;;  %v25467_v24 = vpop.f32.mrb[22].mxu1 }
 0x107   :  { %v22289_v27 = vpop.f32.mrb[23].mxu1  ;;  %v10327_v29 = vsel %vm10257_vm2, %v25467_v24, -inf  ;;  %22793 = vmatmul.mubr.msk.f32.vlgmr.msra.gmra.mrb[124].mxu0 %vm528_vm0, %v524_v14  ;;  %22796 = vmatpush3.xpose.msk.msra.mxu1 %vm528_vm0, %v269_v16 }
 0x108   :  { %v25476_v31 = vpop.f32.mrb[24].mxu0  ;;  %22797 = vmatprep.mubr.msk.f32.mxu1 %vm23965_vm1, %v29132_v0  ;;  %22800 = vmatprep.subr.mxu0 %v29132_v0 }
 0x109   :  { %v10330_v36 = vsel %vm10257_vm2, %v25476_v31, -inf  ;;  %v22294_v37 = vpop.f32.mrb[25].mxu0  ;;  %22801 = vmatpush3.xpose.msk.msra.mxu0 %vm528_vm0, %v270_v26  ;;  %22802 = vmatprep.mubr.msk.f32.mxu0 %vm23965_vm1, %v29132_v0 }
 0x10a   :  { %10328 = vmax.xlane.f32.xlu1 %v10327_v29  ;;  %10331 = vmax.xlane.f32.xlu0 %v10330_v36  ;;  %v25492_v41 = vpop.f32.mrb[24].mxu1 }
 0x10b   :  { %v22299_v42 = vpop.f32.mrb[25].mxu1  ;;  %v10333_v44 = vsel %vm10257_vm2, %v25492_v41, -inf  ;;  %22798 = vmatmul.mubr.msk.f32.vlgmr.msra.gmra.mrb[124].mxu1 %vm528_vm0, %v525_v30  ;;  %22805 = vmatprep.subr.mxu1 %v29132_v0 }
 0x10c   :  { %v25498_v47 = vpop.f32.mrb[26].mxu0  ;;  %22803 = vmatmul.mubr.msk.f32.vlgmr.msra.gmra.mrb[126].mxu0 %vm528_vm0, %v526_v34  ;;  %22806 = vmatpush3.xpose.msk.msra.mxu1 %vm528_vm0, %v271_v40 }
 0x10d   :  { %29381 = vst [vmem:[#allocation2_spill] sm:$0xff] %v25498_v47  ;;  %v10336_v48 = vsel %vm10257_vm2, %v25498_v47, -inf  ;;  %v22304_v50 = vpop.f32.mrb[27].mxu0  ;;  %22807 = vmatprep.mubr.msk.f32.mxu1 %vm23965_vm1, %v29132_v0  ;;  %22810 = vmatprep.subr.mxu0 %v29132_v0  ;;  %v273_v47 = vld [vmem:[%s29129_s2 + $0x8] sm:$0xff] }
 0x10e   :  { %10334 = vmax.xlane.f32.xlu1 %v10333_v44  ;;  %10337 = vmax.xlane.f32.xlu0 %v10336_v48  ;;  %v25507_v52 = vpop.f32.mrb[26].mxu1 }
 0x10f   :  { %29382 = vst [vmem:[#allocation3_spill] sm:$0xff] %v25507_v52  ;;  %v22309_v53 = vpop.f32.mrb[27].mxu1  ;;  %v10339_v55 = vsel %vm10257_vm2, %v25507_v52, -inf  ;;  %22808 = vmatmul.mubr.msk.f32.vlgmr.msra.gmra.mrb[126].mxu1 %vm528_vm0, %v527_v45  ;;  %22812 = vmatprep.mubr.msk.f32.mxu0 %vm23965_vm1, %v29132_v0 }
 0x110   :  { %v25514_v56 = vpop.f32.mrb[28].mxu0  ;;  %22815 = vmatprep.subr.mxu1 %v29132_v0  ;;  %22817 = vmatprep.mubr.msk.f32.mxu1 %vm23965_vm1, %v29132_v0 }
 0x111   :  { %29383 = vst [vmem:[#allocation4_spill] sm:$0xff] %v25514_v56  ;;  %v10342_v57 = vsel %vm10257_vm2, %v25514_v56, -inf  ;;  %v22314_v59 = vpop.f32.mrb[29].mxu0  ;;  %22816 = vmatpush3.msra.mxu1 %v273_v47 }
 0x112   :  { %10340 = vmax.xlane.f32.xlu1 %v10339_v55  ;;  %10343 = vmax.xlane.f32.xlu0 %v10342_v57  ;;  %v25521_v61 = vpop.f32.mrb[28].mxu1 }
 0x113   :  { %29384 = vst [vmem:[#allocation5_spill] sm:$0xff] %v25521_v61  ;;  %v22319_v62 = vpop.f32.mrb[29].mxu1  ;;  %v10345_v63 = vsel %vm10257_vm2, %v25521_v61, -inf }
 0x114   :  { %v25525_v3 = vpop.f32.mrb[30].mxu0 }
 0x115   :  { %29385 = vst [vmem:[#allocation6_spill] sm:$0xff] %v25525_v3  ;;  %v10348_v4 = vsel %vm10257_vm2, %v25525_v3, -inf  ;;  %v22324_v5 = vpop.f32.mrb[31].mxu0 }
 0x116   :  { %10346 = vmax.xlane.f32.xlu1 %v10345_v63  ;;  %10349 = vmax.xlane.f32.xlu0 %v10348_v4  ;;  %v25529_v6 = vpop.f32.mrb[30].mxu1 }
 0x117   :  { %29386 = vst [vmem:[#allocation7_spill] sm:$0xff] %v25529_v6  ;;  %v22329_v8 = vpop.f32.mrb[31].mxu1  ;;  %v10351_v10 = vsel %vm10257_vm2, %v25529_v6, -inf }
 0x118   :  { %v25533_v11 = vpop.f32.mrb[32].mxu0 }
 0x119   :  { %v10354_v14 = vsel %vm10257_vm2, %v25533_v11, -inf  ;;  %v22334_v16 = vpop.f32.mrb[33].mxu0 }
 0x11a   :  { %10352 = vmax.xlane.f32.xlu1 %v10351_v10  ;;  %10355 = vmax.xlane.f32.xlu0 %v10354_v14  ;;  %v25537_v17 = vpop.f32.mrb[32].mxu1 }
 0x11b   :  { %v22339_v19 = vpop.f32.mrb[33].mxu1  ;;  %v10357_v21 = vsel %vm10257_vm2, %v25537_v17, -inf }
 0x11c   :  { %v25541_v23 = vpop.f32.mrb[34].mxu0 }
 0x11d   :  { %29387 = vst [vmem:[#allocation8_spill] sm:$0xff] %v25541_v23  ;;  %v10360_v26 = vsel %vm10257_vm2, %v25541_v23, -inf  ;;  %v22344_v27 = vpop.f32.mrb[35].mxu0 }
 0x11e   :  { %10358 = vmax.xlane.f32.xlu1 %v10357_v21  ;;  %10361 = vmax.xlane.f32.xlu0 %v10360_v26  ;;  %v25545_v29 = vpop.f32.mrb[34].mxu1 }
 0x11f   :  { %v22349_v30 = vpop.f32.mrb[35].mxu1  ;;  %v10363_v34 = vsel %vm10257_vm2, %v25545_v29, -inf }
 0x120   :  { %v25549_v35 = vpop.f32.mrb[36].mxu0 }
 0x121   :  { %v10366_v36 = vsel %vm10257_vm2, %v25549_v35, -inf  ;;  %v22354_v37 = vpop.f32.mrb[37].mxu0 }
 0x122   :  { %10364 = vmax.xlane.f32.xlu1 %v10363_v34  ;;  %10367 = vmax.xlane.f32.xlu0 %v10366_v36  ;;  %v25553_v40 = vpop.f32.mrb[36].mxu1 }
 0x123   :  { %v22359_v42 = vpop.f32.mrb[37].mxu1  ;;  %v10369_v44 = vsel %vm10257_vm2, %v25553_v40, -inf }
 0x124   :  { %v25557_v45 = vpop.f32.mrb[38].mxu0 }
 0x125   :  { %v10372_v48 = vsel %vm10257_vm2, %v25557_v45, -inf  ;;  %v22364_v50 = vpop.f32.mrb[39].mxu0 }
 0x126   :  { %10370 = vmax.xlane.f32.xlu1 %v10369_v44  ;;  %10373 = vmax.xlane.f32.xlu0 %v10372_v48  ;;  %v25561_v53 = vpop.f32.mrb[38].mxu1 }
 0x127   :  { %v22369_v55 = vpop.f32.mrb[39].mxu1  ;;  %v10375_v57 = vsel %vm10257_vm2, %v25561_v53, -inf }
 0x128   :  { %v25565_v59 = vpop.f32.mrb[40].mxu0 }
 0x129   :  { %v10378_v62 = vsel %vm10257_vm2, %v25565_v59, -inf  ;;  %v22374_v63 = vpop.f32.mrb[41].mxu0 }
 0x12a   :  { %10376 = vmax.xlane.f32.xlu1 %v10375_v57  ;;  %10379 = vmax.xlane.f32.xlu0 %v10378_v62  ;;  %v25569_v4 = vpop.f32.mrb[40].mxu1 }
 0x12b   :  { %v22379_v5 = vpop.f32.mrb[41].mxu1  ;;  %v10381_v8 = vsel %vm10257_vm2, %v25569_v4, -inf }
 0x12c   :  { %v25573_v10 = vpop.f32.mrb[42].mxu0 }
 0x12d   :  { %v10384_v14 = vsel %vm10257_vm2, %v25573_v10, -inf  ;;  %v22384_v16 = vpop.f32.mrb[43].mxu0 }
 0x12e   :  { %10382 = vmax.xlane.f32.xlu1 %v10381_v8  ;;  %10385 = vmax.xlane.f32.xlu0 %v10384_v14  ;;  %v25577_v19 = vpop.f32.mrb[42].mxu1 }
 0x12f   :  { %v22389_v21 = vpop.f32.mrb[43].mxu1  ;;  %v10387_v26 = vsel %vm10257_vm2, %v25577_v19, -inf }
 0x130   :  { %v25581_v27 = vpop.f32.mrb[44].mxu0 }
 0x131   :  { %v10390_v30 = vsel %vm10257_vm2, %v25581_v27, -inf  ;;  %v22394_v34 = vpop.f32.mrb[45].mxu0 }
 0x132   :  { %10388 = vmax.xlane.f32.xlu1 %v10387_v26  ;;  %10391 = vmax.xlane.f32.xlu0 %v10390_v30  ;;  %v25585_v36 = vpop.f32.mrb[44].mxu1 }
 0x133   :  { %v22399_v37 = vpop.f32.mrb[45].mxu1  ;;  %v10393_v42 = vsel %vm10257_vm2, %v25585_v36, -inf }
 0x134   :  { %v25589_v44 = vpop.f32.mrb[46].mxu0 }
 0x135   :  { %29388 = vst [vmem:[#allocation9_spill] sm:$0xff] %v25589_v44  ;;  %v10396_v48 = vsel %vm10257_vm2, %v25589_v44, -inf  ;;  %v22404_v50 = vpop.f32.mrb[47].mxu0 }
 0x136   :  { %10394 = vmax.xlane.f32.xlu1 %v10393_v42  ;;  %10397 = vmax.xlane.f32.xlu0 %v10396_v48  ;;  %v25593_v55 = vpop.f32.mrb[46].mxu1 }
 0x137   :  { %v22409_v57 = vpop.f32.mrb[47].mxu1  ;;  %v10399_v62 = vsel %vm10257_vm2, %v25593_v55, -inf }
 0x138   :  { %v25597_v63 = vpop.f32.mrb[48].mxu0 }
 0x139   :  { %29389 = vst [vmem:[#allocation10_spill] sm:$0xff] %v25597_v63  ;;  %v10402_v5 = vsel %vm10257_vm2, %v25597_v63, -inf  ;;  %v22414_v8 = vpop.f32.mrb[49].mxu0 }
 0x13a   :  { %10400 = vmax.xlane.f32.xlu1 %v10399_v62  ;;  %10403 = vmax.xlane.f32.xlu0 %v10402_v5  ;;  %v25601_v14 = vpop.f32.mrb[48].mxu1 }
 0x13b   :  { %29390 = vst [vmem:[#allocation11_spill] sm:$0xff] %v25601_v14  ;;  %v22419_v16 = vpop.f32.mrb[49].mxu1  ;;  %v10405_v21 = vsel %vm10257_vm2, %v25601_v14, -inf }
 0x13c   :  { %v25605_v26 = vpop.f32.mrb[50].mxu0 }
 0x13d   :  { %29391 = vst [vmem:[#allocation12_spill] sm:$0xff] %v25605_v26  ;;  %v10408_v30 = vsel %vm10257_vm2, %v25605_v26, -inf  ;;  %v22424_v34 = vpop.f32.mrb[51].mxu0 }
 0x13e   :  { %10406 = vmax.xlane.f32.xlu1 %v10405_v21  ;;  %10409 = vmax.xlane.f32.xlu0 %v10408_v30  ;;  %v25609_v37 = vpop.f32.mrb[50].mxu1 }
 0x13f   :  { %29392 = vst [vmem:[#allocation13_spill] sm:$0xff] %v25609_v37  ;;  %v22429_v42 = vpop.f32.mrb[51].mxu1  ;;  %v10411_v48 = vsel %vm10257_vm2, %v25609_v37, -inf }
 0x140   :  { %v25613_v50 = vpop.f32.mrb[52].mxu0 }
 0x141   :  { %29393 = vst [vmem:[#allocation14_spill] sm:$0xff] %v25613_v50  ;;  %v10414_v57 = vsel %vm10257_vm2, %v25613_v50, -inf  ;;  %v22434_v62 = vpop.f32.mrb[53].mxu0 }
 0x142   :  { %10412 = vmax.xlane.f32.xlu1 %v10411_v48  ;;  %10415 = vmax.xlane.f32.xlu0 %v10414_v57  ;;  %v25617_v5 = vpop.f32.mrb[52].mxu1 }
 0x143   :  { %29394 = vst [vmem:[#allocation15_spill] sm:$0xff] %v25617_v5  ;;  %v22439_v8 = vpop.f32.mrb[53].mxu1  ;;  %v10417_v16 = vsel %vm10257_vm2, %v25617_v5, -inf }
 0x144   :  { %v25621_v21 = vpop.f32.mrb[54].mxu0 }
 0x145   :  { %29395 = vst [vmem:[#allocation16_spill] sm:$0xff] %v25621_v21  ;;  %v10420_v30 = vsel %vm10257_vm2, %v25621_v21, -inf  ;;  %v22444_v34 = vpop.f32.mrb[55].mxu0 }
 0x146   :  { %10418 = vmax.xlane.f32.xlu1 %v10417_v16  ;;  %10421 = vmax.xlane.f32.xlu0 %v10420_v30  ;;  %v25625_v42 = vpop.f32.mrb[54].mxu1 }
 0x147   :  { %29396 = vst [vmem:[#allocation17_spill] sm:$0xff] %v25625_v42  ;;  %v22449_v0 = vpop.f32.mrb[55].mxu1  ;;  %v10423_v48 = vsel %vm10257_vm2, %v25625_v42, -inf }
 0x148   :  { %v25629_v57 = vpop.f32.mrb[56].mxu0 }
 0x149   :  { %29397 = vst [vmem:[#allocation18_spill] sm:$0xff] %v25629_v57  ;;  %v10426_v62 = vsel %vm10257_vm2, %v25629_v57, -inf  ;;  %v22454_v8 = vpop.f32.mrb[57].mxu0 }
 0x14a   :  { %10424 = vmax.xlane.f32.xlu1 %v10423_v48  ;;  %10427 = vmax.xlane.f32.xlu0 %v10426_v62  ;;  %v25633_v6 = vpop.f32.mrb[56].mxu1 }
 0x14b   :  { %29398 = vst [vmem:[#allocation19_spill] sm:$0xff] %v25633_v6  ;;  %v22459_v3 = vpop.f32.mrb[57].mxu1  ;;  %v10429_v16 = vsel %vm10257_vm2, %v25633_v6, -inf }
 0x14c   :  { %v25637_v30 = vpop.f32.mrb[58].mxu0 }
 0x14d   :  { %29399 = vst [vmem:[#allocation20_spill] sm:$0xff] %v25637_v30  ;;  %v10432_v0 = vsel %vm10257_vm2, %v25637_v30, -inf  ;;  %v22464_v34 = vpop.f32.mrb[59].mxu0 }
 0x14e   :  { %10430 = vmax.xlane.f32.xlu1 %v10429_v16  ;;  %10433 = vmax.xlane.f32.xlu0 %v10432_v0  ;;  %v25641_v42 = vpop.f32.mrb[58].mxu1 }
 0x14f   :  { %29400 = vst [vmem:[#allocation21_spill] sm:$0xff] %v25641_v42  ;;  %v22469_v57 = vpop.f32.mrb[59].mxu1  ;;  %v10435_v48 = vsel %vm10257_vm2, %v25641_v42, -inf }
 0x150   :  { %v25645_v62 = vpop.f32.mrb[60].mxu0 }
 0x151   :  { %29401 = vst [vmem:[#allocation22_spill] sm:$0xff] %v25645_v62  ;;  %v10438_v3 = vsel %vm10257_vm2, %v25645_v62, -inf  ;;  %v22474_v8 = vpop.f32.mrb[61].mxu0 }
 0x152   :  { %10436 = vmax.xlane.f32.xlu1 %v10435_v48  ;;  %10439 = vmax.xlane.f32.xlu0 %v10438_v3  ;;  %v25649_v6 = vpop.f32.mrb[60].mxu1 }
 0x153   :  { %29402 = vst [vmem:[#allocation23_spill] sm:$0xff] %v25649_v6  ;;  %v22479_v30 = vpop.f32.mrb[61].mxu1  ;;  %v10441_v16 = vsel %vm10257_vm2, %v25649_v6, -inf }
 0x154   :  { %v25653_v0 = vpop.f32.mrb[62].mxu0 }
 0x155   :  { %29403 = vst [vmem:[#allocation24_spill] sm:$0xff] %v25653_v0  ;;  %v10444_v57 = vsel %vm10257_vm2, %v25653_v0, -inf  ;;  %v22484_v34 = vpop.f32.mrb[63].mxu0 }
 0x156   :  { %10442 = vmax.xlane.f32.xlu1 %v10441_v16  ;;  %10445 = vmax.xlane.f32.xlu0 %v10444_v57  ;;  %v25657_v42 = vpop.f32.mrb[62].mxu1 }
 0x157   :  { %29404 = vst [vmem:[#allocation25_spill] sm:$0xff] %v25657_v42  ;;  %v22489_v62 = vpop.f32.mrb[63].mxu1  ;;  %v10447_v48 = vsel %vm10257_vm2, %v25657_v42, -inf }
 0x158   :  { %v25661_v3 = vpop.f32.mrb[64].mxu0 }
 0x159   :  { %29405 = vst [vmem:[#allocation26_spill] sm:$0xff] %v25661_v3  ;;  %v10450_v30 = vsel %vm10257_vm2, %v25661_v3, -inf  ;;  %v22494_v8 = vpop.f32.mrb[65].mxu0 }
 0x15a   :  { %10448 = vmax.xlane.f32.xlu1 %v10447_v48  ;;  %10451 = vmax.xlane.f32.xlu0 %v10450_v30  ;;  %v25665_v6 = vpop.f32.mrb[64].mxu1 }
 0x15b   :  { %29406 = vst [vmem:[#allocation27_spill] sm:$0xff] %v25665_v6  ;;  %v22499_v0 = vpop.f32.mrb[65].mxu1  ;;  %v10453_v16 = vsel %vm10257_vm2, %v25665_v6, -inf }
 0x15c   :  { %v25669_v57 = vpop.f32.mrb[66].mxu0 }
 0x15d   :  { %29407 = vst [vmem:[#allocation28_spill] sm:$0xff] %v25669_v57  ;;  %v10456_v62 = vsel %vm10257_vm2, %v25669_v57, -inf  ;;  %v22504_v34 = vpop.f32.mrb[67].mxu0 }
 0x15e   :  { %10454 = vmax.xlane.f32.xlu1 %v10453_v16  ;;  %10457 = vmax.xlane.f32.xlu0 %v10456_v62  ;;  %v25673_v42 = vpop.f32.mrb[66].mxu1 }
 0x15f   :  { %29408 = vst [vmem:[#allocation29_spill] sm:$0xff] %v25673_v42  ;;  %v22509_v3 = vpop.f32.mrb[67].mxu1  ;;  %v10459_v48 = vsel %vm10257_vm2, %v25673_v42, -inf }
 0x160   :  { %v25677_v30 = vpop.f32.mrb[68].mxu0 }
 0x161   :  { %29409 = vst [vmem:[#allocation30_spill] sm:$0xff] %v25677_v30  ;;  %v10462_v0 = vsel %vm10257_vm2, %v25677_v30, -inf  ;;  %v22514_v8 = vpop.f32.mrb[69].mxu0 }
 0x162   :  { %10460 = vmax.xlane.f32.xlu1 %v10459_v48  ;;  %10463 = vmax.xlane.f32.xlu0 %v10462_v0  ;;  %v25681_v6 = vpop.f32.mrb[68].mxu1 }
 0x163   :  { %29410 = vst [vmem:[#allocation31_spill] sm:$0xff] %v25681_v6  ;;  %v22519_v57 = vpop.f32.mrb[69].mxu1  ;;  %v10465_v16 = vsel %vm10257_vm2, %v25681_v6, -inf }
 0x164   :  { %v25685_v62 = vpop.f32.mrb[70].mxu0 }
 0x165   :  { %29411 = vst [vmem:[#allocation32_spill] sm:$0xff] %v25685_v62  ;;  %v10468_v3 = vsel %vm10257_vm2, %v25685_v62, -inf  ;;  %v22524_v34 = vpop.f32.mrb[71].mxu0 }
 0x166   :  { %10466 = vmax.xlane.f32.xlu1 %v10465_v16  ;;  %10469 = vmax.xlane.f32.xlu0 %v10468_v3  ;;  %v25689_v42 = vpop.f32.mrb[70].mxu1 }
 0x167   :  { %29412 = vst [vmem:[#allocation33_spill] sm:$0xff] %v25689_v42  ;;  %v10260_v30 = vpop.xlane.xlu0 %10259  ;;  %v22529_v8 = vpop.f32.mrb[71].mxu1  ;;  %v10471_v48 = vsel %vm10257_vm2, %v25689_v42, -inf }
 0x168   :  { %v10642_v57 = vsub.f32 %v25181_v12, %v10260_v30  ;;  %v25694_v0 = vpop.f32.mrb[72].mxu0 }
 0x169   :  { %29413 = vst [vmem:[#allocation34_spill] sm:$0xff] %v25694_v0  ;;  %v10474_v6 = vsel %vm10257_vm2, %v25694_v0, -inf  ;;  %v22534_v61 = vpop.f32.mrb[73].mxu0 }
 0x16a   :  { %v10770_v21 = vmul.f32 1.442695, %v10642_v57  ;;  %10472 = vmax.xlane.f32.xlu1 %v10471_v48  ;;  %10475 = vmax.xlane.f32.xlu0 %v10474_v6  ;;  %v25698_v16 = vpop.f32.mrb[72].mxu1 }
 0x16b   :  { %29414 = vst [vmem:[#allocation35_spill] sm:$0xff] %v25698_v16  ;;  %v10263_v3 = vpop.xlane.xlu0 %10262  ;;  %v10266_v34 = vpop.xlane.xlu1 %10265  ;;  %v10477_v8 = vsel %vm10257_vm2, %v25698_v16, -inf }
 0x16c   :  { %23452 = vpow2.f32 %v10770_v21  ;;  %v10643_v42 = vsub.f32 %v25196_v18, %v10263_v3  ;;  %v10644_v12 = vsub.f32 %v25204_v22, %v10266_v34  ;;  %v25704_v30 = vpop.f32.mrb[74].mxu0  ;;  %v22539_v62 = vpop.f32.mrb[73].mxu1 }
 0x16d   :  { %29415 = vst [vmem:[#allocation36_spill] sm:$0xff] %v25704_v30  ;;  %v10480_v61 = vsel %vm10257_vm2, %v25704_v30, -inf  ;;  %v22544_v48 = vpop.f32.mrb[75].mxu0 }
 0x16e   :  { %v10772_v6 = vmul.f32 1.442695, %v10643_v42  ;;  %10478 = vmax.xlane.f32.xlu1 %v10477_v8  ;;  %10481 = vmax.xlane.f32.xlu0 %v10480_v61  ;;  %v25708_v57 = vpop.f32.mrb[74].mxu1  ;;  %v10774_v18 = vmul.f32 1.442695, %v10644_v12 }
 0x16f   :  { %29416 = vst [vmem:[#allocation37_spill] sm:$0xff] %v25708_v57  ;;  %v10269_v0 = vpop.xlane.xlu1 %10268  ;;  %v10272_v5 = vpop.xlane.xlu0 %10271  ;;  %v10483_v21 = vsel %vm10257_vm2, %v25708_v57, -inf }
 0x170   :  { %23454 = vpow2.f32 %v10772_v6  ;;  %v10645_v22 = vsub.f32 %v25222_v28, %v10269_v0  ;;  %v25713_v3 = vpop.f32.mrb[76].mxu0  ;;  %v22549_v62 = vpop.f32.mrb[75].mxu1  ;;  %v10646_v28 = vsub.f32 %v25231_v33, %v10272_v5 }
 0x171   :  { %29417 = vst [vmem:[#allocation38_spill] sm:$0xff] %v25713_v3  ;;  %v10486_v34 = vsel %vm10257_vm2, %v25713_v3, -inf  ;;  %v22554_v42 = vpop.f32.mrb[77].mxu0  ;;  %23456 = vpow2.f32 %v10774_v18 }
 0x172   :  { %10484 = vmax.xlane.f32.xlu1 %v10483_v21  ;;  %10487 = vmax.xlane.f32.xlu0 %v10486_v34  ;;  %v25717_v8 = vpop.f32.mrb[76].mxu1  ;;  %v10776_v12 = vmul.f32 1.442695, %v10645_v22  ;;  %v10778_v33 = vmul.f32 1.442695, %v10646_v28 }
 0x173   :  { %29418 = vst [vmem:[#allocation39_spill] sm:$0xff] %v25717_v8  ;;  %v10275_v61 = vpop.xlane.xlu1 %10274  ;;  %v10278_v48 = vpop.xlane.xlu0 %10277  ;;  %v10489_v57 = vsel %vm10257_vm2, %v25717_v8, -inf }
 0x174   :  { %v25722_v0 = vpop.f32.mrb[78].mxu0  ;;  %v22559_v6 = vpop.f32.mrb[77].mxu1  ;;  %23458 = vpow2.f32 %v10776_v12  ;;  %v10647_v5 = vsub.f32 %v25247_v39, %v10275_v61  ;;  %v10648_v61 = vsub.f32 %v25253_v43, %v10278_v48 }
 0x175   :  { %29419 = vst [vmem:[#allocation40_spill] sm:$0xff] %v25722_v0  ;;  %v10492_v62 = vsel %vm10257_vm2, %v25722_v0, -inf  ;;  %v22564_v42 = vpop.f32.mrb[79].mxu0  ;;  %23460 = vpow2.f32 %v10778_v33 }
 0x176   :  { %v25726_v21 = vpop.eup %23452  ;;  %10490 = vmax.xlane.f32.xlu1 %v10489_v57  ;;  %10493 = vmax.xlane.f32.xlu0 %v10492_v62  ;;  %v25728_v34 = vpop.f32.mrb[78].mxu1  ;;  %v10780_v39 = vmul.f32 1.442695, %v10647_v5  ;;  %v10782_v48 = vmul.f32 1.442695, %v10648_v61 }
 0x177   :  { %29420 = vst [vmem:[#allocation41_spill] sm:$0xff] %v25726_v21  ;;  %29421 = vst [vmem:[#allocation42_spill] sm:$0xff] %v25728_v34  ;;  %v10281_v3 = vpop.xlane.xlu1 %10280  ;;  %v10284_v30 = vpop.xlane.xlu0 %10283  ;;  %v10495_v18 = vsel %vm10257_vm2, %v25728_v34, -inf  ;;  %v11026_v42 = vsel %vm10257_vm2, %v25726_v21, 0.0 }
 0x178   :  { %v22569_v22 = vpop.f32.mrb[79].mxu1  ;;  %v25733_v6 = vpop.f32.mrb[80].mxu0  ;;  %23462 = vpow2.f32 %v10780_v39  ;;  %v10649_v33 = vsub.f32 %v25271_v49, %v10281_v3  ;;  %v10650_v39 = vsub.f32 %v25280_v54, %v10284_v30 }
 0x179   :  { %29422 = vst [vmem:[#allocation43_spill] sm:$0xff] %v25733_v6  ;;  %v22574_v0 = vpop.f32.mrb[81].mxu0  ;;  %v10498_v12 = vsel %vm10257_vm2, %v25733_v6, -inf  ;;  %23464 = vpow2.f32 %v10782_v48 }
 0x17a   :  { %v25737_v57 = vpop.eup %23454  ;;  %10496 = vmax.xlane.f32.xlu1 %v10495_v18  ;;  %11027 = vadd.xlane.f32.xlu0 %v11026_v42  ;;  %v25739_v62 = vpop.f32.mrb[80].mxu1  ;;  %v10784_v3 = vmul.f32 1.442695, %v10649_v33  ;;  %v10786_v30 = vmul.f32 1.442695, %v10650_v39 }
 0x17b   :  { %29423 = vst [vmem:[#allocation44_spill] sm:$0xff] %v25737_v57  ;;  %29424 = vst [vmem:[#allocation45_spill] sm:$0xff] %v25739_v62  ;;  %v10287_v8 = vpop.xlane.xlu1 %10286  ;;  %v25741_v16 = vpop.xlane.xlu0 %10289  ;;  %v11029_v0 = vsel %vm10257_vm2, %v25737_v57, 0.0  ;;  %v10501_v43 = vsel %vm10257_vm2, %v25739_v62, -inf }
 0x17c   :  { %v22579_v28 = vpop.f32.mrb[81].mxu1  ;;  %v25746_v22 = vpop.f32.mrb[82].mxu0  ;;  %23466 = vpow2.f32 %v10784_v3  ;;  %v10651_v48 = vsub.f32 %v25296_v60, %v10287_v8  ;;  %v10652_v3 = vsub.f32 %v25302_v1, %v25741_v16 }
 0x17d   :  { %29425 = vst [vmem:[#allocation46_spill] sm:$0xff] %v25746_v22  ;;  %v22584_v18 = vpop.f32.mrb[83].mxu0  ;;  %v25750_v42 = vpop.eup %23456  ;;  %v10504_v49 = vsel %vm10257_vm2, %v25746_v22, -inf  ;;  %23468 = vpow2.f32 %v10786_v30 }
 0x17e   :  { %29426 = vst [vmem:[#allocation47_spill] sm:$0xff] %v25750_v42  ;;  %11030 = vadd.xlane.f32.xlu1 %v11029_v0  ;;  %10499 = vmax.xlane.f32.xlu0 %v10498_v12  ;;  %v25752_v21 = vpop.f32.mrb[82].mxu1  ;;  %v11032_v0 = vsel %vm10257_vm2, %v25750_v42, 0.0  ;;  %v25765_v18 = vpop.eup %23458  ;;  %v10788_v8 = vmul.f32 1.442695, %v10651_v48 }
 0x17f   :  { %29427 = vst [vmem:[#allocation48_spill] sm:$0xff] %v25752_v21  ;;  %v25754_v34 = vpop.xlane.xlu1 %10292  ;;  %v25756_v6 = vpop.xlane.xlu0 %10295  ;;  %29429 = vst [vmem:[#allocation50_spill] sm:$0xff] %v25765_v18  ;;  %v10507_v54 = vsel %vm10257_vm2, %v25752_v21, -inf  ;;  %v10790_v16 = vmul.f32 1.442695, %v10652_v3 }
 0x180   :  { %v22589_v5 = vpop.f32.mrb[83].mxu1  ;;  %v25761_v28 = vpop.f32.mrb[84].mxu0  ;;  %23470 = vpow2.f32 %v10788_v8  ;;  %v10653_v48 = vsub.f32 %v25320_v7, %v25754_v34  ;;  %v10654_v3 = vsub.f32 %v25329_v13, %v25756_v6 }
 0x181   :  { %29428 = vst [vmem:[#allocation49_spill] sm:$0xff] %v25761_v28  ;;  %v22594_v12 = vpop.f32.mrb[85].mxu0  ;;  %v10510_v60 = vsel %vm10257_vm2, %v25761_v28, -inf  ;;  %23472 = vpow2.f32 %v10790_v16 }
 0x182   :  { %10502 = vmax.xlane.f32.xlu1 %v10501_v43  ;;  %11033 = vadd.xlane.f32.xlu0 %v11032_v0  ;;  %v25767_v57 = vpop.f32.mrb[84].mxu1  ;;  %v11035_v43 = vsel %vm10257_vm2, %v25765_v18, 0.0  ;;  %v25780_v12 = vpop.eup %23460  ;;  %v10792_v34 = vmul.f32 1.442695, %v10653_v48 }
 0x183   :  { %29430 = vst [vmem:[#allocation51_spill] sm:$0xff] %v25767_v57  ;;  %v25769_v56 = vpop.xlane.xlu1 %10298  ;;  %v25771_v62 = vpop.xlane.xlu0 %10301  ;;  %29432 = vst [vmem:[#allocation53_spill] sm:$0xff] %v25780_v12  ;;  %v10513_v1 = vsel %vm10257_vm2, %v25767_v57, -inf }
 0x184   :  { %v22599_v61 = vpop.f32.mrb[85].mxu1  ;;  %v25776_v5 = vpop.f32.mrb[86].mxu0  ;;  %23474 = vpow2.f32 %v10792_v34  ;;  %v10656_v34 = vsub.f32 %v25351_v25, %v25771_v62 }
 0x185   :  { %29431 = vst [vmem:[#allocation52_spill] sm:$0xff] %v25776_v5  ;;  %v22604_v0 = vpop.f32.mrb[87].mxu0  ;;  %v10516_v7 = vsel %vm10257_vm2, %v25776_v5, -inf }
 0x186   :  { %11036 = vadd.xlane.f32.xlu1 %v11035_v43  ;;  %10505 = vmax.xlane.f32.xlu0 %v10504_v49  ;;  %v25782_v42 = vpop.f32.mrb[86].mxu1  ;;  %v11038_v43 = vsel %vm10257_vm2, %v25780_v12, 0.0  ;;  %v25795_v0 = vpop.eup %23462  ;;  %v10798_v62 = vmul.f32 1.442695, %v10656_v34 }
 0x187   :  { %29433 = vst [vmem:[#allocation54_spill] sm:$0xff] %v25782_v42  ;;  %v25784_v50 = vpop.xlane.xlu1 %10304  ;;  %v25786_v22 = vpop.xlane.xlu0 %10307  ;;  %29435 = vst [vmem:[#allocation56_spill] sm:$0xff] %v25795_v0  ;;  %v10519_v6 = vsel %vm10257_vm2, %v25782_v42, -inf }
 0x188   :  { %v22609_v33 = vpop.f32.mrb[87].mxu1  ;;  %v25791_v61 = vpop.f32.mrb[88].mxu0  ;;  %v10658_v34 = vsub.f32 %v25378_v38, %v25786_v22 }
 0x189   :  { %29434 = vst [vmem:[#allocation55_spill] sm:$0xff] %v25791_v61  ;;  %v22614_v49 = vpop.f32.mrb[89].mxu0 }
 0x18a   :  { %10508 = vmax.xlane.f32.xlu1 %v10507_v54  ;;  %11039 = vadd.xlane.f32.xlu0 %v11038_v43  ;;  %v25797_v18 = vpop.f32.mrb[88].mxu1  ;;  %v11041_v54 = vsel %vm10257_vm2, %v25795_v0, 0.0  ;;  %v25811_v49 = vpop.eup %23464  ;;  %v10802_v22 = vmul.f32 1.442695, %v10658_v34 }
 0x18b   :  { %29436 = vst [vmem:[#allocation57_spill] sm:$0xff] %v25797_v18  ;;  %v25799_v37 = vpop.xlane.xlu1 %10310  ;;  %v25801_v21 = vpop.xlane.xlu0 %10313  ;;  %29438 = vst [vmem:[#allocation59_spill] sm:$0xff] %v25811_v49  ;;  %v10525_v25 = vsel %vm10257_vm2, %v25797_v18, -inf }
 0x18c   :  { %v22619_v39 = vpop.f32.mrb[89].mxu1  ;;  %v25807_v33 = vpop.f32.mrb[90].mxu0 }
 0x18d   :  { %29437 = vst [vmem:[#allocation58_spill] sm:$0xff] %v25807_v33  ;;  %v22624_v43 = vpop.f32.mrb[91].mxu0  ;;  %v25827_v0 = vpop.eup %23466 }
 0x18e   :  { %11042 = vadd.xlane.f32.xlu1 %v11041_v54  ;;  %10511 = vmax.xlane.f32.xlu0 %v10510_v60  ;;  %v25813_v12 = vpop.f32.mrb[90].mxu1  ;;  %v11044_v60 = vsel %vm10257_vm2, %v25811_v49, 0.0  ;;  %29441 = vst [vmem:[#allocation62_spill] sm:$0xff] %v25827_v0  ;;  %v272_v49 = vld [vmem:[%s29129_s2] sm:$0xff]  ;;  %v25846_v57 = vpop.eup %23468 }
 0x18f   :  { %29439 = vst [vmem:[#allocation60_spill] sm:$0xff] %v25813_v12  ;;  %v25815_v52 = vpop.xlane.xlu1 %10316  ;;  %v25817_v30 = vpop.xlane.xlu0 %10319  ;;  %29444 = vst [vmem:[#allocation65_spill] sm:$0xff] %v25846_v57  ;;  %22811 = vmatpush3.msra.mxu0 %v272_v49  ;;  %v10531_v38 = vsel %vm10257_vm2, %v25813_v12, -inf }
 0x190   :  { %v22629_v39 = vpop.f32.mrb[91].mxu1  ;;  %v25823_v43 = vpop.f32.mrb[92].mxu0 }
 0x191   :  { %29440 = vst [vmem:[#allocation61_spill] sm:$0xff] %v25823_v43  ;;  %v22634_v54 = vpop.f32.mrb[93].mxu0  ;;  %v25866_v42 = vpop.eup %23470  ;;  %v10534_v34 = vsel %vm10257_vm2, %v25823_v43, -inf }
 0x192   :  { %10514 = vmax.xlane.f32.xlu1 %v10513_v1  ;;  %11045 = vadd.xlane.f32.xlu0 %v11044_v60  ;;  %v25829_v28 = vpop.f32.mrb[92].mxu1  ;;  %v11047_v1 = vsel %vm10257_vm2, %v25827_v0, 0.0  ;;  %29448 = vst [vmem:[#allocation68_spill] sm:$0xff] %v25866_v42  ;;  %v25883_v63 = vpop.eup %23472 }
 0x193   :  { %29442 = vst [vmem:[#allocation63_spill] sm:$0xff] %v25829_v28  ;;  %v25831_v26 = vpop.xlane.xlu1 %10322  ;;  %v25833_v8 = vpop.xlane.xlu0 %10325  ;;  %29451 = vst [vmem:[#allocation71_spill] sm:$0xff] %v25883_v63 }
 0x194   :  { %v22639_v39 = vpop.f32.mrb[93].mxu1  ;;  %v25839_v54 = vpop.f32.mrb[94].mxu0 }
 0x195   :  { %29443 = vst [vmem:[#allocation64_spill] sm:$0xff] %v25839_v54  ;;  %v22644_v60 = vpop.f32.mrb[95].mxu0  ;;  %v10794_v39 = vmul.f32 1.442695, %v10654_v3 }
 0x196   :  { %11048 = vadd.xlane.f32.xlu1 %v11047_v1  ;;  %10517 = vmax.xlane.f32.xlu0 %v10516_v7  ;;  %v25848_v16 = vpop.f32.mrb[94].mxu1  ;;  %v10655_v60 = vsub.f32 %v25345_v20, %v25769_v56  ;;  %v29447_v1 = vmov 0.0   ;;  %v11050_v7 = vsel %vm10257_vm2, %v25846_v57, 0.0 }
 0x197   :  { %29445 = vst [vmem:[#allocation66_spill] sm:$0xff] %v25848_v16  ;;  %v25850_v48 = vpop.xlane.xlu1 %10328  ;;  %v25852_v13 = vpop.xlane.xlu0 %10331  ;;  %22820 = vmatprep.subr.mxu0 %v29447_v1  ;;  %23476 = vpow2.f32 %v10794_v39  ;;  %22825 = vmatprep.subr.mxu1 %v29447_v1 }
 0x198   :  { %v22649_v0 = vpop.f32.mrb[95].mxu1  ;;  %v25858_v5 = vpop.f32.mrb[96].mxu0 }
 0x199   :  { %29446 = vst [vmem:[#allocation67_spill] sm:$0xff] %v25858_v5  ;;  %v22654_v14 = vpop.f32.mrb[97].mxu0  ;;  %v10522_v0 = vsel %vm10257_vm2, %v25791_v61, -inf }
 0x19a   :  { %10520 = vmax.xlane.f32.xlu1 %v10519_v6  ;;  %11051 = vadd.xlane.f32.xlu0 %v11050_v7  ;;  %v25868_v49 = vpop.f32.mrb[96].mxu1  ;;  %v10796_v14 = vmul.f32 1.442695, %v10655_v60  ;;  %v11053_v6 = vsel %vm10257_vm2, %v25866_v42, 0.0  ;;  %v10657_v60 = vsub.f32 %v25369_v32, %v25784_v50  ;;  %v25899_v42 = vpop.eup %23474  ;;  %v10528_v32 = vsel %vm10257_vm2, %v25807_v33, -inf }
 0x19b   :  { %29449 = vst [vmem:[#allocation69_spill] sm:$0xff] %v25868_v49  ;;  %v25870_v20 = vpop.xlane.xlu1 %10334  ;;  %v25872_v56 = vpop.xlane.xlu0 %10337  ;;  %29455 = vst [vmem:[#allocation75_spill] sm:$0xff] %v25899_v42 }
 0x19c   :  { %v22659_v3 = vpop.f32.mrb[97].mxu1  ;;  %v25878_v57 = vpop.f32.mrb[98].mxu0  ;;  %23478 = vpow2.f32 %v10796_v14  ;;  %v10800_v50 = vmul.f32 1.442695, %v10657_v60  ;;  %v10659_v60 = vsub.f32 %v25394_v46, %v25799_v37 }
 0x19d   :  { %29450 = vst [vmem:[#allocation70_spill] sm:$0xff] %v25878_v57  ;;  %v22664_v7 = vpop.f32.mrb[99].mxu0  ;;  %23480 = vpow2.f32 %v10798_v62 }
 0x19e   :  { %11054 = vadd.xlane.f32.xlu1 %v11053_v6  ;;  %10523 = vmax.xlane.f32.xlu0 %v10522_v0  ;;  %v25885_v61 = vpop.f32.mrb[98].mxu1  ;;  %v11056_v0 = vsel %vm10257_vm2, %v25883_v63, 0.0  ;;  %23482 = vpow2.f32 %v10800_v50  ;;  %v10660_v50 = vsub.f32 %v25400_v51, %v25801_v21 }
 0x19f   :  { %29452 = vst [vmem:[#allocation72_spill] sm:$0xff] %v25885_v61  ;;  %v25887_v47 = vpop.xlane.xlu1 %10340  ;;  %v25889_v39 = vpop.xlane.xlu0 %10343  ;;  %23484 = vpow2.f32 %v10802_v22 }
 0x1a0   :  { %29453 = vst [vmem:[#allocation73_spill] sm:$0xff] %v25889_v39  ;;  %v22669_v3 = vpop.f32.mrb[99].mxu1  ;;  %v25895_v7 = vpop.f32.mrb[100].mxu0  ;;  %v10806_v22 = vmul.f32 1.442695, %v10660_v50 }
 0x1a1   :  { %29454 = vst [vmem:[#allocation74_spill] sm:$0xff] %v25895_v7  ;;  %v22674_v6 = vpop.f32.mrb[101].mxu0  ;;  %v25915_v63 = vpop.eup %23476 }
 0x1a2   :  { %10526 = vmax.xlane.f32.xlu1 %v10525_v25  ;;  %11057 = vadd.xlane.f32.xlu0 %v11056_v0  ;;  %v25901_v1 = vpop.f32.mrb[100].mxu1  ;;  %v11059_v25 = vsel %vm10257_vm2, %v25899_v42, 0.0  ;;  %29459 = vst [vmem:[#allocation79_spill] sm:$0xff] %v25915_v63 }
 0x1a3   :  { %29456 = vst [vmem:[#allocation76_spill] sm:$0xff] %v25901_v1  ;;  %v25903_v39 = vpop.xlane.xlu1 %10346  ;;  %v25905_v14 = vpop.xlane.xlu0 %10349 }
 0x1a4   :  { %29457 = vst [vmem:[#allocation77_spill] sm:$0xff] %v25905_v14  ;;  %v22679_v3 = vpop.f32.mrb[101].mxu1  ;;  %v25911_v6 = vpop.f32.mrb[102].mxu0 }
 0x1a5   :  { %29458 = vst [vmem:[#allocation78_spill] sm:$0xff] %v25911_v6  ;;  %v22684_v0 = vpop.f32.mrb[103].mxu0 }
 0x1a6   :  { %11060 = vadd.xlane.f32.xlu1 %v11059_v25  ;;  %10529 = vmax.xlane.f32.xlu0 %v10528_v32  ;;  %v25917_v18 = vpop.f32.mrb[102].mxu1  ;;  %v11062_v32 = vsel %vm10257_vm2, %v25915_v63, 0.0  ;;  %v25933_v33 = vpop.eup %23478 }
 0x1a7   :  { %29460 = vst [vmem:[#allocation80_spill] sm:$0xff] %v25917_v18  ;;  %v25919_v14 = vpop.xlane.xlu1 %10352  ;;  %v25921_v62 = vpop.xlane.xlu0 %10355  ;;  %29462 = vst [vmem:[#allocation82_spill] sm:$0xff] %v25933_v33  ;;  %v11065_v51 = vsel %vm10257_vm2, %v25933_v33, 0.0 }
 0x1a8   :  { %v22689_v0 = vpop.f32.mrb[103].mxu1  ;;  %v25929_v25 = vpop.f32.mrb[104].mxu0 }
 0x1a9   :  { %29461 = vst [vmem:[#allocation81_spill] sm:$0xff] %v25929_v25  ;;  %v22694_v42 = vpop.f32.mrb[105].mxu0  ;;  %v10804_v0 = vmul.f32 1.442695, %v10659_v60  ;;  %v25953_v63 = vpop.eup %23480 }
 0x1aa   :  { %10532 = vmax.xlane.f32.xlu1 %v10531_v38  ;;  %11063 = vadd.xlane.f32.xlu0 %v11062_v32  ;;  %v25935_v12 = vpop.f32.mrb[104].mxu1  ;;  %29466 = vst [vmem:[#allocation86_spill] sm:$0xff] %v25953_v63  ;;  %v10661_v38 = vsub.f32 %v25418_v58, %v25815_v52  ;;  %v11068_v50 = vsel %vm10257_vm2, %v25953_v63, 0.0  ;;  %v25973_v23 = vpop.eup %23482  ;;  %v10662_v58 = vsub.f32 %v25427_v2, %v25817_v30 }
 0x1ab   :  { %29463 = vst [vmem:[#allocation83_spill] sm:$0xff] %v25935_v12  ;;  %v25939_v46 = vpop.xlane.xlu1 %10358  ;;  %v25941_v37 = vpop.xlane.xlu0 %10361  ;;  %23486 = vpow2.f32 %v10804_v0  ;;  %29469 = vst [vmem:[#allocation89_spill] sm:$0xff] %v25973_v23  ;;  %v11071_v63 = vsel %vm10257_vm2, %v25973_v23, 0.0 }
 0x1ac   :  { %29464 = vst [vmem:[#allocation84_spill] sm:$0xff] %v25941_v37  ;;  %v22699_v32 = vpop.f32.mrb[105].mxu1  ;;  %v25949_v3 = vpop.f32.mrb[106].mxu0  ;;  %23488 = vpow2.f32 %v10806_v22  ;;  %v10543_v22 = vsel %vm10257_vm2, %v25848_v16, -inf }
 0x1ad   :  { %29465 = vst [vmem:[#allocation85_spill] sm:$0xff] %v25949_v3  ;;  %v22704_v21 = vpop.f32.mrb[107].mxu0  ;;  %v10537_v32 = vsel %vm10257_vm2, %v25829_v28, -inf  ;;  %v25991_v2 = vpop.eup %23484  ;;  %v10810_v28 = vmul.f32 1.442695, %v10662_v58 }
 0x1ae   :  { %11066 = vadd.xlane.f32.xlu1 %v11065_v51  ;;  %10535 = vmax.xlane.f32.xlu0 %v10534_v34  ;;  %v25955_v43 = vpop.f32.mrb[106].mxu1  ;;  %v10808_v34 = vmul.f32 1.442695, %v10661_v38  ;;  %29472 = vst [vmem:[#allocation92_spill] sm:$0xff] %v25991_v2 }
 0x1af   :  { %29467 = vst [vmem:[#allocation87_spill] sm:$0xff] %v25955_v43  ;;  %v25957_v60 = vpop.xlane.xlu1 %10364  ;;  %v25959_v42 = vpop.xlane.xlu0 %10367 }
 0x1b0   :  { %v22709_v51 = vpop.f32.mrb[107].mxu1  ;;  %v25969_v33 = vpop.f32.mrb[108].mxu0  ;;  %23490 = vpow2.f32 %v10808_v34 }
 0x1b1   :  { %29468 = vst [vmem:[#allocation88_spill] sm:$0xff] %v25969_v33  ;;  %v22714_v37 = vpop.f32.mrb[109].mxu0  ;;  %v10540_v51 = vsel %vm10257_vm2, %v25839_v54, -inf  ;;  %23492 = vpow2.f32 %v10810_v28 }
 0x1b2   :  { %10538 = vmax.xlane.f32.xlu1 %v10537_v32  ;;  %11069 = vadd.xlane.f32.xlu0 %v11068_v50  ;;  %v25975_v0 = vpop.f32.mrb[108].mxu1  ;;  %v11074_v37 = vsel %vm10257_vm2, %v25991_v2, 0.0 }
 0x1b3   :  { %29470 = vst [vmem:[#allocation90_spill] sm:$0xff] %v25975_v0  ;;  %v25979_v52 = vpop.xlane.xlu1 %10370  ;;  %v25981_v21 = vpop.xlane.xlu0 %10373 }
 0x1b4   :  { %29471 = vst [vmem:[#allocation91_spill] sm:$0xff] %v25981_v21  ;;  %v22719_v50 = vpop.f32.mrb[109].mxu1 }
 0x1b5   :  { %v10663_v50 = vsub.f32 %v25443_v9, %v25831_v26  ;;  %v26011_v21 = vpop.eup %23486  ;;  %v10664_v9 = vsub.f32 %v25449_v15, %v25833_v8 }
 0x1b6   :  { %11072 = vadd.xlane.f32.xlu1 %v11071_v63  ;;  %10541 = vmax.xlane.f32.xlu0 %v10540_v51  ;;  %v25993_v30 = vpop.f32.mrb[110].mxu0  ;;  %29475 = vst [vmem:[#allocation95_spill] sm:$0xff] %v26011_v21  ;;  %v11077_v2 = vsel %vm10257_vm2, %v26011_v21, 0.0  ;;  %v26029_v15 = vpop.eup %23488 }
 0x1b7   :  { %29473 = vst [vmem:[#allocation93_spill] sm:$0xff] %v25993_v30  ;;  %v25995_v54 = vpop.xlane.xlu1 %10376  ;;  %v25997_v38 = vpop.xlane.xlu0 %10379  ;;  %v10812_v63 = vmul.f32 1.442695, %v10663_v50  ;;  %29478 = vst [vmem:[#allocation98_spill] sm:$0xff] %v26029_v15  ;;  %v10814_v16 = vmul.f32 1.442695, %v10664_v9 }
 0x1b8   :  { %v26007_v51 = vpop.f32.mrb[110].mxu1  ;;  %v22724_v58 = vpop.f32.mrb[111].mxu0  ;;  %v10549_v50 = vsel %vm10257_vm2, %v25868_v49, -inf  ;;  %v11080_v9 = vsel %vm10257_vm2, %v26029_v15, 0.0 }
 0x1b9   :  { %29474 = vst [vmem:[#allocation94_spill] sm:$0xff] %v26007_v51  ;;  %v22729_v23 = vpop.f32.mrb[111].mxu1  ;;  %v10546_v58 = vsel %vm10257_vm2, %v25858_v5, -inf  ;;  %23494 = vpow2.f32 %v10812_v63 }
 0x1ba   :  { %10544 = vmax.xlane.f32.xlu1 %v10543_v22  ;;  %11075 = vadd.xlane.f32.xlu0 %v11074_v37  ;;  %v26013_v34 = vpop.f32.mrb[112].mxu0  ;;  %23496 = vpow2.f32 %v10814_v16 }
 0x1bb   :  { %29476 = vst [vmem:[#allocation96_spill] sm:$0xff] %v26013_v34  ;;  %v26017_v26 = vpop.xlane.xlu1 %10382  ;;  %v26019_v32 = vpop.xlane.xlu0 %10385 }
 0x1bc   :  { %29477 = vst [vmem:[#allocation97_spill] sm:$0xff] %v26019_v32  ;;  %v22734_v22 = vpop.f32.mrb[113].mxu0  ;;  %v26049_v32 = vpop.eup %23490 }
 0x1bd   :  { %v10665_v22 = vsub.f32 %v25467_v24, %v25850_v48  ;;  %29481 = vst [vmem:[#allocation101_spill] sm:$0xff] %v26049_v32  ;;  %v10666_v24 = vsub.f32 %v25476_v31, %v25852_v13  ;;  %v11083_v49 = vsel %vm10257_vm2, %v26049_v32, 0.0  ;;  %v26067_v31 = vpop.eup %23492 }
 0x1be   :  { %11078 = vadd.xlane.f32.xlu1 %v11077_v2  ;;  %10547 = vmax.xlane.f32.xlu0 %v10546_v58  ;;  %v26031_v8 = vpop.f32.mrb[112].mxu1  ;;  %29484 = vst [vmem:[#allocation104_spill] sm:$0xff] %v26067_v31  ;;  %v11086_v32 = vsel %vm10257_vm2, %v26067_v31, 0.0 }
 0x1bf   :  { %29479 = vst [vmem:[#allocation99_spill] sm:$0xff] %v26031_v8  ;;  %v26033_v5 = vpop.xlane.xlu1 %10388  ;;  %v26035_v28 = vpop.xlane.xlu0 %10391  ;;  %v10816_v2 = vmul.f32 1.442695, %v10665_v22  ;;  %v10818_v15 = vmul.f32 1.442695, %v10666_v24  ;;  %v10555_v22 = vsel %vm10257_vm2, %v25885_v61, -inf }
 0x1c0   :  { %v22739_v58 = vpop.f32.mrb[113].mxu1  ;;  %v26045_v23 = vpop.f32.mrb[114].mxu0 }
 0x1c1   :  { %29480 = vst [vmem:[#allocation100_spill] sm:$0xff] %v26045_v23  ;;  %v22744_v21 = vpop.f32.mrb[115].mxu0  ;;  %v10552_v58 = vsel %vm10257_vm2, %v25878_v57, -inf  ;;  %23498 = vpow2.f32 %v10816_v2 }
 0x1c2   :  { %10550 = vmax.xlane.f32.xlu1 %v10549_v50  ;;  %11081 = vadd.xlane.f32.xlu0 %v11080_v9  ;;  %v26051_v63 = vpop.f32.mrb[114].mxu1  ;;  %23500 = vpow2.f32 %v10818_v15 }
 0x1c3   :  { %29482 = vst [vmem:[#allocation102_spill] sm:$0xff] %v26051_v63  ;;  %v26055_v48 = vpop.xlane.xlu1 %10394  ;;  %v26057_v37 = vpop.xlane.xlu0 %10397 }
 0x1c4   :  { %29483 = vst [vmem:[#allocation103_spill] sm:$0xff] %v26057_v37  ;;  %v22749_v9 = vpop.f32.mrb[115].mxu1  ;;  %v26087_v44 = vpop.eup %23494 }
 0x1c5   :  { %v10667_v9 = vsub.f32 %v25492_v41, %v25870_v20  ;;  %29490 = vst [vmem:[#allocation109_spill] sm:$0xff] %v26087_v44  ;;  %v29492_v41 = vld [vmem:[#allocation2_spill] sm:$0xff] }
 0x1c6   :  { %11084 = vadd.xlane.f32.xlu1 %v11083_v49  ;;  %10553 = vmax.xlane.f32.xlu0 %v10552_v58  ;;  %v26069_v13 = vpop.f32.mrb[116].mxu0  ;;  %v10668_v20 = vsub.f32 %v29492_v41, %v25872_v56  ;;  %v11089_v49 = vsel %vm10257_vm2, %v26087_v44, 0.0  ;;  %v26105_v56 = vpop.eup %23496 }
 0x1c7   :  { %29485 = vst [vmem:[#allocation105_spill] sm:$0xff] %v26069_v13  ;;  %v26071_v57 = vpop.xlane.xlu1 %10400  ;;  %v26073_v16 = vpop.xlane.xlu0 %10403  ;;  %v10820_v58 = vmul.f32 1.442695, %v10667_v9  ;;  %29497 = vst [vmem:[#allocation112_spill] sm:$0xff] %v26105_v56  ;;  %v10561_v9 = vsel %vm10257_vm2, %v25901_v1, -inf }
 0x1c8   :  { %29486 = vst [vmem:[#allocation106_spill] sm:$0xff] %v26071_v57  ;;  %29487 = vst [vmem:[#allocation107_spill] sm:$0xff] %v26073_v16  ;;  %v26083_v21 = vpop.f32.mrb[116].mxu1  ;;  %v22754_v24 = vpop.f32.mrb[117].mxu0  ;;  %v10822_v57 = vmul.f32 1.442695, %v10668_v20 }
 0x1c9   :  { %29489 = vst [vmem:[#allocation108_spill] sm:$0xff] %v26083_v21  ;;  %v22759_v37 = vpop.f32.mrb[117].mxu1  ;;  %v10558_v24 = vsel %vm10257_vm2, %v25895_v7, -inf  ;;  %23502 = vpow2.f32 %v10820_v58  ;;  %v11092_v20 = vsel %vm10257_vm2, %v26105_v56, 0.0 }
 0x1ca   :  { %10556 = vmax.xlane.f32.xlu1 %v10555_v22  ;;  %11087 = vadd.xlane.f32.xlu0 %v11086_v32  ;;  %v26089_v2 = vpop.f32.mrb[118].mxu0  ;;  %23504 = vpow2.f32 %v10822_v57 }
 0x1cb   :  { %29491 = vst [vmem:[#allocation110_spill] sm:$0xff] %v26089_v2  ;;  %v26093_v50 = vpop.xlane.xlu1 %10406  ;;  %v26095_v61 = vpop.xlane.xlu0 %10409 }
 0x1cc   :  { %29493 = vst [vmem:[#allocation2_spill] sm:$0xff] %v26093_v50  ;;  %29494 = vst [vmem:[#allocation111_spill] sm:$0xff] %v26095_v61  ;;  %v22764_v16 = vpop.f32.mrb[119].mxu0  ;;  %v26125_v37 = vpop.eup %23498 }
 0x1cd   :  { %v29501_v16 = vld [vmem:[#allocation3_spill] sm:$0xff]  ;;  %29505 = vst [vmem:[#allocation116_spill] sm:$0xff] %v26125_v37 }
 0x1ce   :  { %11090 = vadd.xlane.f32.xlu1 %v11089_v49  ;;  %10559 = vmax.xlane.f32.xlu0 %v10558_v24  ;;  %v26107_v41 = vpop.f32.mrb[118].mxu1  ;;  %v10669_v32 = vsub.f32 %v29501_v16, %v25887_v47  ;;  %v29507_v47 = vld [vmem:[#allocation73_spill] sm:$0xff]  ;;  %v29508_v16 = vld [vmem:[#allocation4_spill] sm:$0xff]  ;;  %v11095_v49 = vsel %vm10257_vm2, %v26125_v37, 0.0 }
 0x1cf   :  { %29498 = vst [vmem:[#allocation113_spill] sm:$0xff] %v26107_v41  ;;  %v26109_v7 = vpop.xlane.xlu1 %10412  ;;  %v26111_v15 = vpop.xlane.xlu0 %10415  ;;  %v10670_v1 = vsub.f32 %v29508_v16, %v29507_v47 }
 0x1d0   :  { %29499 = vst [vmem:[#allocation114_spill] sm:$0xff] %v26109_v7  ;;  %29500 = vst [vmem:[#allocation115_spill] sm:$0xff] %v26111_v15  ;;  %v22769_v61 = vpop.f32.mrb[119].mxu1  ;;  %v26121_v22 = vpop.f32.mrb[120].mxu0  ;;  %v10824_v24 = vmul.f32 1.442695, %v10669_v32 }
 0x1d1   :  { %29504 = vst [vmem:[#allocation3_spill] sm:$0xff] %v26121_v22  ;;  %v22774_v50 = vpop.f32.mrb[121].mxu0  ;;  %v10564_v61 = vsel %vm10257_vm2, %v25911_v6, -inf  ;;  %v26143_v47 = vpop.eup %23500  ;;  %v10826_v31 = vmul.f32 1.442695, %v10670_v1  ;;  %v10567_v32 = vsel %vm10257_vm2, %v25917_v18, -inf }
 0x1d2   :  { %10562 = vmax.xlane.f32.xlu1 %v10561_v9  ;;  %11093 = vadd.xlane.f32.xlu0 %v11092_v20  ;;  %v26127_v58 = vpop.f32.mrb[120].mxu1  ;;  %29513 = vst [vmem:[#allocation118_spill] sm:$0xff] %v26143_v47  ;;  %23506 = vpow2.f32 %v10824_v24  ;;  %v11098_v9 = vsel %vm10257_vm2, %v26143_v47, 0.0  ;;  %v29534_v47 = vld [vmem:[#allocation21_spill] sm:$0xff] }
 0x1d3   :  { %29506 = vst [vmem:[#allocation117_spill] sm:$0xff] %v26127_v58  ;;  %v26131_v44 = vpop.xlane.xlu1 %10418  ;;  %v26133_v7 = vpop.xlane.xlu0 %10421  ;;  %23508 = vpow2.f32 %v10826_v31 }
 0x1d4   :  { %29509 = vst [vmem:[#allocation73_spill] sm:$0xff] %v26131_v44  ;;  %29510 = vst [vmem:[#allocation4_spill] sm:$0xff] %v26133_v7  ;;  %v22779_v15 = vpop.f32.mrb[121].mxu1  ;;  %v26163_v50 = vpop.eup %23502 }
 0x1d5   :  { %v29517_v15 = vld [vmem:[#allocation5_spill] sm:$0xff]  ;;  %29521 = vst [vmem:[#allocation122_spill] sm:$0xff] %v26163_v50 }
 0x1d6   :  { %11096 = vadd.xlane.f32.xlu1 %v11095_v49  ;;  %10565 = vmax.xlane.f32.xlu0 %v10564_v61  ;;  %v26145_v16 = vpop.f32.mrb[122].mxu0  ;;  %v10671_v20 = vsub.f32 %v29517_v15, %v25903_v39  ;;  %v29523_v39 = vld [vmem:[#allocation77_spill] sm:$0xff]  ;;  %v29524_v15 = vld [vmem:[#allocation6_spill] sm:$0xff]  ;;  %v11101_v49 = vsel %vm10257_vm2, %v26163_v50, 0.0  ;;  %v29540_v50 = vld [vmem:[#allocation23_spill] sm:$0xff] }
 0x1d7   :  { %29514 = vst [vmem:[#allocation119_spill] sm:$0xff] %v26145_v16  ;;  %v26147_v6 = vpop.xlane.xlu1 %10424  ;;  %v26149_v57 = vpop.xlane.xlu0 %10427  ;;  %v10672_v18 = vsub.f32 %v29524_v15, %v29523_v39 }
 0x1d8   :  { %29515 = vst [vmem:[#allocation120_spill] sm:$0xff] %v26147_v6  ;;  %29516 = vst [vmem:[#allocation121_spill] sm:$0xff] %v26149_v57  ;;  %v26159_v7 = vpop.f32.mrb[122].mxu1  ;;  %v22784_v1 = vpop.f32.mrb[123].mxu0  ;;  %v10828_v61 = vmul.f32 1.442695, %v10671_v20 }
 0x1d9   :  { %29520 = vst [vmem:[#allocation5_spill] sm:$0xff] %v26159_v7  ;;  %v22789_v44 = vpop.f32.mrb[123].mxu1  ;;  %v10570_v1 = vsel %vm10257_vm2, %v25929_v25, -inf  ;;  %v26181_v39 = vpop.eup %23504  ;;  %v10830_v56 = vmul.f32 1.442695, %v10672_v18  ;;  %v10573_v20 = vsel %vm10257_vm2, %v25935_v12, -inf }
 0x1da   :  { %10568 = vmax.xlane.f32.xlu1 %v10567_v32  ;;  %11099 = vadd.xlane.f32.xlu0 %v11098_v9  ;;  %v26165_v24 = vpop.f32.mrb[124].mxu0  ;;  %29529 = vst [vmem:[#allocation124_spill] sm:$0xff] %v26181_v39  ;;  %23510 = vpow2.f32 %v10828_v61  ;;  %v11104_v18 = vsel %vm10257_vm2, %v26181_v39, 0.0 }
 0x1db   :  { %29522 = vst [vmem:[#allocation123_spill] sm:$0xff] %v26165_v24  ;;  %v26169_v37 = vpop.xlane.xlu1 %10430  ;;  %v26171_v6 = vpop.xlane.xlu0 %10433  ;;  %23512 = vpow2.f32 %v10830_v56  ;;  %v10579_v56 = vsel %vm10257_vm2, %v25955_v43, -inf  ;;  %v29563_v43 = vld [vmem:[#allocation31_spill] sm:$0xff] }
 0x1dc   :  { %29525 = vst [vmem:[#allocation77_spill] sm:$0xff] %v26169_v37  ;;  %29526 = vst [vmem:[#allocation6_spill] sm:$0xff] %v26171_v6  ;;  %v22794_v57 = vpop.f32.mrb[125].mxu0  ;;  %v26201_v44 = vpop.eup %23506 }
 0x1dd   :  { %v29533_v57 = vld [vmem:[#allocation7_spill] sm:$0xff]  ;;  %29537 = vst [vmem:[#allocation21_spill] sm:$0xff] %v26201_v44 }
 0x1de   :  { %11102 = vadd.xlane.f32.xlu1 %v11101_v49  ;;  %10571 = vmax.xlane.f32.xlu0 %v10570_v1  ;;  %v26183_v15 = vpop.f32.mrb[124].mxu1  ;;  %v10673_v9 = vsub.f32 %v29533_v57, %v25919_v14  ;;  %v10576_v1 = vsel %vm10257_vm2, %v25949_v3, -inf  ;;  %v29546_v3 = vld [vmem:[#allocation26_spill] sm:$0xff] }
 0x1df   :  { %29530 = vst [vmem:[#allocation125_spill] sm:$0xff] %v26183_v15  ;;  %v26185_v25 = vpop.xlane.xlu1 %10436  ;;  %v26187_v31 = vpop.xlane.xlu0 %10439 }
 0x1e0   :  { %29531 = vst [vmem:[#allocation126_spill] sm:$0xff] %v26185_v25  ;;  %29532 = vst [vmem:[#allocation127_spill] sm:$0xff] %v26187_v31  ;;  %v22799_v6 = vpop.f32.mrb[125].mxu1  ;;  %v26197_v32 = vpop.f32.mrb[126].mxu0 }
 0x1e1   :  { %29536 = vst [vmem:[#allocation7_spill] sm:$0xff] %v26197_v32  ;;  %v22804_v37 = vpop.f32.mrb[127].mxu0  ;;  %v10832_v6 = vmul.f32 1.442695, %v10673_v9  ;;  %v29544_v9 = vsub.f32 %v25533_v11, %v25921_v62  ;;  %v10582_v11 = vsel %vm10257_vm2, %v25969_v33, -inf  ;;  %v29550_v62 = vsub.f32 %v25537_v17, %v25939_v46  ;;  %v29555_v46 = vld [vmem:[#allocation8_spill] sm:$0xff] }
 0x1e2   :  { %10574 = vmax.xlane.f32.xlu1 %v10573_v20  ;;  %11105 = vadd.xlane.f32.xlu0 %v11104_v18  ;;  %v26203_v61 = vpop.f32.mrb[126].mxu1  ;;  %v29541_v37 = vld [vmem:[#allocation24_spill] sm:$0xff]  ;;  %v11107_v20 = vsel %vm10257_vm2, %v26201_v44, 0.0  ;;  %v26217_v18 = vpop.eup %23508  ;;  %v29551_v44 = vld [vmem:[#allocation27_spill] sm:$0xff]  ;;  %v10585_v17 = vsel %vm10257_vm2, %v25975_v0, -inf }
 0x1e3   :  { %29538 = vst [vmem:[#allocation128_spill] sm:$0xff] %v26203_v61  ;;  %v26205_v14 = vpop.xlane.xlu1 %10442  ;;  %v26207_v57 = vpop.xlane.xlu0 %10445  ;;  %29542 = vst [vmem:[#allocation23_spill] sm:$0xff] %v26217_v18  ;;  %23514 = vpow2.f32 %v10832_v6  ;;  %v10834_v39 = vmul.f32 1.442695, %v29544_v9  ;;  %v10836_v9 = vmul.f32 1.442695, %v29550_v62 }
 0x1e4   :  { %29539 = vst [vmem:[#allocation129_spill] sm:$0xff] %v26207_v57  ;;  %v22809_v31 = vpop.f32.mrb[127].mxu1  ;;  %v29556_v62 = vld [vmem:[#allocation84_spill] sm:$0xff] }
 0x1e5   :  { %v29545_v31 = vld [vmem:[#allocation25_spill] sm:$0xff]  ;;  %23516 = vpow2.f32 %v10834_v39  ;;  %v29557_v12 = vsub.f32 %v29555_v46, %v29556_v62  ;;  %v29562_v46 = vsub.f32 %v25545_v29, %v25957_v60  ;;  %v29564_v0 = vld [vmem:[#allocation32_spill] sm:$0xff]  ;;  %v10591_v29 = vsel %vm10257_vm2, %v26007_v51, -inf }
 0x1e6   :  { %11108 = vadd.xlane.f32.xlu1 %v11107_v20  ;;  %10577 = vmax.xlane.f32.xlu0 %v10576_v1  ;;  %v11110_v1 = vsel %vm10257_vm2, %v26217_v18, 0.0  ;;  %v26234_v20 = vpop.eup %23510  ;;  %23518 = vpow2.f32 %v10836_v9  ;;  %v29558_v18 = vld [vmem:[#allocation29_spill] sm:$0xff]  ;;  %v29567_v60 = vsub.f32 %v25549_v35, %v25959_v42  ;;  %v10594_v35 = vsel %vm10257_vm2, %v26013_v34, -inf }
 0x1e7   :  { %v26219_v49 = vpop.xlane.xlu1 %10448  ;;  %v26221_v25 = vpop.xlane.xlu0 %10451  ;;  %29547 = vst [vmem:[#allocation25_spill] sm:$0xff] %v26234_v20  ;;  %v10838_v33 = vmul.f32 1.442695, %v29557_v12  ;;  %v10588_v12 = vsel %vm10257_vm2, %v25993_v30, -inf  ;;  %v10840_v62 = vmul.f32 1.442695, %v29562_v46  ;;  %v29572_v42 = vsub.f32 %v25553_v40, %v25979_v52 }
 0x1e8   :  { %29543 = vst [vmem:[#allocation24_spill] sm:$0xff] %v26221_v25  ;;  %v10842_v46 = vmul.f32 1.442695, %v29567_v60  ;;  %v29569_v30 = vld [vmem:[#allocation34_spill] sm:$0xff]  ;;  %v10597_v40 = vsel %vm10257_vm2, %v26031_v8, -inf  ;;  %v29577_v52 = vld [vmem:[#allocation91_spill] sm:$0xff] }
 0x1e9   :  { %23520 = vpow2.f32 %v10838_v33  ;;  %v10844_v60 = vmul.f32 1.442695, %v29572_v42  ;;  %v29578_v42 = vsub.f32 %v25557_v45, %v29577_v52  ;;  %v10600_v45 = vsel %vm10257_vm2, %v26045_v23, -inf  ;;  %v29584_v8 = vld [vmem:[#allocation40_spill] sm:$0xff]  ;;  %v29598_v34 = vld [vmem:[#allocation41_spill] sm:$0xff] }
 0x1ea   :  { %10580 = vmax.xlane.f32.xlu1 %v10579_v56  ;;  %11111 = vadd.xlane.f32.xlu0 %v11110_v1  ;;  %v11113_v56 = vsel %vm10257_vm2, %v26234_v20, 0.0  ;;  %v26251_v1 = vpop.eup %23512  ;;  %v29559_v20 = vld [vmem:[#allocation30_spill] sm:$0xff]  ;;  %23522 = vpow2.f32 %v10840_v62  ;;  %v29582_v52 = vsub.f32 %v25561_v53, %v25995_v54  ;;  %v10603_v53 = vsel %vm10257_vm2, %v26051_v63, -inf }
 0x1eb   :  { %v26236_v57 = vpop.xlane.xlu1 %10454  ;;  %v26238_v6 = vpop.xlane.xlu0 %10457  ;;  %29553 = vst [vmem:[#allocation27_spill] sm:$0xff] %v26251_v1  ;;  %23524 = vpow2.f32 %v10842_v46  ;;  %v29586_v54 = vsub.f32 %v25565_v59, %v25997_v38  ;;  %v29589_v59 = vsub.f32 %v25569_v4, %v26017_v26  ;;  %v29592_v4 = vld [vmem:[#allocation97_spill] sm:$0xff] }
 0x1ec   :  { %29548 = vst [vmem:[#allocation26_spill] sm:$0xff] %v26236_v57  ;;  %29549 = vst [vmem:[#allocation130_spill] sm:$0xff] %v26238_v6  ;;  %23526 = vpow2.f32 %v10844_v60  ;;  %v10846_v6 = vmul.f32 1.442695, %v29578_v42  ;;  %v10848_v42 = vmul.f32 1.442695, %v29582_v52  ;;  %v29593_v26 = vsub.f32 %v25573_v10, %v29592_v4 }
 0x1ed   :  { %v10850_v52 = vmul.f32 1.442695, %v29586_v54  ;;  %v10852_v38 = vmul.f32 1.442695, %v29589_v59  ;;  %v29590_v54 = vld [vmem:[#allocation43_spill] sm:$0xff]  ;;  %v29596_v10 = vsub.f32 %v25577_v19, %v26033_v5  ;;  %v29600_v19 = vsub.f32 %v25581_v27, %v26035_v28 }
 0x1ee   :  { %11114 = vadd.xlane.f32.xlu1 %v11113_v56  ;;  %10583 = vmax.xlane.f32.xlu0 %v10582_v11  ;;  %v11116_v11 = vsel %vm10257_vm2, %v26251_v1, 0.0  ;;  %v26268_v56 = vpop.eup %23514  ;;  %v29568_v1 = vld [vmem:[#allocation33_spill] sm:$0xff]  ;;  %23528 = vpow2.f32 %v10846_v6  ;;  %v10854_v59 = vmul.f32 1.442695, %v29593_v26  ;;  %v29603_v28 = vmov 0.0  }
 0x1ef   :  { %v26253_v25 = vpop.xlane.xlu1 %10460  ;;  %v26255_v39 = vpop.xlane.xlu0 %10463  ;;  %29560 = vst [vmem:[#allocation8_spill] sm:$0xff] %v26268_v56  ;;  %23530 = vpow2.f32 %v10848_v42  ;;  %v10606_v42 = vsel %vm10257_vm2, %v26069_v13, -inf  ;;  %v10856_v4 = vmul.f32 1.442695, %v29596_v10  ;;  %v10858_v5 = vmul.f32 1.442695, %v29600_v19 }
 0x1f0   :  { %29554 = vst [vmem:[#allocation131_spill] sm:$0xff] %v26255_v39  ;;  %v29606_v26 = vld [vmem:[#allocation49_spill] sm:$0xff] }
 0x1f2   :  { %10586 = vmax.xlane.f32.xlu1 %v10585_v17  ;;  %11117 = vadd.xlane.f32.xlu0 %v11116_v11  ;;  %v11119_v17 = vsel %vm10257_vm2, %v26268_v56, 0.0  ;;  %v26285_v11 = vpop.eup %23516  ;;  %v29573_v56 = vld [vmem:[#allocation35_spill] sm:$0xff] }
 0x1f3   :  { %v26270_v57 = vpop.xlane.xlu1 %10466  ;;  %v26272_v9 = vpop.xlane.xlu0 %10469  ;;  %29565 = vst [vmem:[#allocation29_spill] sm:$0xff] %v26285_v11 }
 0x1f4   :  { %29561 = vst [vmem:[#allocation84_spill] sm:$0xff] %v26272_v9 }
 0x1f6   :  { %11120 = vadd.xlane.f32.xlu1 %v11119_v17  ;;  %10589 = vmax.xlane.f32.xlu0 %v10588_v12  ;;  %v11122_v12 = vsel %vm10257_vm2, %v26285_v11, 0.0  ;;  %v26302_v17 = vpop.eup %23518  ;;  %v29579_v11 = vld [vmem:[#allocation37_spill] sm:$0xff] }
 0x1f7   :  { %v26287_v39 = vpop.xlane.xlu1 %10472  ;;  %v26289_v33 = vpop.xlane.xlu0 %10475  ;;  %29570 = vst [vmem:[#allocation31_spill] sm:$0xff] %v26302_v17 }
 0x1f8   :  { %29566 = vst [vmem:[#allocation30_spill] sm:$0xff] %v26289_v33 }
 0x1fa   :  { %10592 = vmax.xlane.f32.xlu1 %v10591_v29  ;;  %11123 = vadd.xlane.f32.xlu0 %v11122_v12  ;;  %v11125_v29 = vsel %vm10257_vm2, %v26302_v17, 0.0  ;;  %v26319_v12 = vpop.eup %23520  ;;  %v29580_v17 = vld [vmem:[#allocation38_spill] sm:$0xff] }
 0x1fb   :  { %v26304_v9 = vpop.xlane.xlu1 %10478  ;;  %v26306_v62 = vpop.xlane.xlu0 %10481  ;;  %29575 = vst [vmem:[#allocation33_spill] sm:$0xff] %v26319_v12 }
 0x1fc   :  { %29571 = vst [vmem:[#allocation32_spill] sm:$0xff] %v26306_v62  ;;  %v29583_v62 = vld [vmem:[#allocation39_spill] sm:$0xff] }
 0x1fe   :  { %11126 = vadd.xlane.f32.xlu1 %v11125_v29  ;;  %10595 = vmax.xlane.f32.xlu0 %v10594_v35  ;;  %v11128_v35 = vsel %vm10257_vm2, %v26319_v12, 0.0  ;;  %v26336_v29 = vpop.eup %23522  ;;  %v29587_v12 = vld [vmem:[#allocation42_spill] sm:$0xff] }
 0x1ff   :  { %v26321_v33 = vpop.xlane.xlu1 %10484  ;;  %v26323_v46 = vpop.xlane.xlu0 %10487  ;;  %29581 = vst [vmem:[#allocation35_spill] sm:$0xff] %v26336_v29 }
 0x200   :  { %29576 = vst [vmem:[#allocation34_spill] sm:$0xff] %v26323_v46 }
 0x202   :  { %10598 = vmax.xlane.f32.xlu1 %v10597_v40  ;;  %11129 = vadd.xlane.f32.xlu0 %v11128_v35  ;;  %v11131_v40 = vsel %vm10257_vm2, %v26336_v29, 0.0  ;;  %v26353_v35 = vpop.eup %23524 }
 0x203   :  { %v26338_v51 = vpop.xlane.xlu1 %10490  ;;  %v26340_v60 = vpop.xlane.xlu0 %10493  ;;  %29585 = vst [vmem:[#allocation91_spill] sm:$0xff] %v26353_v35  ;;  %v11134_v23 = vsel %vm10257_vm2, %v26353_v35, 0.0  ;;  %v29613_v35 = vld [vmem:[#allocation50_spill] sm:$0xff] }
 0x204   :  { %v26366_v29 = vpop.eup %23526 }
 0x205   :  { %29588 = vst [vmem:[#allocation37_spill] sm:$0xff] %v26366_v29 }
 0x206   :  { %11132 = vadd.xlane.f32.xlu1 %v11131_v40  ;;  %10601 = vmax.xlane.f32.xlu0 %v10600_v45 }
 0x207   :  { %v26355_v46 = vpop.xlane.xlu1 %10496  ;;  %v11028_v6 = vpop.xlane.xlu0 %11027 }
 0x208   :  { %23532 = vrcp.f32 %v11028_v6  ;;  %v11137_v6 = vsel %vm10257_vm2, %v26366_v29, 0.0 }
 0x209   :  { %23534 = vpow2.f32 %v10850_v52  ;;  %v10609_v52 = vsel %vm10257_vm2, %v26083_v21, -inf }
 0x20a   :  { %10604 = vmax.xlane.f32.xlu1 %v10603_v53  ;;  %11135 = vadd.xlane.f32.xlu0 %v11134_v23  ;;  %v26379_v53 = vpop.eup %23528 }
 0x20b   :  { %v11031_v45 = vpop.xlane.xlu1 %11030  ;;  %v26368_v40 = vpop.xlane.xlu0 %10499  ;;  %29591 = vst [vmem:[#allocation38_spill] sm:$0xff] %v26379_v53  ;;  %v11140_v13 = vsel %vm10257_vm2, %v26379_v53, 0.0 }
 0x20c   :  { %23536 = vrcp.f32 %v11031_v45  ;;  %v29594_v45 = vld [vmem:[#allocation45_spill] sm:$0xff] }
 0x20d   :  { %23538 = vpow2.f32 %v10852_v38  ;;  %v10612_v38 = vsel %vm10257_vm2, %v26089_v2, -inf }
 0x20e   :  { %11138 = vadd.xlane.f32.xlu1 %v11137_v6  ;;  %10607 = vmax.xlane.f32.xlu0 %v10606_v42  ;;  %v26392_v6 = vpop.eup %23530 }
 0x20f   :  { %v26381_v23 = vpop.xlane.xlu1 %10502  ;;  %v11034_v63 = vpop.xlane.xlu0 %11033  ;;  %29595 = vst [vmem:[#allocation39_spill] sm:$0xff] %v26392_v6 }
 0x210   :  { %23540 = vrcp.f32 %v11034_v63  ;;  %v29597_v63 = vld [vmem:[#allocation46_spill] sm:$0xff] }
 0x211   :  { %23542 = vpow2.f32 %v10854_v59 }
 0x212   :  { %10610 = vmax.xlane.f32.xlu1 %v10609_v52  ;;  %11141 = vadd.xlane.f32.xlu0 %v11140_v13  ;;  %v23533_v21 = vpop.eup %23532  ;;  %v11143_v13 = vsel %vm10257_vm2, %v26392_v6, 0.0  ;;  %v274_v52 = vld [vmem:[%s29129_s2 + $0x10] sm:$0xff]  ;;  %v29607_v6 = vld [vmem:[#allocation47_spill] sm:$0xff] }
 0x213   :  { %v11037_v42 = vpop.xlane.xlu1 %11036  ;;  %v26394_v29 = vpop.xlane.xlu0 %10505  ;;  %v11411_v53 = vmul.f32 %v23533_v21, %v29598_v34 }
 0x214   :  { %23544 = vrcp.f32 %v11037_v42  ;;  %v26409_v2 = vpop.eup %23534  ;;  %v10615_v42 = vsel %vm10257_vm2, %v26107_v41, -inf }
 0x215   :  { %29599 = vst [vmem:[#allocation40_spill] sm:$0xff] %v26409_v2  ;;  %22813 = vmatmul.mubr.msk.f32.vlgmr.msra.gmra.mrb[128].mxu0 %vm10257_vm2, %v11411_v53  ;;  %21138 = vst.msk [vmem:[%s29130_s4] sm:$0xff] %vm10257_vm2, %v11411_v53  ;;  %23546 = vpow2.f32 %v10856_v4  ;;  %v275_v53 = vld [vmem:[%s29129_s2 + $0x18] sm:$0xff]  ;;  %v11146_v4 = vsel %vm10257_vm2, %v26409_v2, 0.0 }
 0x216   :  { %11144 = vadd.xlane.f32.xlu1 %v11143_v13  ;;  %10613 = vmax.xlane.f32.xlu0 %v10612_v38  ;;  %v23537_v59 = vpop.eup %23536  ;;  %v29601_v38 = vld [vmem:[#allocation48_spill] sm:$0xff] }
 0x217   :  { %v26419_v34 = vpop.xlane.xlu1 %10508  ;;  %v11040_v21 = vpop.xlane.xlu0 %11039  ;;  %v29602_v13 = vld [vmem:[#allocation44_spill] sm:$0xff]  ;;  %22821 = vmatpush3.msra.mxu0 %v274_v52  ;;  %22822 = vmatprep.mubr.msk.f32.mxu0 %vm23965_vm1, %v29603_v28 }
 0x218   :  { %v11413_v27 = vmul.f32 %v23537_v59, %v29602_v13  ;;  %23548 = vrcp.f32 %v11040_v21  ;;  %22830 = vmatprep.subr.mxu0 %v29603_v28  ;;  %v26432_v19 = vpop.eup %23538  ;;  %v29605_v13 = vsub.f32 %v25585_v36, %v26055_v48 }
 0x219   :  { %29604 = vst [vmem:[#allocation42_spill] sm:$0xff] %v26432_v19  ;;  %23550 = vpow2.f32 %v10858_v5  ;;  %v276_v5 = vld [vmem:[%s29129_s2 + $0x20] sm:$0xff]  ;;  %v11149_v36 = vsel %vm10257_vm2, %v26432_v19, 0.0  ;;  %v10621_v19 = vsel %vm10257_vm2, %v26127_v58, -inf  ;;  %v29619_v58 = vld [vmem:[#allocation53_spill] sm:$0xff] }
 0x21a   :  { %22818 = vmatmul.mubr.msk.f32.vlgmr.msra.gmra.mrb[128].mxu1 %vm10257_vm2, %v11413_v27  ;;  %21139 = vst.msk [vmem:[%s29130_s4 + $0x8] sm:$0xff] %vm10257_vm2, %v11413_v27  ;;  %10616 = vmax.xlane.f32.xlu1 %v10615_v42  ;;  %v23541_v52 = vpop.eup %23540  ;;  %v10860_v10 = vmul.f32 1.442695, %v29605_v13  ;;  %v10618_v42 = vsel %vm10257_vm2, %v26121_v22, -inf  ;;  %v29612_v22 = vld [vmem:[#allocation51_spill] sm:$0xff] }
 0x21b   :  { %11147 = vadd.xlane.f32.xlu0 %v11146_v4  ;;  %v11043_v59 = vpop.xlane.xlu1 %11042  ;;  %v26441_v21 = vpop.xlane.xlu0 %10511  ;;  %22826 = vmatpush3.msra.mxu1 %v275_v53  ;;  %v11415_v27 = vmul.f32 %v23541_v52, %v29607_v6  ;;  %v29609_v53 = vld [vmem:[#allocation9_spill] sm:$0xff]  ;;  %v29610_v4 = vld [vmem:[#allocation103_spill] sm:$0xff] }
 0x21c   :  { %22827 = vmatprep.mubr.msk.f32.mxu1 %vm23965_vm1, %v29603_v28  ;;  %22835 = vmatprep.subr.mxu1 %v29603_v28  ;;  %23552 = vrcp.f32 %v11043_v59  ;;  %v26459_v48 = vpop.eup %23542  ;;  %v29611_v52 = vsub.f32 %v29609_v53, %v29610_v4 }
 0x21d   :  { %29608 = vst [vmem:[#allocation43_spill] sm:$0xff] %v26459_v48  ;;  %22823 = vmatmul.mubr.msk.f32.vlgmr.msra.gmra.mrb[130].mxu0 %vm10257_vm2, %v11415_v27  ;;  %21140 = vst.msk [vmem:[%s29130_s4 + $0x10] sm:$0xff] %vm10257_vm2, %v11415_v27  ;;  %23554 = vpow2.f32 %v10860_v10 }
 0x21e   :  { %11150 = vadd.xlane.f32.xlu1 %v11149_v36  ;;  %v23545_v6 = vpop.eup %23544  ;;  %v10862_v13 = vmul.f32 1.442695, %v29611_v52  ;;  %22831 = vmatpush3.msra.mxu0 %v276_v5  ;;  %v29635_v52 = vld [vmem:[#allocation59_spill] sm:$0xff] }
 0x21f   :  { %10619 = vmax.xlane.f32.xlu0 %v10618_v42  ;;  %v26469_v59 = vpop.xlane.xlu1 %10514  ;;  %v11046_v41 = vpop.xlane.xlu0 %11045  ;;  %v11417_v27 = vmul.f32 %v23545_v6, %v29613_v35  ;;  %22832 = vmatprep.mubr.msk.f32.mxu0 %vm23965_vm1, %v29603_v28  ;;  %v277_v42 = vld [vmem:[%s29129_s2 + $0x28] sm:$0xff]  ;;  %v11152_v35 = vsel %vm10257_vm2, %v26459_v48, 0.0 }
 0x220   :  { %22840 = vmatprep.subr.mxu0 %v29603_v28  ;;  %23556 = vrcp.f32 %v11046_v41  ;;  %v26482_v36 = vpop.eup %23546  ;;  %v29616_v41 = vld [vmem:[#allocation106_spill] sm:$0xff] }
 0x221   :  { %29614 = vst [vmem:[#allocation97_spill] sm:$0xff] %v26482_v36  ;;  %22828 = vmatmul.mubr.msk.f32.vlgmr.msra.gmra.mrb[130].mxu1 %vm10257_vm2, %v11417_v27  ;;  %21141 = vst.msk [vmem:[%s29130_s4 + $0x18] sm:$0xff] %vm10257_vm2, %v11417_v27  ;;  %23558 = vpow2.f32 %v10862_v13  ;;  %v29617_v53 = vsub.f32 %v25593_v55, %v29616_v41  ;;  %v278_v13 = vld [vmem:[%s29129_s2 + $0x30] sm:$0xff]  ;;  %v11155_v55 = vsel %vm10257_vm2, %v26482_v36, 0.0  ;;  %v10627_v36 = vsel %vm10257_vm2, %v26159_v7, -inf  ;;  %v29632_v7 = vld [vmem:[#allocation111_spill] sm:$0xff] }
 0x222   :  { %10622 = vmax.xlane.f32.xlu1 %v10621_v19  ;;  %v23549_v10 = vpop.eup %23548  ;;  %22836 = vmatpush3.msra.mxu1 %v277_v42  ;;  %v10624_v19 = vsel %vm10257_vm2, %v26145_v16, -inf  ;;  %v29631_v16 = vld [vmem:[#allocation12_spill] sm:$0xff] }
 0x223   :  { %11153 = vadd.xlane.f32.xlu0 %v11152_v35  ;;  %v11049_v5 = vpop.xlane.xlu1 %11048  ;;  %v26491_v6 = vpop.xlane.xlu0 %10517  ;;  %v10864_v4 = vmul.f32 1.442695, %v29617_v53  ;;  %v11419_v27 = vmul.f32 %v23549_v10, %v29619_v58  ;;  %22837 = vmatprep.mubr.msk.f32.mxu1 %vm23965_vm1, %v29603_v28  ;;  %v29621_v35 = vld [vmem:[#allocation10_spill] sm:$0xff]  ;;  %v29622_v10 = vld [vmem:[#allocation107_spill] sm:$0xff] }
 0x224   :  { %29615 = vst [vmem:[#allocation45_spill] sm:$0xff] %v26491_v6  ;;  %22845 = vmatprep.subr.mxu1 %v29603_v28  ;;  %v26507_v42 = vpop.eup %23550  ;;  %23560 = vrcp.f32 %v11049_v5  ;;  %v29623_v41 = vsub.f32 %v29621_v35, %v29622_v10  ;;  %v29626_v6 = vld [vmem:[#allocation56_spill] sm:$0xff] }
 0x225   :  { %29620 = vst [vmem:[#allocation46_spill] sm:$0xff] %v26507_v42  ;;  %22833 = vmatmul.mubr.msk.f32.vlgmr.msra.gmra.mrb[132].mxu0 %vm10257_vm2, %v11419_v27  ;;  %21142 = vst.msk [vmem:[%s29130_s4 + $0x20] sm:$0xff] %vm10257_vm2, %v11419_v27  ;;  %23562 = vpow2.f32 %v10864_v4 }
 0x226   :  { %11156 = vadd.xlane.f32.xlu1 %v11155_v55  ;;  %v23553_v58 = vpop.eup %23552  ;;  %v10866_v53 = vmul.f32 1.442695, %v29623_v41  ;;  %22841 = vmatpush3.msra.mxu0 %v278_v13  ;;  %v29628_v13 = vld [vmem:[#allocation11_spill] sm:$0xff] }
 0x227   :  { %10625 = vmax.xlane.f32.xlu0 %v10624_v19  ;;  %v26519_v2 = vpop.xlane.xlu1 %10520  ;;  %v11052_v5 = vpop.xlane.xlu0 %11051  ;;  %v11421_v27 = vmul.f32 %v23553_v58, %v29626_v6  ;;  %22842 = vmatprep.mubr.msk.f32.mxu0 %vm23965_vm1, %v29603_v28  ;;  %v279_v19 = vld [vmem:[%s29129_s2 + $0x38] sm:$0xff]  ;;  %v11158_v6 = vsel %vm10257_vm2, %v26507_v42, 0.0  ;;  %v29629_v58 = vld [vmem:[#allocation2_spill] sm:$0xff] }
 0x228   :  { %29624 = vst [vmem:[#allocation41_spill] sm:$0xff] %v26519_v2  ;;  %22850 = vmatprep.subr.mxu0 %v29603_v28  ;;  %23564 = vrcp.f32 %v11052_v5  ;;  %v26532_v55 = vpop.eup %23554  ;;  %v29630_v35 = vsub.f32 %v29628_v13, %v29629_v58  ;;  %v29633_v2 = vsub.f32 %v29631_v16, %v29632_v7  ;;  %v29638_v16 = vld [vmem:[#allocation114_spill] sm:$0xff] }
 0x229   :  { %29627 = vst [vmem:[#allocation48_spill] sm:$0xff] %v26532_v55  ;;  %22838 = vmatmul.mubr.msk.f32.vlgmr.msra.gmra.mrb[132].mxu1 %vm10257_vm2, %v11421_v27  ;;  %21143 = vst.msk [vmem:[%s29130_s4 + $0x28] sm:$0xff] %vm10257_vm2, %v11421_v27  ;;  %23566 = vpow2.f32 %v10866_v53  ;;  %v10630_v53 = vsel %vm10257_vm2, %v26165_v24, -inf  ;;  %v11161_v7 = vsel %vm10257_vm2, %v26532_v55, 0.0  ;;  %v29640_v58 = vld [vmem:[#allocation14_spill] sm:$0xff] }
 0x22a   :  { %10628 = vmax.xlane.f32.xlu1 %v10627_v36  ;;  %v23557_v4 = vpop.eup %23556  ;;  %v10868_v10 = vmul.f32 1.442695, %v29630_v35  ;;  %22846 = vmatpush3.msra.mxu1 %v279_v19  ;;  %v10870_v48 = vmul.f32 1.442695, %v29633_v2  ;;  %v29634_v36 = vld [vmem:[#allocation55_spill] sm:$0xff]  ;;  %v29637_v2 = vld [vmem:[#allocation13_spill] sm:$0xff] }
 0x22b   :  { %11159 = vadd.xlane.f32.xlu0 %v11158_v6  ;;  %v11055_v41 = vpop.xlane.xlu1 %11054  ;;  %v26544_v5 = vpop.xlane.xlu0 %10523  ;;  %v11423_v42 = vmul.f32 %v23557_v4, %v29635_v52  ;;  %22847 = vmatprep.mubr.msk.f32.mxu1 %vm23965_vm1, %v29603_v28  ;;  %v280_v6 = vld [vmem:[%s29129_s2 + $0x40] sm:$0xff]  ;;  %v29639_v52 = vsub.f32 %v29637_v2, %v29638_v16  ;;  %v29641_v35 = vld [vmem:[#allocation115_spill] sm:$0xff]  ;;  %v10633_v2 = vsel %vm10257_vm2, %v26183_v15, -inf  ;;  %v29655_v16 = vld [vmem:[#allocation65_spill] sm:$0xff] }
 0x22c   :  { %22855 = vmatprep.subr.mxu1 %v29603_v28  ;;  %v26560_v19 = vpop.eup %23558  ;;  %23568 = vrcp.f32 %v11055_v41  ;;  %v29642_v41 = vsub.f32 %v29640_v58, %v29641_v35  ;;  %v29648_v58 = vld [vmem:[#allocation73_spill] sm:$0xff] }
 0x22d   :  { %29636 = vst [vmem:[#allocation44_spill] sm:$0xff] %v26560_v19  ;;  %v10872_v4 = vmul.f32 1.442695, %v29639_v52  ;;  %22843 = vmatmul.mubr.msk.f32.vlgmr.msra.gmra.mrb[134].mxu0 %vm10257_vm2, %v11423_v42  ;;  %21144 = vst.msk [vmem:[%s29130_s4 + $0x30] sm:$0xff] %vm10257_vm2, %v11423_v42  ;;  %23570 = vpow2.f32 %v10868_v10  ;;  %v29645_v42 = vld [vmem:[#allocation62_spill] sm:$0xff]  ;;  %v281_v10 = vld [vmem:[%s29129_s2 + $0x48] sm:$0xff] }
 0x22e   :  { %11162 = vadd.xlane.f32.xlu1 %v11161_v7  ;;  %v23561_v13 = vpop.eup %23560  ;;  %v10874_v27 = vmul.f32 1.442695, %v29642_v41  ;;  %22851 = vmatpush3.msra.mxu0 %v280_v6  ;;  %23572 = vpow2.f32 %v10870_v48  ;;  %v11164_v48 = vsel %vm10257_vm2, %v26560_v19, 0.0  ;;  %v29652_v52 = vld [vmem:[#allocation4_spill] sm:$0xff] }
 0x22f   :  { %10631 = vmax.xlane.f32.xlu0 %v10630_v53  ;;  %v26575_v55 = vpop.xlane.xlu1 %10526  ;;  %v11058_v24 = vpop.xlane.xlu0 %11057  ;;  %v11425_v7 = vmul.f32 %v23561_v13, %v29645_v42  ;;  %22852 = vmatprep.mubr.msk.f32.mxu0 %vm23965_vm1, %v29603_v28  ;;  %v29647_v13 = vld [vmem:[#allocation15_spill] sm:$0xff]  ;;  %v29651_v42 = vld [vmem:[#allocation16_spill] sm:$0xff] }
 0x230   :  { %29643 = vst [vmem:[#allocation49_spill] sm:$0xff] %v26575_v55  ;;  %22860 = vmatprep.subr.mxu0 %v29603_v28  ;;  %23574 = vrcp.f32 %v11058_v24  ;;  %v26588_v53 = vpop.eup %23562  ;;  %v29649_v35 = vsub.f32 %v29647_v13, %v29648_v58  ;;  %v29653_v15 = vsub.f32 %v29651_v42, %v29652_v52  ;;  %v29657_v52 = vld [vmem:[#allocation17_spill] sm:$0xff]  ;;  %v10639_v42 = vsel %vm10257_vm2, %v26203_v61, -inf }
 0x231   :  { %29646 = vst [vmem:[#allocation47_spill] sm:$0xff] %v26588_v53  ;;  %23576 = vpow2.f32 %v10872_v4  ;;  %22848 = vmatmul.mubr.msk.f32.vlgmr.msra.gmra.mrb[134].mxu1 %vm10257_vm2, %v11425_v7  ;;  %21145 = vst.msk [vmem:[%s29130_s4 + $0x38] sm:$0xff] %vm10257_vm2, %v11425_v7  ;;  %v29661_v7 = vld [vmem:[#allocation18_spill] sm:$0xff] }
 0x232   :  { %10634 = vmax.xlane.f32.xlu1 %v10633_v2  ;;  %v23565_v6 = vpop.eup %23564  ;;  %23578 = vpow2.f32 %v10874_v27  ;;  %v10876_v24 = vmul.f32 1.442695, %v29649_v35  ;;  %22856 = vmatpush3.msra.mxu1 %v281_v10  ;;  %v10878_v55 = vmul.f32 1.442695, %v29653_v15  ;;  %v10636_v27 = vsel %vm10257_vm2, %v26197_v32, -inf }
 0x233   :  { %11165 = vadd.xlane.f32.xlu0 %v11164_v48  ;;  %v11061_v41 = vpop.xlane.xlu1 %11060  ;;  %v26600_v4 = vpop.xlane.xlu0 %10529  ;;  %v11427_v19 = vmul.f32 %v23565_v6, %v29655_v16  ;;  %22857 = vmatprep.mubr.msk.f32.mxu1 %vm23965_vm1, %v29603_v28  ;;  %v282_v48 = vld [vmem:[%s29129_s2 + $0x50] sm:$0xff]  ;;  %v11167_v15 = vsel %vm10257_vm2, %v26588_v53, 0.0  ;;  %v29662_v53 = vld [vmem:[#allocation121_spill] sm:$0xff] }
 0x234   :  { %29650 = vst [vmem:[#allocation9_spill] sm:$0xff] %v26600_v4  ;;  %22865 = vmatprep.subr.mxu1 %v29603_v28  ;;  %v26616_v10 = vpop.eup %23566  ;;  %23580 = vrcp.f32 %v11061_v41  ;;  %v29658_v6 = vld [vmem:[#allocation120_spill] sm:$0xff]  ;;  %v29663_v32 = vsub.f32 %v29661_v7, %v29662_v53  ;;  %v29669_v7 = vld [vmem:[#allocation77_spill] sm:$0xff] }
 0x235   :  { %29656 = vst [vmem:[#allocation103_spill] sm:$0xff] %v26616_v10  ;;  %22853 = vmatmul.mubr.msk.f32.vlgmr.msra.gmra.mrb[136].mxu0 %vm10257_vm2, %v11427_v19  ;;  %21146 = vst.msk [vmem:[%s29130_s4 + $0x40] sm:$0xff] %vm10257_vm2, %v11427_v19  ;;  %23582 = vpow2.f32 %v10876_v24  ;;  %v29659_v13 = vsub.f32 %v29657_v52, %v29658_v6  ;;  %v29665_v4 = vld [vmem:[#allocation68_spill] sm:$0xff] }
 0x236   :  { %11168 = vadd.xlane.f32.xlu1 %v11167_v15  ;;  %v23569_v16 = vpop.eup %23568  ;;  %22861 = vmatpush3.msra.mxu0 %v282_v48  ;;  %23584 = vpow2.f32 %v10878_v55  ;;  %v10882_v19 = vmul.f32 1.442695, %v29663_v32  ;;  %v11170_v32 = vsel %vm10257_vm2, %v26616_v10, 0.0  ;;  %v29672_v24 = vld [vmem:[#allocation20_spill] sm:$0xff]  ;;  %v29675_v10 = vld [vmem:[#allocation61_spill] sm:$0xff] }
 0x237   :  { %v10880_v58 = vmul.f32 1.442695, %v29659_v13  ;;  %10637 = vmax.xlane.f32.xlu0 %v10636_v27  ;;  %v26628_v35 = vpop.xlane.xlu1 %10532  ;;  %v11064_v41 = vpop.xlane.xlu0 %11063  ;;  %v11429_v2 = vmul.f32 %v23569_v16, %v29665_v4  ;;  %22862 = vmatprep.mubr.msk.f32.mxu0 %vm23965_vm1, %v29603_v28  ;;  %v283_v27 = vld [vmem:[%s29129_s2 + $0x58] sm:$0xff]  ;;  %v29668_v4 = vld [vmem:[#allocation19_spill] sm:$0xff] }
 0x238   :  { %29660 = vst [vmem:[#allocation51_spill] sm:$0xff] %v26628_v35  ;;  %22870 = vmatprep.subr.mxu0 %v29603_v28  ;;  %v26644_v48 = vpop.eup %23570  ;;  %23586 = vrcp.f32 %v11064_v41  ;;  %v29670_v16 = vsub.f32 %v29668_v4, %v29669_v7  ;;  %v29678_v4 = vld [vmem:[#allocation126_spill] sm:$0xff] }
 0x239   :  { %29666 = vst [vmem:[#allocation50_spill] sm:$0xff] %v26644_v48  ;;  %v26646_v55 = vpop.eup %23572  ;;  %22858 = vmatmul.mubr.msk.f32.vlgmr.msra.gmra.mrb[136].mxu1 %vm10257_vm2, %v11429_v2  ;;  %21147 = vst.msk [vmem:[%s29130_s4 + $0x48] sm:$0xff] %vm10257_vm2, %v11429_v2  ;;  %23588 = vpow2.f32 %v10880_v58  ;;  %v29673_v2 = vld [vmem:[#allocation6_spill] sm:$0xff]  ;;  %v29676_v58 = vld [vmem:[#allocation71_spill] sm:$0xff]  ;;  %v29679_v7 = vsub.f32 %v29534_v47, %v29678_v4 }
 0x23a   :  { %29667 = vst [vmem:[#allocation106_spill] sm:$0xff] %v26646_v55  ;;  %10640 = vmax.xlane.f32.xlu1 %v10639_v42  ;;  %v23575_v53 = vpop.eup %23574  ;;  %v10884_v52 = vmul.f32 1.442695, %v29670_v16  ;;  %22866 = vmatpush3.msra.mxu1 %v283_v27  ;;  %23590 = vpow2.f32 %v10882_v19  ;;  %v29674_v42 = vsub.f32 %v29672_v24, %v29673_v2  ;;  %v11173_v19 = vsel %vm10257_vm2, %v26644_v48, 0.0  ;;  %v285_v47 = vld [vmem:[%s29129_s2 + $0x68] sm:$0xff] }
 0x23b   :  { %11171 = vadd.xlane.f32.xlu0 %v11170_v32  ;;  %v11067_v6 = vpop.xlane.xlu1 %11066  ;;  %v26658_v13 = vpop.xlane.xlu0 %10535  ;;  %v11431_v15 = vmul.f32 %v23575_v53, %v29676_v58  ;;  %22867 = vmatprep.mubr.msk.f32.mxu1 %vm23965_vm1, %v29603_v28  ;;  %v284_v32 = vld [vmem:[%s29129_s2 + $0x60] sm:$0xff]  ;;  %v11176_v24 = vsel %vm10257_vm2, %v26646_v55, 0.0  ;;  %v10888_v16 = vmul.f32 1.442695, %v29679_v7  ;;  %v29681_v58 = vld [vmem:[#allocation127_spill] sm:$0xff] }
 0x23c   :  { %29671 = vst [vmem:[#allocation53_spill] sm:$0xff] %v26658_v13  ;;  %v26660_v41 = vpop.eup %23576  ;;  %v10886_v61 = vmul.f32 1.442695, %v29674_v42  ;;  %22875 = vmatprep.subr.mxu1 %v29603_v28  ;;  %23592 = vrcp.f32 %v11067_v6  ;;  %v29680_v42 = vld [vmem:[#allocation22_spill] sm:$0xff]  ;;  %v29684_v55 = vld [vmem:[#allocation75_spill] sm:$0xff] }
 0x23d   :  { %v26674_v27 = vpop.eup %23578  ;;  %22863 = vmatmul.mubr.msk.f32.vlgmr.msra.gmra.mrb[138].mxu0 %vm10257_vm2, %v11431_v15  ;;  %21148 = vst.msk [vmem:[%s29130_s4 + $0x50] sm:$0xff] %vm10257_vm2, %v11431_v15  ;;  %23594 = vpow2.f32 %v10884_v52  ;;  %v29682_v35 = vsub.f32 %v29680_v42, %v29681_v58  ;;  %v29689_v58 = vld [vmem:[#allocation64_spill] sm:$0xff]  ;;  %v29690_v48 = vld [vmem:[#allocation79_spill] sm:$0xff] }
 0x23e   :  { %29677 = vst [vmem:[#allocation10_spill] sm:$0xff] %v26674_v27  ;;  %11174 = vadd.xlane.f32.xlu1 %v11173_v19  ;;  %v23581_v53 = vpop.eup %23580  ;;  %22871 = vmatpush3.msra.mxu0 %v284_v32  ;;  %23596 = vpow2.f32 %v10886_v61  ;;  %v29683_v19 = vld [vmem:[#allocation63_spill] sm:$0xff]  ;;  %v11179_v61 = vsel %vm10257_vm2, %v26660_v41, 0.0 }
 0x23f   :  { %11177 = vadd.xlane.f32.xlu0 %v11176_v24  ;;  %v26688_v6 = vpop.xlane.xlu1 %10538  ;;  %v11070_v2 = vpop.xlane.xlu0 %11069  ;;  %v10890_v15 = vmul.f32 1.442695, %v29682_v35  ;;  %v11433_v13 = vmul.f32 %v23581_v53, %v29684_v55  ;;  %22872 = vmatprep.mubr.msk.f32.mxu0 %vm23965_vm1, %v29603_v28  ;;  %v11182_v55 = vsel %vm10257_vm2, %v26674_v27, 0.0  ;;  %v29686_v24 = vsub.f32 %v29540_v50, %v26205_v14  ;;  %v286_v50 = vld [vmem:[%s29129_s2 + $0x70] sm:$0xff] }
 0x240   :  { %22880 = vmatprep.subr.mxu0 %v29603_v28  ;;  %v26702_v52 = vpop.eup %23582  ;;  %23598 = vrcp.f32 %v11070_v2  ;;  %v29687_v2 = vld [vmem:[#allocation129_spill] sm:$0xff] }
 0x241   :  { %v26706_v35 = vpop.eup %23584  ;;  %22868 = vmatmul.mubr.msk.f32.vlgmr.msra.gmra.mrb[138].mxu1 %vm10257_vm2, %v11433_v13  ;;  %21149 = vst.msk [vmem:[%s29130_s4 + $0x58] sm:$0xff] %vm10257_vm2, %v11433_v13  ;;  %23600 = vpow2.f32 %v10888_v16  ;;  %v10892_v53 = vmul.f32 1.442695, %v29686_v24  ;;  %v29688_v42 = vsub.f32 %v29541_v37, %v29687_v2  ;;  %v11185_v37 = vsel %vm10257_vm2, %v26702_v52, 0.0 }
 0x242   :  { %29685 = vst [vmem:[#allocation107_spill] sm:$0xff] %v26706_v35  ;;  %11180 = vadd.xlane.f32.xlu1 %v11179_v61  ;;  %v23587_v32 = vpop.eup %23586  ;;  %22876 = vmatpush3.msra.mxu1 %v285_v47  ;;  %23602 = vpow2.f32 %v10890_v15  ;;  %v29692_v47 = vsub.f32 %v29545_v31, %v26219_v49  ;;  %v29696_v61 = vld [vmem:[#allocation82_spill] sm:$0xff]  ;;  %v287_v49 = vld [vmem:[%s29129_s2 + $0x78] sm:$0xff] }
 0x243   :  { %11183 = vadd.xlane.f32.xlu0 %v11182_v55  ;;  %v11073_v4 = vpop.xlane.xlu1 %11072  ;;  %v26718_v7 = vpop.xlane.xlu0 %10541  ;;  %v10894_v13 = vmul.f32 1.442695, %v29688_v42  ;;  %v11435_v27 = vmul.f32 %v23587_v32, %v29690_v48  ;;  %22877 = vmatprep.mubr.msk.f32.mxu1 %vm23965_vm1, %v29603_v28  ;;  %v11188_v48 = vsel %vm10257_vm2, %v26706_v35, 0.0  ;;  %v29695_v42 = vld [vmem:[#allocation66_spill] sm:$0xff] }
 0x244   :  { %22885 = vmatprep.subr.mxu1 %v29603_v28  ;;  %v26732_v14 = vpop.eup %23588  ;;  %23604 = vrcp.f32 %v11073_v4  ;;  %v10896_v55 = vmul.f32 1.442695, %v29692_v47  ;;  %v29693_v4 = vld [vmem:[#allocation24_spill] sm:$0xff] }
 0x245   :  { %29691 = vst [vmem:[#allocation56_spill] sm:$0xff] %v26732_v14  ;;  %v26736_v16 = vpop.eup %23590  ;;  %22873 = vmatmul.mubr.msk.f32.vlgmr.msra.gmra.mrb[140].mxu0 %vm10257_vm2, %v11435_v27  ;;  %21150 = vst.msk [vmem:[%s29130_s4 + $0x60] sm:$0xff] %vm10257_vm2, %v11435_v27  ;;  %23606 = vpow2.f32 %v10892_v53  ;;  %v29694_v2 = vsub.f32 %v29546_v3, %v29693_v4  ;;  %v11191_v3 = vsel %vm10257_vm2, %v26732_v14, 0.0  ;;  %v29699_v4 = vld [vmem:[#allocation28_spill] sm:$0xff] }
 0x246   :  { %11186 = vadd.xlane.f32.xlu1 %v11185_v37  ;;  %v23593_v15 = vpop.eup %23592  ;;  %22881 = vmatpush3.msra.mxu0 %v286_v50  ;;  %23608 = vpow2.f32 %v10894_v13  ;;  %v11194_v13 = vsel %vm10257_vm2, %v26736_v16, 0.0  ;;  %v29697_v50 = vld [vmem:[#allocation26_spill] sm:$0xff] }
 0x247   :  { %11189 = vadd.xlane.f32.xlu0 %v11188_v48  ;;  %v26748_v32 = vpop.xlane.xlu1 %10544  ;;  %v11076_v24 = vpop.xlane.xlu0 %11075  ;;  %v10898_v27 = vmul.f32 1.442695, %v29694_v2  ;;  %v11437_v35 = vmul.f32 %v23593_v15, %v29696_v61  ;;  %22882 = vmatprep.mubr.msk.f32.mxu0 %vm23965_vm1, %v29603_v28  ;;  %v29698_v48 = vsub.f32 %v29551_v44, %v29697_v50  ;;  %v29700_v2 = vld [vmem:[#allocation130_spill] sm:$0xff] }
 0x248   :  { %22890 = vmatprep.subr.mxu0 %v29603_v28  ;;  %v26762_v31 = vpop.eup %23594  ;;  %23610 = vrcp.f32 %v11076_v24  ;;  %v29701_v37 = vsub.f32 %v29699_v4, %v29700_v2  ;;  %v288_v44 = vld [vmem:[%s29129_s2 + $0x80] sm:$0xff]  ;;  %v29704_v4 = vld [vmem:[#allocation131_spill] sm:$0xff] }
 0x249   :  { %v26766_v53 = vpop.eup %23596  ;;  %22878 = vmatmul.mubr.msk.f32.vlgmr.msra.gmra.mrb[140].mxu1 %vm10257_vm2, %v11437_v35  ;;  %21151 = vst.msk [vmem:[%s29130_s4 + $0x68] sm:$0xff] %vm10257_vm2, %v11437_v35  ;;  %23612 = vpow2.f32 %v10896_v55  ;;  %v10900_v15 = vmul.f32 1.442695, %v29698_v48  ;;  %v29705_v2 = vsub.f32 %v29559_v20, %v29704_v4  ;;  %v29708_v4 = vld [vmem:[#allocation84_spill] sm:$0xff] }
 0x24a   :  { %11192 = vadd.xlane.f32.xlu1 %v11191_v3  ;;  %v23599_v61 = vpop.eup %23598  ;;  %22886 = vmatpush3.msra.mxu1 %v287_v49  ;;  %23614 = vpow2.f32 %v10898_v27  ;;  %v10902_v35 = vmul.f32 1.442695, %v29701_v37  ;;  %v29702_v3 = vld [vmem:[#allocation86_spill] sm:$0xff]  ;;  %v11197_v27 = vsel %vm10257_vm2, %v26762_v31, 0.0  ;;  %v11200_v37 = vsel %vm10257_vm2, %v26766_v53, 0.0 }
 0x24b   :  { %11195 = vadd.xlane.f32.xlu0 %v11194_v13  ;;  %v11079_v47 = vpop.xlane.xlu1 %11078  ;;  %v26778_v24 = vpop.xlane.xlu0 %10547  ;;  %v11439_v14 = vmul.f32 %v23599_v61, %v29702_v3  ;;  %22887 = vmatprep.mubr.msk.f32.mxu1 %vm23965_vm1, %v29603_v28  ;;  %v29703_v61 = vsub.f32 %v29558_v18, %v26253_v25  ;;  %v29706_v3 = vld [vmem:[#allocation89_spill] sm:$0xff]  ;;  %v289_v25 = vld [vmem:[%s29129_s2 + $0x88] sm:$0xff] }
 0x24c   :  { %22895 = vmatprep.subr.mxu1 %v29603_v28  ;;  %v26790_v55 = vpop.eup %23600  ;;  %23616 = vrcp.f32 %v11079_v47 }
 0x24d   :  { %v26794_v49 = vpop.eup %23602  ;;  %22883 = vmatmul.mubr.msk.f32.vlgmr.msra.gmra.mrb[142].mxu0 %vm10257_vm2, %v11439_v14  ;;  %21152 = vst.msk [vmem:[%s29130_s4 + $0x70] sm:$0xff] %vm10257_vm2, %v11439_v14  ;;  %23618 = vpow2.f32 %v10900_v15  ;;  %v10904_v50 = vmul.f32 1.442695, %v29703_v61  ;;  %v10906_v14 = vmul.f32 1.442695, %v29705_v2  ;;  %v11203_v15 = vsel %vm10257_vm2, %v26790_v55, 0.0 }
 0x24e   :  { %11198 = vadd.xlane.f32.xlu1 %v11197_v27  ;;  %v23605_v13 = vpop.eup %23604  ;;  %22891 = vmatpush3.msra.mxu0 %v288_v44  ;;  %23620 = vpow2.f32 %v10902_v35  ;;  %v11206_v20 = vsel %vm10257_vm2, %v26794_v49, 0.0  ;;  %v29709_v2 = vsub.f32 %v29564_v0, %v29708_v4  ;;  %v29713_v4 = vld [vmem:[#allocation30_spill] sm:$0xff] }
 0x24f   :  { %11201 = vadd.xlane.f32.xlu0 %v11200_v37  ;;  %v26806_v48 = vpop.xlane.xlu1 %10550  ;;  %v11082_v47 = vpop.xlane.xlu0 %11081  ;;  %v11441_v27 = vmul.f32 %v23605_v13, %v29706_v3  ;;  %22892 = vmatprep.mubr.msk.f32.mxu0 %vm23965_vm1, %v29603_v28  ;;  %v29707_v37 = vsub.f32 %v29563_v43, %v26270_v57  ;;  %v290_v43 = vld [vmem:[%s29129_s2 + $0x90] sm:$0xff] }
 0x250   :  { %22900 = vmatprep.subr.mxu0 %v29603_v28  ;;  %v26818_v18 = vpop.eup %23606  ;;  %23622 = vrcp.f32 %v11082_v47  ;;  %v10910_v3 = vmul.f32 1.442695, %v29709_v2  ;;  %v29714_v2 = vsub.f32 %v29569_v30, %v29713_v4  ;;  %v29717_v4 = vld [vmem:[#allocation36_spill] sm:$0xff] }
 0x251   :  { %v26822_v35 = vpop.eup %23608  ;;  %22888 = vmatmul.mubr.msk.f32.vlgmr.msra.gmra.mrb[142].mxu1 %vm10257_vm2, %v11441_v27  ;;  %21153 = vst.msk [vmem:[%s29130_s4 + $0x78] sm:$0xff] %vm10257_vm2, %v11441_v27  ;;  %23624 = vpow2.f32 %v10904_v50  ;;  %v10908_v13 = vmul.f32 1.442695, %v29707_v37  ;;  %v29710_v27 = vld [vmem:[#allocation92_spill] sm:$0xff]  ;;  %v11209_v50 = vsel %vm10257_vm2, %v26818_v18, 0.0 }
 0x252   :  { %11204 = vadd.xlane.f32.xlu1 %v11203_v15  ;;  %v23611_v44 = vpop.eup %23610  ;;  %22896 = vmatpush3.msra.mxu1 %v289_v25  ;;  %23626 = vpow2.f32 %v10906_v14  ;;  %v11212_v0 = vsel %vm10257_vm2, %v26822_v35, 0.0 }
 0x253   :  { %11207 = vadd.xlane.f32.xlu0 %v11206_v20  ;;  %v11085_v61 = vpop.xlane.xlu1 %11084  ;;  %v26834_v47 = vpop.xlane.xlu0 %10553  ;;  %v11443_v15 = vmul.f32 %v23611_v44, %v29710_v27  ;;  %22897 = vmatprep.mubr.msk.f32.mxu1 %vm23965_vm1, %v29603_v28  ;;  %v29712_v20 = vsub.f32 %v29568_v1, %v26287_v39  ;;  %v10914_v27 = vmul.f32 1.442695, %v29714_v2  ;;  %v291_v1 = vld [vmem:[%s29129_s2 + $0x98] sm:$0xff]  ;;  %v29718_v2 = vld [vmem:[#allocation32_spill] sm:$0xff] }
 0x254   :  { %22905 = vmatprep.subr.mxu1 %v29603_v28  ;;  %v26846_v57 = vpop.eup %23612  ;;  %23628 = vrcp.f32 %v11085_v61 }
 0x255   :  { %29711 = vst [vmem:[#allocation11_spill] sm:$0xff] %v26846_v57  ;;  %v26850_v14 = vpop.eup %23614  ;;  %22893 = vmatmul.mubr.msk.f32.vlgmr.msra.gmra.mrb[144].mxu0 %vm10257_vm2, %v11443_v15  ;;  %21154 = vst.msk [vmem:[%s29130_s4 + $0x80] sm:$0xff] %vm10257_vm2, %v11443_v15  ;;  %23630 = vpow2.f32 %v10908_v13  ;;  %v10912_v44 = vmul.f32 1.442695, %v29712_v20  ;;  %v29715_v15 = vld [vmem:[#allocation95_spill] sm:$0xff]  ;;  %v11215_v13 = vsel %vm10257_vm2, %v26846_v57, 0.0 }
 0x256   :  { %11210 = vadd.xlane.f32.xlu1 %v11209_v50  ;;  %v23617_v25 = vpop.eup %23616  ;;  %22901 = vmatpush3.msra.mxu0 %v290_v43  ;;  %23632 = vpow2.f32 %v10910_v3  ;;  %v11218_v30 = vsel %vm10257_vm2, %v26850_v14, 0.0 }
 0x257   :  { %11213 = vadd.xlane.f32.xlu0 %v11212_v0  ;;  %v26862_v37 = vpop.xlane.xlu1 %10556  ;;  %v11088_v61 = vpop.xlane.xlu0 %11087  ;;  %v11445_v50 = vmul.f32 %v23617_v25, %v29715_v15  ;;  %22902 = vmatprep.mubr.msk.f32.mxu0 %vm23965_vm1, %v29603_v28  ;;  %v29716_v0 = vsub.f32 %v29573_v56, %v26304_v9  ;;  %v29719_v15 = vsub.f32 %v29717_v4, %v29718_v2  ;;  %v292_v56 = vld [vmem:[%s29129_s2 + $0xa0] sm:$0xff] }
 0x258   :  { %22910 = vmatprep.subr.mxu0 %v29603_v28  ;;  %v26874_v39 = vpop.eup %23618  ;;  %23634 = vrcp.f32 %v11088_v61  ;;  %v29722_v2 = vld [vmem:[#allocation34_spill] sm:$0xff] }
 0x259   :  { %v26878_v3 = vpop.eup %23620  ;;  %22898 = vmatmul.mubr.msk.f32.vlgmr.msra.gmra.mrb[144].mxu1 %vm10257_vm2, %v11445_v50  ;;  %21155 = vst.msk [vmem:[%s29130_s4 + $0x88] sm:$0xff] %vm10257_vm2, %v11445_v50  ;;  %23636 = vpow2.f32 %v10912_v44  ;;  %v10916_v25 = vmul.f32 1.442695, %v29716_v0  ;;  %v10918_v50 = vmul.f32 1.442695, %v29719_v15  ;;  %v11221_v44 = vsel %vm10257_vm2, %v26874_v39, 0.0 }
 0x25a   :  { %11216 = vadd.xlane.f32.xlu1 %v11215_v13  ;;  %v23623_v43 = vpop.eup %23622  ;;  %22906 = vmatpush3.msra.mxu1 %v291_v1  ;;  %23638 = vpow2.f32 %v10914_v27  ;;  %v29720_v13 = vld [vmem:[#allocation98_spill] sm:$0xff]  ;;  %v11224_v1 = vsel %vm10257_vm2, %v26878_v3, 0.0  ;;  %v29723_v15 = vsub.f32 %v29580_v17, %v29722_v2  ;;  %v29726_v2 = vsub.f32 %v29584_v8, %v26340_v60 }
 0x25b   :  { %11219 = vadd.xlane.f32.xlu0 %v11218_v30  ;;  %v11091_v20 = vpop.xlane.xlu1 %11090  ;;  %v26890_v61 = vpop.xlane.xlu0 %10559  ;;  %v11447_v57 = vmul.f32 %v23623_v43, %v29720_v13  ;;  %22907 = vmatprep.mubr.msk.f32.mxu1 %vm23965_vm1, %v29603_v28  ;;  %v29721_v43 = vsub.f32 %v29579_v11, %v26321_v33  ;;  %v29724_v13 = vld [vmem:[#allocation101_spill] sm:$0xff]  ;;  %v293_v11 = vld [vmem:[%s29129_s2 + $0xa8] sm:$0xff] }
 0x25c   :  { %22915 = vmatprep.subr.mxu1 %v29603_v28  ;;  %v26902_v9 = vpop.eup %23624  ;;  %23640 = vrcp.f32 %v11091_v20 }
 0x25d   :  { %v26906_v27 = vpop.eup %23626  ;;  %22903 = vmatmul.mubr.msk.f32.vlgmr.msra.gmra.mrb[146].mxu0 %vm10257_vm2, %v11447_v57  ;;  %21156 = vst.msk [vmem:[%s29130_s4 + $0x90] sm:$0xff] %vm10257_vm2, %v11447_v57  ;;  %23642 = vpow2.f32 %v10916_v25  ;;  %v10920_v0 = vmul.f32 1.442695, %v29721_v43  ;;  %v10922_v57 = vmul.f32 1.442695, %v29723_v15  ;;  %v11227_v25 = vsel %vm10257_vm2, %v26902_v9, 0.0 }
 0x25e   :  { %11222 = vadd.xlane.f32.xlu1 %v11221_v44  ;;  %v23629_v30 = vpop.eup %23628  ;;  %22911 = vmatpush3.msra.mxu0 %v292_v56  ;;  %23644 = vpow2.f32 %v10918_v50  ;;  %v11230_v17 = vsel %vm10257_vm2, %v26906_v27, 0.0  ;;  %v10926_v15 = vmul.f32 1.442695, %v29726_v2  ;;  %v29730_v2 = vld [vmem:[#allocation109_spill] sm:$0xff] }
 0x25f   :  { %11225 = vadd.xlane.f32.xlu0 %v11224_v1  ;;  %v26918_v20 = vpop.xlane.xlu1 %10562  ;;  %v11094_v4 = vpop.xlane.xlu0 %11093  ;;  %v11449_v44 = vmul.f32 %v23629_v30, %v29724_v13  ;;  %22912 = vmatprep.mubr.msk.f32.mxu0 %vm23965_vm1, %v29603_v28  ;;  %v29725_v1 = vsub.f32 %v29583_v62, %v26338_v51  ;;  %v29727_v13 = vld [vmem:[#allocation104_spill] sm:$0xff] }
 0x260   :  { %22920 = vmatprep.subr.mxu0 %v29603_v28  ;;  %v26930_v33 = vpop.eup %23630  ;;  %23646 = vrcp.f32 %v11094_v4  ;;  %v294_v51 = vld [vmem:[%s29129_s2 + $0xb0] sm:$0xff] }
 0x261   :  { %v26934_v50 = vpop.eup %23632  ;;  %22908 = vmatmul.mubr.msk.f32.vlgmr.msra.gmra.mrb[146].mxu1 %vm10257_vm2, %v11449_v44  ;;  %21157 = vst.msk [vmem:[%s29130_s4 + $0x98] sm:$0xff] %vm10257_vm2, %v11449_v44  ;;  %23648 = vpow2.f32 %v10920_v0  ;;  %v10924_v30 = vmul.f32 1.442695, %v29725_v1  ;;  %v11233_v0 = vsel %vm10257_vm2, %v26930_v33, 0.0  ;;  %v29729_v1 = vsub.f32 %v29590_v54, %v26368_v40 }
 0x262   :  { %11228 = vadd.xlane.f32.xlu1 %v11227_v25  ;;  %v23635_v56 = vpop.eup %23634  ;;  %22916 = vmatpush3.msra.mxu1 %v293_v11  ;;  %23650 = vpow2.f32 %v10922_v57  ;;  %v11236_v8 = vsel %vm10257_vm2, %v26934_v50, 0.0  ;;  %v29728_v11 = vsub.f32 %v29587_v12, %v26355_v46  ;;  %v295_v12 = vld [vmem:[%s29129_s2 + $0xb8] sm:$0xff] }
 0x263   :  { %11231 = vadd.xlane.f32.xlu0 %v11230_v17  ;;  %v11097_v43 = vpop.xlane.xlu1 %11096  ;;  %v26946_v4 = vpop.xlane.xlu0 %10565  ;;  %v11451_v44 = vmul.f32 %v23635_v56, %v29727_v13  ;;  %22917 = vmatprep.mubr.msk.f32.mxu1 %vm23965_vm1, %v29603_v28 }
 0x264   :  { %22925 = vmatprep.subr.mxu1 %v29603_v28  ;;  %v26958_v62 = vpop.eup %23636  ;;  %23652 = vrcp.f32 %v11097_v43  ;;  %v10928_v25 = vmul.f32 1.442695, %v29728_v11  ;;  %v10930_v43 = vmul.f32 1.442695, %v29729_v1 }
 0x265   :  { %v26962_v57 = vpop.eup %23638  ;;  %22913 = vmatmul.mubr.msk.f32.vlgmr.msra.gmra.mrb[148].mxu0 %vm10257_vm2, %v11451_v44  ;;  %21158 = vst.msk [vmem:[%s29130_s4 + $0xa0] sm:$0xff] %vm10257_vm2, %v11451_v44  ;;  %23654 = vpow2.f32 %v10924_v30  ;;  %v11239_v30 = vsel %vm10257_vm2, %v26958_v62, 0.0  ;;  %v29731_v44 = vsub.f32 %v29594_v45, %v26381_v23  ;;  %v296_v23 = vld [vmem:[%s29129_s2 + $0xc0] sm:$0xff] }
 0x266   :  { %11234 = vadd.xlane.f32.xlu1 %v11233_v0  ;;  %v23641_v60 = vpop.eup %23640  ;;  %22921 = vmatpush3.msra.mxu0 %v294_v51  ;;  %23656 = vpow2.f32 %v10926_v15  ;;  %v11242_v40 = vsel %vm10257_vm2, %v26962_v57, 0.0 }
 0x267   :  { %11237 = vadd.xlane.f32.xlu0 %v11236_v8  ;;  %v26974_v17 = vpop.xlane.xlu1 %10568  ;;  %v11100_v56 = vpop.xlane.xlu0 %11099  ;;  %v11453_v13 = vmul.f32 %v23641_v60, %v29730_v2  ;;  %22922 = vmatprep.mubr.msk.f32.mxu0 %vm23965_vm1, %v29603_v28  ;;  %v10932_v51 = vmul.f32 1.442695, %v29731_v44  ;;  %v29732_v60 = vsub.f32 %v29597_v63, %v26394_v29  ;;  %v29734_v2 = vsub.f32 %v29601_v38, %v26419_v34  ;;  %v29736_v44 = vld [vmem:[#allocation116_spill] sm:$0xff]  ;;  %v297_v34 = vld [vmem:[%s29129_s2 + $0xc8] sm:$0xff] }
 0x268   :  { %22930 = vmatprep.subr.mxu0 %v29603_v28  ;;  %v26986_v46 = vpop.eup %23642  ;;  %23658 = vrcp.f32 %v11100_v56  ;;  %v29733_v56 = vld [vmem:[#allocation112_spill] sm:$0xff] }
 0x269   :  { %v26990_v15 = vpop.eup %23644  ;;  %22918 = vmatmul.mubr.msk.f32.vlgmr.msra.gmra.mrb[148].mxu1 %vm10257_vm2, %v11453_v13  ;;  %21159 = vst.msk [vmem:[%s29130_s4 + $0xa8] sm:$0xff] %vm10257_vm2, %v11453_v13  ;;  %23660 = vpow2.f32 %v10928_v25  ;;  %v10934_v11 = vmul.f32 1.442695, %v29732_v60  ;;  %v11245_v25 = vsel %vm10257_vm2, %v26986_v46, 0.0  ;;  %v10936_v13 = vmul.f32 1.442695, %v29734_v2 }
 0x26a   :  { %11240 = vadd.xlane.f32.xlu1 %v11239_v30  ;;  %v23647_v54 = vpop.eup %23646  ;;  %22926 = vmatpush3.msra.mxu1 %v295_v12  ;;  %23662 = vpow2.f32 %v10930_v43  ;;  %v11248_v29 = vsel %vm10257_vm2, %v26990_v15, 0.0 }
 0x26b   :  { %11243 = vadd.xlane.f32.xlu0 %v11242_v40  ;;  %v11103_v0 = vpop.xlane.xlu1 %11102  ;;  %v27002_v8 = vpop.xlane.xlu0 %10571  ;;  %v11455_v1 = vmul.f32 %v23647_v54, %v29733_v56  ;;  %22927 = vmatprep.mubr.msk.f32.mxu1 %vm23965_vm1, %v29603_v28  ;;  %v29735_v40 = vsub.f32 %v29606_v26, %v26441_v21 }
 0x26c   :  { %22935 = vmatprep.subr.mxu1 %v29603_v28  ;;  %v27014_v45 = vpop.eup %23648  ;;  %23664 = vrcp.f32 %v11103_v0 }
 0x26d   :  { %v27018_v43 = vpop.eup %23650  ;;  %22923 = vmatmul.mubr.msk.f32.vlgmr.msra.gmra.mrb[150].mxu0 %vm10257_vm2, %v11455_v1  ;;  %21160 = vst.msk [vmem:[%s29130_s4 + $0xb0] sm:$0xff] %vm10257_vm2, %v11455_v1  ;;  %23666 = vpow2.f32 %v10932_v51  ;;  %v10938_v54 = vmul.f32 1.442695, %v29735_v40  ;;  %v11251_v51 = vsel %vm10257_vm2, %v27014_v45, 0.0 }
 0x26e   :  { %11246 = vadd.xlane.f32.xlu1 %v11245_v25  ;;  %v23653_v63 = vpop.eup %23652  ;;  %22931 = vmatpush3.msra.mxu0 %v296_v23  ;;  %23668 = vpow2.f32 %v10934_v11  ;;  %v11254_v26 = vsel %vm10257_vm2, %v27018_v43, 0.0  ;;  %v29737_v11 = vsub.f32 %v29612_v22, %v26469_v59  ;;  %v29738_v25 = vld [vmem:[#allocation52_spill] sm:$0xff] }
 0x26f   :  { %11249 = vadd.xlane.f32.xlu0 %v11248_v29  ;;  %v27030_v12 = vpop.xlane.xlu1 %10574  ;;  %v11106_v30 = vpop.xlane.xlu0 %11105  ;;  %v11457_v0 = vmul.f32 %v23653_v63, %v29736_v44  ;;  %22932 = vmatprep.mubr.msk.f32.mxu0 %vm23965_vm1, %v29603_v28  ;;  %v29739_v29 = vld [vmem:[#allocation45_spill] sm:$0xff]  ;;  %v298_v22 = vld [vmem:[%s29129_s2 + $0xd0] sm:$0xff] }
 0x270   :  { %22940 = vmatprep.subr.mxu0 %v29603_v28  ;;  %v27042_v38 = vpop.eup %23654  ;;  %23670 = vrcp.f32 %v11106_v30  ;;  %v10940_v56 = vmul.f32 1.442695, %v29737_v11  ;;  %v29740_v63 = vsub.f32 %v29738_v25, %v29739_v29  ;;  %v29741_v30 = vld [vmem:[#allocation118_spill] sm:$0xff]  ;;  %v29747_v25 = vsub.f32 %v29634_v36, %v26544_v5 }
 0x271   :  { %v27046_v60 = vpop.eup %23656  ;;  %22928 = vmatmul.mubr.msk.f32.vlgmr.msra.gmra.mrb[150].mxu1 %vm10257_vm2, %v11457_v0  ;;  %21161 = vst.msk [vmem:[%s29130_s4 + $0xb8] sm:$0xff] %vm10257_vm2, %v11457_v0  ;;  %23672 = vpow2.f32 %v10936_v13  ;;  %v11257_v13 = vsel %vm10257_vm2, %v27042_v38, 0.0 }
 0x272   :  { %11252 = vadd.xlane.f32.xlu1 %v11251_v51  ;;  %v23659_v21 = vpop.eup %23658  ;;  %22936 = vmatpush3.msra.mxu1 %v297_v34  ;;  %23674 = vpow2.f32 %v10938_v54  ;;  %v10942_v2 = vmul.f32 1.442695, %v29740_v63  ;;  %v11260_v44 = vsel %vm10257_vm2, %v27046_v60, 0.0  ;;  %v29744_v34 = vld [vmem:[#allocation54_spill] sm:$0xff]  ;;  %v29745_v51 = vld [vmem:[#allocation41_spill] sm:$0xff] }
 0x273   :  { %11255 = vadd.xlane.f32.xlu0 %v11254_v26  ;;  %v11109_v1 = vpop.xlane.xlu1 %11108  ;;  %v27058_v23 = vpop.xlane.xlu0 %10577  ;;  %v11459_v40 = vmul.f32 %v23659_v21, %v29741_v30  ;;  %22937 = vmatprep.mubr.msk.f32.mxu1 %vm23965_vm1, %v29603_v28  ;;  %v29746_v26 = vsub.f32 %v29744_v34, %v29745_v51  ;;  %v10946_v29 = vmul.f32 1.442695, %v29747_v25  ;;  %v29748_v63 = vld [vmem:[#allocation122_spill] sm:$0xff]  ;;  %v29754_v25 = vld [vmem:[#allocation9_spill] sm:$0xff] }
 0x274   :  { %22945 = vmatprep.subr.mxu1 %v29603_v28  ;;  %v27070_v59 = vpop.eup %23660  ;;  %23676 = vrcp.f32 %v11109_v1 }
 0x275   :  { %29742 = vst [vmem:[#allocation2_spill] sm:$0xff] %v27070_v59  ;;  %v27074_v54 = vpop.eup %23662  ;;  %22933 = vmatmul.mubr.msk.f32.vlgmr.msra.gmra.mrb[152].mxu0 %vm10257_vm2, %v11459_v40  ;;  %21162 = vst.msk [vmem:[%s29130_s4 + $0xc0] sm:$0xff] %vm10257_vm2, %v11459_v40  ;;  %23678 = vpow2.f32 %v10940_v56  ;;  %v10944_v21 = vmul.f32 1.442695, %v29746_v26  ;;  %v299_v56 = vld [vmem:[%s29129_s2 + $0xd8] sm:$0xff] }
 0x276   :  { %29743 = vst [vmem:[#allocation12_spill] sm:$0xff] %v27074_v54  ;;  %11258 = vadd.xlane.f32.xlu1 %v11257_v13  ;;  %v23665_v0 = vpop.eup %23664  ;;  %22941 = vmatpush3.msra.mxu0 %v298_v22  ;;  %23680 = vpow2.f32 %v10942_v2  ;;  %v11263_v2 = vsel %vm10257_vm2, %v27070_v59, 0.0  ;;  %v11266_v5 = vsel %vm10257_vm2, %v27074_v54, 0.0  ;;  %v29750_v13 = vld [vmem:[#allocation57_spill] sm:$0xff] }
 0x277   :  { %11261 = vadd.xlane.f32.xlu0 %v11260_v44  ;;  %v27086_v11 = vpop.xlane.xlu1 %10580  ;;  %v11112_v1 = vpop.xlane.xlu0 %11111  ;;  %v11461_v30 = vmul.f32 %v23665_v0, %v29748_v63  ;;  %22942 = vmatprep.mubr.msk.f32.mxu0 %vm23965_vm1, %v29603_v28  ;;  %v29751_v44 = vld [vmem:[#allocation49_spill] sm:$0xff] }
 0x278   :  { %22950 = vmatprep.subr.mxu0 %v29603_v28  ;;  %v27098_v40 = vpop.eup %23666  ;;  %23682 = vrcp.f32 %v11112_v1  ;;  %v29752_v0 = vsub.f32 %v29750_v13, %v29751_v44  ;;  %v29753_v1 = vld [vmem:[#allocation58_spill] sm:$0xff]  ;;  %v29758_v44 = vld [vmem:[#allocation60_spill] sm:$0xff] }
 0x279   :  { %29749 = vst [vmem:[#allocation111_spill] sm:$0xff] %v27098_v40  ;;  %v27102_v22 = vpop.eup %23668  ;;  %22938 = vmatmul.mubr.msk.f32.vlgmr.msra.gmra.mrb[152].mxu1 %vm10257_vm2, %v11461_v30  ;;  %21163 = vst.msk [vmem:[%s29130_s4 + $0xc8] sm:$0xff] %vm10257_vm2, %v11461_v30  ;;  %23684 = vpow2.f32 %v10944_v21  ;;  %v29755_v63 = vsub.f32 %v29753_v1, %v29754_v25  ;;  %v300_v21 = vld [vmem:[%s29129_s2 + $0xe0] sm:$0xff] }
 0x27a   :  { %11264 = vadd.xlane.f32.xlu1 %v11263_v2  ;;  %v23671_v36 = vpop.eup %23670  ;;  %v10948_v34 = vmul.f32 1.442695, %v29752_v0  ;;  %22946 = vmatpush3.msra.mxu1 %v299_v56  ;;  %23686 = vpow2.f32 %v10946_v29  ;;  %v29756_v2 = vld [vmem:[#allocation124_spill] sm:$0xff]  ;;  %v11269_v29 = vsel %vm10257_vm2, %v27098_v40, 0.0  ;;  %v29759_v0 = vld [vmem:[#allocation51_spill] sm:$0xff] }
 0x27b   :  { %11267 = vadd.xlane.f32.xlu0 %v11266_v5  ;;  %v11115_v51 = vpop.xlane.xlu1 %11114  ;;  %v27114_v26 = vpop.xlane.xlu0 %10583  ;;  %v10950_v30 = vmul.f32 1.442695, %v29755_v63  ;;  %v11463_v59 = vmul.f32 %v23671_v36, %v29756_v2  ;;  %22947 = vmatprep.mubr.msk.f32.mxu1 %vm23965_vm1, %v29603_v28  ;;  %v11272_v36 = vsel %vm10257_vm2, %v27102_v22, 0.0  ;;  %v29761_v2 = vld [vmem:[#allocation53_spill] sm:$0xff] }
 0x27c   :  { %22955 = vmatprep.subr.mxu1 %v29603_v28  ;;  %v27126_v5 = vpop.eup %23672  ;;  %23688 = vrcp.f32 %v11115_v51  ;;  %v29760_v51 = vsub.f32 %v29758_v44, %v29759_v0  ;;  %v29762_v40 = vsub.f32 %v29675_v10, %v29761_v2  ;;  %v29766_v2 = vld [vmem:[#allocation67_spill] sm:$0xff] }
 0x27d   :  { %v27130_v56 = vpop.eup %23674  ;;  %22943 = vmatmul.mubr.msk.f32.vlgmr.msra.gmra.mrb[154].mxu0 %vm10257_vm2, %v11463_v59  ;;  %21164 = vst.msk [vmem:[%s29130_s4 + $0xd0] sm:$0xff] %vm10257_vm2, %v11463_v59  ;;  %23690 = vpow2.f32 %v10948_v34  ;;  %v301_v34 = vld [vmem:[%s29129_s2 + $0xe8] sm:$0xff] }
 0x27e   :  { %29757 = vst [vmem:[#allocation55_spill] sm:$0xff] %v27130_v56  ;;  %11270 = vadd.xlane.f32.xlu1 %v11269_v29  ;;  %v23677_v13 = vpop.eup %23676  ;;  %v10952_v1 = vmul.f32 1.442695, %v29760_v51  ;;  %22951 = vmatpush3.msra.mxu0 %v300_v21  ;;  %23692 = vpow2.f32 %v10950_v30  ;;  %v10954_v59 = vmul.f32 1.442695, %v29762_v40  ;;  %v29763_v29 = vld [vmem:[#allocation21_spill] sm:$0xff] }
 0x27f   :  { %11273 = vadd.xlane.f32.xlu0 %v11272_v36  ;;  %v27142_v25 = vpop.xlane.xlu1 %10586  ;;  %v11118_v63 = vpop.xlane.xlu0 %11117  ;;  %v11465_v54 = vmul.f32 %v23677_v13, %v29763_v29  ;;  %22952 = vmatprep.mubr.msk.f32.mxu0 %vm23965_vm1, %v29603_v28  ;;  %v11275_v30 = vsel %vm10257_vm2, %v27126_v5, 0.0  ;;  %v11278_v10 = vsel %vm10257_vm2, %v27130_v56, 0.0  ;;  %v29764_v13 = vsub.f32 %v29683_v19, %v26688_v6  ;;  %v302_v6 = vld [vmem:[%s29129_s2 + $0xf0] sm:$0xff] }
 0x280   :  { %22960 = vmatprep.subr.mxu0 %v29603_v28  ;;  %v27154_v36 = vpop.eup %23678  ;;  %23694 = vrcp.f32 %v11118_v63  ;;  %v29765_v63 = vsub.f32 %v29689_v58, %v26718_v7  ;;  %v10738_v29 = vsub.f32 %v29766_v2, %v26778_v24 }
 0x281   :  { %v27158_v21 = vpop.eup %23680  ;;  %22948 = vmatmul.mubr.msk.f32.vlgmr.msra.gmra.mrb[154].mxu1 %vm10257_vm2, %v11465_v54  ;;  %21165 = vst.msk [vmem:[%s29130_s4 + $0xd8] sm:$0xff] %vm10257_vm2, %v11465_v54  ;;  %23696 = vpow2.f32 %v10952_v1  ;;  %v10956_v44 = vmul.f32 1.442695, %v29764_v13  ;;  %v11281_v7 = vsel %vm10257_vm2, %v27154_v36, 0.0 }
 0x282   :  { %11276 = vadd.xlane.f32.xlu1 %v11275_v30  ;;  %v23683_v40 = vpop.eup %23682  ;;  %22956 = vmatpush3.msra.mxu1 %v301_v34  ;;  %23698 = vpow2.f32 %v10954_v59  ;;  %v10958_v54 = vmul.f32 1.442695, %v29765_v63  ;;  %v29767_v30 = vld [vmem:[#allocation23_spill] sm:$0xff]  ;;  %v11284_v24 = vsel %vm10257_vm2, %v27158_v21, 0.0  ;;  %v29768_v59 = vsub.f32 %v29695_v42, %v26748_v32  ;;  %v29770_v63 = vld [vmem:[#allocation70_spill] sm:$0xff]  ;;  %v303_v32 = vld [vmem:[%s29129_s2 + $0xf8] sm:$0xff] }
 0x283   :  { %11279 = vadd.xlane.f32.xlu0 %v11278_v10  ;;  %v11121_v0 = vpop.xlane.xlu1 %11120  ;;  %v27170_v51 = vpop.xlane.xlu0 %10589  ;;  %v11467_v56 = vmul.f32 %v23683_v40, %v29767_v30  ;;  %22957 = vmatprep.mubr.msk.f32.mxu1 %vm23965_vm1, %v29603_v28  ;;  %v29769_v10 = vld [vmem:[#allocation69_spill] sm:$0xff]  ;;  %v10740_v2 = vsub.f32 %v29770_v63, %v26834_v47 }
 0x284   :  { %22965 = vmatprep.subr.mxu1 %v29603_v28  ;;  %v27184_v19 = vpop.eup %23684  ;;  %23700 = vrcp.f32 %v11121_v0  ;;  %v10960_v34 = vmul.f32 1.442695, %v29768_v59  ;;  %v10739_v40 = vsub.f32 %v29769_v10, %v26806_v48  ;;  %v29771_v30 = vld [vmem:[#allocation25_spill] sm:$0xff] }
 0x285   :  { %v27188_v58 = vpop.eup %23686  ;;  %22953 = vmatmul.mubr.msk.f32.vlgmr.msra.gmra.mrb[156].mxu0 %vm10257_vm2, %v11467_v56  ;;  %21166 = vst.msk [vmem:[%s29130_s4 + $0xe0] sm:$0xff] %vm10257_vm2, %v11467_v56  ;;  %23702 = vpow2.f32 %v10956_v44  ;;  %v10962_v56 = vmul.f32 1.442695, %v10738_v29  ;;  %v11287_v48 = vsel %vm10257_vm2, %v27184_v19, 0.0  ;;  %v10966_v10 = vmul.f32 1.442695, %v10740_v2 }
 0x286   :  { %11282 = vadd.xlane.f32.xlu1 %v11281_v7  ;;  %v23689_v1 = vpop.eup %23688  ;;  %22961 = vmatpush3.msra.mxu0 %v302_v6  ;;  %23704 = vpow2.f32 %v10958_v54  ;;  %v11290_v47 = vsel %vm10257_vm2, %v27188_v58, 0.0  ;;  %v10964_v29 = vmul.f32 1.442695, %v10739_v40  ;;  %v29772_v6 = vld [vmem:[#allocation72_spill] sm:$0xff] }
 0x287   :  { %11285 = vadd.xlane.f32.xlu0 %v11284_v24  ;;  %v27202_v13 = vpop.xlane.xlu1 %10592  ;;  %v11124_v0 = vpop.xlane.xlu0 %11123  ;;  %v11469_v7 = vmul.f32 %v23689_v1, %v29771_v30  ;;  %22962 = vmatprep.mubr.msk.f32.mxu0 %vm23965_vm1, %v29603_v28  ;;  %v10741_v24 = vsub.f32 %v29772_v6, %v26862_v37  ;;  %v29774_v30 = vld [vmem:[#allocation27_spill] sm:$0xff] }
 0x288   :  { %22970 = vmatprep.subr.mxu0 %v29603_v28  ;;  %v27213_v42 = vpop.eup %23690  ;;  %23706 = vrcp.f32 %v11124_v0  ;;  %v29773_v0 = vld [vmem:[#allocation74_spill] sm:$0xff] }
 0x289   :  { %v27217_v44 = vpop.eup %23692  ;;  %22958 = vmatmul.mubr.msk.f32.vlgmr.msra.gmra.mrb[156].mxu1 %vm10257_vm2, %v11469_v7  ;;  %21167 = vst.msk [vmem:[%s29130_s4 + $0xe8] sm:$0xff] %vm10257_vm2, %v11469_v7  ;;  %23708 = vpow2.f32 %v10960_v34  ;;  %v10742_v63 = vsub.f32 %v29773_v0, %v26890_v61  ;;  %v304_v34 = vld [vmem:[%s29129_s2 + $0x100] sm:$0xff]  ;;  %v11293_v40 = vsel %vm10257_vm2, %v27213_v42, 0.0 }
 0x28a   :  { %11288 = vadd.xlane.f32.xlu1 %v11287_v48  ;;  %v23695_v54 = vpop.eup %23694  ;;  %22966 = vmatpush3.msra.mxu1 %v303_v32  ;;  %23710 = vpow2.f32 %v10962_v56  ;;  %v11296_v61 = vsel %vm10257_vm2, %v27217_v44, 0.0  ;;  %v10968_v32 = vmul.f32 1.442695, %v10741_v24  ;;  %v29776_v48 = vld [vmem:[#allocation76_spill] sm:$0xff]  ;;  %v29777_v0 = vld [vmem:[#allocation78_spill] sm:$0xff] }
 0x28b   :  { %11291 = vadd.xlane.f32.xlu0 %v11290_v47  ;;  %v11127_v1 = vpop.xlane.xlu1 %11126  ;;  %v27228_v59 = vpop.xlane.xlu0 %10595  ;;  %v11471_v7 = vmul.f32 %v23695_v54, %v29774_v30  ;;  %22967 = vmatprep.mubr.msk.f32.mxu1 %vm23965_vm1, %v29603_v28  ;;  %v10743_v47 = vsub.f32 %v29776_v48, %v26918_v20  ;;  %v10744_v30 = vsub.f32 %v29777_v0, %v26946_v4 }
 0x28c   :  { %22975 = vmatprep.subr.mxu1 %v29603_v28  ;;  %v27239_v37 = vpop.eup %23696  ;;  %23712 = vrcp.f32 %v11127_v1  ;;  %v10970_v1 = vmul.f32 1.442695, %v10742_v63 }
 0x28d   :  { %29775 = vst [vmem:[#allocation59_spill] sm:$0xff] %v27239_v37  ;;  %v27243_v56 = vpop.eup %23698  ;;  %22963 = vmatmul.mubr.msk.f32.vlgmr.msra.gmra.mrb[158].mxu0 %vm10257_vm2, %v11471_v7  ;;  %21168 = vst.msk [vmem:[%s29130_s4 + $0xf0] sm:$0xff] %vm10257_vm2, %v11471_v7  ;;  %23714 = vpow2.f32 %v10964_v29  ;;  %v29778_v7 = vld [vmem:[#allocation8_spill] sm:$0xff]  ;;  %v305_v29 = vld [vmem:[%s29129_s2 + $0x108] sm:$0xff]  ;;  %v11299_v24 = vsel %vm10257_vm2, %v27239_v37, 0.0 }
 0x28e   :  { %11294 = vadd.xlane.f32.xlu1 %v11293_v40  ;;  %v23701_v2 = vpop.eup %23700  ;;  %22971 = vmatpush3.msra.mxu0 %v304_v34  ;;  %23716 = vpow2.f32 %v10966_v10  ;;  %v11302_v4 = vsel %vm10257_vm2, %v27243_v56, 0.0  ;;  %v10972_v34 = vmul.f32 1.442695, %v10743_v47  ;;  %v10974_v0 = vmul.f32 1.442695, %v10744_v30 }
 0x28f   :  { %11297 = vadd.xlane.f32.xlu0 %v11296_v61  ;;  %v27254_v54 = vpop.xlane.xlu1 %10598  ;;  %v11130_v6 = vpop.xlane.xlu0 %11129  ;;  %v11473_v40 = vmul.f32 %v23701_v2, %v29778_v7  ;;  %22972 = vmatprep.mubr.msk.f32.mxu0 %vm23965_vm1, %v29603_v28  ;;  %v29780_v61 = vld [vmem:[#allocation80_spill] sm:$0xff]  ;;  %v29781_v7 = vld [vmem:[#allocation81_spill] sm:$0xff] }
 0x290   :  { %22980 = vmatprep.subr.mxu0 %v29603_v28  ;;  %v27265_v20 = vpop.eup %23702  ;;  %23718 = vrcp.f32 %v11130_v6  ;;  %v10745_v2 = vsub.f32 %v29780_v61, %v26974_v17 }
 0x291   :  { %29779 = vst [vmem:[#allocation13_spill] sm:$0xff] %v27265_v20  ;;  %v27269_v10 = vpop.eup %23704  ;;  %22968 = vmatmul.mubr.msk.f32.vlgmr.msra.gmra.mrb[158].mxu1 %vm10257_vm2, %v11473_v40  ;;  %21169 = vst.msk [vmem:[%s29130_s4 + $0xf8] sm:$0xff] %vm10257_vm2, %v11473_v40  ;;  %23720 = vpow2.f32 %v10968_v32  ;;  %v10746_v40 = vsub.f32 %v29781_v7, %v27002_v8  ;;  %v306_v32 = vld [vmem:[%s29129_s2 + $0x110] sm:$0xff]  ;;  %v11305_v47 = vsel %vm10257_vm2, %v27265_v20, 0.0 }
 0x292   :  { %11300 = vadd.xlane.f32.xlu1 %v11299_v24  ;;  %v23707_v63 = vpop.eup %23706  ;;  %22976 = vmatpush3.msra.mxu1 %v305_v29  ;;  %23722 = vpow2.f32 %v10970_v1  ;;  %v29782_v24 = vld [vmem:[#allocation29_spill] sm:$0xff]  ;;  %v11308_v8 = vsel %vm10257_vm2, %v27269_v10, 0.0  ;;  %v10976_v29 = vmul.f32 1.442695, %v10745_v2 }
 0x293   :  { %11303 = vadd.xlane.f32.xlu0 %v11302_v4  ;;  %v11133_v48 = vpop.xlane.xlu1 %11132  ;;  %v27280_v6 = vpop.xlane.xlu0 %10601  ;;  %v11475_v37 = vmul.f32 %v23707_v63, %v29782_v24  ;;  %22977 = vmatprep.mubr.msk.f32.mxu1 %vm23965_vm1, %v29603_v28  ;;  %v29784_v4 = vld [vmem:[#allocation83_spill] sm:$0xff]  ;;  %v10978_v7 = vmul.f32 1.442695, %v10746_v40  ;;  %v29785_v24 = vld [vmem:[#allocation85_spill] sm:$0xff] }
 0x294   :  { %22985 = vmatprep.subr.mxu1 %v29603_v28  ;;  %v27291_v17 = vpop.eup %23708  ;;  %23724 = vrcp.f32 %v11133_v48  ;;  %v10747_v63 = vsub.f32 %v29784_v4, %v27030_v12 }
 0x295   :  { %29783 = vst [vmem:[#allocation114_spill] sm:$0xff] %v27291_v17  ;;  %v27295_v1 = vpop.eup %23710  ;;  %22973 = vmatmul.mubr.msk.f32.vlgmr.msra.gmra.mrb[160].mxu0 %vm10257_vm2, %v11475_v37  ;;  %21170 = vst.msk [vmem:[%s29130_s4 + $0x100] sm:$0xff] %vm10257_vm2, %v11475_v37  ;;  %23726 = vpow2.f32 %v10972_v34  ;;  %v10748_v37 = vsub.f32 %v29785_v24, %v27058_v23  ;;  %v307_v34 = vld [vmem:[%s29129_s2 + $0x118] sm:$0xff]  ;;  %v11311_v2 = vsel %vm10257_vm2, %v27291_v17, 0.0 }
 0x296   :  { %11306 = vadd.xlane.f32.xlu1 %v11305_v47  ;;  %v23713_v30 = vpop.eup %23712  ;;  %22981 = vmatpush3.msra.mxu0 %v306_v32  ;;  %23728 = vpow2.f32 %v10974_v0  ;;  %v29786_v47 = vld [vmem:[#allocation31_spill] sm:$0xff]  ;;  %v11314_v23 = vsel %vm10257_vm2, %v27295_v1, 0.0  ;;  %v10980_v32 = vmul.f32 1.442695, %v10747_v63 }
 0x297   :  { %11309 = vadd.xlane.f32.xlu0 %v11308_v8  ;;  %v27306_v61 = vpop.xlane.xlu1 %10604  ;;  %v11136_v48 = vpop.xlane.xlu0 %11135  ;;  %v11477_v20 = vmul.f32 %v23713_v30, %v29786_v47  ;;  %22982 = vmatprep.mubr.msk.f32.mxu0 %vm23965_vm1, %v29603_v28  ;;  %v29788_v8 = vld [vmem:[#allocation87_spill] sm:$0xff]  ;;  %v10982_v24 = vmul.f32 1.442695, %v10748_v37  ;;  %v29789_v47 = vld [vmem:[#allocation88_spill] sm:$0xff] }
 0x298   :  { %22990 = vmatprep.subr.mxu0 %v29603_v28  ;;  %v27317_v12 = vpop.eup %23714  ;;  %23730 = vrcp.f32 %v11136_v48  ;;  %v10749_v30 = vsub.f32 %v29788_v8, %v27086_v11 }
 0x299   :  { %29787 = vst [vmem:[#allocation14_spill] sm:$0xff] %v27317_v12  ;;  %v27321_v0 = vpop.eup %23716  ;;  %22978 = vmatmul.mubr.msk.f32.vlgmr.msra.gmra.mrb[160].mxu1 %vm10257_vm2, %v11477_v20  ;;  %21171 = vst.msk [vmem:[%s29130_s4 + $0x108] sm:$0xff] %vm10257_vm2, %v11477_v20  ;;  %23732 = vpow2.f32 %v10976_v29  ;;  %v10750_v20 = vsub.f32 %v29789_v47, %v27114_v26  ;;  %v308_v29 = vld [vmem:[%s29129_s2 + $0x120] sm:$0xff]  ;;  %v11317_v63 = vsel %vm10257_vm2, %v27317_v12, 0.0 }
 0x29a   :  { %11312 = vadd.xlane.f32.xlu1 %v11311_v2  ;;  %v23719_v40 = vpop.eup %23718  ;;  %22986 = vmatpush3.msra.mxu1 %v307_v34  ;;  %23734 = vpow2.f32 %v10978_v7  ;;  %v29790_v2 = vld [vmem:[#allocation33_spill] sm:$0xff]  ;;  %v11320_v26 = vsel %vm10257_vm2, %v27321_v0, 0.0  ;;  %v10984_v34 = vmul.f32 1.442695, %v10749_v30 }
 0x29b   :  { %11315 = vadd.xlane.f32.xlu0 %v11314_v23  ;;  %v11139_v4 = vpop.xlane.xlu1 %11138  ;;  %v27332_v48 = vpop.xlane.xlu0 %10607  ;;  %v11479_v17 = vmul.f32 %v23719_v40, %v29790_v2  ;;  %22987 = vmatprep.mubr.msk.f32.mxu1 %vm23965_vm1, %v29603_v28  ;;  %v29792_v23 = vld [vmem:[#allocation90_spill] sm:$0xff]  ;;  %v10986_v47 = vmul.f32 1.442695, %v10750_v20  ;;  %v29793_v2 = vld [vmem:[#allocation93_spill] sm:$0xff] }
 0x29c   :  { %22995 = vmatprep.subr.mxu1 %v29603_v28  ;;  %v27343_v11 = vpop.eup %23720  ;;  %23736 = vrcp.f32 %v11139_v4  ;;  %v10751_v40 = vsub.f32 %v29792_v23, %v27142_v25 }
 0x29d   :  { %29791 = vst [vmem:[#allocation115_spill] sm:$0xff] %v27343_v11  ;;  %v27347_v7 = vpop.eup %23722  ;;  %22983 = vmatmul.mubr.msk.f32.vlgmr.msra.gmra.mrb[162].mxu0 %vm10257_vm2, %v11479_v17  ;;  %21172 = vst.msk [vmem:[%s29130_s4 + $0x110] sm:$0xff] %vm10257_vm2, %v11479_v17  ;;  %23738 = vpow2.f32 %v10980_v32  ;;  %v10752_v17 = vsub.f32 %v29793_v2, %v27170_v51  ;;  %v309_v32 = vld [vmem:[%s29129_s2 + $0x128] sm:$0xff]  ;;  %v11323_v30 = vsel %vm10257_vm2, %v27343_v11, 0.0 }
 0x29e   :  { %11318 = vadd.xlane.f32.xlu1 %v11317_v63  ;;  %v23725_v37 = vpop.eup %23724  ;;  %22991 = vmatpush3.msra.mxu0 %v308_v29  ;;  %23740 = vpow2.f32 %v10982_v24  ;;  %v29794_v63 = vld [vmem:[#allocation35_spill] sm:$0xff]  ;;  %v11326_v51 = vsel %vm10257_vm2, %v27347_v7, 0.0  ;;  %v10988_v29 = vmul.f32 1.442695, %v10751_v40 }
 0x29f   :  { %11321 = vadd.xlane.f32.xlu0 %v11320_v26  ;;  %v27358_v8 = vpop.xlane.xlu1 %10610  ;;  %v11142_v4 = vpop.xlane.xlu0 %11141  ;;  %v11481_v12 = vmul.f32 %v23725_v37, %v29794_v63  ;;  %22992 = vmatprep.mubr.msk.f32.mxu0 %vm23965_vm1, %v29603_v28  ;;  %v29796_v26 = vld [vmem:[#allocation94_spill] sm:$0xff]  ;;  %v10990_v2 = vmul.f32 1.442695, %v10752_v17  ;;  %v29797_v63 = vld [vmem:[#allocation96_spill] sm:$0xff] }
 0x2a0   :  { %23000 = vmatprep.subr.mxu0 %v29603_v28  ;;  %v27369_v25 = vpop.eup %23726  ;;  %23742 = vrcp.f32 %v11142_v4  ;;  %v10753_v37 = vsub.f32 %v29796_v26, %v27202_v13 }
 0x2a1   :  { %29795 = vst [vmem:[#allocation62_spill] sm:$0xff] %v27369_v25  ;;  %v27373_v24 = vpop.eup %23728  ;;  %22988 = vmatmul.mubr.msk.f32.vlgmr.msra.gmra.mrb[162].mxu1 %vm10257_vm2, %v11481_v12  ;;  %21173 = vst.msk [vmem:[%s29130_s4 + $0x118] sm:$0xff] %vm10257_vm2, %v11481_v12  ;;  %23744 = vpow2.f32 %v10984_v34  ;;  %v10754_v12 = vsub.f32 %v29797_v63, %v27228_v59  ;;  %v310_v34 = vld [vmem:[%s29129_s2 + $0x130] sm:$0xff]  ;;  %v11329_v40 = vsel %vm10257_vm2, %v27369_v25, 0.0 }
 0x2a2   :  { %11324 = vadd.xlane.f32.xlu1 %v11323_v30  ;;  %v23731_v20 = vpop.eup %23730  ;;  %22996 = vmatpush3.msra.mxu1 %v309_v32  ;;  %23746 = vpow2.f32 %v10986_v47  ;;  %v29798_v30 = vld [vmem:[#allocation91_spill] sm:$0xff]  ;;  %v11332_v59 = vsel %vm10257_vm2, %v27373_v24, 0.0  ;;  %v10992_v32 = vmul.f32 1.442695, %v10753_v37 }
 0x2a3   :  { %11327 = vadd.xlane.f32.xlu0 %v11326_v51  ;;  %v11145_v23 = vpop.xlane.xlu1 %11144  ;;  %v27384_v4 = vpop.xlane.xlu0 %10613  ;;  %v11483_v11 = vmul.f32 %v23731_v20, %v29798_v30  ;;  %22997 = vmatprep.mubr.msk.f32.mxu1 %vm23965_vm1, %v29603_v28  ;;  %v29800_v51 = vld [vmem:[#allocation99_spill] sm:$0xff]  ;;  %v29801_v30 = vld [vmem:[#allocation37_spill] sm:$0xff] }
 0x2a4   :  { %23005 = vmatprep.subr.mxu1 %v29603_v28  ;;  %v27395_v13 = vpop.eup %23732  ;;  %23748 = vrcp.f32 %v11145_v23  ;;  %v10755_v20 = vsub.f32 %v29800_v51, %v27254_v54  ;;  %v10994_v23 = vmul.f32 1.442695, %v10754_v12  ;;  %v29803_v54 = vld [vmem:[#allocation100_spill] sm:$0xff] }
 0x2a5   :  { %v27399_v47 = vpop.eup %23734  ;;  %22993 = vmatmul.mubr.msk.f32.vlgmr.msra.gmra.mrb[164].mxu0 %vm10257_vm2, %v11483_v11  ;;  %21174 = vst.msk [vmem:[%s29130_s4 + $0x120] sm:$0xff] %vm10257_vm2, %v11483_v11  ;;  %23750 = vpow2.f32 %v10988_v29  ;;  %v311_v11 = vld [vmem:[%s29129_s2 + $0x138] sm:$0xff]  ;;  %v10756_v37 = vsub.f32 %v29803_v54, %v27280_v6 }
 0x2a6   :  { %29799 = vst [vmem:[#allocation15_spill] sm:$0xff] %v27399_v47  ;;  %11330 = vadd.xlane.f32.xlu1 %v11329_v40  ;;  %v23737_v17 = vpop.eup %23736  ;;  %23001 = vmatpush3.msra.mxu0 %v310_v34  ;;  %23752 = vpow2.f32 %v10990_v2  ;;  %v11335_v2 = vsel %vm10257_vm2, %v27395_v13, 0.0  ;;  %v11338_v34 = vsel %vm10257_vm2, %v27399_v47, 0.0  ;;  %v10996_v6 = vmul.f32 1.442695, %v10755_v20 }
 0x2a7   :  { %11333 = vadd.xlane.f32.xlu0 %v11332_v59  ;;  %v27410_v26 = vpop.xlane.xlu1 %10616  ;;  %v11485_v25 = vmul.f32 %v23737_v17, %v29801_v30  ;;  %23002 = vmatprep.mubr.msk.f32.mxu0 %vm23965_vm1, %v29603_v28  ;;  %v27419_v29 = vpop.eup %23738  ;;  %v29804_v59 = vld [vmem:[#allocation102_spill] sm:$0xff]  ;;  %v10998_v20 = vmul.f32 1.442695, %v10756_v37 }
 0x2a8   :  { %v11148_v63 = vpop.xlane.xlu0 %11147  ;;  %23010 = vmatprep.subr.mxu0 %v29603_v28  ;;  %29802 = vst [vmem:[#allocation73_spill] sm:$0xff] %v27419_v29  ;;  %v27425_v12 = vpop.eup %23740  ;;  %v10757_v17 = vsub.f32 %v29804_v59, %v27306_v61 }
 0x2a9   :  { %23754 = vrcp.f32 %v11148_v63  ;;  %22998 = vmatmul.mubr.msk.f32.vlgmr.msra.gmra.mrb[164].mxu1 %vm10257_vm2, %v11485_v25  ;;  %21175 = vst.msk [vmem:[%s29130_s4 + $0x128] sm:$0xff] %vm10257_vm2, %v11485_v25  ;;  %v29805_v63 = vld [vmem:[#allocation105_spill] sm:$0xff]  ;;  %v29806_v25 = vld [vmem:[#allocation38_spill] sm:$0xff] }
 0x2aa   :  { %11336 = vadd.xlane.f32.xlu1 %v11335_v2  ;;  %v23743_v40 = vpop.eup %23742  ;;  %23756 = vpow2.f32 %v10992_v32  ;;  %23006 = vmatpush3.msra.mxu1 %v311_v11  ;;  %v10758_v30 = vsub.f32 %v29805_v63, %v27332_v48  ;;  %v312_v32 = vld [vmem:[%s29129_s2 + $0x140] sm:$0xff]  ;;  %v11341_v48 = vsel %vm10257_vm2, %v27419_v29, 0.0  ;;  %v11344_v11 = vsel %vm10257_vm2, %v27425_v12, 0.0  ;;  %v29809_v29 = vld [vmem:[#allocation39_spill] sm:$0xff] }
 0x2ab   :  { %11339 = vadd.xlane.f32.xlu0 %v11338_v34  ;;  %v11151_v51 = vpop.xlane.xlu1 %11150  ;;  %23758 = vpow2.f32 %v10994_v23  ;;  %v11487_v2 = vmul.f32 %v23743_v40, %v29806_v25  ;;  %23007 = vmatprep.mubr.msk.f32.mxu1 %vm23965_vm1, %v29603_v28  ;;  %v27447_v61 = vpop.eup %23744  ;;  %v11000_v37 = vmul.f32 1.442695, %v10757_v17  ;;  %v29811_v17 = vld [vmem:[#allocation110_spill] sm:$0xff] }
 0x2ac   :  { %v27438_v54 = vpop.xlane.xlu0 %10619  ;;  %23015 = vmatprep.subr.mxu1 %v29603_v28  ;;  %29807 = vst [vmem:[#allocation16_spill] sm:$0xff] %v27447_v61  ;;  %23760 = vrcp.f32 %v11151_v51  ;;  %v27451_v23 = vpop.eup %23746  ;;  %v11002_v59 = vmul.f32 1.442695, %v10758_v30  ;;  %v29808_v51 = vld [vmem:[#allocation108_spill] sm:$0xff]  ;;  %v10760_v30 = vsub.f32 %v29811_v17, %v27384_v4  ;;  %v29812_v4 = vld [vmem:[#allocation113_spill] sm:$0xff]  ;;  %v29814_v17 = vld [vmem:[#allocation3_spill] sm:$0xff] }
 0x2ad   :  { %23003 = vmatmul.mubr.msk.f32.vlgmr.msra.gmra.mrb[166].mxu0 %vm10257_vm2, %v11487_v2  ;;  %21176 = vst.msk [vmem:[%s29130_s4 + $0x130] sm:$0xff] %vm10257_vm2, %v11487_v2  ;;  %23762 = vpow2.f32 %v10996_v6  ;;  %v10759_v63 = vsub.f32 %v29808_v51, %v27358_v8  ;;  %v313_v2 = vld [vmem:[%s29129_s2 + $0x148] sm:$0xff]  ;;  %v11347_v8 = vsel %vm10257_vm2, %v27447_v61, 0.0  ;;  %v29813_v51 = vld [vmem:[#allocation40_spill] sm:$0xff]  ;;  %v10762_v61 = vsub.f32 %v29814_v17, %v27438_v54 }
 0x2ae   :  { %11342 = vadd.xlane.f32.xlu1 %v11341_v48  ;;  %v23749_v34 = vpop.eup %23748  ;;  %23011 = vmatpush3.msra.mxu0 %v312_v32  ;;  %23764 = vpow2.f32 %v10998_v20  ;;  %v10761_v48 = vsub.f32 %v29812_v4, %v27410_v26 }
 0x2af   :  { %11345 = vadd.xlane.f32.xlu0 %v11344_v11  ;;  %v27460_v40 = vpop.xlane.xlu1 %10622  ;;  %v11489_v47 = vmul.f32 %v23749_v34, %v29809_v29  ;;  %23012 = vmatprep.mubr.msk.f32.mxu0 %vm23965_vm1, %v29603_v28  ;;  %v27471_v6 = vpop.eup %23750  ;;  %v11350_v29 = vsel %vm10257_vm2, %v27451_v23, 0.0  ;;  %v11004_v34 = vmul.f32 1.442695, %v10759_v63 }
 0x2b0   :  { %v11154_v25 = vpop.xlane.xlu0 %11153  ;;  %23020 = vmatprep.subr.mxu0 %v29603_v28  ;;  %29810 = vst [vmem:[#allocation4_spill] sm:$0xff] %v27471_v6  ;;  %v27477_v32 = vpop.eup %23752 }
 0x2b1   :  { %23766 = vrcp.f32 %v11154_v25  ;;  %23008 = vmatmul.mubr.msk.f32.vlgmr.msra.gmra.mrb[166].mxu1 %vm10257_vm2, %v11489_v47  ;;  %21177 = vst.msk [vmem:[%s29130_s4 + $0x138] sm:$0xff] %vm10257_vm2, %v11489_v47  ;;  %v11356_v54 = vsel %vm10257_vm2, %v27477_v32, 0.0 }
 0x2b2   :  { %11348 = vadd.xlane.f32.xlu1 %v11347_v8  ;;  %23768 = vpow2.f32 %v11000_v37  ;;  %23016 = vmatpush3.msra.mxu1 %v313_v2  ;;  %v314_v37 = vld [vmem:[%s29129_s2 + $0x150] sm:$0xff]  ;;  %v11006_v2 = vmul.f32 1.442695, %v10760_v30 }
 0x2b3   :  { %v23755_v20 = vpop.eup %23754  ;;  %11351 = vadd.xlane.f32.xlu0 %v11350_v29  ;;  %v11157_v11 = vpop.xlane.xlu1 %11156  ;;  %23770 = vpow2.f32 %v11002_v59  ;;  %23017 = vmatprep.mubr.msk.f32.mxu1 %vm23965_vm1, %v29603_v28  ;;  %v11353_v59 = vsel %vm10257_vm2, %v27471_v6, 0.0  ;;  %v11008_v29 = vmul.f32 1.442695, %v10761_v48 }
 0x2b4   :  { %v11491_v25 = vmul.f32 %v23755_v20, %v29813_v51  ;;  %v10626_v47 = vpop.xlane.xlu0 %10625  ;;  %23025 = vmatprep.subr.mxu1 %v29603_v28  ;;  %v27497_v26 = vpop.eup %23756  ;;  %23772 = vrcp.f32 %v11157_v11  ;;  %v29815_v20 = vld [vmem:[#allocation42_spill] sm:$0xff]  ;;  %v11010_v11 = vmul.f32 1.442695, %v10762_v61  ;;  %v29816_v51 = vld [vmem:[#allocation117_spill] sm:$0xff] }
 0x2b5   :  { %v27501_v63 = vpop.eup %23758  ;;  %23774 = vpow2.f32 %v11004_v34  ;;  %v10763_v17 = vsub.f32 %v29816_v51, %v27460_v40  ;;  %v29818_v34 = vld [vmem:[#allocation119_spill] sm:$0xff]  ;;  %v11359_v61 = vsel %vm10257_vm2, %v27497_v26, 0.0 }
 0x2b6   :  { %21178 = vst.msk [vmem:[%s29130_s4 + $0x140] sm:$0xff] %vm10257_vm2, %v11491_v25  ;;  %23013 = vmatmul.mubr.msk.f32.vlgmr.msra.gmra.mrb[168].mxu0 %vm10257_vm2, %v11491_v25  ;;  %11354 = vadd.xlane.f32.xlu1 %v11353_v59  ;;  %v23761_v8 = vpop.eup %23760  ;;  %v315_v25 = vld [vmem:[%s29129_s2 + $0x158] sm:$0xff]  ;;  %23776 = vpow2.f32 %v11006_v2  ;;  %v11362_v40 = vsel %vm10257_vm2, %v27501_v63, 0.0 }
 0x2b7   :  { %11357 = vadd.xlane.f32.xlu0 %v11356_v54  ;;  %v10629_v30 = vpop.xlane.xlu1 %10628  ;;  %23021 = vmatpush3.msra.mxu0 %v314_v37  ;;  %v11493_v4 = vmul.f32 %v23761_v8, %v29815_v20  ;;  %v27519_v48 = vpop.eup %23762  ;;  %v10764_v37 = vsub.f32 %v29818_v34, %v10626_v47  ;;  %v29820_v2 = vld [vmem:[#allocation5_spill] sm:$0xff]  ;;  %v11012_v20 = vmul.f32 1.442695, %v10763_v17 }
 0x2b8   :  { %v11160_v6 = vpop.xlane.xlu0 %11159  ;;  %23022 = vmatprep.mubr.msk.f32.mxu0 %vm23965_vm1, %v29603_v28  ;;  %23030 = vmatprep.subr.mxu0 %v29603_v28  ;;  %29817 = vst [vmem:[#allocation65_spill] sm:$0xff] %v27519_v48  ;;  %v27531_v59 = vpop.eup %23764  ;;  %v10765_v47 = vsub.f32 %v29820_v2, %v10629_v30 }
 0x2b9   :  { %21179 = vst.msk [vmem:[%s29130_s4 + $0x148] sm:$0xff] %vm10257_vm2, %v11493_v4  ;;  %23778 = vrcp.f32 %v11160_v6  ;;  %23018 = vmatmul.mubr.msk.f32.vlgmr.msra.gmra.mrb[168].mxu1 %vm10257_vm2, %v11493_v4  ;;  %29819 = vst [vmem:[#allocation17_spill] sm:$0xff] %v27531_v59  ;;  %v11365_v6 = vsel %vm10257_vm2, %v27519_v48, 0.0  ;;  %v11014_v30 = vmul.f32 1.442695, %v10764_v37 }
 0x2ba   :  { %11360 = vadd.xlane.f32.xlu1 %v11359_v61  ;;  %23780 = vpow2.f32 %v11008_v29  ;;  %23026 = vmatpush3.msra.mxu1 %v315_v25  ;;  %v29821_v29 = vld [vmem:[#allocation43_spill] sm:$0xff]  ;;  %v11016_v37 = vmul.f32 1.442695, %v10765_v47 }
 0x2bb   :  { %11363 = vadd.xlane.f32.xlu0 %v11362_v40  ;;  %v11163_v54 = vpop.xlane.xlu1 %11162  ;;  %v23767_v8 = vpop.eup %23766  ;;  %23782 = vpow2.f32 %v11010_v11  ;;  %23027 = vmatprep.mubr.msk.f32.mxu1 %vm23965_vm1, %v29603_v28  ;;  %v29822_v61 = vld [vmem:[#allocation123_spill] sm:$0xff]  ;;  %v316_v11 = vld [vmem:[%s29129_s2 + $0x160] sm:$0xff]  ;;  %v11368_v40 = vsel %vm10257_vm2, %v27531_v59, 0.0 }
 0x2bc   :  { %v10632_v51 = vpop.xlane.xlu0 %10631  ;;  %23035 = vmatprep.subr.mxu1 %v29603_v28  ;;  %v27539_v4 = vpop.eup %23768  ;;  %v11495_v34 = vmul.f32 %v23767_v8, %v29821_v29  ;;  %23784 = vrcp.f32 %v11163_v54  ;;  %v29823_v8 = vld [vmem:[#allocation97_spill] sm:$0xff]  ;;  %v317_v59 = vld [vmem:[%s29129_s2 + $0x168] sm:$0xff] }
 0x2bd   :  { %v10766_v25 = vsub.f32 %v29822_v61, %v10632_v51  ;;  %v27546_v17 = vpop.eup %23770  ;;  %23786 = vpow2.f32 %v11012_v20  ;;  %v29824_v61 = vld [vmem:[#allocation125_spill] sm:$0xff]  ;;  %v11371_v47 = vsel %vm10257_vm2, %v27539_v4, 0.0 }
 0x2be   :  { %11366 = vadd.xlane.f32.xlu1 %v11365_v6  ;;  %v23773_v2 = vpop.eup %23772  ;;  %21180 = vst.msk [vmem:[%s29130_s4 + $0x150] sm:$0xff] %vm10257_vm2, %v11495_v34  ;;  %23023 = vmatmul.mubr.msk.f32.vlgmr.msra.gmra.mrb[170].mxu0 %vm10257_vm2, %v11495_v34  ;;  %23788 = vpow2.f32 %v11014_v30  ;;  %v11374_v34 = vsel %vm10257_vm2, %v27546_v17, 0.0 }
 0x2bf   :  { %11369 = vadd.xlane.f32.xlu0 %v11368_v40  ;;  %v10635_v54 = vpop.xlane.xlu1 %10634  ;;  %v11497_v51 = vmul.f32 %v23773_v2, %v29823_v8  ;;  %v11018_v29 = vmul.f32 1.442695, %v10766_v25  ;;  %23031 = vmatpush3.msra.mxu0 %v316_v11  ;;  %v27565_v20 = vpop.eup %23774 }
 0x2c0   :  { %v10767_v6 = vsub.f32 %v29824_v61, %v10635_v54  ;;  %v11166_v48 = vpop.xlane.xlu0 %11165  ;;  %23032 = vmatprep.mubr.msk.f32.mxu0 %vm23965_vm1, %v29603_v28  ;;  %23040 = vmatprep.subr.mxu0 %v29603_v28  ;;  %v27574_v30 = vpop.eup %23776  ;;  %v29826_v54 = vld [vmem:[#allocation46_spill] sm:$0xff] }
 0x2c1   :  { %21181 = vst.msk [vmem:[%s29130_s4 + $0x158] sm:$0xff] %vm10257_vm2, %v11497_v51  ;;  %23790 = vrcp.f32 %v11166_v48  ;;  %23028 = vmatmul.mubr.msk.f32.vlgmr.msra.gmra.mrb[170].mxu1 %vm10257_vm2, %v11497_v51  ;;  %29825 = vst [vmem:[#allocation120_spill] sm:$0xff] %v27574_v30  ;;  %v29827_v51 = vld [vmem:[#allocation7_spill] sm:$0xff] }
 0x2c2   :  { %11372 = vadd.xlane.f32.xlu1 %v11371_v47  ;;  %23792 = vpow2.f32 %v11016_v37  ;;  %23036 = vmatpush3.msra.mxu1 %v317_v59  ;;  %v11020_v40 = vmul.f32 1.442695, %v10767_v6  ;;  %v11377_v37 = vsel %vm10257_vm2, %v27565_v20, 0.0  ;;  %v318_v59 = vld [vmem:[%s29129_s2 + $0x170] sm:$0xff]  ;;  %v11380_v6 = vsel %vm10257_vm2, %v27574_v30, 0.0  ;;  %v319_v30 = vld [vmem:[%s29129_s2 + $0x178] sm:$0xff] }
 0x2c3   :  { %11375 = vadd.xlane.f32.xlu0 %v11374_v34  ;;  %v11169_v25 = vpop.xlane.xlu1 %11168  ;;  %v23779_v11 = vpop.eup %23778  ;;  %23794 = vpow2.f32 %v11018_v29  ;;  %23037 = vmatprep.mubr.msk.f32.mxu1 %vm23965_vm1, %v29603_v28 }
 0x2c4   :  { %v10638_v2 = vpop.xlane.xlu0 %10637  ;;  %23045 = vmatprep.subr.mxu1 %v29603_v28  ;;  %v27579_v48 = vpop.eup %23780  ;;  %v11499_v8 = vmul.f32 %v23779_v11, %v29826_v54  ;;  %23796 = vrcp.f32 %v11169_v25  ;;  %v29828_v11 = vld [vmem:[#allocation48_spill] sm:$0xff] }
 0x2c5   :  { %v10768_v61 = vsub.f32 %v29827_v51, %v10638_v2  ;;  %v27588_v29 = vpop.eup %23782  ;;  %23798 = vpow2.f32 %v11020_v40  ;;  %v29829_v54 = vld [vmem:[#allocation128_spill] sm:$0xff] }
 0x2c6   :  { %11378 = vadd.xlane.f32.xlu1 %v11377_v37  ;;  %v23785_v47 = vpop.eup %23784  ;;  %21182 = vst.msk [vmem:[%s29130_s4 + $0x160] sm:$0xff] %vm10257_vm2, %v11499_v8  ;;  %23033 = vmatmul.mubr.msk.f32.vlgmr.msra.gmra.mrb[172].mxu0 %vm10257_vm2, %v11499_v8  ;;  %v11383_v8 = vsel %vm10257_vm2, %v27579_v48, 0.0 }
 0x2c7   :  { %v11022_v34 = vmul.f32 1.442695, %v10768_v61  ;;  %11381 = vadd.xlane.f32.xlu0 %v11380_v6  ;;  %v10641_v25 = vpop.xlane.xlu1 %10640  ;;  %v11501_v2 = vmul.f32 %v23785_v47, %v29828_v11  ;;  %23041 = vmatpush3.msra.mxu0 %v318_v59  ;;  %v27607_v61 = vpop.eup %23786  ;;  %v11386_v59 = vsel %vm10257_vm2, %v27588_v29, 0.0 }
 0x2c8   :  { %v10769_v51 = vsub.f32 %v29829_v54, %v10641_v25  ;;  %v11172_v37 = vpop.xlane.xlu0 %11171  ;;  %23042 = vmatprep.mubr.msk.f32.mxu0 %vm23965_vm1, %v29603_v28  ;;  %23050 = vmatprep.subr.mxu0 %v29603_v28  ;;  %v27616_v6 = vpop.eup %23788 }
 0x2c9   :  { %23800 = vpow2.f32 %v11022_v34  ;;  %21183 = vst.msk [vmem:[%s29130_s4 + $0x168] sm:$0xff] %vm10257_vm2, %v11501_v2  ;;  %23038 = vmatmul.mubr.msk.f32.vlgmr.msra.gmra.mrb[172].mxu1 %vm10257_vm2, %v11501_v2  ;;  %29830 = vst [vmem:[#allocation18_spill] sm:$0xff] %v27616_v6  ;;  %v29832_v2 = vld [vmem:[#allocation44_spill] sm:$0xff] }
 0x2ca   :  { %v11024_v40 = vmul.f32 1.442695, %v10769_v51  ;;  %23802 = vrcp.f32 %v11172_v37  ;;  %11384 = vadd.xlane.f32.xlu1 %v11383_v8  ;;  %23046 = vmatpush3.msra.mxu1 %v319_v30  ;;  %v11389_v51 = vsel %vm10257_vm2, %v27607_v61, 0.0  ;;  %v320_v30 = vld [vmem:[%s29129_s2 + $0x180] sm:$0xff]  ;;  %v11392_v8 = vsel %vm10257_vm2, %v27616_v6, 0.0 }
 0x2cb   :  { %11387 = vadd.xlane.f32.xlu0 %v11386_v59  ;;  %v11175_v47 = vpop.xlane.xlu1 %11174  ;;  %v23791_v34 = vpop.eup %23790  ;;  %23047 = vmatprep.mubr.msk.f32.mxu1 %vm23965_vm1, %v29603_v28 }
 0x2cc   :  { %23804 = vpow2.f32 %v11024_v40  ;;  %v11178_v25 = vpop.xlane.xlu0 %11177  ;;  %23055 = vmatprep.subr.mxu1 %v29603_v28  ;;  %v27621_v11 = vpop.eup %23792  ;;  %v11503_v54 = vmul.f32 %v23791_v34, %v29832_v2 }
 0x2cd   :  { %29831 = vst [vmem:[#allocation121_spill] sm:$0xff] %v27621_v11  ;;  %23806 = vrcp.f32 %v11175_v47  ;;  %v27629_v37 = vpop.eup %23794  ;;  %v29834_v47 = vld [vmem:[#allocation47_spill] sm:$0xff] }
 0x2ce   :  { %29833 = vst [vmem:[#allocation68_spill] sm:$0xff] %v27629_v37  ;;  %23808 = vrcp.f32 %v11178_v25  ;;  %11390 = vadd.xlane.f32.xlu1 %v11389_v51  ;;  %v23797_v40 = vpop.eup %23796  ;;  %21184 = vst.msk [vmem:[%s29130_s4 + $0x170] sm:$0xff] %vm10257_vm2, %v11503_v54  ;;  %23043 = vmatmul.mubr.msk.f32.vlgmr.msra.gmra.mrb[174].mxu0 %vm10257_vm2, %v11503_v54  ;;  %v321_v25 = vld [vmem:[%s29129_s2 + $0x188] sm:$0xff]  ;;  %v11395_v51 = vsel %vm10257_vm2, %v27621_v11, 0.0 }
 0x2cf   :  { %11393 = vadd.xlane.f32.xlu0 %v11392_v8  ;;  %v11181_v59 = vpop.xlane.xlu1 %11180  ;;  %v11505_v34 = vmul.f32 %v23797_v40, %v29834_v47  ;;  %23051 = vmatpush3.msra.mxu0 %v320_v30  ;;  %v27647_v54 = vpop.eup %23798  ;;  %v11398_v30 = vsel %vm10257_vm2, %v27629_v37, 0.0 }
 0x2d0   :  { %23810 = vrcp.f32 %v11181_v59  ;;  %v11184_v2 = vpop.xlane.xlu0 %11183  ;;  %23052 = vmatprep.mubr.msk.f32.mxu0 %vm23965_vm1, %v29603_v28  ;;  %23060 = vmatprep.subr.mxu0 %v29603_v28  ;;  %29835 = vst [vmem:[#allocation19_spill] sm:$0xff] %v27647_v54 }
 0x2d1   :  { %23812 = vrcp.f32 %v11184_v2  ;;  %21185 = vst.msk [vmem:[%s29130_s4 + $0x178] sm:$0xff] %vm10257_vm2, %v11505_v34  ;;  %23048 = vmatmul.mubr.msk.f32.vlgmr.msra.gmra.mrb[174].mxu1 %vm10257_vm2, %v11505_v34  ;;  %v29837_v2 = vld [vmem:[#allocation103_spill] sm:$0xff]  ;;  %v11401_v34 = vsel %vm10257_vm2, %v27647_v54, 0.0 }
 0x2d2   :  { %11396 = vadd.xlane.f32.xlu1 %v11395_v51  ;;  %23056 = vmatpush3.msra.mxu1 %v321_v25  ;;  %v322_v51 = vld [vmem:[%s29129_s2 + $0x190] sm:$0xff] }
 0x2d3   :  { %v27656_v8 = vpop.eup %23800  ;;  %11399 = vadd.xlane.f32.xlu0 %v11398_v30  ;;  %v11187_v40 = vpop.xlane.xlu1 %11186  ;;  %23057 = vmatprep.mubr.msk.f32.mxu1 %vm23965_vm1, %v29603_v28 }
 0x2d4   :  { %29836 = vst [vmem:[#allocation77_spill] sm:$0xff] %v27656_v8  ;;  %v23803_v59 = vpop.eup %23802  ;;  %23814 = vrcp.f32 %v11187_v40  ;;  %v11190_v47 = vpop.xlane.xlu0 %11189  ;;  %23065 = vmatprep.subr.mxu1 %v29603_v28  ;;  %v11404_v25 = vsel %vm10257_vm2, %v27656_v8, 0.0  ;;  %v29839_v8 = vld [vmem:[#allocation106_spill] sm:$0xff] }
 0x2d5   :  { %v11507_v11 = vmul.f32 %v23803_v59, %v29837_v2  ;;  %23816 = vrcp.f32 %v11190_v47  ;;  %v29838_v2 = vld [vmem:[#allocation50_spill] sm:$0xff] }
 0x2d6   :  { %v27667_v30 = vpop.eup %23804  ;;  %11402 = vadd.xlane.f32.xlu1 %v11401_v34  ;;  %v323_v34 = vld [vmem:[%s29129_s2 + $0x198] sm:$0xff] }
 0x2d7   :  { %v23807_v40 = vpop.eup %23806  ;;  %21186 = vst.msk [vmem:[%s29130_s4 + $0x180] sm:$0xff] %vm10257_vm2, %v11507_v11  ;;  %23053 = vmatmul.mubr.msk.f32.vlgmr.msra.gmra.mrb[176].mxu0 %vm10257_vm2, %v11507_v11  ;;  %11405 = vadd.xlane.f32.xlu0 %v11404_v25  ;;  %v11193_v59 = vpop.xlane.xlu1 %11192  ;;  %v11407_v11 = vsel %vm10257_vm2, %v27667_v30, 0.0  ;;  %v324_v25 = vld [vmem:[%s29129_s2 + $0x1a0] sm:$0xff] }
 0x2d8   :  { %v23809_v47 = vpop.eup %23808  ;;  %v11509_v54 = vmul.f32 %v23807_v40, %v29838_v2  ;;  %23818 = vrcp.f32 %v11193_v59  ;;  %v11196_v37 = vpop.xlane.xlu0 %11195  ;;  %23061 = vmatpush3.msra.mxu0 %v322_v51  ;;  %23062 = vmatprep.mubr.msk.f32.mxu0 %vm23965_vm1, %v29603_v28  ;;  %v29840_v59 = vld [vmem:[#allocation10_spill] sm:$0xff] }
 0x2d9   :  { %v11511_v6 = vmul.f32 %v23809_v47, %v29839_v8  ;;  %23820 = vrcp.f32 %v11196_v37  ;;  %23070 = vmatprep.subr.mxu0 %v29603_v28 }
 0x2da   :  { %v23811_v51 = vpop.eup %23810  ;;  %21187 = vst.msk [vmem:[%s29130_s4 + $0x188] sm:$0xff] %vm10257_vm2, %v11509_v54  ;;  %23058 = vmatmul.mubr.msk.f32.vlgmr.msra.gmra.mrb[176].mxu1 %vm10257_vm2, %v11509_v54  ;;  %11408 = vadd.xlane.f32.xlu1 %v11407_v11  ;;  %v325_v54 = vld [vmem:[%s29129_s2 + $0x1a8] sm:$0xff] }
 0x2db   :  { %v23813_v8 = vpop.eup %23812  ;;  %21188 = vst.msk [vmem:[%s29130_s4 + $0x190] sm:$0xff] %vm10257_vm2, %v11511_v6  ;;  %v11513_v37 = vmul.f32 %v23811_v51, %v26660_v41  ;;  %23063 = vmatmul.mubr.msk.f32.vlgmr.msra.gmra.mrb[178].mxu0 %vm10257_vm2, %v11511_v6  ;;  %23066 = vmatpush3.msra.mxu1 %v323_v34  ;;  %v11199_v40 = vpop.xlane.xlu1 %11198  ;;  %v326_v41 = vld [vmem:[%s29129_s2 + $0x1b0] sm:$0xff]  ;;  %v29841_v51 = vld [vmem:[#allocation107_spill] sm:$0xff] }
 0x2dc   :  { %v11515_v47 = vmul.f32 %v23813_v8, %v29840_v59  ;;  %23822 = vrcp.f32 %v11199_v40  ;;  %v11202_v2 = vpop.xlane.xlu0 %11201  ;;  %23067 = vmatprep.mubr.msk.f32.mxu1 %vm23965_vm1, %v29603_v28  ;;  %23071 = vmatpush3.msra.mxu0 %v324_v25 }
 0x2dd   :  { %21189 = vst.msk [vmem:[%s29130_s4 + $0x198] sm:$0xff] %vm10257_vm2, %v11513_v37  ;;  %23824 = vrcp.f32 %v11202_v2  ;;  %23072 = vmatprep.mubr.msk.f32.mxu0 %vm23965_vm1, %v29603_v28  ;;  %23075 = vmatprep.subr.mxu1 %v29603_v28  ;;  %v29842_v2 = vld [vmem:[#allocation56_spill] sm:$0xff] }
 0x2de   :  { %v23815_v6 = vpop.eup %23814  ;;  %21190 = vst.msk [vmem:[%s29130_s4 + $0x1a0] sm:$0xff] %vm10257_vm2, %v11515_v47  ;;  %23068 = vmatmul.mubr.msk.f32.vlgmr.msra.gmra.mrb[178].mxu1 %vm10257_vm2, %v11513_v37  ;;  %23080 = vmatprep.subr.mxu0 %v29603_v28  ;;  %v327_v37 = vld [vmem:[%s29129_s2 + $0x1b8] sm:$0xff] }
 0x2df   :  { %v23817_v34 = vpop.eup %23816  ;;  %v11517_v11 = vmul.f32 %v23815_v6, %v26702_v52  ;;  %23073 = vmatmul.mubr.msk.f32.vlgmr.msra.gmra.mrb[180].mxu0 %vm10257_vm2, %v11515_v47  ;;  %23076 = vmatpush3.msra.mxu1 %v325_v54  ;;  %v11205_v25 = vpop.xlane.xlu1 %11204  ;;  %v328_v52 = vld [vmem:[%s29129_s2 + $0x1c0] sm:$0xff] }
 0x2e0   :  { %v11519_v8 = vmul.f32 %v23817_v34, %v29841_v51  ;;  %23826 = vrcp.f32 %v11205_v25  ;;  %v11208_v40 = vpop.xlane.xlu0 %11207  ;;  %23077 = vmatprep.mubr.msk.f32.mxu1 %vm23965_vm1, %v29603_v28  ;;  %23081 = vmatpush3.msra.mxu0 %v326_v41 }
 0x2e1   :  { %21191 = vst.msk [vmem:[%s29130_s4 + $0x1a8] sm:$0xff] %vm10257_vm2, %v11517_v11  ;;  %23828 = vrcp.f32 %v11208_v40  ;;  %23082 = vmatprep.mubr.msk.f32.mxu0 %vm23965_vm1, %v29603_v28  ;;  %23085 = vmatprep.subr.mxu1 %v29603_v28 }
 0x2e2   :  { %v23819_v59 = vpop.eup %23818  ;;  %21192 = vst.msk [vmem:[%s29130_s4 + $0x1b0] sm:$0xff] %vm10257_vm2, %v11519_v8  ;;  %23078 = vmatmul.mubr.msk.f32.vlgmr.msra.gmra.mrb[180].mxu1 %vm10257_vm2, %v11517_v11  ;;  %23090 = vmatprep.subr.mxu0 %v29603_v28  ;;  %v329_v11 = vld [vmem:[%s29129_s2 + $0x1c8] sm:$0xff] }
 0x2e3   :  { %v23821_v47 = vpop.eup %23820  ;;  %v11521_v54 = vmul.f32 %v23819_v59, %v29842_v2  ;;  %23083 = vmatmul.mubr.msk.f32.vlgmr.msra.gmra.mrb[182].mxu0 %vm10257_vm2, %v11519_v8  ;;  %23086 = vmatpush3.msra.mxu1 %v327_v37  ;;  %v11211_v41 = vpop.xlane.xlu1 %11210  ;;  %v331_v59 = vld [vmem:[%s29129_s2 + $0x1d8] sm:$0xff] }
 0x2e4   :  { %v11523_v6 = vmul.f32 %v23821_v47, %v26736_v16  ;;  %23830 = vrcp.f32 %v11211_v41  ;;  %v11214_v34 = vpop.xlane.xlu0 %11213  ;;  %23087 = vmatprep.mubr.msk.f32.mxu1 %vm23965_vm1, %v29603_v28  ;;  %23091 = vmatpush3.msra.mxu0 %v328_v52  ;;  %v330_v16 = vld [vmem:[%s29129_s2 + $0x1d0] sm:$0xff] }
 0x2e5   :  { %21193 = vst.msk [vmem:[%s29130_s4 + $0x1b8] sm:$0xff] %vm10257_vm2, %v11521_v54  ;;  %23832 = vrcp.f32 %v11214_v34  ;;  %23092 = vmatprep.mubr.msk.f32.mxu0 %vm23965_vm1, %v29603_v28  ;;  %23095 = vmatprep.subr.mxu1 %v29603_v28 }
 0x2e6   :  { %v23823_v25 = vpop.eup %23822  ;;  %21194 = vst.msk [vmem:[%s29130_s4 + $0x1c0] sm:$0xff] %vm10257_vm2, %v11523_v6  ;;  %23088 = vmatmul.mubr.msk.f32.vlgmr.msra.gmra.mrb[182].mxu1 %vm10257_vm2, %v11521_v54  ;;  %23100 = vmatprep.subr.mxu0 %v29603_v28 }
 0x2e7   :  { %v23825_v51 = vpop.eup %23824  ;;  %v11525_v8 = vmul.f32 %v23823_v25, %v26762_v31  ;;  %23093 = vmatmul.mubr.msk.f32.vlgmr.msra.gmra.mrb[184].mxu0 %vm10257_vm2, %v11523_v6  ;;  %23096 = vmatpush3.msra.mxu1 %v329_v11  ;;  %v11217_v40 = vpop.xlane.xlu1 %11216  ;;  %v332_v31 = vld [vmem:[%s29129_s2 + $0x1e0] sm:$0xff] }
 0x2e8   :  { %v11527_v37 = vmul.f32 %v23825_v51, %v26766_v53  ;;  %23834 = vrcp.f32 %v11217_v40  ;;  %v11220_v52 = vpop.xlane.xlu0 %11219  ;;  %23097 = vmatprep.mubr.msk.f32.mxu1 %vm23965_vm1, %v29603_v28  ;;  %23101 = vmatpush3.msra.mxu0 %v330_v16  ;;  %v11735_v47 = vpop.f32.mrb[128].mxu0 }
 0x2e9   :  { %21195 = vst.msk [vmem:[%s29130_s4 + $0x1c8] sm:$0xff] %vm10257_vm2, %v11525_v8  ;;  %23836 = vrcp.f32 %v11220_v52  ;;  %23102 = vmatprep.mubr.msk.f32.mxu0 %vm23965_vm1, %v29603_v28  ;;  %23105 = vmatprep.subr.mxu1 %v29603_v28  ;;  %v22814_v41 = vpop.f32.mrb[129].mxu0 }
 0x2ea   :  { %v23827_v53 = vpop.eup %23826  ;;  %21196 = vst.msk [vmem:[%s29130_s4 + $0x1d0] sm:$0xff] %vm10257_vm2, %v11527_v37  ;;  %23098 = vmatmul.mubr.msk.f32.vlgmr.msra.gmra.mrb[184].mxu1 %vm10257_vm2, %v11525_v8  ;;  %23110 = vmatprep.subr.mxu0 %v29603_v28 }
 0x2eb   :  { %v23829_v2 = vpop.eup %23828  ;;  %v11529_v54 = vmul.f32 %v23827_v53, %v26790_v55  ;;  %21010 = vst.msk [vmem:[%s29131_s3] sm:$0xff] %vm528_vm0, %v11735_v47  ;;  %23103 = vmatmul.mubr.msk.f32.vlgmr.msra.gmra.mrb[186].mxu0 %vm10257_vm2, %v11527_v37  ;;  %23106 = vmatpush3.msra.mxu1 %v331_v59  ;;  %v11223_v6 = vpop.xlane.xlu1 %11222  ;;  %v333_v55 = vld [vmem:[%s29129_s2 + $0x1e8] sm:$0xff] }
 0x2ec   :  { %v11531_v34 = vmul.f32 %v23829_v2, %v26794_v49  ;;  %23838 = vrcp.f32 %v11223_v6  ;;  %v11226_v11 = vpop.xlane.xlu0 %11225  ;;  %23107 = vmatprep.mubr.msk.f32.mxu1 %vm23965_vm1, %v29603_v28  ;;  %23111 = vmatpush3.msra.mxu0 %v332_v31  ;;  %v334_v49 = vld [vmem:[%s29129_s2 + $0x1f0] sm:$0xff]  ;;  %v335_v31 = vld [vmem:[%s29129_s2 + $0x1f8] sm:$0xff] }
 0x2ed   :  { %21197 = vst.msk [vmem:[%s29130_s4 + $0x1d8] sm:$0xff] %vm10257_vm2, %v11529_v54  ;;  %23840 = vrcp.f32 %v11226_v11  ;;  %v11808_v16 = vpop.f32.mrb[128].mxu1  ;;  %23112 = vmatprep.mubr.msk.f32.mxu0 %vm23965_vm1, %v29603_v28  ;;  %23115 = vmatprep.subr.mxu1 %v29603_v28 }
 0x2ee   :  { %v23831_v25 = vpop.eup %23830  ;;  %21198 = vst.msk [vmem:[%s29130_s4 + $0x1e0] sm:$0xff] %vm10257_vm2, %v11531_v34  ;;  %v22819_v51 = vpop.f32.mrb[129].mxu1  ;;  %23108 = vmatmul.mubr.msk.f32.vlgmr.msra.gmra.mrb[186].mxu1 %vm10257_vm2, %v11529_v54  ;;  %23120 = vmatprep.subr.mxu0 %v29603_v28  ;;  %v29843_v54 = vld [vmem:[#allocation11_spill] sm:$0xff] }
 0x2ef   :  { %21011 = vst.msk [vmem:[%s29131_s3 + $0x8] sm:$0xff] %vm528_vm0, %v11808_v16  ;;  %v23833_v8 = vpop.eup %23832  ;;  %v11533_v40 = vmul.f32 %v23831_v25, %v26818_v18  ;;  %23113 = vmatmul.mubr.msk.f32.vlgmr.msra.gmra.mrb[188].mxu0 %vm10257_vm2, %v11531_v34  ;;  %23116 = vmatpush3.msra.mxu1 %v333_v55  ;;  %v11229_v37 = vpop.xlane.xlu1 %11228  ;;  %v337_v55 = vld [vmem:[%s29129_s2 + $0x208] sm:$0xff] }
 0x2f0   :  { %v11535_v52 = vmul.f32 %v23833_v8, %v26822_v35  ;;  %23842 = vrcp.f32 %v11229_v37  ;;  %v11232_v59 = vpop.xlane.xlu0 %11231  ;;  %23117 = vmatprep.mubr.msk.f32.mxu1 %vm23965_vm1, %v29603_v28  ;;  %23121 = vmatpush3.msra.mxu0 %v334_v49  ;;  %v11881_v18 = vpop.f32.mrb[130].mxu0  ;;  %v336_v35 = vld [vmem:[%s29129_s2 + $0x200] sm:$0xff] }
 0x2f1   :  { %21199 = vst.msk [vmem:[%s29130_s4 + $0x1e8] sm:$0xff] %vm10257_vm2, %v11533_v40  ;;  %23844 = vrcp.f32 %v11232_v59  ;;  %23122 = vmatprep.mubr.msk.f32.mxu0 %vm23965_vm1, %v29603_v28  ;;  %23125 = vmatprep.subr.mxu1 %v29603_v28  ;;  %v22824_v47 = vpop.f32.mrb[131].mxu0  ;;  %v339_v59 = vld [vmem:[%s29129_s2 + $0x218] sm:$0xff] }
 0x2f2   :  { %v23835_v53 = vpop.eup %23834  ;;  %21200 = vst.msk [vmem:[%s29130_s4 + $0x1f0] sm:$0xff] %vm10257_vm2, %v11535_v52  ;;  %23118 = vmatmul.mubr.msk.f32.vlgmr.msra.gmra.mrb[188].mxu1 %vm10257_vm2, %v11533_v40  ;;  %23130 = vmatprep.subr.mxu0 %v29603_v28 }
 0x2f3   :  { %21012 = vst.msk [vmem:[%s29131_s3 + $0x10] sm:$0xff] %vm528_vm0, %v11881_v18  ;;  %v23837_v2 = vpop.eup %23836  ;;  %v11537_v41 = vmul.f32 %v23835_v53, %v29843_v54  ;;  %23123 = vmatmul.mubr.msk.f32.vlgmr.msra.gmra.mrb[190].mxu0 %vm10257_vm2, %v11535_v52  ;;  %23126 = vmatpush3.msra.mxu1 %v335_v31  ;;  %v11235_v6 = vpop.xlane.xlu1 %11234 }
 0x2f4   :  { %v11539_v34 = vmul.f32 %v23837_v2, %v26850_v14  ;;  %23846 = vrcp.f32 %v11235_v6  ;;  %v11238_v11 = vpop.xlane.xlu0 %11237  ;;  %23127 = vmatprep.mubr.msk.f32.mxu1 %vm23965_vm1, %v29603_v28  ;;  %23131 = vmatpush3.msra.mxu0 %v336_v35  ;;  %v11954_v16 = vpop.f32.mrb[130].mxu1  ;;  %v338_v14 = vld [vmem:[%s29129_s2 + $0x210] sm:$0xff] }
 0x2f5   :  { %21201 = vst.msk [vmem:[%s29130_s4 + $0x1f8] sm:$0xff] %vm10257_vm2, %v11537_v41  ;;  %23848 = vrcp.f32 %v11238_v11  ;;  %23132 = vmatprep.mubr.msk.f32.mxu0 %vm23965_vm1, %v29603_v28  ;;  %23135 = vmatprep.subr.mxu1 %v29603_v28  ;;  %v22829_v25 = vpop.f32.mrb[131].mxu1 }
 0x2f6   :  { %v23839_v49 = vpop.eup %23838  ;;  %21202 = vst.msk [vmem:[%s29130_s4 + $0x200] sm:$0xff] %vm10257_vm2, %v11539_v34  ;;  %23128 = vmatmul.mubr.msk.f32.vlgmr.msra.gmra.mrb[190].mxu1 %vm10257_vm2, %v11537_v41  ;;  %23140 = vmatprep.subr.mxu0 %v29603_v28  ;;  %v341_v41 = vld [vmem:[%s29129_s2 + $0x228] sm:$0xff]  ;;  %v343_v25 = vld [vmem:[%s29129_s2 + $0x238] sm:$0xff] }
 0x2f7   :  { %21013 = vst.msk [vmem:[%s29131_s3 + $0x18] sm:$0xff] %vm528_vm0, %v11954_v16  ;;  %v23841_v51 = vpop.eup %23840  ;;  %v11541_v8 = vmul.f32 %v23839_v49, %v26874_v39  ;;  %23133 = vmatmul.mubr.msk.f32.vlgmr.msra.gmra.mrb[192].mxu0 %vm10257_vm2, %v11539_v34  ;;  %23136 = vmatpush3.msra.mxu1 %v337_v55  ;;  %v11241_v40 = vpop.xlane.xlu1 %11240 }
 0x2f8   :  { %v11543_v37 = vmul.f32 %v23841_v51, %v26878_v3  ;;  %23850 = vrcp.f32 %v11241_v40  ;;  %v11244_v52 = vpop.xlane.xlu0 %11243  ;;  %23137 = vmatprep.mubr.msk.f32.mxu1 %vm23965_vm1, %v29603_v28  ;;  %23141 = vmatpush3.msra.mxu0 %v338_v14  ;;  %v12027_v39 = vpop.f32.mrb[132].mxu0  ;;  %v340_v3 = vld [vmem:[%s29129_s2 + $0x220] sm:$0xff] }
 0x2f9   :  { %21203 = vst.msk [vmem:[%s29130_s4 + $0x208] sm:$0xff] %vm10257_vm2, %v11541_v8  ;;  %23852 = vrcp.f32 %v11244_v52  ;;  %23142 = vmatprep.mubr.msk.f32.mxu0 %vm23965_vm1, %v29603_v28  ;;  %23145 = vmatprep.subr.mxu1 %v29603_v28  ;;  %v22834_v18 = vpop.f32.mrb[133].mxu0 }
 0x2fa   :  { %v23843_v31 = vpop.eup %23842  ;;  %21204 = vst.msk [vmem:[%s29130_s4 + $0x210] sm:$0xff] %vm10257_vm2, %v11543_v37  ;;  %23138 = vmatmul.mubr.msk.f32.vlgmr.msra.gmra.mrb[192].mxu1 %vm10257_vm2, %v11541_v8  ;;  %23150 = vmatprep.subr.mxu0 %v29603_v28 }
 0x2fb   :  { %21014 = vst.msk [vmem:[%s29131_s3 + $0x20] sm:$0xff] %vm528_vm0, %v12027_v39  ;;  %v23845_v35 = vpop.eup %23844  ;;  %v11545_v53 = vmul.f32 %v23843_v31, %v26902_v9  ;;  %23143 = vmatmul.mubr.msk.f32.vlgmr.msra.gmra.mrb[194].mxu0 %vm10257_vm2, %v11543_v37  ;;  %23146 = vmatpush3.msra.mxu1 %v339_v59  ;;  %v11247_v47 = vpop.xlane.xlu1 %11246 }
 0x2fc   :  { %v11547_v2 = vmul.f32 %v23845_v35, %v26906_v27  ;;  %23854 = vrcp.f32 %v11247_v47  ;;  %v11250_v54 = vpop.xlane.xlu0 %11249  ;;  %23147 = vmatprep.mubr.msk.f32.mxu1 %vm23965_vm1, %v29603_v28  ;;  %23151 = vmatpush3.msra.mxu0 %v340_v3  ;;  %v12100_v9 = vpop.f32.mrb[132].mxu1  ;;  %v342_v27 = vld [vmem:[%s29129_s2 + $0x230] sm:$0xff]  ;;  %v345_v3 = vld [vmem:[%s29129_s2 + $0x248] sm:$0xff] }
 0x2fd   :  { %21205 = vst.msk [vmem:[%s29130_s4 + $0x218] sm:$0xff] %vm10257_vm2, %v11545_v53  ;;  %23856 = vrcp.f32 %v11250_v54  ;;  %23152 = vmatprep.mubr.msk.f32.mxu0 %vm23965_vm1, %v29603_v28  ;;  %23155 = vmatprep.subr.mxu1 %v29603_v28  ;;  %v22839_v34 = vpop.f32.mrb[133].mxu1 }
 0x2fe   :  { %v23847_v6 = vpop.eup %23846  ;;  %21206 = vst.msk [vmem:[%s29130_s4 + $0x220] sm:$0xff] %vm10257_vm2, %v11547_v2  ;;  %23148 = vmatmul.mubr.msk.f32.vlgmr.msra.gmra.mrb[194].mxu1 %vm10257_vm2, %v11545_v53  ;;  %23160 = vmatprep.subr.mxu0 %v29603_v28 }
 0x2ff   :  { %21015 = vst.msk [vmem:[%s29131_s3 + $0x28] sm:$0xff] %vm528_vm0, %v12100_v9  ;;  %v23849_v11 = vpop.eup %23848  ;;  %v11549_v55 = vmul.f32 %v23847_v6, %v26930_v33  ;;  %23153 = vmatmul.mubr.msk.f32.vlgmr.msra.gmra.mrb[196].mxu0 %vm10257_vm2, %v11547_v2  ;;  %23156 = vmatpush3.msra.mxu1 %v341_v41  ;;  %v11253_v16 = vpop.xlane.xlu1 %11252  ;;  %v347_v41 = vld [vmem:[%s29129_s2 + $0x258] sm:$0xff] }
 0x300   :  { %v11551_v14 = vmul.f32 %v23849_v11, %v26934_v50  ;;  %23858 = vrcp.f32 %v11253_v16  ;;  %v11256_v49 = vpop.xlane.xlu0 %11255  ;;  %23157 = vmatprep.mubr.msk.f32.mxu1 %vm23965_vm1, %v29603_v28  ;;  %23161 = vmatpush3.msra.mxu0 %v342_v27  ;;  %v12173_v33 = vpop.f32.mrb[134].mxu0  ;;  %v344_v50 = vld [vmem:[%s29129_s2 + $0x240] sm:$0xff] }
 0x301   :  { %21207 = vst.msk [vmem:[%s29130_s4 + $0x228] sm:$0xff] %vm10257_vm2, %v11549_v55  ;;  %23860 = vrcp.f32 %v11256_v49  ;;  %23162 = vmatprep.mubr.msk.f32.mxu0 %vm23965_vm1, %v29603_v28  ;;  %23165 = vmatprep.subr.mxu1 %v29603_v28  ;;  %v22844_v8 = vpop.f32.mrb[135].mxu0 }
 0x302   :  { %v23851_v51 = vpop.eup %23850  ;;  %21208 = vst.msk [vmem:[%s29130_s4 + $0x230] sm:$0xff] %vm10257_vm2, %v11551_v14  ;;  %23158 = vmatmul.mubr.msk.f32.vlgmr.msra.gmra.mrb[196].mxu1 %vm10257_vm2, %v11549_v55  ;;  %23170 = vmatprep.subr.mxu0 %v29603_v28 }
 0x303   :  { %21016 = vst.msk [vmem:[%s29131_s3 + $0x30] sm:$0xff] %vm528_vm0, %v12173_v33  ;;  %v23853_v40 = vpop.eup %23852  ;;  %v11553_v37 = vmul.f32 %v23851_v51, %v26958_v62  ;;  %23163 = vmatmul.mubr.msk.f32.vlgmr.msra.gmra.mrb[198].mxu0 %vm10257_vm2, %v11551_v14  ;;  %23166 = vmatpush3.msra.mxu1 %v343_v25  ;;  %v11259_v52 = vpop.xlane.xlu1 %11258  ;;  %v349_v14 = vld [vmem:[%s29129_s2 + $0x268] sm:$0xff] }
 0x304   :  { %v11555_v59 = vmul.f32 %v23853_v40, %v26962_v57  ;;  %23862 = vrcp.f32 %v11259_v52  ;;  %v11262_v39 = vpop.xlane.xlu0 %11261  ;;  %23167 = vmatprep.mubr.msk.f32.mxu1 %vm23965_vm1, %v29603_v28  ;;  %23171 = vmatpush3.msra.mxu0 %v344_v50  ;;  %v12246_v62 = vpop.f32.mrb[134].mxu1  ;;  %v346_v57 = vld [vmem:[%s29129_s2 + $0x250] sm:$0xff] }
 0x305   :  { %21209 = vst.msk [vmem:[%s29130_s4 + $0x238] sm:$0xff] %vm10257_vm2, %v11553_v37  ;;  %23864 = vrcp.f32 %v11262_v39  ;;  %23172 = vmatprep.mubr.msk.f32.mxu0 %vm23965_vm1, %v29603_v28  ;;  %23175 = vmatprep.subr.mxu1 %v29603_v28  ;;  %v22849_v18 = vpop.f32.mrb[135].mxu1 }
 0x306   :  { %v23855_v31 = vpop.eup %23854  ;;  %21210 = vst.msk [vmem:[%s29130_s4 + $0x240] sm:$0xff] %vm10257_vm2, %v11555_v59  ;;  %23168 = vmatmul.mubr.msk.f32.vlgmr.msra.gmra.mrb[198].mxu1 %vm10257_vm2, %v11553_v37  ;;  %23180 = vmatprep.subr.mxu0 %v29603_v28  ;;  %v351_v37 = vld [vmem:[%s29129_s2 + $0x278] sm:$0xff] }
 0x307   :  { %21017 = vst.msk [vmem:[%s29131_s3 + $0x38] sm:$0xff] %vm528_vm0, %v12246_v62  ;;  %v23857_v35 = vpop.eup %23856  ;;  %v11557_v53 = vmul.f32 %v23855_v31, %v26986_v46  ;;  %23173 = vmatmul.mubr.msk.f32.vlgmr.msra.gmra.mrb[200].mxu0 %vm10257_vm2, %v11555_v59  ;;  %23176 = vmatpush3.msra.mxu1 %v345_v3  ;;  %v11265_v47 = vpop.xlane.xlu1 %11264  ;;  %v29844_v3 = vld [vmem:[#allocation2_spill] sm:$0xff]  ;;  %v29845_v31 = vld [vmem:[#allocation12_spill] sm:$0xff] }
 0x308   :  { %v11559_v2 = vmul.f32 %v23857_v35, %v26990_v15  ;;  %23866 = vrcp.f32 %v11265_v47  ;;  %v11268_v54 = vpop.xlane.xlu0 %11267  ;;  %23177 = vmatprep.mubr.msk.f32.mxu1 %vm23965_vm1, %v29603_v28  ;;  %23181 = vmatpush3.msra.mxu0 %v346_v57  ;;  %v12319_v46 = vpop.f32.mrb[136].mxu0  ;;  %v348_v15 = vld [vmem:[%s29129_s2 + $0x260] sm:$0xff] }
 0x309   :  { %21211 = vst.msk [vmem:[%s29130_s4 + $0x248] sm:$0xff] %vm10257_vm2, %v11557_v53  ;;  %23868 = vrcp.f32 %v11268_v54  ;;  %23182 = vmatprep.mubr.msk.f32.mxu0 %vm23965_vm1, %v29603_v28  ;;  %23185 = vmatprep.subr.mxu1 %v29603_v28  ;;  %v22854_v27 = vpop.f32.mrb[137].mxu0 }
 0x30a   :  { %v23859_v9 = vpop.eup %23858  ;;  %21212 = vst.msk [vmem:[%s29130_s4 + $0x250] sm:$0xff] %vm10257_vm2, %v11559_v2  ;;  %23178 = vmatmul.mubr.msk.f32.vlgmr.msra.gmra.mrb[200].mxu1 %vm10257_vm2, %v11557_v53  ;;  %23190 = vmatprep.subr.mxu0 %v29603_v28  ;;  %v353_v53 = vld [vmem:[%s29129_s2 + $0x288] sm:$0xff] }
 0x30b   :  { %21018 = vst.msk [vmem:[%s29131_s3 + $0x40] sm:$0xff] %vm528_vm0, %v12319_v46  ;;  %v23861_v6 = vpop.eup %23860  ;;  %v11561_v34 = vmul.f32 %v23859_v9, %v27014_v45  ;;  %23183 = vmatmul.mubr.msk.f32.vlgmr.msra.gmra.mrb[202].mxu0 %vm10257_vm2, %v11559_v2  ;;  %23186 = vmatpush3.msra.mxu1 %v347_v41  ;;  %v11271_v11 = vpop.xlane.xlu1 %11270  ;;  %v354_v2 = vld [vmem:[%s29129_s2 + $0x290] sm:$0xff] }
 0x30c   :  { %v11563_v55 = vmul.f32 %v23861_v6, %v27018_v43  ;;  %23870 = vrcp.f32 %v11271_v11  ;;  %v11274_v16 = vpop.xlane.xlu0 %11273  ;;  %23187 = vmatprep.mubr.msk.f32.mxu1 %vm23965_vm1, %v29603_v28  ;;  %23191 = vmatpush3.msra.mxu0 %v348_v15  ;;  %v12392_v45 = vpop.f32.mrb[136].mxu1  ;;  %v350_v43 = vld [vmem:[%s29129_s2 + $0x270] sm:$0xff]  ;;  %v29846_v15 = vld [vmem:[#allocation111_spill] sm:$0xff]  ;;  %v355_v11 = vld [vmem:[%s29129_s2 + $0x298] sm:$0xff] }
 0x30d   :  { %21213 = vst.msk [vmem:[%s29130_s4 + $0x258] sm:$0xff] %vm10257_vm2, %v11561_v34  ;;  %23872 = vrcp.f32 %v11274_v16  ;;  %23192 = vmatprep.mubr.msk.f32.mxu0 %vm23965_vm1, %v29603_v28  ;;  %23195 = vmatprep.subr.mxu1 %v29603_v28  ;;  %v22859_v25 = vpop.f32.mrb[137].mxu1 }
 0x30e   :  { %v23863_v49 = vpop.eup %23862  ;;  %21214 = vst.msk [vmem:[%s29130_s4 + $0x260] sm:$0xff] %vm10257_vm2, %v11563_v55  ;;  %23188 = vmatmul.mubr.msk.f32.vlgmr.msra.gmra.mrb[202].mxu1 %vm10257_vm2, %v11561_v34  ;;  %23200 = vmatprep.subr.mxu0 %v29603_v28  ;;  %v29847_v25 = vld [vmem:[#allocation55_spill] sm:$0xff] }
 0x30f   :  { %21019 = vst.msk [vmem:[%s29131_s3 + $0x48] sm:$0xff] %vm528_vm0, %v12392_v45  ;;  %v23865_v33 = vpop.eup %23864  ;;  %v11565_v50 = vmul.f32 %v23863_v49, %v27042_v38  ;;  %23193 = vmatmul.mubr.msk.f32.vlgmr.msra.gmra.mrb[204].mxu0 %vm10257_vm2, %v11563_v55  ;;  %23196 = vmatpush3.msra.mxu1 %v349_v14  ;;  %v11277_v51 = vpop.xlane.xlu1 %11276 }
 0x310   :  { %v11567_v8 = vmul.f32 %v23865_v33, %v27046_v60  ;;  %23874 = vrcp.f32 %v11277_v51  ;;  %v11280_v40 = vpop.xlane.xlu0 %11279  ;;  %23197 = vmatprep.mubr.msk.f32.mxu1 %vm23965_vm1, %v29603_v28  ;;  %23201 = vmatpush3.msra.mxu0 %v350_v43  ;;  %v12465_v38 = vpop.f32.mrb[138].mxu0  ;;  %v352_v60 = vld [vmem:[%s29129_s2 + $0x280] sm:$0xff]  ;;  %v357_v51 = vld [vmem:[%s29129_s2 + $0x2a8] sm:$0xff] }
 0x311   :  { %21215 = vst.msk [vmem:[%s29130_s4 + $0x268] sm:$0xff] %vm10257_vm2, %v11565_v50  ;;  %23876 = vrcp.f32 %v11280_v40  ;;  %23202 = vmatprep.mubr.msk.f32.mxu0 %vm23965_vm1, %v29603_v28  ;;  %23205 = vmatprep.subr.mxu1 %v29603_v28  ;;  %v22864_v59 = vpop.f32.mrb[139].mxu0 }
 0x312   :  { %v23867_v52 = vpop.eup %23866  ;;  %21216 = vst.msk [vmem:[%s29130_s4 + $0x270] sm:$0xff] %vm10257_vm2, %v11567_v8  ;;  %23198 = vmatmul.mubr.msk.f32.vlgmr.msra.gmra.mrb[204].mxu1 %vm10257_vm2, %v11565_v50  ;;  %23210 = vmatprep.subr.mxu0 %v29603_v28 }
 0x313   :  { %21020 = vst.msk [vmem:[%s29131_s3 + $0x50] sm:$0xff] %vm528_vm0, %v12465_v38  ;;  %v23869_v39 = vpop.eup %23868  ;;  %v11569_v62 = vmul.f32 %v23867_v52, %v29844_v3  ;;  %23203 = vmatmul.mubr.msk.f32.vlgmr.msra.gmra.mrb[206].mxu0 %vm10257_vm2, %v11567_v8  ;;  %23206 = vmatpush3.msra.mxu1 %v351_v37  ;;  %v11283_v57 = vpop.xlane.xlu1 %11282  ;;  %v358_v8 = vld [vmem:[%s29129_s2 + $0x2b0] sm:$0xff]  ;;  %v359_v3 = vld [vmem:[%s29129_s2 + $0x2b8] sm:$0xff] }
 0x314   :  { %v11571_v18 = vmul.f32 %v23869_v39, %v29845_v31  ;;  %23878 = vrcp.f32 %v11283_v57  ;;  %v11286_v35 = vpop.xlane.xlu0 %11285  ;;  %23207 = vmatprep.mubr.msk.f32.mxu1 %vm23965_vm1, %v29603_v28  ;;  %23211 = vmatpush3.msra.mxu0 %v352_v60  ;;  %v12538_v47 = vpop.f32.mrb[138].mxu1 }
 0x315   :  { %21217 = vst.msk [vmem:[%s29130_s4 + $0x278] sm:$0xff] %vm10257_vm2, %v11569_v62  ;;  %23880 = vrcp.f32 %v11286_v35  ;;  %23212 = vmatprep.mubr.msk.f32.mxu0 %vm23965_vm1, %v29603_v28  ;;  %23215 = vmatprep.subr.mxu1 %v29603_v28  ;;  %v22869_v41 = vpop.f32.mrb[139].mxu1 }
 0x316   :  { %v23871_v54 = vpop.eup %23870  ;;  %21218 = vst.msk [vmem:[%s29130_s4 + $0x280] sm:$0xff] %vm10257_vm2, %v11571_v18  ;;  %23208 = vmatmul.mubr.msk.f32.vlgmr.msra.gmra.mrb[206].mxu1 %vm10257_vm2, %v11569_v62  ;;  %23220 = vmatprep.subr.mxu0 %v29603_v28 }
 0x317   :  { %21021 = vst.msk [vmem:[%s29131_s3 + $0x58] sm:$0xff] %vm528_vm0, %v12538_v47  ;;  %v23873_v46 = vpop.eup %23872  ;;  %v11573_v9 = vmul.f32 %v23871_v54, %v29846_v15  ;;  %23213 = vmatmul.mubr.msk.f32.vlgmr.msra.gmra.mrb[208].mxu0 %vm10257_vm2, %v11571_v18  ;;  %23216 = vmatpush3.msra.mxu1 %v353_v53  ;;  %v11289_v27 = vpop.xlane.xlu1 %11288 }
 0x318   :  { %v11575_v6 = vmul.f32 %v23873_v46, %v27102_v22  ;;  %23882 = vrcp.f32 %v11289_v27  ;;  %v11292_v34 = vpop.xlane.xlu0 %11291  ;;  %23217 = vmatprep.mubr.msk.f32.mxu1 %vm23965_vm1, %v29603_v28  ;;  %23221 = vmatpush3.msra.mxu0 %v354_v2  ;;  %v12611_v55 = vpop.f32.mrb[140].mxu0  ;;  %v356_v22 = vld [vmem:[%s29129_s2 + $0x2a0] sm:$0xff]  ;;  %v361_v2 = vld [vmem:[%s29129_s2 + $0x2c8] sm:$0xff] }
 0x319   :  { %21219 = vst.msk [vmem:[%s29130_s4 + $0x288] sm:$0xff] %vm10257_vm2, %v11573_v9  ;;  %23884 = vrcp.f32 %v11292_v34  ;;  %23222 = vmatprep.mubr.msk.f32.mxu0 %vm23965_vm1, %v29603_v28  ;;  %23225 = vmatprep.subr.mxu1 %v29603_v28  ;;  %v22874_v14 = vpop.f32.mrb[141].mxu0  ;;  %v363_v34 = vld [vmem:[%s29129_s2 + $0x2d8] sm:$0xff] }
 0x31a   :  { %v23875_v16 = vpop.eup %23874  ;;  %21220 = vst.msk [vmem:[%s29130_s4 + $0x290] sm:$0xff] %vm10257_vm2, %v11575_v6  ;;  %23218 = vmatmul.mubr.msk.f32.vlgmr.msra.gmra.mrb[208].mxu1 %vm10257_vm2, %v11573_v9  ;;  %23230 = vmatprep.subr.mxu0 %v29603_v28 }
 0x31b   :  { %21022 = vst.msk [vmem:[%s29131_s3 + $0x60] sm:$0xff] %vm528_vm0, %v12611_v55  ;;  %v23877_v45 = vpop.eup %23876  ;;  %v11577_v43 = vmul.f32 %v23875_v16, %v27126_v5  ;;  %23223 = vmatmul.mubr.msk.f32.vlgmr.msra.gmra.mrb[210].mxu0 %vm10257_vm2, %v11575_v6  ;;  %23226 = vmatpush3.msra.mxu1 %v355_v11  ;;  %v11295_v49 = vpop.xlane.xlu1 %11294  ;;  %v29848_v16 = vld [vmem:[#allocation59_spill] sm:$0xff] }
 0x31c   :  { %v11579_v33 = vmul.f32 %v23877_v45, %v29847_v25  ;;  %23886 = vrcp.f32 %v11295_v49  ;;  %v11298_v50 = vpop.xlane.xlu0 %11297  ;;  %23227 = vmatprep.mubr.msk.f32.mxu1 %vm23965_vm1, %v29603_v28  ;;  %23231 = vmatpush3.msra.mxu0 %v356_v22  ;;  %v12684_v5 = vpop.f32.mrb[140].mxu1  ;;  %v365_v25 = vld [vmem:[%s29129_s2 + $0x2e8] sm:$0xff] }
 0x31d   :  { %21221 = vst.msk [vmem:[%s29130_s4 + $0x298] sm:$0xff] %vm10257_vm2, %v11577_v43  ;;  %23888 = vrcp.f32 %v11298_v50  ;;  %23232 = vmatprep.mubr.msk.f32.mxu0 %vm23965_vm1, %v29603_v28  ;;  %23235 = vmatprep.subr.mxu1 %v29603_v28  ;;  %v22879_v37 = vpop.f32.mrb[141].mxu1 }
 0x31e   :  { %v23879_v40 = vpop.eup %23878  ;;  %21222 = vst.msk [vmem:[%s29130_s4 + $0x2a0] sm:$0xff] %vm10257_vm2, %v11579_v33  ;;  %23228 = vmatmul.mubr.msk.f32.vlgmr.msra.gmra.mrb[210].mxu1 %vm10257_vm2, %v11577_v43  ;;  %23240 = vmatprep.subr.mxu0 %v29603_v28 }
 0x31f   :  { %21023 = vst.msk [vmem:[%s29131_s3 + $0x68] sm:$0xff] %vm528_vm0, %v12684_v5  ;;  %v23881_v38 = vpop.eup %23880  ;;  %v11581_v60 = vmul.f32 %v23879_v40, %v27154_v36  ;;  %23233 = vmatmul.mubr.msk.f32.vlgmr.msra.gmra.mrb[212].mxu0 %vm10257_vm2, %v11579_v33  ;;  %23236 = vmatpush3.msra.mxu1 %v357_v51  ;;  %v11301_v52 = vpop.xlane.xlu1 %11300 }
 0x320   :  { %v11583_v59 = vmul.f32 %v23881_v38, %v27158_v21  ;;  %23890 = vrcp.f32 %v11301_v52  ;;  %v11304_v39 = vpop.xlane.xlu0 %11303  ;;  %23237 = vmatprep.mubr.msk.f32.mxu1 %vm23965_vm1, %v29603_v28  ;;  %23241 = vmatpush3.msra.mxu0 %v358_v8  ;;  %v12757_v36 = vpop.f32.mrb[142].mxu0  ;;  %v360_v21 = vld [vmem:[%s29129_s2 + $0x2c0] sm:$0xff]  ;;  %v29849_v8 = vld [vmem:[#allocation13_spill] sm:$0xff] }
 0x321   :  { %21223 = vst.msk [vmem:[%s29130_s4 + $0x2a8] sm:$0xff] %vm10257_vm2, %v11581_v60  ;;  %23892 = vrcp.f32 %v11304_v39  ;;  %23242 = vmatprep.mubr.msk.f32.mxu0 %vm23965_vm1, %v29603_v28  ;;  %23245 = vmatprep.subr.mxu1 %v29603_v28  ;;  %v22884_v57 = vpop.f32.mrb[143].mxu0  ;;  %v367_v52 = vld [vmem:[%s29129_s2 + $0x2f8] sm:$0xff] }
 0x322   :  { %v23883_v62 = vpop.eup %23882  ;;  %21224 = vst.msk [vmem:[%s29130_s4 + $0x2b0] sm:$0xff] %vm10257_vm2, %v11583_v59  ;;  %23238 = vmatmul.mubr.msk.f32.vlgmr.msra.gmra.mrb[212].mxu1 %vm10257_vm2, %v11581_v60  ;;  %23250 = vmatprep.subr.mxu0 %v29603_v28 }
 0x323   :  { %21024 = vst.msk [vmem:[%s29131_s3 + $0x70] sm:$0xff] %vm528_vm0, %v12757_v36  ;;  %v23885_v31 = vpop.eup %23884  ;;  %v11585_v18 = vmul.f32 %v23883_v62, %v27184_v19  ;;  %23243 = vmatmul.mubr.msk.f32.vlgmr.msra.gmra.mrb[214].mxu0 %vm10257_vm2, %v11583_v59  ;;  %23246 = vmatpush3.msra.mxu1 %v359_v3  ;;  %v11307_v35 = vpop.xlane.xlu1 %11306 }
 0x324   :  { %v11587_v53 = vmul.f32 %v23885_v31, %v27188_v58  ;;  %23894 = vrcp.f32 %v11307_v35  ;;  %v11310_v47 = vpop.xlane.xlu0 %11309  ;;  %23247 = vmatprep.mubr.msk.f32.mxu1 %vm23965_vm1, %v29603_v28  ;;  %23251 = vmatpush3.msra.mxu0 %v360_v21  ;;  %v12830_v19 = vpop.f32.mrb[142].mxu1  ;;  %v362_v58 = vld [vmem:[%s29129_s2 + $0x2d0] sm:$0xff]  ;;  %v29850_v21 = vld [vmem:[#allocation114_spill] sm:$0xff]  ;;  %v369_v35 = vld [vmem:[%s29129_s2 + $0x308] sm:$0xff] }
 0x325   :  { %21225 = vst.msk [vmem:[%s29130_s4 + $0x2b8] sm:$0xff] %vm10257_vm2, %v11585_v18  ;;  %23896 = vrcp.f32 %v11310_v47  ;;  %23252 = vmatprep.mubr.msk.f32.mxu0 %vm23965_vm1, %v29603_v28  ;;  %23255 = vmatprep.subr.mxu1 %v29603_v28  ;;  %v22889_v41 = vpop.f32.mrb[143].mxu1 }
 0x326   :  { %v23887_v54 = vpop.eup %23886  ;;  %21226 = vst.msk [vmem:[%s29130_s4 + $0x2c0] sm:$0xff] %vm10257_vm2, %v11587_v53  ;;  %23248 = vmatmul.mubr.msk.f32.vlgmr.msra.gmra.mrb[214].mxu1 %vm10257_vm2, %v11585_v18  ;;  %23260 = vmatprep.subr.mxu0 %v29603_v28 }
 0x327   :  { %21025 = vst.msk [vmem:[%s29131_s3 + $0x78] sm:$0xff] %vm528_vm0, %v12830_v19  ;;  %v23889_v46 = vpop.eup %23888  ;;  %v11589_v15 = vmul.f32 %v23887_v54, %v27213_v42  ;;  %23253 = vmatmul.mubr.msk.f32.vlgmr.msra.gmra.mrb[216].mxu0 %vm10257_vm2, %v11587_v53  ;;  %23256 = vmatpush3.msra.mxu1 %v361_v2  ;;  %v11313_v9 = vpop.xlane.xlu1 %11312 }
 0x328   :  { %v11591_v27 = vmul.f32 %v23889_v46, %v27217_v44  ;;  %23898 = vrcp.f32 %v11313_v9  ;;  %v11316_v6 = vpop.xlane.xlu0 %11315  ;;  %23257 = vmatprep.mubr.msk.f32.mxu1 %vm23965_vm1, %v29603_v28  ;;  %23261 = vmatpush3.msra.mxu0 %v362_v58  ;;  %v12903_v42 = vpop.f32.mrb[144].mxu0  ;;  %v364_v44 = vld [vmem:[%s29129_s2 + $0x2e0] sm:$0xff]  ;;  %v371_v9 = vld [vmem:[%s29129_s2 + $0x318] sm:$0xff] }
 0x329   :  { %21227 = vst.msk [vmem:[%s29130_s4 + $0x2c8] sm:$0xff] %vm10257_vm2, %v11589_v15  ;;  %23900 = vrcp.f32 %v11316_v6  ;;  %23262 = vmatprep.mubr.msk.f32.mxu0 %vm23965_vm1, %v29603_v28  ;;  %23265 = vmatprep.subr.mxu1 %v29603_v28  ;;  %v22894_v55 = vpop.f32.mrb[145].mxu0  ;;  %v29851_v58 = vld [vmem:[#allocation14_spill] sm:$0xff] }
 0x32a   :  { %v23891_v11 = vpop.eup %23890  ;;  %21228 = vst.msk [vmem:[%s29130_s4 + $0x2d0] sm:$0xff] %vm10257_vm2, %v11591_v27  ;;  %23258 = vmatmul.mubr.msk.f32.vlgmr.msra.gmra.mrb[216].mxu1 %vm10257_vm2, %v11589_v15  ;;  %23270 = vmatprep.subr.mxu0 %v29603_v28 }
 0x32b   :  { %21026 = vst.msk [vmem:[%s29131_s3 + $0x80] sm:$0xff] %vm528_vm0, %v12903_v42  ;;  %v23893_v22 = vpop.eup %23892  ;;  %v11593_v14 = vmul.f32 %v23891_v11, %v29848_v16  ;;  %23263 = vmatmul.mubr.msk.f32.vlgmr.msra.gmra.mrb[218].mxu0 %vm10257_vm2, %v11591_v27  ;;  %23266 = vmatpush3.msra.mxu1 %v363_v34  ;;  %v11319_v45 = vpop.xlane.xlu1 %11318 }
 0x32c   :  { %v11595_v43 = vmul.f32 %v23893_v22, %v27243_v56  ;;  %23902 = vrcp.f32 %v11319_v45  ;;  %v11322_v49 = vpop.xlane.xlu0 %11321  ;;  %23267 = vmatprep.mubr.msk.f32.mxu1 %vm23965_vm1, %v29603_v28  ;;  %23271 = vmatpush3.msra.mxu0 %v364_v44  ;;  %v12976_v33 = vpop.f32.mrb[144].mxu1  ;;  %v366_v56 = vld [vmem:[%s29129_s2 + $0x2f0] sm:$0xff]  ;;  %v29852_v44 = vld [vmem:[#allocation115_spill] sm:$0xff] }
 0x32d   :  { %21229 = vst.msk [vmem:[%s29130_s4 + $0x2d8] sm:$0xff] %vm10257_vm2, %v11593_v14  ;;  %23904 = vrcp.f32 %v11322_v49  ;;  %23272 = vmatprep.mubr.msk.f32.mxu0 %vm23965_vm1, %v29603_v28  ;;  %23275 = vmatprep.subr.mxu1 %v29603_v28  ;;  %v22899_v51 = vpop.f32.mrb[145].mxu1 }
 0x32e   :  { %v23895_v50 = vpop.eup %23894  ;;  %21230 = vst.msk [vmem:[%s29130_s4 + $0x2e0] sm:$0xff] %vm10257_vm2, %v11595_v43  ;;  %23268 = vmatmul.mubr.msk.f32.vlgmr.msra.gmra.mrb[218].mxu1 %vm10257_vm2, %v11593_v14  ;;  %23280 = vmatprep.subr.mxu0 %v29603_v28  ;;  %v373_v14 = vld [vmem:[%s29129_s2 + $0x328] sm:$0xff] }
 0x32f   :  { %21027 = vst.msk [vmem:[%s29131_s3 + $0x88] sm:$0xff] %vm528_vm0, %v12976_v33  ;;  %v23897_v5 = vpop.eup %23896  ;;  %v11597_v40 = vmul.f32 %v23895_v50, %v29849_v8  ;;  %23273 = vmatmul.mubr.msk.f32.vlgmr.msra.gmra.mrb[220].mxu0 %vm10257_vm2, %v11595_v43  ;;  %23276 = vmatpush3.msra.mxu1 %v365_v25  ;;  %v11325_v37 = vpop.xlane.xlu1 %11324  ;;  %v29853_v33 = vld [vmem:[#allocation62_spill] sm:$0xff]  ;;  %v375_v8 = vld [vmem:[%s29129_s2 + $0x338] sm:$0xff] }
 0x330   :  { %v11599_v38 = vmul.f32 %v23897_v5, %v27269_v10  ;;  %23906 = vrcp.f32 %v11325_v37  ;;  %v11328_v60 = vpop.xlane.xlu0 %11327  ;;  %23277 = vmatprep.mubr.msk.f32.mxu1 %vm23965_vm1, %v29603_v28  ;;  %23281 = vmatpush3.msra.mxu0 %v366_v56  ;;  %v13049_v59 = vpop.f32.mrb[146].mxu0  ;;  %v368_v10 = vld [vmem:[%s29129_s2 + $0x300] sm:$0xff] }
 0x331   :  { %21231 = vst.msk [vmem:[%s29130_s4 + $0x2e8] sm:$0xff] %vm10257_vm2, %v11597_v40  ;;  %23908 = vrcp.f32 %v11328_v60  ;;  %23282 = vmatprep.mubr.msk.f32.mxu0 %vm23965_vm1, %v29603_v28  ;;  %23285 = vmatprep.subr.mxu1 %v29603_v28  ;;  %v22904_v3 = vpop.f32.mrb[147].mxu0 }
 0x332   :  { %v23899_v39 = vpop.eup %23898  ;;  %21232 = vst.msk [vmem:[%s29130_s4 + $0x2f0] sm:$0xff] %vm10257_vm2, %v11599_v38  ;;  %23278 = vmatmul.mubr.msk.f32.vlgmr.msra.gmra.mrb[220].mxu1 %vm10257_vm2, %v11597_v40  ;;  %23290 = vmatprep.subr.mxu0 %v29603_v28 }
 0x333   :  { %21028 = vst.msk [vmem:[%s29131_s3 + $0x90] sm:$0xff] %vm528_vm0, %v13049_v59  ;;  %v23901_v36 = vpop.eup %23900  ;;  %v11601_v62 = vmul.f32 %v23899_v39, %v29850_v21  ;;  %23283 = vmatmul.mubr.msk.f32.vlgmr.msra.gmra.mrb[222].mxu0 %vm10257_vm2, %v11599_v38  ;;  %23286 = vmatpush3.msra.mxu1 %v367_v52  ;;  %v11331_v57 = vpop.xlane.xlu1 %11330  ;;  %v378_v21 = vld [vmem:[%s29129_s2 + $0x350] sm:$0xff] }
 0x334   :  { %v11603_v31 = vmul.f32 %v23901_v36, %v27295_v1  ;;  %23910 = vrcp.f32 %v11331_v57  ;;  %v11334_v18 = vpop.xlane.xlu0 %11333  ;;  %23287 = vmatprep.mubr.msk.f32.mxu1 %vm23965_vm1, %v29603_v28  ;;  %23291 = vmatpush3.msra.mxu0 %v368_v10  ;;  %v13122_v53 = vpop.f32.mrb[146].mxu1  ;;  %v370_v1 = vld [vmem:[%s29129_s2 + $0x310] sm:$0xff]  ;;  %v29854_v10 = vld [vmem:[#allocation15_spill] sm:$0xff] }
 0x335   :  { %21233 = vst.msk [vmem:[%s29130_s4 + $0x2f8] sm:$0xff] %vm10257_vm2, %v11601_v62  ;;  %23912 = vrcp.f32 %v11334_v18  ;;  %23292 = vmatprep.mubr.msk.f32.mxu0 %vm23965_vm1, %v29603_v28  ;;  %23295 = vmatprep.subr.mxu1 %v29603_v28  ;;  %v22909_v2 = vpop.f32.mrb[147].mxu1  ;;  %v377_v36 = vld [vmem:[%s29129_s2 + $0x348] sm:$0xff]  ;;  %v29855_v18 = vld [vmem:[#allocation73_spill] sm:$0xff] }
 0x336   :  { %v23903_v47 = vpop.eup %23902  ;;  %21234 = vst.msk [vmem:[%s29130_s4 + $0x300] sm:$0xff] %vm10257_vm2, %v11603_v31  ;;  %23288 = vmatmul.mubr.msk.f32.vlgmr.msra.gmra.mrb[222].mxu1 %vm10257_vm2, %v11601_v62  ;;  %23300 = vmatprep.subr.mxu0 %v29603_v28  ;;  %v379_v2 = vld [vmem:[%s29129_s2 + $0x358] sm:$0xff] }
 0x337   :  { %21029 = vst.msk [vmem:[%s29131_s3 + $0x98] sm:$0xff] %vm528_vm0, %v13122_v53  ;;  %v23905_v19 = vpop.eup %23904  ;;  %v11605_v54 = vmul.f32 %v23903_v47, %v29851_v58  ;;  %23293 = vmatmul.mubr.msk.f32.vlgmr.msra.gmra.mrb[224].mxu0 %vm10257_vm2, %v11603_v31  ;;  %23296 = vmatpush3.msra.mxu1 %v369_v35  ;;  %v11337_v41 = vpop.xlane.xlu1 %11336 }
 0x338   :  { %v11607_v46 = vmul.f32 %v23905_v19, %v27321_v0  ;;  %23914 = vrcp.f32 %v11337_v41  ;;  %v11340_v15 = vpop.xlane.xlu0 %11339  ;;  %23297 = vmatprep.mubr.msk.f32.mxu1 %vm23965_vm1, %v29603_v28  ;;  %23301 = vmatpush3.msra.mxu0 %v370_v1  ;;  %v13195_v27 = vpop.f32.mrb[148].mxu0  ;;  %v372_v0 = vld [vmem:[%s29129_s2 + $0x320] sm:$0xff] }
 0x339   :  { %21235 = vst.msk [vmem:[%s29130_s4 + $0x308] sm:$0xff] %vm10257_vm2, %v11605_v54  ;;  %23916 = vrcp.f32 %v11340_v15  ;;  %23302 = vmatprep.mubr.msk.f32.mxu0 %vm23965_vm1, %v29603_v28  ;;  %23305 = vmatprep.subr.mxu1 %v29603_v28  ;;  %v22914_v34 = vpop.f32.mrb[149].mxu0 }
 0x33a   :  { %v23907_v6 = vpop.eup %23906  ;;  %21236 = vst.msk [vmem:[%s29130_s4 + $0x310] sm:$0xff] %vm10257_vm2, %v11607_v46  ;;  %23298 = vmatmul.mubr.msk.f32.vlgmr.msra.gmra.mrb[224].mxu1 %vm10257_vm2, %v11605_v54  ;;  %23310 = vmatprep.subr.mxu0 %v29603_v28 }
 0x33b   :  { %21030 = vst.msk [vmem:[%s29131_s3 + $0xa0] sm:$0xff] %vm528_vm0, %v13195_v27  ;;  %v23909_v42 = vpop.eup %23908  ;;  %v11609_v11 = vmul.f32 %v23907_v6, %v29852_v44  ;;  %23303 = vmatmul.mubr.msk.f32.vlgmr.msra.gmra.mrb[226].mxu0 %vm10257_vm2, %v11607_v46  ;;  %23306 = vmatpush3.msra.mxu1 %v371_v9  ;;  %v11343_v55 = vpop.xlane.xlu1 %11342  ;;  %v29856_v46 = vld [vmem:[#allocation16_spill] sm:$0xff]  ;;  %v381_v6 = vld [vmem:[%s29129_s2 + $0x368] sm:$0xff] }
 0x33c   :  { %v11611_v22 = vmul.f32 %v23909_v42, %v27347_v7  ;;  %23918 = vrcp.f32 %v11343_v55  ;;  %v11346_v16 = vpop.xlane.xlu0 %11345  ;;  %23307 = vmatprep.mubr.msk.f32.mxu1 %vm23965_vm1, %v29603_v28  ;;  %23311 = vmatpush3.msra.mxu0 %v372_v0  ;;  %v13268_v45 = vpop.f32.mrb[148].mxu1  ;;  %v374_v7 = vld [vmem:[%s29129_s2 + $0x330] sm:$0xff] }
 0x33d   :  { %21237 = vst.msk [vmem:[%s29130_s4 + $0x318] sm:$0xff] %vm10257_vm2, %v11609_v11  ;;  %23920 = vrcp.f32 %v11346_v16  ;;  %23312 = vmatprep.mubr.msk.f32.mxu0 %vm23965_vm1, %v29603_v28  ;;  %23315 = vmatprep.subr.mxu1 %v29603_v28  ;;  %v22919_v49 = vpop.f32.mrb[149].mxu1  ;;  %v29857_v55 = vld [vmem:[#allocation4_spill] sm:$0xff] }
 0x33e   :  { %v23911_v43 = vpop.eup %23910  ;;  %21238 = vst.msk [vmem:[%s29130_s4 + $0x320] sm:$0xff] %vm10257_vm2, %v11611_v22  ;;  %23308 = vmatmul.mubr.msk.f32.vlgmr.msra.gmra.mrb[226].mxu1 %vm10257_vm2, %v11609_v11  ;;  %23320 = vmatprep.subr.mxu0 %v29603_v28 }
 0x33f   :  { %21031 = vst.msk [vmem:[%s29131_s3 + $0xa8] sm:$0xff] %vm528_vm0, %v13268_v45  ;;  %v23913_v25 = vpop.eup %23912  ;;  %v11613_v56 = vmul.f32 %v23911_v43, %v29853_v33  ;;  %23313 = vmatmul.mubr.msk.f32.vlgmr.msra.gmra.mrb[228].mxu0 %vm10257_vm2, %v11611_v22  ;;  %23316 = vmatpush3.msra.mxu1 %v373_v14  ;;  %v11349_v50 = vpop.xlane.xlu1 %11348 }
 0x340   :  { %v11615_v51 = vmul.f32 %v23913_v25, %v27373_v24  ;;  %23922 = vrcp.f32 %v11349_v50  ;;  %v11352_v5 = vpop.xlane.xlu0 %11351  ;;  %23317 = vmatprep.mubr.msk.f32.mxu1 %vm23965_vm1, %v29603_v28  ;;  %23321 = vmatpush3.msra.mxu0 %v374_v7  ;;  %v13341_v40 = vpop.f32.mrb[150].mxu0  ;;  %v376_v24 = vld [vmem:[%s29129_s2 + $0x340] sm:$0xff]  ;;  %v383_v7 = vld [vmem:[%s29129_s2 + $0x378] sm:$0xff] }
 0x341   :  { %21239 = vst.msk [vmem:[%s29130_s4 + $0x328] sm:$0xff] %vm10257_vm2, %v11613_v56  ;;  %23924 = vrcp.f32 %v11352_v5  ;;  %23322 = vmatprep.mubr.msk.f32.mxu0 %vm23965_vm1, %v29603_v28  ;;  %23325 = vmatprep.subr.mxu1 %v29603_v28  ;;  %v22924_v38 = vpop.f32.mrb[151].mxu0 }
 0x342   :  { %v23915_v37 = vpop.eup %23914  ;;  %21240 = vst.msk [vmem:[%s29130_s4 + $0x330] sm:$0xff] %vm10257_vm2, %v11615_v51  ;;  %23318 = vmatmul.mubr.msk.f32.vlgmr.msra.gmra.mrb[228].mxu1 %vm10257_vm2, %v11613_v56  ;;  %23330 = vmatprep.subr.mxu0 %v29603_v28  ;;  %v29858_v38 = vld [vmem:[#allocation65_spill] sm:$0xff] }
 0x343   :  { %21032 = vst.msk [vmem:[%s29131_s3 + $0xb0] sm:$0xff] %vm528_vm0, %v13341_v40  ;;  %v23917_v60 = vpop.eup %23916  ;;  %v11617_v52 = vmul.f32 %v23915_v37, %v27395_v13  ;;  %23323 = vmatmul.mubr.msk.f32.vlgmr.msra.gmra.mrb[230].mxu0 %vm10257_vm2, %v11615_v51  ;;  %23326 = vmatpush3.msra.mxu1 %v375_v8  ;;  %v11355_v59 = vpop.xlane.xlu1 %11354  ;;  %v385_v8 = vld [vmem:[%s29129_s2 + $0x388] sm:$0xff] }
 0x344   :  { %v11619_v39 = vmul.f32 %v23917_v60, %v29854_v10  ;;  %23926 = vrcp.f32 %v11355_v59  ;;  %v11358_v3 = vpop.xlane.xlu0 %11357  ;;  %23327 = vmatprep.mubr.msk.f32.mxu1 %vm23965_vm1, %v29603_v28  ;;  %23331 = vmatpush3.msra.mxu0 %v376_v24  ;;  %v13414_v13 = vpop.f32.mrb[150].mxu1  ;;  %v29859_v59 = vld [vmem:[#allocation17_spill] sm:$0xff] }
 0x345   :  { %21241 = vst.msk [vmem:[%s29130_s4 + $0x338] sm:$0xff] %vm10257_vm2, %v11617_v52  ;;  %23928 = vrcp.f32 %v11358_v3  ;;  %23332 = vmatprep.mubr.msk.f32.mxu0 %vm23965_vm1, %v29603_v28  ;;  %23335 = vmatprep.subr.mxu1 %v29603_v28  ;;  %v22929_v57 = vpop.f32.mrb[151].mxu1  ;;  %v387_v3 = vld [vmem:[%s29129_s2 + $0x398] sm:$0xff] }
 0x346   :  { %v23919_v62 = vpop.eup %23918  ;;  %21242 = vst.msk [vmem:[%s29130_s4 + $0x340] sm:$0xff] %vm10257_vm2, %v11619_v39  ;;  %23328 = vmatmul.mubr.msk.f32.vlgmr.msra.gmra.mrb[230].mxu1 %vm10257_vm2, %v11617_v52  ;;  %23340 = vmatprep.subr.mxu0 %v29603_v28 }
 0x347   :  { %21033 = vst.msk [vmem:[%s29131_s3 + $0xb8] sm:$0xff] %vm528_vm0, %v13414_v13  ;;  %v23921_v31 = vpop.eup %23920  ;;  %v11621_v35 = vmul.f32 %v23919_v62, %v29855_v18  ;;  %23333 = vmatmul.mubr.msk.f32.vlgmr.msra.gmra.mrb[232].mxu0 %vm10257_vm2, %v11619_v39  ;;  %23336 = vmatpush3.msra.mxu1 %v377_v36  ;;  %v11361_v53 = vpop.xlane.xlu1 %11360  ;;  %v388_v13 = vld [vmem:[%s29129_s2 + $0x3a0] sm:$0xff] }
 0x348   :  { %v11623_v1 = vmul.f32 %v23921_v31, %v27425_v12  ;;  %23930 = vrcp.f32 %v11361_v53  ;;  %v11364_v47 = vpop.xlane.xlu0 %11363  ;;  %23337 = vmatprep.mubr.msk.f32.mxu1 %vm23965_vm1, %v29603_v28  ;;  %23341 = vmatpush3.msra.mxu0 %v378_v21  ;;  %v13487_v19 = vpop.f32.mrb[152].mxu0  ;;  %v380_v12 = vld [vmem:[%s29129_s2 + $0x360] sm:$0xff] }
 0x349   :  { %21243 = vst.msk [vmem:[%s29130_s4 + $0x348] sm:$0xff] %vm10257_vm2, %v11621_v35  ;;  %23932 = vrcp.f32 %v11364_v47  ;;  %23342 = vmatprep.mubr.msk.f32.mxu0 %vm23965_vm1, %v29603_v28  ;;  %23345 = vmatprep.subr.mxu1 %v29603_v28  ;;  %v22934_v54 = vpop.f32.mrb[153].mxu0 }
 0x34a   :  { %v23923_v58 = vpop.eup %23922  ;;  %21244 = vst.msk [vmem:[%s29130_s4 + $0x350] sm:$0xff] %vm10257_vm2, %v11623_v1  ;;  %23338 = vmatmul.mubr.msk.f32.vlgmr.msra.gmra.mrb[232].mxu1 %vm10257_vm2, %v11621_v35  ;;  %23350 = vmatprep.subr.mxu0 %v29603_v28  ;;  %v29860_v54 = vld [vmem:[#allocation120_spill] sm:$0xff] }
 0x34b   :  { %21034 = vst.msk [vmem:[%s29131_s3 + $0xc0] sm:$0xff] %vm528_vm0, %v13487_v19  ;;  %v23925_v41 = vpop.eup %23924  ;;  %v11625_v15 = vmul.f32 %v23923_v58, %v29856_v46  ;;  %23343 = vmatmul.mubr.msk.f32.vlgmr.msra.gmra.mrb[234].mxu0 %vm10257_vm2, %v11623_v1  ;;  %23346 = vmatpush3.msra.mxu1 %v379_v2  ;;  %v11367_v9 = vpop.xlane.xlu1 %11366  ;;  %v389_v1 = vld [vmem:[%s29129_s2 + $0x3a8] sm:$0xff] }
 0x34c   :  { %v11627_v27 = vmul.f32 %v23925_v41, %v27451_v23  ;;  %23934 = vrcp.f32 %v11367_v9  ;;  %v11370_v0 = vpop.xlane.xlu0 %11369  ;;  %23347 = vmatprep.mubr.msk.f32.mxu1 %vm23965_vm1, %v29603_v28  ;;  %23351 = vmatpush3.msra.mxu0 %v380_v12  ;;  %v13560_v34 = vpop.f32.mrb[152].mxu1  ;;  %v382_v23 = vld [vmem:[%s29129_s2 + $0x370] sm:$0xff]  ;;  %v392_v9 = vld [vmem:[%s29129_s2 + $0x3c0] sm:$0xff] }
 0x34d   :  { %21245 = vst.msk [vmem:[%s29130_s4 + $0x358] sm:$0xff] %vm10257_vm2, %v11625_v15  ;;  %23936 = vrcp.f32 %v11370_v0  ;;  %23352 = vmatprep.mubr.msk.f32.mxu0 %vm23965_vm1, %v29603_v28  ;;  %23355 = vmatprep.subr.mxu1 %v29603_v28  ;;  %v22939_v44 = vpop.f32.mrb[153].mxu1 }
 0x34e   :  { %v23927_v42 = vpop.eup %23926  ;;  %21246 = vst.msk [vmem:[%s29130_s4 + $0x360] sm:$0xff] %vm10257_vm2, %v11627_v27  ;;  %23348 = vmatmul.mubr.msk.f32.vlgmr.msra.gmra.mrb[234].mxu1 %vm10257_vm2, %v11625_v15  ;;  %23360 = vmatprep.subr.mxu0 %v29603_v28  ;;  %v391_v15 = vld [vmem:[%s29129_s2 + $0x3b8] sm:$0xff] }
 0x34f   :  { %21035 = vst.msk [vmem:[%s29131_s3 + $0xc8] sm:$0xff] %vm528_vm0, %v13560_v34  ;;  %v23929_v11 = vpop.eup %23928  ;;  %v11629_v22 = vmul.f32 %v23927_v42, %v29857_v55  ;;  %23353 = vmatmul.mubr.msk.f32.vlgmr.msra.gmra.mrb[236].mxu0 %vm10257_vm2, %v11627_v27  ;;  %23356 = vmatpush3.msra.mxu1 %v381_v6  ;;  %v11373_v16 = vpop.xlane.xlu1 %11372 }
 0x350   :  { %v11631_v14 = vmul.f32 %v23929_v11, %v27477_v32  ;;  %23938 = vrcp.f32 %v11373_v16  ;;  %v11376_v45 = vpop.xlane.xlu0 %11375  ;;  %23357 = vmatprep.mubr.msk.f32.mxu1 %vm23965_vm1, %v29603_v28  ;;  %23361 = vmatpush3.msra.mxu0 %v382_v23  ;;  %v13633_v43 = vpop.f32.mrb[154].mxu0  ;;  %v384_v32 = vld [vmem:[%s29129_s2 + $0x380] sm:$0xff]  ;;  %v393_v11 = vld [vmem:[%s29129_s2 + $0x3c8] sm:$0xff] }
 0x351   :  { %21247 = vst.msk [vmem:[%s29130_s4 + $0x368] sm:$0xff] %vm10257_vm2, %v11629_v22  ;;  %23940 = vrcp.f32 %v11376_v45  ;;  %23362 = vmatprep.mubr.msk.f32.mxu0 %vm23965_vm1, %v29603_v28  ;;  %23365 = vmatprep.subr.mxu1 %v29603_v28  ;;  %v22944_v25 = vpop.f32.mrb[155].mxu0 }
 0x352   :  { %v23931_v49 = vpop.eup %23930  ;;  %21248 = vst.msk [vmem:[%s29130_s4 + $0x370] sm:$0xff] %vm10257_vm2, %v11631_v14  ;;  %23358 = vmatmul.mubr.msk.f32.vlgmr.msra.gmra.mrb[236].mxu1 %vm10257_vm2, %v11629_v22  ;;  %23370 = vmatprep.subr.mxu0 %v29603_v28 }
 0x353   :  { %21036 = vst.msk [vmem:[%s29131_s3 + $0xd0] sm:$0xff] %vm528_vm0, %v13633_v43  ;;  %v23933_v33 = vpop.eup %23932  ;;  %v11633_v56 = vmul.f32 %v23931_v49, %v27497_v26  ;;  %23363 = vmatmul.mubr.msk.f32.vlgmr.msra.gmra.mrb[238].mxu0 %vm10257_vm2, %v11631_v14  ;;  %23366 = vmatpush3.msra.mxu1 %v383_v7  ;;  %v11379_v50 = vpop.xlane.xlu1 %11378  ;;  %v29861_v7 = vld [vmem:[#allocation18_spill] sm:$0xff] }
 0x354   :  { %v11635_v51 = vmul.f32 %v23933_v33, %v27501_v63  ;;  %23942 = vrcp.f32 %v11379_v50  ;;  %v11382_v5 = vpop.xlane.xlu0 %11381  ;;  %23367 = vmatprep.mubr.msk.f32.mxu1 %vm23965_vm1, %v29603_v28  ;;  %23371 = vmatpush3.msra.mxu0 %v384_v32  ;;  %v13706_v26 = vpop.f32.mrb[154].mxu1  ;;  %v386_v63 = vld [vmem:[%s29129_s2 + $0x390] sm:$0xff]  ;;  %v395_v32 = vld [vmem:[%s29129_s2 + $0x3d8] sm:$0xff]  ;;  %v396_v49 = vld [vmem:[%s29129_s2 + $0x3e0] sm:$0xff] }
 0x355   :  { %21249 = vst.msk [vmem:[%s29130_s4 + $0x378] sm:$0xff] %vm10257_vm2, %v11633_v56  ;;  %23944 = vrcp.f32 %v11382_v5  ;;  %23372 = vmatprep.mubr.msk.f32.mxu0 %vm23965_vm1, %v29603_v28  ;;  %23375 = vmatprep.subr.mxu1 %v29603_v28  ;;  %v22949_v24 = vpop.f32.mrb[155].mxu1  ;;  %v29862_v50 = vld [vmem:[#allocation121_spill] sm:$0xff]  ;;  %v29863_v5 = vld [vmem:[#allocation68_spill] sm:$0xff] }
 0x356   :  { %v23935_v40 = vpop.eup %23934  ;;  %21250 = vst.msk [vmem:[%s29130_s4 + $0x380] sm:$0xff] %vm10257_vm2, %v11635_v51  ;;  %23368 = vmatmul.mubr.msk.f32.vlgmr.msra.gmra.mrb[238].mxu1 %vm10257_vm2, %v11633_v56  ;;  %23380 = vmatprep.subr.mxu0 %v29603_v28 }
 0x357   :  { %21037 = vst.msk [vmem:[%s29131_s3 + $0xd8] sm:$0xff] %vm528_vm0, %v13706_v26  ;;  %v23937_v37 = vpop.eup %23936  ;;  %v11637_v60 = vmul.f32 %v23935_v40, %v29858_v38  ;;  %23373 = vmatmul.mubr.msk.f32.vlgmr.msra.gmra.mrb[240].mxu0 %vm10257_vm2, %v11635_v51  ;;  %23376 = vmatpush3.msra.mxu1 %v385_v8  ;;  %v11385_v52 = vpop.xlane.xlu1 %11384  ;;  %v397_v26 = vld [vmem:[%s29129_s2 + $0x3e8] sm:$0xff]  ;;  %v398_v40 = vld [vmem:[%s29129_s2 + $0x3f0] sm:$0xff] }
 0x358   :  { %v11639_v10 = vmul.f32 %v23937_v37, %v29859_v59  ;;  %23946 = vrcp.f32 %v11385_v52  ;;  %v11388_v39 = vpop.xlane.xlu0 %11387  ;;  %23377 = vmatprep.mubr.msk.f32.mxu1 %vm23965_vm1, %v29603_v28  ;;  %23381 = vmatpush3.msra.mxu0 %v386_v63  ;;  %v13779_v36 = vpop.f32.mrb[156].mxu0  ;;  %v29865_v59 = vld [vmem:[#allocation77_spill] sm:$0xff] }
 0x359   :  { %21251 = vst.msk [vmem:[%s29130_s4 + $0x388] sm:$0xff] %vm10257_vm2, %v11637_v60  ;;  %23948 = vrcp.f32 %v11388_v39  ;;  %23382 = vmatprep.mubr.msk.f32.mxu0 %vm23965_vm1, %v29603_v28  ;;  %23385 = vmatprep.subr.mxu1 %v29603_v28  ;;  %v22954_v62 = vpop.f32.mrb[157].mxu0  ;;  %v399_v39 = vld [vmem:[%s29129_s2 + $0x3f8] sm:$0xff] }
 0x35a   :  { %v23939_v21 = vpop.eup %23938  ;;  %21252 = vst.msk [vmem:[%s29130_s4 + $0x390] sm:$0xff] %vm10257_vm2, %v11639_v10  ;;  %23378 = vmatmul.mubr.msk.f32.vlgmr.msra.gmra.mrb[240].mxu1 %vm10257_vm2, %v11637_v60  ;;  %23390 = vmatprep.subr.mxu0 %v29603_v28  ;;  %v29864_v60 = vld [vmem:[#allocation19_spill] sm:$0xff] }
 0x35b   :  { %21038 = vst.msk [vmem:[%s29131_s3 + $0xe0] sm:$0xff] %vm528_vm0, %v13779_v36  ;;  %v23941_v57 = vpop.eup %23940  ;;  %v11641_v31 = vmul.f32 %v23939_v21, %v27539_v4  ;;  %23383 = vmatmul.mubr.msk.f32.vlgmr.msra.gmra.mrb[242].mxu0 %vm10257_vm2, %v11639_v10  ;;  %23386 = vmatpush3.msra.mxu1 %v387_v3  ;;  %v11391_v18 = vpop.xlane.xlu1 %11390 }
 0x35c   :  { %v11643_v35 = vmul.f32 %v23941_v57, %v27546_v17  ;;  %23950 = vrcp.f32 %v11391_v18  ;;  %v11394_v53 = vpop.xlane.xlu0 %11393  ;;  %23387 = vmatprep.mubr.msk.f32.mxu1 %vm23965_vm1, %v29603_v28  ;;  %23391 = vmatpush3.msra.mxu0 %v388_v13  ;;  %v13852_v4 = vpop.f32.mrb[156].mxu1  ;;  %v390_v17 = vld [vmem:[%s29129_s2 + $0x3b0] sm:$0xff] }
 0x35d   :  { %21253 = vst.msk [vmem:[%s29130_s4 + $0x398] sm:$0xff] %vm10257_vm2, %v11641_v31  ;;  %23952 = vrcp.f32 %v11394_v53  ;;  %23392 = vmatprep.mubr.msk.f32.mxu0 %vm23965_vm1, %v29603_v28  ;;  %23395 = vmatprep.subr.mxu1 %v29603_v28  ;;  %v22959_v2 = vpop.f32.mrb[157].mxu1 }
 0x35e   :  { %v23943_v47 = vpop.eup %23942  ;;  %21254 = vst.msk [vmem:[%s29130_s4 + $0x3a0] sm:$0xff] %vm10257_vm2, %v11643_v35  ;;  %23388 = vmatmul.mubr.msk.f32.vlgmr.msra.gmra.mrb[242].mxu1 %vm10257_vm2, %v11641_v31  ;;  %23400 = vmatprep.subr.mxu0 %v29603_v28 }
 0x35f   :  { %21039 = vst.msk [vmem:[%s29131_s3 + $0xe8] sm:$0xff] %vm528_vm0, %v13852_v4  ;;  %v23945_v19 = vpop.eup %23944  ;;  %v11645_v12 = vmul.f32 %v23943_v47, %v27565_v20  ;;  %23393 = vmatmul.mubr.msk.f32.vlgmr.msra.gmra.mrb[244].mxu0 %vm10257_vm2, %v11643_v35  ;;  %23396 = vmatpush3.msra.mxu1 %v389_v1  ;;  %v11397_v58 = vpop.xlane.xlu1 %11396 }
 0x360   :  { %v11647_v41 = vmul.f32 %v23945_v19, %v29860_v54  ;;  %23954 = vrcp.f32 %v11397_v58  ;;  %v11400_v46 = vpop.xlane.xlu0 %11399  ;;  %23397 = vmatprep.mubr.msk.f32.mxu1 %vm23965_vm1, %v29603_v28  ;;  %23401 = vmatpush3.msra.mxu0 %v390_v17  ;;  %v13925_v20 = vpop.f32.mrb[158].mxu0 }
 0x361   :  { %21255 = vst.msk [vmem:[%s29130_s4 + $0x3a8] sm:$0xff] %vm10257_vm2, %v11645_v12  ;;  %23956 = vrcp.f32 %v11400_v46  ;;  %23402 = vmatprep.mubr.msk.f32.mxu0 %vm23965_vm1, %v29603_v28  ;;  %23405 = vmatprep.subr.mxu1 %v29603_v28  ;;  %v22964_v0 = vpop.f32.mrb[159].mxu0 }
 0x362   :  { %v23947_v27 = vpop.eup %23946  ;;  %21256 = vst.msk [vmem:[%s29130_s4 + $0x3b0] sm:$0xff] %vm10257_vm2, %v11647_v41  ;;  %23398 = vmatmul.mubr.msk.f32.vlgmr.msra.gmra.mrb[244].mxu1 %vm10257_vm2, %v11645_v12  ;;  %23410 = vmatprep.subr.mxu0 %v29603_v28 }
 0x363   :  { %21040 = vst.msk [vmem:[%s29131_s3 + $0xf0] sm:$0xff] %vm528_vm0, %v13925_v20  ;;  %v23949_v6 = vpop.eup %23948  ;;  %v11649_v34 = vmul.f32 %v23947_v27, %v27579_v48  ;;  %23403 = vmatmul.mubr.msk.f32.vlgmr.msra.gmra.mrb[246].mxu0 %vm10257_vm2, %v11647_v41  ;;  %23406 = vmatpush3.msra.mxu1 %v391_v15  ;;  %v11403_v23 = vpop.xlane.xlu1 %11402 }
 0x364   :  { %v11651_v42 = vmul.f32 %v23949_v6, %v27588_v29  ;;  %23958 = vrcp.f32 %v11403_v23  ;;  %v11406_v44 = vpop.xlane.xlu0 %11405  ;;  %23407 = vmatprep.mubr.msk.f32.mxu1 %vm23965_vm1, %v29603_v28  ;;  %23411 = vmatpush3.msra.mxu0 %v392_v9  ;;  %v13998_v48 = vpop.f32.mrb[158].mxu1  ;;  %v394_v29 = vld [vmem:[%s29129_s2 + $0x3d0] sm:$0xff] }
 0x365   :  { %21257 = vst.msk [vmem:[%s29130_s4 + $0x3b8] sm:$0xff] %vm10257_vm2, %v11649_v34  ;;  %23960 = vrcp.f32 %v11406_v44  ;;  %23412 = vmatprep.mubr.msk.f32.mxu0 %vm23965_vm1, %v29603_v28  ;;  %23415 = vmatprep.subr.mxu1 %v29603_v28  ;;  %v22969_v22 = vpop.f32.mrb[159].mxu1 }
 0x366   :  { %v23951_v55 = vpop.eup %23950  ;;  %21258 = vst.msk [vmem:[%s29130_s4 + $0x3c0] sm:$0xff] %vm10257_vm2, %v11651_v42  ;;  %23408 = vmatmul.mubr.msk.f32.vlgmr.msra.gmra.mrb[246].mxu1 %vm10257_vm2, %v11649_v34  ;;  %23420 = vmatprep.subr.mxu0 %v29603_v28 }
 0x367   :  { %21041 = vst.msk [vmem:[%s29131_s3 + $0xf8] sm:$0xff] %vm528_vm0, %v13998_v48  ;;  %v23953_v16 = vpop.eup %23952  ;;  %v11653_v14 = vmul.f32 %v23951_v55, %v27607_v61  ;;  %23413 = vmatmul.mubr.msk.f32.vlgmr.msra.gmra.mrb[248].mxu0 %vm10257_vm2, %v11651_v42  ;;  %23416 = vmatpush3.msra.mxu1 %v393_v11  ;;  %v11409_v45 = vpop.xlane.xlu1 %11408 }
 0x368   :  { %v11655_v43 = vmul.f32 %v23953_v16, %v29861_v7  ;;  %23962 = vrcp.f32 %v11409_v45  ;;  %23417 = vmatprep.mubr.msk.f32.mxu1 %vm23965_vm1, %v29603_v28  ;;  %23421 = vmatpush3.msra.mxu0 %v394_v29  ;;  %v14071_v61 = vpop.f32.mrb[160].mxu0 }
 0x369   :  { %21259 = vst.msk [vmem:[%s29130_s4 + $0x3c8] sm:$0xff] %vm10257_vm2, %v11653_v14  ;;  %23422 = vmatprep.mubr.msk.f32.mxu0 %vm23965_vm1, %v29603_v28  ;;  %23425 = vmatprep.subr.mxu1 %v29603_v28  ;;  %v22974_v33 = vpop.f32.mrb[161].mxu0 }
 0x36a   :  { %v23955_v25 = vpop.eup %23954  ;;  %21260 = vst.msk [vmem:[%s29130_s4 + $0x3d0] sm:$0xff] %vm10257_vm2, %v11655_v43  ;;  %23418 = vmatmul.mubr.msk.f32.vlgmr.msra.gmra.mrb[248].mxu1 %vm10257_vm2, %v11653_v14  ;;  %23430 = vmatprep.subr.mxu0 %v29603_v28 }
 0x36b   :  { %21042 = vst.msk [vmem:[%s29131_s3 + $0x100] sm:$0xff] %vm528_vm0, %v14071_v61  ;;  %v23957_v56 = vpop.eup %23956  ;;  %v11657_v51 = vmul.f32 %v23955_v25, %v29862_v50  ;;  %23423 = vmatmul.mubr.msk.f32.vlgmr.msra.gmra.mrb[250].mxu0 %vm10257_vm2, %v11655_v43  ;;  %23426 = vmatpush3.msra.mxu1 %v395_v32 }
 0x36c   :  { %v11659_v8 = vmul.f32 %v23957_v56, %v29863_v5  ;;  %23427 = vmatprep.mubr.msk.f32.mxu1 %vm23965_vm1, %v29603_v28  ;;  %23431 = vmatpush3.msra.mxu0 %v396_v49  ;;  %v14144_v63 = vpop.f32.mrb[160].mxu1 }
 0x36d   :  { %21261 = vst.msk [vmem:[%s29130_s4 + $0x3d8] sm:$0xff] %vm10257_vm2, %v11657_v51  ;;  %23432 = vmatprep.mubr.msk.f32.mxu0 %vm23965_vm1, %v29603_v28  ;;  %23435 = vmatprep.subr.mxu1 %v29603_v28  ;;  %v22979_v37 = vpop.f32.mrb[161].mxu1 }
 0x36e   :  { %v23959_v24 = vpop.eup %23958  ;;  %21262 = vst.msk [vmem:[%s29130_s4 + $0x3e0] sm:$0xff] %vm10257_vm2, %v11659_v8  ;;  %23428 = vmatmul.mubr.msk.f32.vlgmr.msra.gmra.mrb[250].mxu1 %vm10257_vm2, %v11657_v51  ;;  %23440 = vmatprep.subr.mxu0 %v29603_v28 }
 0x36f   :  { %21043 = vst.msk [vmem:[%s29131_s3 + $0x108] sm:$0xff] %vm528_vm0, %v14144_v63  ;;  %v23961_v38 = vpop.eup %23960  ;;  %v11661_v52 = vmul.f32 %v23959_v24, %v29864_v60  ;;  %23433 = vmatmul.mubr.msk.f32.vlgmr.msra.gmra.mrb[252].mxu0 %vm10257_vm2, %v11659_v8  ;;  %23436 = vmatpush3.msra.mxu1 %v397_v26 }
 0x370   :  { %v11663_v10 = vmul.f32 %v23961_v38, %v29865_v59  ;;  %23437 = vmatprep.mubr.msk.f32.mxu1 %vm23965_vm1, %v29603_v28  ;;  %23441 = vmatpush3.msra.mxu0 %v398_v40  ;;  %v14217_v3 = vpop.f32.mrb[162].mxu0 }
 0x371   :  { %21263 = vst.msk [vmem:[%s29130_s4 + $0x3e8] sm:$0xff] %vm10257_vm2, %v11661_v52  ;;  %23442 = vmatprep.mubr.msk.f32.mxu0 %vm23965_vm1, %v29603_v28  ;;  %23445 = vmatprep.subr.mxu1 %v29603_v28  ;;  %v22984_v13 = vpop.f32.mrb[163].mxu0 }
 0x372   :  { %v23963_v36 = vpop.eup %23962  ;;  %21264 = vst.msk [vmem:[%s29130_s4 + $0x3f0] sm:$0xff] %vm10257_vm2, %v11663_v10  ;;  %23438 = vmatmul.mubr.msk.f32.vlgmr.msra.gmra.mrb[252].mxu1 %vm10257_vm2, %v11661_v52 }
 0x373   :  { %21044 = vst.msk [vmem:[%s29131_s3 + $0x110] sm:$0xff] %vm528_vm0, %v14217_v3  ;;  %v11665_v21 = vmul.f32 %v23963_v36, %v27667_v30  ;;  %23443 = vmatmul.mubr.msk.f32.vlgmr.msra.gmra.mrb[254].mxu0 %vm10257_vm2, %v11663_v10  ;;  %23446 = vmatpush3.msra.mxu1 %v399_v39 }
 0x374   :  { %23447 = vmatprep.mubr.msk.f32.mxu1 %vm23965_vm1, %v29603_v28  ;;  %v14290_v62 = vpop.f32.mrb[162].mxu1 }
 0x375   :  { %21265 = vst.msk [vmem:[%s29130_s4 + $0x3f8] sm:$0xff] %vm10257_vm2, %v11665_v21  ;;  %v22989_v57 = vpop.f32.mrb[163].mxu1 }
 0x376   :  { %21045 = vst.msk [vmem:[%s29131_s3 + $0x118] sm:$0xff] %vm528_vm0, %v14290_v62  ;;  %23448 = vmatmul.mubr.msk.f32.vlgmr.msra.gmra.mrb[254].mxu1 %vm10257_vm2, %v11665_v21 }
 0x378   :  { %v14363_v30 = vpop.f32.mrb[164].mxu0 }
 0x379   :  { %21046 = vst.msk [vmem:[%s29131_s3 + $0x120] sm:$0xff] %vm528_vm0, %v14363_v30  ;;  %v22994_v28 = vpop.f32.mrb[165].mxu0 }
 0x37c   :  { %v14436_v31 = vpop.f32.mrb[164].mxu1 }
 0x37d   :  { %21047 = vst.msk [vmem:[%s29131_s3 + $0x128] sm:$0xff] %vm528_vm0, %v14436_v31  ;;  %v22999_v18 = vpop.f32.mrb[165].mxu1 }
 0x380   :  { %v14509_v35 = vpop.f32.mrb[166].mxu0 }
 0x381   :  { %21048 = vst.msk [vmem:[%s29131_s3 + $0x130] sm:$0xff] %vm528_vm0, %v14509_v35  ;;  %v23004_v53 = vpop.f32.mrb[167].mxu0 }
 0x384   :  { %v14582_v1 = vpop.f32.mrb[166].mxu1 }
 0x385   :  { %21049 = vst.msk [vmem:[%s29131_s3 + $0x138] sm:$0xff] %vm528_vm0, %v14582_v1  ;;  %v23009_v4 = vpop.f32.mrb[167].mxu1 }
 0x389   :  { %v14655_v17 = vpop.f32.mrb[168].mxu0 }
 0x38a   :  { %21050 = vst.msk [vmem:[%s29131_s3 + $0x140] sm:$0xff] %vm528_vm0, %v14655_v17  ;;  %v23014_v47 = vpop.f32.mrb[169].mxu0 }
 0x38c   :  { %v14728_v2 = vpop.f32.mrb[168].mxu1 }
 0x38d   :  { %21051 = vst.msk [vmem:[%s29131_s3 + $0x148] sm:$0xff] %vm528_vm0, %v14728_v2  ;;  %v23019_v19 = vpop.f32.mrb[169].mxu1 }
 0x391   :  { %v14801_v12 = vpop.f32.mrb[170].mxu0 }
 0x392   :  { %21052 = vst.msk [vmem:[%s29131_s3 + $0x150] sm:$0xff] %vm528_vm0, %v14801_v12  ;;  %v23024_v58 = vpop.f32.mrb[171].mxu0 }
 0x394   :  { %v14874_v54 = vpop.f32.mrb[170].mxu1 }
 0x395   :  { %21053 = vst.msk [vmem:[%s29131_s3 + $0x158] sm:$0xff] %vm528_vm0, %v14874_v54  ;;  %v23029_v41 = vpop.f32.mrb[171].mxu1 }
 0x399   :  { %v14947_v46 = vpop.f32.mrb[172].mxu0 }
 0x39a   :  { %21054 = vst.msk [vmem:[%s29131_s3 + $0x160] sm:$0xff] %vm528_vm0, %v14947_v46  ;;  %v23034_v15 = vpop.f32.mrb[173].mxu0 }
 0x39c   :  { %v15020_v20 = vpop.f32.mrb[172].mxu1 }
 0x39d   :  { %21055 = vst.msk [vmem:[%s29131_s3 + $0x168] sm:$0xff] %vm528_vm0, %v15020_v20  ;;  %v23039_v9 = vpop.f32.mrb[173].mxu1 }
 0x3a1   :  { %v15093_v27 = vpop.f32.mrb[174].mxu0 }
 0x3a2   :  { %21056 = vst.msk [vmem:[%s29131_s3 + $0x170] sm:$0xff] %vm528_vm0, %v15093_v27  ;;  %v23044_v0 = vpop.f32.mrb[175].mxu0 }
 0x3a4   :  { %v15166_v6 = vpop.f32.mrb[174].mxu1 }
 0x3a5   :  { %21057 = vst.msk [vmem:[%s29131_s3 + $0x178] sm:$0xff] %vm528_vm0, %v15166_v6  ;;  %v23049_v34 = vpop.f32.mrb[175].mxu1 }
 0x3aa   :  { %v15239_v23 = vpop.f32.mrb[176].mxu0 }
 0x3ab   :  { %21058 = vst.msk [vmem:[%s29131_s3 + $0x180] sm:$0xff] %vm528_vm0, %v15239_v23  ;;  %v23054_v42 = vpop.f32.mrb[177].mxu0 }
 0x3ad   :  { %v15312_v44 = vpop.f32.mrb[176].mxu1 }
 0x3ae   :  { %21059 = vst.msk [vmem:[%s29131_s3 + $0x188] sm:$0xff] %vm528_vm0, %v15312_v44  ;;  %v15385_v11 = vpop.f32.mrb[178].mxu0  ;;  %v23059_v48 = vpop.f32.mrb[177].mxu1 }
 0x3af   :  { %21060 = vst.msk [vmem:[%s29131_s3 + $0x190] sm:$0xff] %vm528_vm0, %v15385_v11  ;;  %v23064_v29 = vpop.f32.mrb[179].mxu0 }
 0x3b1   :  { %v15458_v55 = vpop.f32.mrb[178].mxu1 }
 0x3b2   :  { %21061 = vst.msk [vmem:[%s29131_s3 + $0x198] sm:$0xff] %vm528_vm0, %v15458_v55  ;;  %v15531_v22 = vpop.f32.mrb[180].mxu0  ;;  %v23069_v16 = vpop.f32.mrb[179].mxu1 }
 0x3b3   :  { %21062 = vst.msk [vmem:[%s29131_s3 + $0x1a0] sm:$0xff] %vm528_vm0, %v15531_v22  ;;  %v23074_v14 = vpop.f32.mrb[181].mxu0 }
 0x3b5   :  { %v15604_v45 = vpop.f32.mrb[180].mxu1 }
 0x3b6   :  { %21063 = vst.msk [vmem:[%s29131_s3 + $0x1a8] sm:$0xff] %vm528_vm0, %v15604_v45  ;;  %v15677_v7 = vpop.f32.mrb[182].mxu0  ;;  %v23079_v43 = vpop.f32.mrb[181].mxu1 }
 0x3b7   :  { %21064 = vst.msk [vmem:[%s29131_s3 + $0x1b0] sm:$0xff] %vm528_vm0, %v15677_v7  ;;  %v23084_v32 = vpop.f32.mrb[183].mxu0 }
 0x3b9   :  { %v15750_v61 = vpop.f32.mrb[182].mxu1 }
 0x3ba   :  { %21065 = vst.msk [vmem:[%s29131_s3 + $0x1b8] sm:$0xff] %vm528_vm0, %v15750_v61  ;;  %v15823_v49 = vpop.f32.mrb[184].mxu0  ;;  %v23089_v25 = vpop.f32.mrb[183].mxu1 }
 0x3bb   :  { %21066 = vst.msk [vmem:[%s29131_s3 + $0x1c0] sm:$0xff] %vm528_vm0, %v15823_v49  ;;  %v23094_v33 = vpop.f32.mrb[185].mxu0 }
 0x3bd   :  { %v15896_v56 = vpop.f32.mrb[184].mxu1 }
 0x3be   :  { %21067 = vst.msk [vmem:[%s29131_s3 + $0x1c8] sm:$0xff] %vm528_vm0, %v15896_v56  ;;  %v15969_v50 = vpop.f32.mrb[186].mxu0  ;;  %v23099_v51 = vpop.f32.mrb[185].mxu1 }
 0x3bf   :  { %21068 = vst.msk [vmem:[%s29131_s3 + $0x1d0] sm:$0xff] %vm528_vm0, %v15969_v50  ;;  %v23104_v5 = vpop.f32.mrb[187].mxu0 }
 0x3c1   :  { %v16042_v8 = vpop.f32.mrb[186].mxu1 }
 0x3c2   :  { %21069 = vst.msk [vmem:[%s29131_s3 + $0x1d8] sm:$0xff] %vm528_vm0, %v16042_v8  ;;  %v16115_v26 = vpop.f32.mrb[188].mxu0  ;;  %v23109_v63 = vpop.f32.mrb[187].mxu1 }
 0x3c3   :  { %21070 = vst.msk [vmem:[%s29131_s3 + $0x1e0] sm:$0xff] %vm528_vm0, %v16115_v26  ;;  %v23114_v40 = vpop.f32.mrb[189].mxu0 }
 0x3c5   :  { %v16188_v24 = vpop.f32.mrb[188].mxu1 }
 0x3c6   :  { %21071 = vst.msk [vmem:[%s29131_s3 + $0x1e8] sm:$0xff] %vm528_vm0, %v16188_v24  ;;  %v16261_v37 = vpop.f32.mrb[190].mxu0  ;;  %v23119_v38 = vpop.f32.mrb[189].mxu1 }
 0x3c7   :  { %21072 = vst.msk [vmem:[%s29131_s3 + $0x1f0] sm:$0xff] %vm528_vm0, %v16261_v37  ;;  %v23124_v60 = vpop.f32.mrb[191].mxu0 }
 0x3c9   :  { %v16334_v52 = vpop.f32.mrb[190].mxu1 }
 0x3ca   :  { %21073 = vst.msk [vmem:[%s29131_s3 + $0x1f8] sm:$0xff] %vm528_vm0, %v16334_v52  ;;  %v16407_v59 = vpop.f32.mrb[192].mxu0  ;;  %v23129_v10 = vpop.f32.mrb[191].mxu1 }
 0x3cb   :  { %21074 = vst.msk [vmem:[%s29131_s3 + $0x200] sm:$0xff] %vm528_vm0, %v16407_v59  ;;  %v23134_v39 = vpop.f32.mrb[193].mxu0 }
 0x3cd   :  { %v16480_v3 = vpop.f32.mrb[192].mxu1 }
 0x3ce   :  { %21075 = vst.msk [vmem:[%s29131_s3 + $0x208] sm:$0xff] %vm528_vm0, %v16480_v3  ;;  %v16553_v36 = vpop.f32.mrb[194].mxu0  ;;  %v23139_v13 = vpop.f32.mrb[193].mxu1 }
 0x3cf   :  { %21076 = vst.msk [vmem:[%s29131_s3 + $0x210] sm:$0xff] %vm528_vm0, %v16553_v36  ;;  %v23144_v21 = vpop.f32.mrb[195].mxu0 }
 0x3d1   :  { %v16626_v62 = vpop.f32.mrb[194].mxu1 }
 0x3d2   :  { %21077 = vst.msk [vmem:[%s29131_s3 + $0x218] sm:$0xff] %vm528_vm0, %v16626_v62  ;;  %v16699_v57 = vpop.f32.mrb[196].mxu0  ;;  %v23149_v30 = vpop.f32.mrb[195].mxu1 }
 0x3d3   :  { %21078 = vst.msk [vmem:[%s29131_s3 + $0x220] sm:$0xff] %vm528_vm0, %v16699_v57  ;;  %v23154_v28 = vpop.f32.mrb[197].mxu0 }
 0x3d5   :  { %v16772_v31 = vpop.f32.mrb[196].mxu1 }
 0x3d6   :  { %21079 = vst.msk [vmem:[%s29131_s3 + $0x228] sm:$0xff] %vm528_vm0, %v16772_v31  ;;  %v16845_v18 = vpop.f32.mrb[198].mxu0  ;;  %v23159_v35 = vpop.f32.mrb[197].mxu1 }
 0x3d7   :  { %21080 = vst.msk [vmem:[%s29131_s3 + $0x230] sm:$0xff] %vm528_vm0, %v16845_v18  ;;  %v23164_v53 = vpop.f32.mrb[199].mxu0 }
 0x3d9   :  { %v16918_v1 = vpop.f32.mrb[198].mxu1 }
 0x3da   :  { %21081 = vst.msk [vmem:[%s29131_s3 + $0x238] sm:$0xff] %vm528_vm0, %v16918_v1  ;;  %v16991_v4 = vpop.f32.mrb[200].mxu0  ;;  %v23169_v17 = vpop.f32.mrb[199].mxu1 }
 0x3db   :  { %21082 = vst.msk [vmem:[%s29131_s3 + $0x240] sm:$0xff] %vm528_vm0, %v16991_v4  ;;  %v23174_v47 = vpop.f32.mrb[201].mxu0 }
 0x3dd   :  { %v17064_v2 = vpop.f32.mrb[200].mxu1 }
 0x3de   :  { %21083 = vst.msk [vmem:[%s29131_s3 + $0x248] sm:$0xff] %vm528_vm0, %v17064_v2  ;;  %v17137_v19 = vpop.f32.mrb[202].mxu0  ;;  %v23179_v12 = vpop.f32.mrb[201].mxu1 }
 0x3df   :  { %21084 = vst.msk [vmem:[%s29131_s3 + $0x250] sm:$0xff] %vm528_vm0, %v17137_v19  ;;  %v23184_v58 = vpop.f32.mrb[203].mxu0 }
 0x3e1   :  { %v17210_v54 = vpop.f32.mrb[202].mxu1 }
 0x3e2   :  { %21085 = vst.msk [vmem:[%s29131_s3 + $0x258] sm:$0xff] %vm528_vm0, %v17210_v54  ;;  %v17283_v41 = vpop.f32.mrb[204].mxu0  ;;  %v23189_v46 = vpop.f32.mrb[203].mxu1 }
 0x3e3   :  { %21086 = vst.msk [vmem:[%s29131_s3 + $0x260] sm:$0xff] %vm528_vm0, %v17283_v41  ;;  %v23194_v15 = vpop.f32.mrb[205].mxu0 }
 0x3e5   :  { %v17356_v20 = vpop.f32.mrb[204].mxu1 }
 0x3e6   :  { %21087 = vst.msk [vmem:[%s29131_s3 + $0x268] sm:$0xff] %vm528_vm0, %v17356_v20  ;;  %v17429_v9 = vpop.f32.mrb[206].mxu0  ;;  %v23199_v27 = vpop.f32.mrb[205].mxu1 }
 0x3e7   :  { %21088 = vst.msk [vmem:[%s29131_s3 + $0x270] sm:$0xff] %vm528_vm0, %v17429_v9  ;;  %v23204_v0 = vpop.f32.mrb[207].mxu0 }
 0x3e9   :  { %v17502_v6 = vpop.f32.mrb[206].mxu1 }
 0x3ea   :  { %21089 = vst.msk [vmem:[%s29131_s3 + $0x278] sm:$0xff] %vm528_vm0, %v17502_v6  ;;  %v17575_v34 = vpop.f32.mrb[208].mxu0  ;;  %v23209_v23 = vpop.f32.mrb[207].mxu1 }
 0x3eb   :  { %21090 = vst.msk [vmem:[%s29131_s3 + $0x280] sm:$0xff] %vm528_vm0, %v17575_v34  ;;  %v23214_v42 = vpop.f32.mrb[209].mxu0 }
 0x3ed   :  { %v17648_v44 = vpop.f32.mrb[208].mxu1 }
 0x3ee   :  { %21091 = vst.msk [vmem:[%s29131_s3 + $0x288] sm:$0xff] %vm528_vm0, %v17648_v44  ;;  %v17721_v11 = vpop.f32.mrb[210].mxu0  ;;  %v23219_v48 = vpop.f32.mrb[209].mxu1 }
 0x3ef   :  { %21092 = vst.msk [vmem:[%s29131_s3 + $0x290] sm:$0xff] %vm528_vm0, %v17721_v11  ;;  %v23224_v29 = vpop.f32.mrb[211].mxu0 }
 0x3f1   :  { %v17794_v55 = vpop.f32.mrb[210].mxu1 }
 0x3f2   :  { %21093 = vst.msk [vmem:[%s29131_s3 + $0x298] sm:$0xff] %vm528_vm0, %v17794_v55  ;;  %v17867_v22 = vpop.f32.mrb[212].mxu0  ;;  %v23229_v16 = vpop.f32.mrb[211].mxu1 }
 0x3f3   :  { %21094 = vst.msk [vmem:[%s29131_s3 + $0x2a0] sm:$0xff] %vm528_vm0, %v17867_v22  ;;  %v23234_v14 = vpop.f32.mrb[213].mxu0 }
 0x3f5   :  { %v17940_v45 = vpop.f32.mrb[212].mxu1 }
 0x3f6   :  { %21095 = vst.msk [vmem:[%s29131_s3 + $0x2a8] sm:$0xff] %vm528_vm0, %v17940_v45  ;;  %v18013_v7 = vpop.f32.mrb[214].mxu0  ;;  %v23239_v43 = vpop.f32.mrb[213].mxu1 }
 0x3f7   :  { %21096 = vst.msk [vmem:[%s29131_s3 + $0x2b0] sm:$0xff] %vm528_vm0, %v18013_v7  ;;  %v23244_v32 = vpop.f32.mrb[215].mxu0 }
 0x3f9   :  { %v18086_v61 = vpop.f32.mrb[214].mxu1 }
 0x3fa   :  { %21097 = vst.msk [vmem:[%s29131_s3 + $0x2b8] sm:$0xff] %vm528_vm0, %v18086_v61  ;;  %v18159_v49 = vpop.f32.mrb[216].mxu0  ;;  %v23249_v25 = vpop.f32.mrb[215].mxu1 }
 0x3fb   :  { %21098 = vst.msk [vmem:[%s29131_s3 + $0x2c0] sm:$0xff] %vm528_vm0, %v18159_v49  ;;  %v23254_v33 = vpop.f32.mrb[217].mxu0 }
 0x3fd   :  { %v18232_v56 = vpop.f32.mrb[216].mxu1 }
 0x3fe   :  { %21099 = vst.msk [vmem:[%s29131_s3 + $0x2c8] sm:$0xff] %vm528_vm0, %v18232_v56  ;;  %v18305_v50 = vpop.f32.mrb[218].mxu0  ;;  %v23259_v51 = vpop.f32.mrb[217].mxu1 }
 0x3ff   :  { %21100 = vst.msk [vmem:[%s29131_s3 + $0x2d0] sm:$0xff] %vm528_vm0, %v18305_v50  ;;  %v23264_v5 = vpop.f32.mrb[219].mxu0 }
 0x401   :  { %v18378_v8 = vpop.f32.mrb[218].mxu1 }
 0x402   :  { %21101 = vst.msk [vmem:[%s29131_s3 + $0x2d8] sm:$0xff] %vm528_vm0, %v18378_v8  ;;  %v18451_v26 = vpop.f32.mrb[220].mxu0  ;;  %v23269_v63 = vpop.f32.mrb[219].mxu1 }
 0x403   :  { %21102 = vst.msk [vmem:[%s29131_s3 + $0x2e0] sm:$0xff] %vm528_vm0, %v18451_v26  ;;  %v23274_v40 = vpop.f32.mrb[221].mxu0 }
 0x405   :  { %v18524_v24 = vpop.f32.mrb[220].mxu1 }
 0x406   :  { %21103 = vst.msk [vmem:[%s29131_s3 + $0x2e8] sm:$0xff] %vm528_vm0, %v18524_v24  ;;  %v18597_v37 = vpop.f32.mrb[222].mxu0  ;;  %v23279_v38 = vpop.f32.mrb[221].mxu1 }
 0x407   :  { %21104 = vst.msk [vmem:[%s29131_s3 + $0x2f0] sm:$0xff] %vm528_vm0, %v18597_v37  ;;  %v23284_v60 = vpop.f32.mrb[223].mxu0 }
 0x409   :  { %v18670_v52 = vpop.f32.mrb[222].mxu1 }
 0x40a   :  { %21105 = vst.msk [vmem:[%s29131_s3 + $0x2f8] sm:$0xff] %vm528_vm0, %v18670_v52  ;;  %v18743_v59 = vpop.f32.mrb[224].mxu0  ;;  %v23289_v10 = vpop.f32.mrb[223].mxu1 }
 0x40b   :  { %21106 = vst.msk [vmem:[%s29131_s3 + $0x300] sm:$0xff] %vm528_vm0, %v18743_v59  ;;  %v23294_v39 = vpop.f32.mrb[225].mxu0 }
 0x40d   :  { %v18816_v3 = vpop.f32.mrb[224].mxu1 }
 0x40e   :  { %21107 = vst.msk [vmem:[%s29131_s3 + $0x308] sm:$0xff] %vm528_vm0, %v18816_v3  ;;  %v18889_v36 = vpop.f32.mrb[226].mxu0  ;;  %v23299_v13 = vpop.f32.mrb[225].mxu1 }
 0x40f   :  { %21108 = vst.msk [vmem:[%s29131_s3 + $0x310] sm:$0xff] %vm528_vm0, %v18889_v36  ;;  %v23304_v21 = vpop.f32.mrb[227].mxu0 }
 0x411   :  { %v18962_v62 = vpop.f32.mrb[226].mxu1 }
 0x412   :  { %21109 = vst.msk [vmem:[%s29131_s3 + $0x318] sm:$0xff] %vm528_vm0, %v18962_v62  ;;  %v19035_v57 = vpop.f32.mrb[228].mxu0  ;;  %v23309_v30 = vpop.f32.mrb[227].mxu1 }
 0x413   :  { %21110 = vst.msk [vmem:[%s29131_s3 + $0x320] sm:$0xff] %vm528_vm0, %v19035_v57  ;;  %v23314_v28 = vpop.f32.mrb[229].mxu0 }
 0x415   :  { %v19108_v31 = vpop.f32.mrb[228].mxu1 }
 0x416   :  { %21111 = vst.msk [vmem:[%s29131_s3 + $0x328] sm:$0xff] %vm528_vm0, %v19108_v31  ;;  %v19181_v18 = vpop.f32.mrb[230].mxu0  ;;  %v23319_v35 = vpop.f32.mrb[229].mxu1 }
 0x417   :  { %21112 = vst.msk [vmem:[%s29131_s3 + $0x330] sm:$0xff] %vm528_vm0, %v19181_v18  ;;  %v23324_v53 = vpop.f32.mrb[231].mxu0 }
 0x419   :  { %v19254_v1 = vpop.f32.mrb[230].mxu1 }
 0x41a   :  { %21113 = vst.msk [vmem:[%s29131_s3 + $0x338] sm:$0xff] %vm528_vm0, %v19254_v1  ;;  %v19327_v4 = vpop.f32.mrb[232].mxu0  ;;  %v23329_v17 = vpop.f32.mrb[231].mxu1 }
 0x41b   :  { %21114 = vst.msk [vmem:[%s29131_s3 + $0x340] sm:$0xff] %vm528_vm0, %v19327_v4  ;;  %v23334_v47 = vpop.f32.mrb[233].mxu0 }
 0x41d   :  { %v19400_v2 = vpop.f32.mrb[232].mxu1 }
 0x41e   :  { %21115 = vst.msk [vmem:[%s29131_s3 + $0x348] sm:$0xff] %vm528_vm0, %v19400_v2  ;;  %v19473_v19 = vpop.f32.mrb[234].mxu0  ;;  %v23339_v12 = vpop.f32.mrb[233].mxu1 }
 0x41f   :  { %21116 = vst.msk [vmem:[%s29131_s3 + $0x350] sm:$0xff] %vm528_vm0, %v19473_v19  ;;  %v23344_v58 = vpop.f32.mrb[235].mxu0 }
 0x421   :  { %v19546_v54 = vpop.f32.mrb[234].mxu1 }
 0x422   :  { %21117 = vst.msk [vmem:[%s29131_s3 + $0x358] sm:$0xff] %vm528_vm0, %v19546_v54  ;;  %v19619_v41 = vpop.f32.mrb[236].mxu0  ;;  %v23349_v46 = vpop.f32.mrb[235].mxu1 }
 0x423   :  { %21118 = vst.msk [vmem:[%s29131_s3 + $0x360] sm:$0xff] %vm528_vm0, %v19619_v41  ;;  %v23354_v15 = vpop.f32.mrb[237].mxu0 }
 0x425   :  { %v19692_v20 = vpop.f32.mrb[236].mxu1 }
 0x426   :  { %21119 = vst.msk [vmem:[%s29131_s3 + $0x368] sm:$0xff] %vm528_vm0, %v19692_v20  ;;  %v19765_v9 = vpop.f32.mrb[238].mxu0  ;;  %v23359_v27 = vpop.f32.mrb[237].mxu1 }
 0x427   :  { %21120 = vst.msk [vmem:[%s29131_s3 + $0x370] sm:$0xff] %vm528_vm0, %v19765_v9  ;;  %v23364_v0 = vpop.f32.mrb[239].mxu0 }
 0x429   :  { %v19838_v6 = vpop.f32.mrb[238].mxu1 }
 0x42a   :  { %21121 = vst.msk [vmem:[%s29131_s3 + $0x378] sm:$0xff] %vm528_vm0, %v19838_v6  ;;  %v19911_v34 = vpop.f32.mrb[240].mxu0  ;;  %v23369_v23 = vpop.f32.mrb[239].mxu1 }
 0x42b   :  { %21122 = vst.msk [vmem:[%s29131_s3 + $0x380] sm:$0xff] %vm528_vm0, %v19911_v34  ;;  %v23374_v42 = vpop.f32.mrb[241].mxu0 }
 0x42d   :  { %v19984_v44 = vpop.f32.mrb[240].mxu1 }
 0x42e   :  { %21123 = vst.msk [vmem:[%s29131_s3 + $0x388] sm:$0xff] %vm528_vm0, %v19984_v44  ;;  %v20057_v11 = vpop.f32.mrb[242].mxu0  ;;  %v23379_v48 = vpop.f32.mrb[241].mxu1 }
 0x42f   :  { %21124 = vst.msk [vmem:[%s29131_s3 + $0x390] sm:$0xff] %vm528_vm0, %v20057_v11  ;;  %v23384_v29 = vpop.f32.mrb[243].mxu0 }
 0x431   :  { %v20130_v55 = vpop.f32.mrb[242].mxu1 }
 0x432   :  { %21125 = vst.msk [vmem:[%s29131_s3 + $0x398] sm:$0xff] %vm528_vm0, %v20130_v55  ;;  %v20203_v22 = vpop.f32.mrb[244].mxu0  ;;  %v23389_v16 = vpop.f32.mrb[243].mxu1 }
 0x433   :  { %21126 = vst.msk [vmem:[%s29131_s3 + $0x3a0] sm:$0xff] %vm528_vm0, %v20203_v22  ;;  %v23394_v14 = vpop.f32.mrb[245].mxu0 }
 0x435   :  { %v20276_v45 = vpop.f32.mrb[244].mxu1 }
 0x436   :  { %21127 = vst.msk [vmem:[%s29131_s3 + $0x3a8] sm:$0xff] %vm528_vm0, %v20276_v45  ;;  %v20349_v7 = vpop.f32.mrb[246].mxu0  ;;  %v23399_v43 = vpop.f32.mrb[245].mxu1 }
 0x437   :  { %21128 = vst.msk [vmem:[%s29131_s3 + $0x3b0] sm:$0xff] %vm528_vm0, %v20349_v7  ;;  %v23404_v32 = vpop.f32.mrb[247].mxu0 }
 0x439   :  { %v20422_v61 = vpop.f32.mrb[246].mxu1 }
 0x43a   :  { %21129 = vst.msk [vmem:[%s29131_s3 + $0x3b8] sm:$0xff] %vm528_vm0, %v20422_v61  ;;  %v20495_v49 = vpop.f32.mrb[248].mxu0  ;;  %v23409_v25 = vpop.f32.mrb[247].mxu1 }
 0x43b   :  { %21130 = vst.msk [vmem:[%s29131_s3 + $0x3c0] sm:$0xff] %vm528_vm0, %v20495_v49  ;;  %v23414_v33 = vpop.f32.mrb[249].mxu0 }
 0x43d   :  { %v20568_v56 = vpop.f32.mrb[248].mxu1 }
 0x43e   :  { %21131 = vst.msk [vmem:[%s29131_s3 + $0x3c8] sm:$0xff] %vm528_vm0, %v20568_v56  ;;  %v20641_v50 = vpop.f32.mrb[250].mxu0  ;;  %v23419_v51 = vpop.f32.mrb[249].mxu1 }
 0x43f   :  { %21132 = vst.msk [vmem:[%s29131_s3 + $0x3d0] sm:$0xff] %vm528_vm0, %v20641_v50  ;;  %v23424_v5 = vpop.f32.mrb[251].mxu0 }
 0x441   :  { %v20714_v8 = vpop.f32.mrb[250].mxu1 }
 0x442   :  { %21133 = vst.msk [vmem:[%s29131_s3 + $0x3d8] sm:$0xff] %vm528_vm0, %v20714_v8  ;;  %v20787_v26 = vpop.f32.mrb[252].mxu0  ;;  %v23429_v63 = vpop.f32.mrb[251].mxu1 }
 0x443   :  { %21134 = vst.msk [vmem:[%s29131_s3 + $0x3e0] sm:$0xff] %vm528_vm0, %v20787_v26  ;;  %v23434_v40 = vpop.f32.mrb[253].mxu0 }
 0x445   :  { %v20860_v24 = vpop.f32.mrb[252].mxu1 }
 0x446   :  { %21135 = vst.msk [vmem:[%s29131_s3 + $0x3e8] sm:$0xff] %vm528_vm0, %v20860_v24  ;;  %v20933_v37 = vpop.f32.mrb[254].mxu0  ;;  %v23439_v38 = vpop.f32.mrb[253].mxu1 }
 0x447   :  { %21136 = vst.msk [vmem:[%s29131_s3 + $0x3f0] sm:$0xff] %vm528_vm0, %v20933_v37  ;;  %v23444_v60 = vpop.f32.mrb[255].mxu0 }
 0x449   :  { %v21006_v52 = vpop.f32.mrb[254].mxu1 }
 0x44a   :  { %21137 = vst.msk [vmem:[%s29131_s3 + $0x3f8] sm:$0xff] %vm528_vm0, %v21006_v52  ;;  %v23449_v59 = vpop.f32.mrb[255].mxu1 }

</bundles_post_ra>
